<compile_context>
chip_gen: v6e
topology: v6e:2x2x1
jax: 0.10.0
libtpu: 0.0.40
codegen_flags: <defaults>
</compile_context>

<pallas_src>
import jax
import jax.numpy as jnp
from jax.experimental import pallas as pl
from jax.experimental.pallas import tpu as pltpu

NEG_SLOPE = 0.01  # nn.LeakyReLU default


def _leaky(v):
    return jnp.where(v > 0, v, NEG_SLOPE * v)


def _round_up(x, m):
    return ((x + m - 1) // m) * m


# ---------------------------------------------------------------------------
# Fused kernel: conv1 -> conv2 -> FC -> argmax, entirely in VMEM.
#
# Activation layout: (..spatial (major dims).., batch_tile, channels).
#   p1_ref : (2, 2, 8, 8, TB, 16)  conv1 patches, parity-split:
#            p1[pi, pj, a, c, m, t] = x[m, 2*(2a+pi)+i_t, 2*(2c+pj)+j_t]
#   a1_ref : (2, 2, 8, 8, TB, 32)  conv1 output in the same parity layout,
#            so conv2 tap (i, j) is the contiguous window
#            a1[i%2, j%2, i//2:i//2+6, j//2:j//2+6, :, :].
# ---------------------------------------------------------------------------
def fused_net_kernel(p1_ref, w1_ref, b1_ref, w2_ref, b2_ref, wfc_ref, bfc_ref,
                     o_ref, a1_ref):
    TB = p1_ref.shape[4]        # batch tile (multiple of 8)
    K1 = p1_ref.shape[5]        # 16 conv1 taps (C_in = 1)
    C = w1_ref.shape[1]         # 32 channels
    A = wfc_ref.shape[1]        # num_actions

    # ---- conv1 (+ folded /255 in the weights) + LeakyReLU ------------------
    p2d = p1_ref[...].reshape(2 * 2 * 8 * 8 * TB, K1)          # layout-preserving
    h1 = jnp.dot(p2d, w1_ref[...], preferred_element_type=jnp.float32)
    h1 = _leaky(h1 + b1_ref[...])
    a1_ref[...] = h1.reshape(2, 2, 8, 8, TB, C)                # keep in VMEM

    # ---- conv2 + LeakyReLU: 16 taps, each a contiguous window --------------
    acc = None
    for i in range(4):
        for j in range(4):
            pi, pj, ih, jh = i % 2, j % 2, i // 2, j // 2
            tap = a1_ref[pi, pj, ih:ih + 6, jh:jh + 6, :, :]   # (6, 6, TB, C)
            t2d = tap.reshape(36 * TB, C)                      # rows = (oh2, ow2, m)
            part = jnp.dot(t2d, w2_ref[i * 4 + j],
                           preferred_element_type=jnp.float32)
            acc = part if acc is None else acc + part
    a2 = _leaky(acc + b2_ref[...])                             # (36*TB, C)

    # ---- Linear + LeakyReLU + argmax ----------------------------------------
    # FC as a 36-way batched matmul over spatial positions (no channel->lane
    # flatten needed); wfc was pre-permuted to (spatial, action, channel).
    a2_3 = a2.reshape(36, TB, C)
    partial = jnp.einsum("sbc,sac->sba", a2_3, wfc_ref[...],
                         preferred_element_type=jnp.float32)   # (36, TB, A)
    vals = _leaky(jnp.sum(partial, axis=0) + bfc_ref[...])     # (TB, A)

    # first-occurrence argmax over actions (matches torch .max(1))
    idx = jax.lax.broadcasted_iota(jnp.int32, vals.shape, 1)
    maxv = jnp.max(vals, axis=1, keepdims=True)
    cand = jnp.where(vals == maxv, idx, jnp.int32(2 ** 30))
    o_ref[...] = jnp.min(cand, axis=1, keepdims=True).astype(jnp.int32)


# ---------------------------------------------------------------------------
# Wrapper: weight re-layout (trace-time, tiny) + conv1 patch packing on the
# raw input + a single batch-gridded pallas_call.
# ---------------------------------------------------------------------------
@jax.jit
def model_forward(params, img):
    """img: (N, 1, 32, 32); returns int32 action index per example."""
    N = img.shape[0]
    A = params["fc_w"].shape[0]

    TB = min(16, _round_up(N, 8))      # batch tile (multiple of 8, VMEM-safe)
    N_pad = _round_up(N, TB)

    x = img[:, 0, :, :].astype(jnp.float32)
    if N_pad != N:
        x = jnp.pad(x, ((0, N_pad - N), (0, 0), (0, 0)))

    # conv1 im2col on the raw (tiny) input, packed so that inside the kernel
    # every conv2 tap becomes a contiguous slice:
    #   p1[pi, pj, a, c, n, t] = x[n, 2*(2a+pi)+i_t, 2*(2c+pj)+j_t]
    taps = [x[:, i:i + 29:2, j:j + 29:2] for i in range(4) for j in range(4)]
    p = jnp.stack(taps, axis=-1)                          # (Np, 15, 15, 16)
    p = jnp.pad(p, ((0, 0), (0, 1), (0, 1), (0, 0)))      # (Np, 16, 16, 16)
    p1 = p.reshape(N_pad, 8, 2, 8, 2, 16).transpose(2, 4, 1, 3, 0, 5)

    # weights: torch layouts -> kernel layouts (1/255 folded into conv1 w)
    w1 = jnp.transpose(params["conv1_w"], (2, 3, 1, 0)).reshape(16, 32)
    w1 = w1 * (1.0 / 255.0)
    b1 = params["conv1_b"].reshape(1, 32)
    w2 = jnp.transpose(params["conv2_w"], (2, 3, 1, 0)).reshape(16, 32, 32)
    b2 = params["conv2_b"].reshape(1, 32)
    wfc = params["fc_w"].reshape(A, 32, 6, 6).transpose(2, 3, 0, 1)
    wfc = wfc.reshape(36, A, 32)                          # (spatial, action, chan)
    bfc = params["fc_b"].reshape(1, A)

    out = pl.pallas_call(
        fused_net_kernel,
        out_shape=jax.ShapeDtypeStruct((N_pad, 1), jnp.int32),
        grid_spec=pltpu.PrefetchScalarGridSpec(
            num_scalar_prefetch=0,
            grid=(N_pad // TB,),
            in_specs=[
                pl.BlockSpec((2, 2, 8, 8, TB, 16), lambda b: (0, 0, 0, 0, b, 0)),
                pl.BlockSpec((16, 32), lambda b: (0, 0)),
                pl.BlockSpec((1, 32), lambda b: (0, 0)),
                pl.BlockSpec((16, 32, 32), lambda b: (0, 0, 0)),
                pl.BlockSpec((1, 32), lambda b: (0, 0)),
                pl.BlockSpec((36, A, 32), lambda b: (0, 0, 0)),
                pl.BlockSpec((1, A), lambda b: (0, 0)),
            ],
            out_specs=pl.BlockSpec((TB, 1), lambda b: (b, 0)),
            scratch_shapes=[pltpu.VMEM((2, 2, 8, 8, TB, 32), jnp.float32)],
        ),
        compiler_params=pltpu.CompilerParams(
            dimension_semantics=("parallel",)),
    )(p1, w1, b1, w2, b2, wfc, bfc)
    return out[:N, 0]


# ---------------------------------------------------------------------------
def init_params(key, num_actions):
    k1, k2, k3 = jax.random.split(key, 3)
    return {
        "conv1_w": jax.random.normal(k1, (32, 1, 4, 4), jnp.float32) * 0.1,
        "conv1_b": jnp.zeros((32,), jnp.float32),
        "conv2_w": jax.random.normal(k2, (32, 32, 4, 4), jnp.float32) * 0.05,
        "conv2_b": jnp.zeros((32,), jnp.float32),
        # torch Linear layout: (out_features, in_features), in_features in CHW order
        "fc_w": jax.random.normal(k3, (num_actions, 32 * 6 * 6), jnp.float32) * 0.02,
        "fc_b": jnp.zeros((num_actions,), jnp.float32),
    }


if __name__ == "__main__":
    num_actions = 4
    key = jax.random.PRNGKey(0)
    kp, kx = jax.random.split(key)
    params = init_params(kp, num_actions)

    # spatial 32x32 so two stride-2 k=4 convs give 6x6 (matches 32*6*6 in the FC)
    img = jax.random.uniform(kx, (2, 1, 32, 32), jnp.float32) * 255.0

    action = model_forward(params, img)
    jax.block_until_ready(action)
    assert action.shape == (2,) and action.dtype == jnp.int32
    print("KERNEL_OK")
</pallas_src>

<mosaic_0001>
module attributes {stable_mosaic.version = 11 : i64} {
  func.func @fused_net_kernel(%arg0: i32, %arg1: memref<2x2x8x8x8x16xf32, #tpu.memory_space<vmem>>, %arg2: memref<16x32xf32, #tpu.memory_space<vmem>>, %arg3: memref<1x32xf32, #tpu.memory_space<vmem>>, %arg4: memref<16x32x32xf32, #tpu.memory_space<vmem>>, %arg5: memref<1x32xf32, #tpu.memory_space<vmem>>, %arg6: memref<36x4x32xf32, #tpu.memory_space<vmem>>, %arg7: memref<1x4xf32, #tpu.memory_space<vmem>>, %arg8: memref<8x1xi32, #tpu.memory_space<vmem>>, %arg9: memref<2x2x8x8x8x32xf32, #tpu.memory_space<vmem>>) attributes {dimension_semantics = [#tpu.dimension_semantics<parallel>], iteration_bounds = array<i64: 1>, scalar_prefetch = 0 : i64, scratch_operands = 1 : i64, tpu.core_type = #tpu.core_type<tc>, window_params = [{transform_indices = @transform_0, window_bounds = array<i64: 2, 2, 8, 8, 8, 16>}, {pipeline_mode = #tpu.pipeline_mode<synchronous>, transform_indices = @transform_1, window_bounds = array<i64: 16, 32>}, {pipeline_mode = #tpu.pipeline_mode<synchronous>, transform_indices = @transform_2, window_bounds = array<i64: 1, 32>}, {pipeline_mode = #tpu.pipeline_mode<synchronous>, transform_indices = @transform_3, window_bounds = array<i64: 16, 32, 32>}, {pipeline_mode = #tpu.pipeline_mode<synchronous>, transform_indices = @transform_4, window_bounds = array<i64: 1, 32>}, {pipeline_mode = #tpu.pipeline_mode<synchronous>, transform_indices = @transform_5, window_bounds = array<i64: 36, 4, 32>}, {pipeline_mode = #tpu.pipeline_mode<synchronous>, transform_indices = @transform_6, window_bounds = array<i64: 1, 4>}, {transform_indices = @transform_7, window_bounds = array<i64: 8, 1>}]} {
    %c0 = arith.constant 0 : index
    %c0_0 = arith.constant 0 : index
    %c0_1 = arith.constant 0 : index
    %c0_2 = arith.constant 0 : index
    %c0_3 = arith.constant 0 : index
    %c0_4 = arith.constant 0 : index
    %0 = vector.load %arg1[%c0, %c0_0, %c0_1, %c0_2, %c0_3, %c0_4] : memref<2x2x8x8x8x16xf32, #tpu.memory_space<vmem>>, vector<2x2x8x8x8x16xf32>
    %1 = vector.shape_cast %0 : vector<2x2x8x8x8x16xf32> to vector<2048x16xf32>
    %c0_5 = arith.constant 0 : index
    %c0_6 = arith.constant 0 : index
    %2 = vector.load %arg2[%c0_5, %c0_6] : memref<16x32xf32, #tpu.memory_space<vmem>>, vector<16x32xf32>
    %cst = arith.constant dense<0.000000e+00> : vector<2048x32xf32>
    %3 = tpu.matmul %1, %2, %cst {dimension_numbers = #tpu.dot_dimension_numbers<[1], [0], [0], [1], [0, 0, 1, 1], [], []>} : vector<2048x16xf32>, vector<16x32xf32>, vector<2048x32xf32> -> vector<2048x32xf32>
    %c0_7 = arith.constant 0 : index
    %c0_8 = arith.constant 0 : index
    %4 = vector.load %arg3[%c0_7, %c0_8] : memref<1x32xf32, #tpu.memory_space<vmem>>, vector<1x32xf32>
    %5 = vector.broadcast %4 : vector<1x32xf32> to vector<2048x32xf32>
    %6 = arith.addf %3, %5 : vector<2048x32xf32>
    %cst_9 = arith.constant 0.000000e+00 : f32
    %7 = vector.broadcast %cst_9 : f32 to vector<2048x32xf32>
    %8 = arith.cmpf ogt, %6, %7 : vector<2048x32xf32>
    %cst_10 = arith.constant 0.00999999977 : f32
    %9 = vector.broadcast %cst_10 : f32 to vector<2048x32xf32>
    %10 = arith.mulf %9, %6 : vector<2048x32xf32>
    %11 = arith.select %8, %6, %10 : vector<2048x32xi1>, vector<2048x32xf32>
    %12 = vector.shape_cast %11 : vector<2048x32xf32> to vector<2x2x8x8x8x32xf32>
    %c0_11 = arith.constant 0 : index
    %c0_12 = arith.constant 0 : index
    %c0_13 = arith.constant 0 : index
    %c0_14 = arith.constant 0 : index
    %c0_15 = arith.constant 0 : index
    %c0_16 = arith.constant 0 : index
    %13 = vector.load %arg9[%c0_11, %c0_12, %c0_13, %c0_14, %c0_15, %c0_16] : memref<2x2x8x8x8x32xf32, #tpu.memory_space<vmem>>, vector<2x2x8x8x8x32xf32>
    tpu.vector_store %arg9[%c0_11, %c0_12, %c0_13, %c0_14, %c0_15, %c0_16], %12 {strides = array<i32>} : memref<2x2x8x8x8x32xf32, #tpu.memory_space<vmem>>, vector<2x2x8x8x8x32xf32>,
    %c0_17 = arith.constant 0 : index
    %c0_18 = arith.constant 0 : index
    %c0_19 = arith.constant 0 : index
    %c0_20 = arith.constant 0 : index
    %c0_21 = arith.constant 0 : index
    %c0_22 = arith.constant 0 : index
    %14 = vector.load %arg9[%c0_17, %c0_18, %c0_19, %c0_20, %c0_21, %c0_22] : memref<2x2x8x8x8x32xf32, #tpu.memory_space<vmem>>, vector<1x1x6x6x8x32xf32>
    %15 = vector.shape_cast %14 : vector<1x1x6x6x8x32xf32> to vector<6x6x8x32xf32>
    %16 = vector.shape_cast %15 : vector<6x6x8x32xf32> to vector<288x32xf32>
    %c0_23 = arith.constant 0 : index
    %c0_24 = arith.constant 0 : index
    %c0_25 = arith.constant 0 : index
    %17 = vector.load %arg4[%c0_23, %c0_24, %c0_25] : memref<16x32x32xf32, #tpu.memory_space<vmem>>, vector<1x32x32xf32>
    %18 = vector.shape_cast %17 : vector<1x32x32xf32> to vector<32x32xf32>
    %cst_26 = arith.constant dense<0.000000e+00> : vector<288x32xf32>
    %19 = tpu.matmul %16, %18, %cst_26 {dimension_numbers = #tpu.dot_dimension_numbers<[1], [0], [0], [1], [0, 0, 1, 1], [], []>} : vector<288x32xf32>, vector<32x32xf32>, vector<288x32xf32> -> vector<288x32xf32>
    %c0_27 = arith.constant 0 : index
    %c1 = arith.constant 1 : index
    %c0_28 = arith.constant 0 : index
    %c0_29 = arith.constant 0 : index
    %c0_30 = arith.constant 0 : index
    %c0_31 = arith.constant 0 : index
    %20 = vector.load %arg9[%c0_27, %c1, %c0_28, %c0_29, %c0_30, %c0_31] : memref<2x2x8x8x8x32xf32, #tpu.memory_space<vmem>>, vector<1x1x6x6x8x32xf32>
    %21 = vector.shape_cast %20 : vector<1x1x6x6x8x32xf32> to vector<6x6x8x32xf32>
    %22 = vector.shape_cast %21 : vector<6x6x8x32xf32> to vector<288x32xf32>
    %c1_32 = arith.constant 1 : index
    %c0_33 = arith.constant 0 : index
    %c0_34 = arith.constant 0 : index
    %23 = vector.load %arg4[%c1_32, %c0_33, %c0_34] : memref<16x32x32xf32, #tpu.memory_space<vmem>>, vector<1x32x32xf32>
    %24 = vector.shape_cast %23 : vector<1x32x32xf32> to vector<32x32xf32>
    %cst_35 = arith.constant dense<0.000000e+00> : vector<288x32xf32>
    %25 = tpu.matmul %22, %24, %cst_35 {dimension_numbers = #tpu.dot_dimension_numbers<[1], [0], [0], [1], [0, 0, 1, 1], [], []>} : vector<288x32xf32>, vector<32x32xf32>, vector<288x32xf32> -> vector<288x32xf32>
    %26 = arith.addf %19, %25 : vector<288x32xf32>
    %c0_36 = arith.constant 0 : index
    %c0_37 = arith.constant 0 : index
    %c0_38 = arith.constant 0 : index
    %c1_39 = arith.constant 1 : index
    %c0_40 = arith.constant 0 : index
    %c0_41 = arith.constant 0 : index
    %27 = vector.load %arg9[%c0_36, %c0_37, %c0_38, %c1_39, %c0_40, %c0_41] : memref<2x2x8x8x8x32xf32, #tpu.memory_space<vmem>>, vector<1x1x6x6x8x32xf32>
    %28 = vector.shape_cast %27 : vector<1x1x6x6x8x32xf32> to vector<6x6x8x32xf32>
    %29 = vector.shape_cast %28 : vector<6x6x8x32xf32> to vector<288x32xf32>
    %c2 = arith.constant 2 : index
    %c0_42 = arith.constant 0 : index
    %c0_43 = arith.constant 0 : index
    %30 = vector.load %arg4[%c2, %c0_42, %c0_43] : memref<16x32x32xf32, #tpu.memory_space<vmem>>, vector<1x32x32xf32>
    %31 = vector.shape_cast %30 : vector<1x32x32xf32> to vector<32x32xf32>
    %cst_44 = arith.constant dense<0.000000e+00> : vector<288x32xf32>
    %32 = tpu.matmul %29, %31, %cst_44 {dimension_numbers = #tpu.dot_dimension_numbers<[1], [0], [0], [1], [0, 0, 1, 1], [], []>} : vector<288x32xf32>, vector<32x32xf32>, vector<288x32xf32> -> vector<288x32xf32>
    %33 = arith.addf %26, %32 : vector<288x32xf32>
    %c0_45 = arith.constant 0 : index
    %c1_46 = arith.constant 1 : index
    %c0_47 = arith.constant 0 : index
    %c1_48 = arith.constant 1 : index
    %c0_49 = arith.constant 0 : index
    %c0_50 = arith.constant 0 : index
    %34 = vector.load %arg9[%c0_45, %c1_46, %c0_47, %c1_48, %c0_49, %c0_50] : memref<2x2x8x8x8x32xf32, #tpu.memory_space<vmem>>, vector<1x1x6x6x8x32xf32>
    %35 = vector.shape_cast %34 : vector<1x1x6x6x8x32xf32> to vector<6x6x8x32xf32>
    %36 = vector.shape_cast %35 : vector<6x6x8x32xf32> to vector<288x32xf32>
    %c3 = arith.constant 3 : index
    %c0_51 = arith.constant 0 : index
    %c0_52 = arith.constant 0 : index
    %37 = vector.load %arg4[%c3, %c0_51, %c0_52] : memref<16x32x32xf32, #tpu.memory_space<vmem>>, vector<1x32x32xf32>
    %38 = vector.shape_cast %37 : vector<1x32x32xf32> to vector<32x32xf32>
    %cst_53 = arith.constant dense<0.000000e+00> : vector<288x32xf32>
    %39 = tpu.matmul %36, %38, %cst_53 {dimension_numbers = #tpu.dot_dimension_numbers<[1], [0], [0], [1], [0, 0, 1, 1], [], []>} : vector<288x32xf32>, vector<32x32xf32>, vector<288x32xf32> -> vector<288x32xf32>
    %40 = arith.addf %33, %39 : vector<288x32xf32>
    %c1_54 = arith.constant 1 : index
    %c0_55 = arith.constant 0 : index
    %c0_56 = arith.constant 0 : index
    %c0_57 = arith.constant 0 : index
    %c0_58 = arith.constant 0 : index
    %c0_59 = arith.constant 0 : index
    %41 = vector.load %arg9[%c1_54, %c0_55, %c0_56, %c0_57, %c0_58, %c0_59] : memref<2x2x8x8x8x32xf32, #tpu.memory_space<vmem>>, vector<1x1x6x6x8x32xf32>
    %42 = vector.shape_cast %41 : vector<1x1x6x6x8x32xf32> to vector<6x6x8x32xf32>
    %43 = vector.shape_cast %42 : vector<6x6x8x32xf32> to vector<288x32xf32>
    %c4 = arith.constant 4 : index
    %c0_60 = arith.constant 0 : index
    %c0_61 = arith.constant 0 : index
    %44 = vector.load %arg4[%c4, %c0_60, %c0_61] : memref<16x32x32xf32, #tpu.memory_space<vmem>>, vector<1x32x32xf32>
    %45 = vector.shape_cast %44 : vector<1x32x32xf32> to vector<32x32xf32>
    %cst_62 = arith.constant dense<0.000000e+00> : vector<288x32xf32>
    %46 = tpu.matmul %43, %45, %cst_62 {dimension_numbers = #tpu.dot_dimension_numbers<[1], [0], [0], [1], [0, 0, 1, 1], [], []>} : vector<288x32xf32>, vector<32x32xf32>, vector<288x32xf32> -> vector<288x32xf32>
    %47 = arith.addf %40, %46 : vector<288x32xf32>
    %c1_63 = arith.constant 1 : index
    %c1_64 = arith.constant 1 : index
    %c0_65 = arith.constant 0 : index
    %c0_66 = arith.constant 0 : index
    %c0_67 = arith.constant 0 : index
    %c0_68 = arith.constant 0 : index
    %48 = vector.load %arg9[%c1_63, %c1_64, %c0_65, %c0_66, %c0_67, %c0_68] : memref<2x2x8x8x8x32xf32, #tpu.memory_space<vmem>>, vector<1x1x6x6x8x32xf32>
    %49 = vector.shape_cast %48 : vector<1x1x6x6x8x32xf32> to vector<6x6x8x32xf32>
    %50 = vector.shape_cast %49 : vector<6x6x8x32xf32> to vector<288x32xf32>
    %c5 = arith.constant 5 : index
    %c0_69 = arith.constant 0 : index
    %c0_70 = arith.constant 0 : index
    %51 = vector.load %arg4[%c5, %c0_69, %c0_70] : memref<16x32x32xf32, #tpu.memory_space<vmem>>, vector<1x32x32xf32>
    %52 = vector.shape_cast %51 : vector<1x32x32xf32> to vector<32x32xf32>
    %cst_71 = arith.constant dense<0.000000e+00> : vector<288x32xf32>
    %53 = tpu.matmul %50, %52, %cst_71 {dimension_numbers = #tpu.dot_dimension_numbers<[1], [0], [0], [1], [0, 0, 1, 1], [], []>} : vector<288x32xf32>, vector<32x32xf32>, vector<288x32xf32> -> vector<288x32xf32>
    %54 = arith.addf %47, %53 : vector<288x32xf32>
    %c1_72 = arith.constant 1 : index
    %c0_73 = arith.constant 0 : index
    %c0_74 = arith.constant 0 : index
    %c1_75 = arith.constant 1 : index
    %c0_76 = arith.constant 0 : index
    %c0_77 = arith.constant 0 : index
    %55 = vector.load %arg9[%c1_72, %c0_73, %c0_74, %c1_75, %c0_76, %c0_77] : memref<2x2x8x8x8x32xf32, #tpu.memory_space<vmem>>, vector<1x1x6x6x8x32xf32>
    %56 = vector.shape_cast %55 : vector<1x1x6x6x8x32xf32> to vector<6x6x8x32xf32>
    %57 = vector.shape_cast %56 : vector<6x6x8x32xf32> to vector<288x32xf32>
    %c6 = arith.constant 6 : index
    %c0_78 = arith.constant 0 : index
    %c0_79 = arith.constant 0 : index
    %58 = vector.load %arg4[%c6, %c0_78, %c0_79] : memref<16x32x32xf32, #tpu.memory_space<vmem>>, vector<1x32x32xf32>
    %59 = vector.shape_cast %58 : vector<1x32x32xf32> to vector<32x32xf32>
    %cst_80 = arith.constant dense<0.000000e+00> : vector<288x32xf32>
    %60 = tpu.matmul %57, %59, %cst_80 {dimension_numbers = #tpu.dot_dimension_numbers<[1], [0], [0], [1], [0, 0, 1, 1], [], []>} : vector<288x32xf32>, vector<32x32xf32>, vector<288x32xf32> -> vector<288x32xf32>
    %61 = arith.addf %54, %60 : vector<288x32xf32>
    %c1_81 = arith.constant 1 : index
    %c1_82 = arith.constant 1 : index
    %c0_83 = arith.constant 0 : index
    %c1_84 = arith.constant 1 : index
    %c0_85 = arith.constant 0 : index
    %c0_86 = arith.constant 0 : index
    %62 = vector.load %arg9[%c1_81, %c1_82, %c0_83, %c1_84, %c0_85, %c0_86] : memref<2x2x8x8x8x32xf32, #tpu.memory_space<vmem>>, vector<1x1x6x6x8x32xf32>
    %63 = vector.shape_cast %62 : vector<1x1x6x6x8x32xf32> to vector<6x6x8x32xf32>
    %64 = vector.shape_cast %63 : vector<6x6x8x32xf32> to vector<288x32xf32>
    %c7 = arith.constant 7 : index
    %c0_87 = arith.constant 0 : index
    %c0_88 = arith.constant 0 : index
    %65 = vector.load %arg4[%c7, %c0_87, %c0_88] : memref<16x32x32xf32, #tpu.memory_space<vmem>>, vector<1x32x32xf32>
    %66 = vector.shape_cast %65 : vector<1x32x32xf32> to vector<32x32xf32>
    %cst_89 = arith.constant dense<0.000000e+00> : vector<288x32xf32>
    %67 = tpu.matmul %64, %66, %cst_89 {dimension_numbers = #tpu.dot_dimension_numbers<[1], [0], [0], [1], [0, 0, 1, 1], [], []>} : vector<288x32xf32>, vector<32x32xf32>, vector<288x32xf32> -> vector<288x32xf32>
    %68 = arith.addf %61, %67 : vector<288x32xf32>
    %c0_90 = arith.constant 0 : index
    %c0_91 = arith.constant 0 : index
    %c1_92 = arith.constant 1 : index
    %c0_93 = arith.constant 0 : index
    %c0_94 = arith.constant 0 : index
    %c0_95 = arith.constant 0 : index
    %69 = vector.load %arg9[%c0_90, %c0_91, %c1_92, %c0_93, %c0_94, %c0_95] : memref<2x2x8x8x8x32xf32, #tpu.memory_space<vmem>>, vector<1x1x6x6x8x32xf32>
    %70 = vector.shape_cast %69 : vector<1x1x6x6x8x32xf32> to vector<6x6x8x32xf32>
    %71 = vector.shape_cast %70 : vector<6x6x8x32xf32> to vector<288x32xf32>
    %c8 = arith.constant 8 : index
    %c0_96 = arith.constant 0 : index
    %c0_97 = arith.constant 0 : index
    %72 = vector.load %arg4[%c8, %c0_96, %c0_97] : memref<16x32x32xf32, #tpu.memory_space<vmem>>, vector<1x32x32xf32>
    %73 = vector.shape_cast %72 : vector<1x32x32xf32> to vector<32x32xf32>
    %cst_98 = arith.constant dense<0.000000e+00> : vector<288x32xf32>
    %74 = tpu.matmul %71, %73, %cst_98 {dimension_numbers = #tpu.dot_dimension_numbers<[1], [0], [0], [1], [0, 0, 1, 1], [], []>} : vector<288x32xf32>, vector<32x32xf32>, vector<288x32xf32> -> vector<288x32xf32>
    %75 = arith.addf %68, %74 : vector<288x32xf32>
    %c0_99 = arith.constant 0 : index
    %c1_100 = arith.constant 1 : index
    %c1_101 = arith.constant 1 : index
    %c0_102 = arith.constant 0 : index
    %c0_103 = arith.constant 0 : index
    %c0_104 = arith.constant 0 : index
    %76 = vector.load %arg9[%c0_99, %c1_100, %c1_101, %c0_102, %c0_103, %c0_104] : memref<2x2x8x8x8x32xf32, #tpu.memory_space<vmem>>, vector<1x1x6x6x8x32xf32>
    %77 = vector.shape_cast %76 : vector<1x1x6x6x8x32xf32> to vector<6x6x8x32xf32>
    %78 = vector.shape_cast %77 : vector<6x6x8x32xf32> to vector<288x32xf32>
    %c9 = arith.constant 9 : index
    %c0_105 = arith.constant 0 : index
    %c0_106 = arith.constant 0 : index
    %79 = vector.load %arg4[%c9, %c0_105, %c0_106] : memref<16x32x32xf32, #tpu.memory_space<vmem>>, vector<1x32x32xf32>
    %80 = vector.shape_cast %79 : vector<1x32x32xf32> to vector<32x32xf32>
    %cst_107 = arith.constant dense<0.000000e+00> : vector<288x32xf32>
    %81 = tpu.matmul %78, %80, %cst_107 {dimension_numbers = #tpu.dot_dimension_numbers<[1], [0], [0], [1], [0, 0, 1, 1], [], []>} : vector<288x32xf32>, vector<32x32xf32>, vector<288x32xf32> -> vector<288x32xf32>
    %82 = arith.addf %75, %81 : vector<288x32xf32>
    %c0_108 = arith.constant 0 : index
    %c0_109 = arith.constant 0 : index
    %c1_110 = arith.constant 1 : index
    %c1_111 = arith.constant 1 : index
    %c0_112 = arith.constant 0 : index
    %c0_113 = arith.constant 0 : index
    %83 = vector.load %arg9[%c0_108, %c0_109, %c1_110, %c1_111, %c0_112, %c0_113] : memref<2x2x8x8x8x32xf32, #tpu.memory_space<vmem>>, vector<1x1x6x6x8x32xf32>
    %84 = vector.shape_cast %83 : vector<1x1x6x6x8x32xf32> to vector<6x6x8x32xf32>
    %85 = vector.shape_cast %84 : vector<6x6x8x32xf32> to vector<288x32xf32>
    %c10 = arith.constant 10 : index
    %c0_114 = arith.constant 0 : index
    %c0_115 = arith.constant 0 : index
    %86 = vector.load %arg4[%c10, %c0_114, %c0_115] : memref<16x32x32xf32, #tpu.memory_space<vmem>>, vector<1x32x32xf32>
    %87 = vector.shape_cast %86 : vector<1x32x32xf32> to vector<32x32xf32>
    %cst_116 = arith.constant dense<0.000000e+00> : vector<288x32xf32>
    %88 = tpu.matmul %85, %87, %cst_116 {dimension_numbers = #tpu.dot_dimension_numbers<[1], [0], [0], [1], [0, 0, 1, 1], [], []>} : vector<288x32xf32>, vector<32x32xf32>, vector<288x32xf32> -> vector<288x32xf32>
    %89 = arith.addf %82, %88 : vector<288x32xf32>
    %c0_117 = arith.constant 0 : index
    %c1_118 = arith.constant 1 : index
    %c1_119 = arith.constant 1 : index
    %c1_120 = arith.constant 1 : index
    %c0_121 = arith.constant 0 : index
    %c0_122 = arith.constant 0 : index
    %90 = vector.load %arg9[%c0_117, %c1_118, %c1_119, %c1_120, %c0_121, %c0_122] : memref<2x2x8x8x8x32xf32, #tpu.memory_space<vmem>>, vector<1x1x6x6x8x32xf32>
    %91 = vector.shape_cast %90 : vector<1x1x6x6x8x32xf32> to vector<6x6x8x32xf32>
    %92 = vector.shape_cast %91 : vector<6x6x8x32xf32> to vector<288x32xf32>
    %c11 = arith.constant 11 : index
    %c0_123 = arith.constant 0 : index
    %c0_124 = arith.constant 0 : index
    %93 = vector.load %arg4[%c11, %c0_123, %c0_124] : memref<16x32x32xf32, #tpu.memory_space<vmem>>, vector<1x32x32xf32>
    %94 = vector.shape_cast %93 : vector<1x32x32xf32> to vector<32x32xf32>
    %cst_125 = arith.constant dense<0.000000e+00> : vector<288x32xf32>
    %95 = tpu.matmul %92, %94, %cst_125 {dimension_numbers = #tpu.dot_dimension_numbers<[1], [0], [0], [1], [0, 0, 1, 1], [], []>} : vector<288x32xf32>, vector<32x32xf32>, vector<288x32xf32> -> vector<288x32xf32>
    %96 = arith.addf %89, %95 : vector<288x32xf32>
    %c1_126 = arith.constant 1 : index
    %c0_127 = arith.constant 0 : index
    %c1_128 = arith.constant 1 : index
    %c0_129 = arith.constant 0 : index
    %c0_130 = arith.constant 0 : index
    %c0_131 = arith.constant 0 : index
    %97 = vector.load %arg9[%c1_126, %c0_127, %c1_128, %c0_129, %c0_130, %c0_131] : memref<2x2x8x8x8x32xf32, #tpu.memory_space<vmem>>, vector<1x1x6x6x8x32xf32>
    %98 = vector.shape_cast %97 : vector<1x1x6x6x8x32xf32> to vector<6x6x8x32xf32>
    %99 = vector.shape_cast %98 : vector<6x6x8x32xf32> to vector<288x32xf32>
    %c12 = arith.constant 12 : index
    %c0_132 = arith.constant 0 : index
    %c0_133 = arith.constant 0 : index
    %100 = vector.load %arg4[%c12, %c0_132, %c0_133] : memref<16x32x32xf32, #tpu.memory_space<vmem>>, vector<1x32x32xf32>
    %101 = vector.shape_cast %100 : vector<1x32x32xf32> to vector<32x32xf32>
    %cst_134 = arith.constant dense<0.000000e+00> : vector<288x32xf32>
    %102 = tpu.matmul %99, %101, %cst_134 {dimension_numbers = #tpu.dot_dimension_numbers<[1], [0], [0], [1], [0, 0, 1, 1], [], []>} : vector<288x32xf32>, vector<32x32xf32>, vector<288x32xf32> -> vector<288x32xf32>
    %103 = arith.addf %96, %102 : vector<288x32xf32>
    %c1_135 = arith.constant 1 : index
    %c1_136 = arith.constant 1 : index
    %c1_137 = arith.constant 1 : index
    %c0_138 = arith.constant 0 : index
    %c0_139 = arith.constant 0 : index
    %c0_140 = arith.constant 0 : index
    %104 = vector.load %arg9[%c1_135, %c1_136, %c1_137, %c0_138, %c0_139, %c0_140] : memref<2x2x8x8x8x32xf32, #tpu.memory_space<vmem>>, vector<1x1x6x6x8x32xf32>
    %105 = vector.shape_cast %104 : vector<1x1x6x6x8x32xf32> to vector<6x6x8x32xf32>
    %106 = vector.shape_cast %105 : vector<6x6x8x32xf32> to vector<288x32xf32>
    %c13 = arith.constant 13 : index
    %c0_141 = arith.constant 0 : index
    %c0_142 = arith.constant 0 : index
    %107 = vector.load %arg4[%c13, %c0_141, %c0_142] : memref<16x32x32xf32, #tpu.memory_space<vmem>>, vector<1x32x32xf32>
    %108 = vector.shape_cast %107 : vector<1x32x32xf32> to vector<32x32xf32>
    %cst_143 = arith.constant dense<0.000000e+00> : vector<288x32xf32>
    %109 = tpu.matmul %106, %108, %cst_143 {dimension_numbers = #tpu.dot_dimension_numbers<[1], [0], [0], [1], [0, 0, 1, 1], [], []>} : vector<288x32xf32>, vector<32x32xf32>, vector<288x32xf32> -> vector<288x32xf32>
    %110 = arith.addf %103, %109 : vector<288x32xf32>
    %c1_144 = arith.constant 1 : index
    %c0_145 = arith.constant 0 : index
    %c1_146 = arith.constant 1 : index
    %c1_147 = arith.constant 1 : index
    %c0_148 = arith.constant 0 : index
    %c0_149 = arith.constant 0 : index
    %111 = vector.load %arg9[%c1_144, %c0_145, %c1_146, %c1_147, %c0_148, %c0_149] : memref<2x2x8x8x8x32xf32, #tpu.memory_space<vmem>>, vector<1x1x6x6x8x32xf32>
    %112 = vector.shape_cast %111 : vector<1x1x6x6x8x32xf32> to vector<6x6x8x32xf32>
    %113 = vector.shape_cast %112 : vector<6x6x8x32xf32> to vector<288x32xf32>
    %c14 = arith.constant 14 : index
    %c0_150 = arith.constant 0 : index
    %c0_151 = arith.constant 0 : index
    %114 = vector.load %arg4[%c14, %c0_150, %c0_151] : memref<16x32x32xf32, #tpu.memory_space<vmem>>, vector<1x32x32xf32>
    %115 = vector.shape_cast %114 : vector<1x32x32xf32> to vector<32x32xf32>
    %cst_152 = arith.constant dense<0.000000e+00> : vector<288x32xf32>
    %116 = tpu.matmul %113, %115, %cst_152 {dimension_numbers = #tpu.dot_dimension_numbers<[1], [0], [0], [1], [0, 0, 1, 1], [], []>} : vector<288x32xf32>, vector<32x32xf32>, vector<288x32xf32> -> vector<288x32xf32>
    %117 = arith.addf %110, %116 : vector<288x32xf32>
    %c1_153 = arith.constant 1 : index
    %c1_154 = arith.constant 1 : index
    %c1_155 = arith.constant 1 : index
    %c1_156 = arith.constant 1 : index
    %c0_157 = arith.constant 0 : index
    %c0_158 = arith.constant 0 : index
    %118 = vector.load %arg9[%c1_153, %c1_154, %c1_155, %c1_156, %c0_157, %c0_158] : memref<2x2x8x8x8x32xf32, #tpu.memory_space<vmem>>, vector<1x1x6x6x8x32xf32>
    %119 = vector.shape_cast %118 : vector<1x1x6x6x8x32xf32> to vector<6x6x8x32xf32>
    %120 = vector.shape_cast %119 : vector<6x6x8x32xf32> to vector<288x32xf32>
    %c15 = arith.constant 15 : index
    %c0_159 = arith.constant 0 : index
    %c0_160 = arith.constant 0 : index
    %121 = vector.load %arg4[%c15, %c0_159, %c0_160] : memref<16x32x32xf32, #tpu.memory_space<vmem>>, vector<1x32x32xf32>
    %122 = vector.shape_cast %121 : vector<1x32x32xf32> to vector<32x32xf32>
    %cst_161 = arith.constant dense<0.000000e+00> : vector<288x32xf32>
    %123 = tpu.matmul %120, %122, %cst_161 {dimension_numbers = #tpu.dot_dimension_numbers<[1], [0], [0], [1], [0, 0, 1, 1], [], []>} : vector<288x32xf32>, vector<32x32xf32>, vector<288x32xf32> -> vector<288x32xf32>
    %124 = arith.addf %117, %123 : vector<288x32xf32>
    %c0_162 = arith.constant 0 : index
    %c0_163 = arith.constant 0 : index
    %125 = vector.load %arg5[%c0_162, %c0_163] : memref<1x32xf32, #tpu.memory_space<vmem>>, vector<1x32xf32>
    %126 = vector.broadcast %125 : vector<1x32xf32> to vector<288x32xf32>
    %127 = arith.addf %124, %126 : vector<288x32xf32>
    %cst_164 = arith.constant 0.000000e+00 : f32
    %128 = vector.broadcast %cst_164 : f32 to vector<288x32xf32>
    %129 = arith.cmpf ogt, %127, %128 : vector<288x32xf32>
    %cst_165 = arith.constant 0.00999999977 : f32
    %130 = vector.broadcast %cst_165 : f32 to vector<288x32xf32>
    %131 = arith.mulf %130, %127 : vector<288x32xf32>
    %132 = arith.select %129, %127, %131 : vector<288x32xi1>, vector<288x32xf32>
    %133 = vector.shape_cast %132 : vector<288x32xf32> to vector<36x8x32xf32>
    %c0_166 = arith.constant 0 : index
    %c0_167 = arith.constant 0 : index
    %c0_168 = arith.constant 0 : index
    %134 = vector.load %arg6[%c0_166, %c0_167, %c0_168] : memref<36x4x32xf32, #tpu.memory_space<vmem>>, vector<36x4x32xf32>
    "tpu.trace_start"() <{level = 10 : i32, message = "sbc,sac->sba"}> : () -> ()
    %cst_169 = arith.constant dense<0.000000e+00> : vector<36x8x4xf32>
    %135 = tpu.matmul %133, %134, %cst_169 {dimension_numbers = #tpu.dot_dimension_numbers<[2], [2], [1], [1], [0, 0, 0, 1, 1, 1], [0], [0]>} : vector<36x8x32xf32>, vector<36x4x32xf32>, vector<36x8x4xf32> -> vector<36x8x4xf32>
    "tpu.trace_stop"() : () -> ()
    %cst_170 = arith.constant dense<0.000000e+00> : vector<8x4xf32>
    %136 = vector.multi_reduction <add>, %135, %cst_170 [0] : vector<36x8x4xf32> to vector<8x4xf32>
    %c0_171 = arith.constant 0 : index
    %c0_172 = arith.constant 0 : index
    %137 = vector.load %arg7[%c0_171, %c0_172] : memref<1x4xf32, #tpu.memory_space<vmem>>, vector<1x4xf32>
    %138 = vector.broadcast %137 : vector<1x4xf32> to vector<8x4xf32>
    %139 = arith.addf %136, %138 : vector<8x4xf32>
    %cst_173 = arith.constant 0.000000e+00 : f32
    %140 = vector.broadcast %cst_173 : f32 to vector<8x4xf32>
    %141 = arith.cmpf ogt, %139, %140 : vector<8x4xf32>
    %cst_174 = arith.constant 0.00999999977 : f32
    %142 = vector.broadcast %cst_174 : f32 to vector<8x4xf32>
    %143 = arith.mulf %142, %139 : vector<8x4xf32>
    %144 = arith.select %141, %139, %143 : vector<8x4xi1>, vector<8x4xf32>
    %145 = tpu.iota {dimensions = array<i32: 1>} : vector<8x4xi32>
    %cst_175 = arith.constant dense<0xFF800000> : vector<8xf32>
    %146 = vector.multi_reduction <maximumf>, %144, %cst_175 [1] : vector<8x4xf32> to vector<8xf32>
    %147 = vector.shape_cast %146 : vector<8xf32> to vector<8x1xf32>
    %148 = vector.broadcast %147 : vector<8x1xf32> to vector<8x4xf32>
    %149 = arith.cmpf oeq, %144, %148 : vector<8x4xf32>
    %c1073741824_i32 = arith.constant 1073741824 : i32
    %150 = vector.broadcast %c1073741824_i32 : i32 to vector<8x4xi32>
    %151 = arith.select %149, %145, %150 : vector<8x4xi1>, vector<8x4xi32>
    %cst_176 = arith.constant dense<2147483647> : vector<8xi32>
    %152 = vector.multi_reduction <minsi>, %151, %cst_176 [1] : vector<8x4xi32> to vector<8xi32>
    %153 = vector.shape_cast %152 : vector<8xi32> to vector<8x1xi32>
    %c0_177 = arith.constant 0 : index
    %c0_178 = arith.constant 0 : index
    %154 = vector.load %arg8[%c0_177, %c0_178] : memref<8x1xi32, #tpu.memory_space<vmem>>, vector<8x1xi32>
    tpu.vector_store %arg8[%c0_177, %c0_178], %153 {strides = array<i32>} : memref<8x1xi32, #tpu.memory_space<vmem>>, vector<8x1xi32>,
    return
  }
  func.func @transform_0(%arg0: i32) -> (i32, i32, i32, i32, i32, i32) {
    %c0_i32 = arith.constant 0 : i32
    %c0_i32_0 = arith.constant 0 : i32
    %c0_i32_1 = arith.constant 0 : i32
    %c0_i32_2 = arith.constant 0 : i32
    %c0_i32_3 = arith.constant 0 : i32
    %c0_i32_4 = arith.constant 0 : i32
    return %c0_i32, %c0_i32_0, %c0_i32_1, %c0_i32_2, %arg0, %c0_i32_3 : i32, i32, i32, i32, i32, i32
  }
  func.func @transform_1(%arg0: i32) -> (i32, i32) {
    %c0_i32 = arith.constant 0 : i32
    %c0_i32_0 = arith.constant 0 : i32
    %c0_i32_1 = arith.constant 0 : i32
    return %c0_i32, %c0_i32_0 : i32, i32
  }
  func.func @transform_2(%arg0: i32) -> (i32, i32) {
    %c0_i32 = arith.constant 0 : i32
    %c0_i32_0 = arith.constant 0 : i32
    %c0_i32_1 = arith.constant 0 : i32
    return %c0_i32, %c0_i32_0 : i32, i32
  }
  func.func @transform_3(%arg0: i32) -> (i32, i32, i32) {
    %c0_i32 = arith.constant 0 : i32
    %c0_i32_0 = arith.constant 0 : i32
    %c0_i32_1 = arith.constant 0 : i32
    %c0_i32_2 = arith.constant 0 : i32
    return %c0_i32, %c0_i32_0, %c0_i32_1 : i32, i32, i32
  }
  func.func @transform_4(%arg0: i32) -> (i32, i32) {
    %c0_i32 = arith.constant 0 : i32
    %c0_i32_0 = arith.constant 0 : i32
    %c0_i32_1 = arith.constant 0 : i32
    return %c0_i32, %c0_i32_0 : i32, i32
  }
  func.func @transform_5(%arg0: i32) -> (i32, i32, i32) {
    %c0_i32 = arith.constant 0 : i32
    %c0_i32_0 = arith.constant 0 : i32
    %c0_i32_1 = arith.constant 0 : i32
    %c0_i32_2 = arith.constant 0 : i32
    return %c0_i32, %c0_i32_0, %c0_i32_1 : i32, i32, i32
  }
  func.func @transform_6(%arg0: i32) -> (i32, i32) {
    %c0_i32 = arith.constant 0 : i32
    %c0_i32_0 = arith.constant 0 : i32
    %c0_i32_1 = arith.constant 0 : i32
    return %c0_i32, %c0_i32_0 : i32, i32
  }
  func.func @transform_7(%arg0: i32) -> (i32, i32) {
    %c0_i32 = arith.constant 0 : i32
    %c0_i32_0 = arith.constant 0 : i32
    return %arg0, %c0_i32 : i32, i32
  }
}

</mosaic_0001>

<bundles_post_ra>
// kernel: model_forward.1
= control target key start
LH: loop header
LB: loop body
LE: loop exit
PB: predicated region body
PF: predicated region fallthrough
CT: control target
= control target key end

     0   :  { %vm291_vm0 = vcmask 130048   ;;  %vm3173_vm2 = vcmask 261120   ;;  %s21890_s1 = inlined_call_operand.vmem [shape: f32[16,32], index: 1, kind: input, shape index: {}]   ;;  %s21891_s0 = inlined_call_operand.vmem [shape: f32[2,2,8,8,8,16], index: 0, kind: input, shape index: {}]   ;;  %s21892_s2 = inlined_call_operand.vmem [shape: f32[1,32], index: 2, kind: input, shape index: {}]   ;;  %s21893_s3 = inlined_call_operand.vmem [shape: f32[16,32,32], index: 3, kind: input, shape index: {}]   ;;  %s21894_s5 = inlined_call_operand.vmem [shape: f32[36,4,32], index: 5, kind: input, shape index: {}]   ;;  %s21895_s4 = inlined_call_operand.vmem [shape: f32[1,32], index: 4, kind: input, shape index: {}]   ;;  %s21896_s6 = inlined_call_operand.vmem [shape: f32[1,4], index: 6, kind: input, shape index: {}]   ;;  %s21897_s7 = inlined_call_operand.vmem [shape: s32[8,1], index: 7, kind: output, shape index: {}]  }
   0x1   :  { %v283_v0 = vld [vmem:[%s21890_s1 + $0x8] sm:$0xff]  ;;  %v282_v1 = vld [vmem:[%s21890_s1] sm:$0xff]  ;;  %v28_v4 = vld [vmem:[%s21891_s0 + $0x10] sm:$0xff] }
   0x2   :  { %v26_v2 = vld [vmem:[%s21891_s0] sm:$0xff]  ;;  %15223 = vmatprep.subr.mxu0 %v283_v0  ;;  %v27_v3 = vld [vmem:[%s21891_s0 + $0x8] sm:$0xff]  ;;  %v29_v5 = vld [vmem:[%s21891_s0 + $0x18] sm:$0xff] }
   0x3   :  { %15227 = vmatprep.mubr.msk.f32.mxu0 %vm291_vm0, %v26_v2  ;;  %15224 = vmatpush3.msra.mxu0 %v283_v0  ;;  %v30_v6 = vld [vmem:[%s21891_s0 + $0x20] sm:$0xff]  ;;  %v31_v7 = vld [vmem:[%s21891_s0 + $0x28] sm:$0xff]  ;;  %v32_v8 = vld [vmem:[%s21891_s0 + $0x30] sm:$0xff] }
   0x4   :  { %15225 = vmatprep.subr.mxu0 %v282_v1  ;;  %v33_v9 = vld [vmem:[%s21891_s0 + $0x38] sm:$0xff]  ;;  %v34_v10 = vld [vmem:[%s21891_s0 + $0x40] sm:$0xff]  ;;  %v35_v11 = vld [vmem:[%s21891_s0 + $0x48] sm:$0xff] }
   0x5   :  { %15226 = vmatpush3.msra.mxu0 %v282_v1  ;;  %v36_v12 = vld [vmem:[%s21891_s0 + $0x50] sm:$0xff]  ;;  %v37_v13 = vld [vmem:[%s21891_s0 + $0x58] sm:$0xff]  ;;  %v38_v14 = vld [vmem:[%s21891_s0 + $0x60] sm:$0xff] }
   0x6   :  { %15228 = vmatmul.mubr.msk.f32.vlgmr.msra.gmra.mxu0 %vm291_vm0, %v27_v3  ;;  %v39_v15 = vld [vmem:[%s21891_s0 + $0x68] sm:$0xff]  ;;  %v40_v16 = vld [vmem:[%s21891_s0 + $0x70] sm:$0xff]  ;;  %v41_v17 = vld [vmem:[%s21891_s0 + $0x78] sm:$0xff] }
   0x7   :  { %15230 = vmatprep.mubr.msk.f32.mxu0 %vm291_vm0, %v28_v4  ;;  %v42_v18 = vld [vmem:[%s21891_s0 + $0x80] sm:$0xff]  ;;  %v43_v19 = vld [vmem:[%s21891_s0 + $0x88] sm:$0xff]  ;;  %v44_v20 = vld [vmem:[%s21891_s0 + $0x90] sm:$0xff] }
   0x8   :  { %v45_v21 = vld [vmem:[%s21891_s0 + $0x98] sm:$0xff]  ;;  %v46_v22 = vld [vmem:[%s21891_s0 + $0xa0] sm:$0xff]  ;;  %v47_v23 = vld [vmem:[%s21891_s0 + $0xa8] sm:$0xff] }
   0x9   :  { %v48_v24 = vld [vmem:[%s21891_s0 + $0xb0] sm:$0xff]  ;;  %v49_v25 = vld [vmem:[%s21891_s0 + $0xb8] sm:$0xff]  ;;  %v50_v26 = vld [vmem:[%s21891_s0 + $0xc0] sm:$0xff] }
   0xa   :  { %15231 = vmatmul.mubr.msk.f32.gmra.mxu0 %vm291_vm0, %v29_v5  ;;  %v51_v27 = vld [vmem:[%s21891_s0 + $0xc8] sm:$0xff]  ;;  %v52_v28 = vld [vmem:[%s21891_s0 + $0xd0] sm:$0xff]  ;;  %v53_v29 = vld [vmem:[%s21891_s0 + $0xd8] sm:$0xff] }
   0xb   :  { %15233 = vmatprep.mubr.msk.f32.mxu0 %vm291_vm0, %v30_v6  ;;  %v54_v30 = vld [vmem:[%s21891_s0 + $0xe0] sm:$0xff]  ;;  %v55_v31 = vld [vmem:[%s21891_s0 + $0xe8] sm:$0xff]  ;;  %v56_v32 = vld [vmem:[%s21891_s0 + $0xf0] sm:$0xff] }
   0xc   :  { %v57_v33 = vld [vmem:[%s21891_s0 + $0xf8] sm:$0xff]  ;;  %v58_v34 = vld [vmem:[%s21891_s0 + $0x100] sm:$0xff]  ;;  %v59_v35 = vld [vmem:[%s21891_s0 + $0x108] sm:$0xff] }
   0xd   :  { %v60_v36 = vld [vmem:[%s21891_s0 + $0x110] sm:$0xff]  ;;  %v61_v37 = vld [vmem:[%s21891_s0 + $0x118] sm:$0xff]  ;;  %v62_v38 = vld [vmem:[%s21891_s0 + $0x120] sm:$0xff] }
   0xe   :  { %15234 = vmatmul.mubr.msk.f32.gmra.mxu0 %vm291_vm0, %v31_v7  ;;  %v63_v39 = vld [vmem:[%s21891_s0 + $0x128] sm:$0xff]  ;;  %v64_v40 = vld [vmem:[%s21891_s0 + $0x130] sm:$0xff]  ;;  %v65_v41 = vld [vmem:[%s21891_s0 + $0x138] sm:$0xff] }
   0xf   :  { %15236 = vmatprep.mubr.msk.f32.mxu0 %vm291_vm0, %v32_v8  ;;  %v66_v42 = vld [vmem:[%s21891_s0 + $0x140] sm:$0xff]  ;;  %v67_v43 = vld [vmem:[%s21891_s0 + $0x148] sm:$0xff]  ;;  %v68_v44 = vld [vmem:[%s21891_s0 + $0x150] sm:$0xff] }
  0x10   :  { %v69_v45 = vld [vmem:[%s21891_s0 + $0x158] sm:$0xff]  ;;  %v70_v46 = vld [vmem:[%s21891_s0 + $0x160] sm:$0xff]  ;;  %v71_v47 = vld [vmem:[%s21891_s0 + $0x168] sm:$0xff] }
  0x11   :  { %v72_v48 = vld [vmem:[%s21891_s0 + $0x170] sm:$0xff]  ;;  %v73_v49 = vld [vmem:[%s21891_s0 + $0x178] sm:$0xff]  ;;  %v74_v50 = vld [vmem:[%s21891_s0 + $0x180] sm:$0xff] }
  0x12   :  { %15237 = vmatmul.mubr.msk.f32.gmra.mxu0 %vm291_vm0, %v33_v9  ;;  %v75_v51 = vld [vmem:[%s21891_s0 + $0x188] sm:$0xff]  ;;  %v76_v52 = vld [vmem:[%s21891_s0 + $0x190] sm:$0xff]  ;;  %v77_v53 = vld [vmem:[%s21891_s0 + $0x198] sm:$0xff] }
  0x13   :  { %15239 = vmatprep.mubr.msk.f32.mxu0 %vm291_vm0, %v34_v10  ;;  %v78_v54 = vld [vmem:[%s21891_s0 + $0x1a0] sm:$0xff]  ;;  %v79_v55 = vld [vmem:[%s21891_s0 + $0x1a8] sm:$0xff]  ;;  %v80_v56 = vld [vmem:[%s21891_s0 + $0x1b0] sm:$0xff] }
  0x14   :  { %v81_v57 = vld [vmem:[%s21891_s0 + $0x1b8] sm:$0xff]  ;;  %v82_v58 = vld [vmem:[%s21891_s0 + $0x1c0] sm:$0xff]  ;;  %v83_v59 = vld [vmem:[%s21891_s0 + $0x1c8] sm:$0xff] }
  0x15   :  { %v84_v60 = vld [vmem:[%s21891_s0 + $0x1d0] sm:$0xff]  ;;  %v85_v61 = vld [vmem:[%s21891_s0 + $0x1d8] sm:$0xff]  ;;  %v86_v62 = vld [vmem:[%s21891_s0 + $0x1e0] sm:$0xff] }
  0x16   :  { %15240 = vmatmul.mubr.msk.f32.gmra.mxu0 %vm291_vm0, %v35_v11  ;;  %v87_v63 = vld [vmem:[%s21891_s0 + $0x1e8] sm:$0xff]  ;;  %v88_v0 = vld [vmem:[%s21891_s0 + $0x1f0] sm:$0xff]  ;;  %v89_v1 = vld [vmem:[%s21891_s0 + $0x1f8] sm:$0xff] }
  0x17   :  { %15242 = vmatprep.mubr.msk.f32.mxu0 %vm291_vm0, %v36_v12  ;;  %v90_v2 = vld [vmem:[%s21891_s0 + $0x200] sm:$0xff]  ;;  %v91_v3 = vld [vmem:[%s21891_s0 + $0x208] sm:$0xff]  ;;  %v92_v4 = vld [vmem:[%s21891_s0 + $0x210] sm:$0xff] }
  0x18   :  { %v93_v5 = vld [vmem:[%s21891_s0 + $0x218] sm:$0xff]  ;;  %v94_v6 = vld [vmem:[%s21891_s0 + $0x220] sm:$0xff]  ;;  %v95_v7 = vld [vmem:[%s21891_s0 + $0x228] sm:$0xff] }
  0x19   :  { %v96_v8 = vld [vmem:[%s21891_s0 + $0x230] sm:$0xff]  ;;  %v97_v9 = vld [vmem:[%s21891_s0 + $0x238] sm:$0xff]  ;;  %v98_v10 = vld [vmem:[%s21891_s0 + $0x240] sm:$0xff] }
  0x1a   :  { %15243 = vmatmul.mubr.msk.f32.gmra.mxu0 %vm291_vm0, %v37_v13  ;;  %v99_v11 = vld [vmem:[%s21891_s0 + $0x248] sm:$0xff]  ;;  %v100_v12 = vld [vmem:[%s21891_s0 + $0x250] sm:$0xff]  ;;  %v101_v13 = vld [vmem:[%s21891_s0 + $0x258] sm:$0xff] }
  0x1b   :  { %15245 = vmatprep.mubr.msk.f32.mxu0 %vm291_vm0, %v38_v14  ;;  %v102_v14 = vld [vmem:[%s21891_s0 + $0x260] sm:$0xff] }
  0x1e   :  { %15246 = vmatmul.mubr.msk.f32.gmra.mxu0 %vm291_vm0, %v39_v15  ;;  %v103_v15 = vld [vmem:[%s21891_s0 + $0x268] sm:$0xff] }
  0x1f   :  { %15248 = vmatprep.mubr.msk.f32.mxu0 %vm291_vm0, %v40_v16  ;;  %v104_v16 = vld [vmem:[%s21891_s0 + $0x270] sm:$0xff] }
  0x22   :  { %15249 = vmatmul.mubr.msk.f32.gmra.mxu0 %vm291_vm0, %v41_v17  ;;  %v105_v17 = vld [vmem:[%s21891_s0 + $0x278] sm:$0xff] }
  0x23   :  { %15251 = vmatprep.mubr.msk.f32.mxu0 %vm291_vm0, %v42_v18  ;;  %v106_v18 = vld [vmem:[%s21891_s0 + $0x280] sm:$0xff] }
  0x26   :  { %15252 = vmatmul.mubr.msk.f32.gmra.mxu0 %vm291_vm0, %v43_v19  ;;  %v107_v19 = vld [vmem:[%s21891_s0 + $0x288] sm:$0xff] }
  0x27   :  { %15254 = vmatprep.mubr.msk.f32.mxu0 %vm291_vm0, %v44_v20  ;;  %v108_v20 = vld [vmem:[%s21891_s0 + $0x290] sm:$0xff] }
  0x2a   :  { %15255 = vmatmul.mubr.msk.f32.gmra.mxu0 %vm291_vm0, %v45_v21  ;;  %v109_v21 = vld [vmem:[%s21891_s0 + $0x298] sm:$0xff] }
  0x2b   :  { %15257 = vmatprep.mubr.msk.f32.mxu0 %vm291_vm0, %v46_v22  ;;  %v110_v22 = vld [vmem:[%s21891_s0 + $0x2a0] sm:$0xff] }
  0x2e   :  { %15258 = vmatmul.mubr.msk.f32.gmra.mxu0 %vm291_vm0, %v47_v23  ;;  %v111_v23 = vld [vmem:[%s21891_s0 + $0x2a8] sm:$0xff] }
  0x2f   :  { %15260 = vmatprep.mubr.msk.f32.mxu0 %vm291_vm0, %v48_v24  ;;  %v112_v24 = vld [vmem:[%s21891_s0 + $0x2b0] sm:$0xff] }
  0x32   :  { %15261 = vmatmul.mubr.msk.f32.gmra.mxu0 %vm291_vm0, %v49_v25  ;;  %v113_v25 = vld [vmem:[%s21891_s0 + $0x2b8] sm:$0xff] }
  0x33   :  { %15263 = vmatprep.mubr.msk.f32.mxu0 %vm291_vm0, %v50_v26  ;;  %v114_v26 = vld [vmem:[%s21891_s0 + $0x2c0] sm:$0xff] }
  0x36   :  { %15264 = vmatmul.mubr.msk.f32.gmra.mxu0 %vm291_vm0, %v51_v27  ;;  %v115_v27 = vld [vmem:[%s21891_s0 + $0x2c8] sm:$0xff] }
  0x37   :  { %15266 = vmatprep.mubr.msk.f32.mxu0 %vm291_vm0, %v52_v28  ;;  %v116_v28 = vld [vmem:[%s21891_s0 + $0x2d0] sm:$0xff] }
  0x3a   :  { %15267 = vmatmul.mubr.msk.f32.gmra.mxu0 %vm291_vm0, %v53_v29  ;;  %v117_v29 = vld [vmem:[%s21891_s0 + $0x2d8] sm:$0xff] }
  0x3b   :  { %15269 = vmatprep.mubr.msk.f32.mxu0 %vm291_vm0, %v54_v30  ;;  %v118_v30 = vld [vmem:[%s21891_s0 + $0x2e0] sm:$0xff] }
  0x3e   :  { %15270 = vmatmul.mubr.msk.f32.gmra.mxu0 %vm291_vm0, %v55_v31  ;;  %v119_v31 = vld [vmem:[%s21891_s0 + $0x2e8] sm:$0xff] }
  0x3f   :  { %15272 = vmatprep.mubr.msk.f32.mxu0 %vm291_vm0, %v56_v32  ;;  %v120_v32 = vld [vmem:[%s21891_s0 + $0x2f0] sm:$0xff] }
  0x42   :  { %15273 = vmatmul.mubr.msk.f32.gmra.mxu0 %vm291_vm0, %v57_v33  ;;  %v121_v33 = vld [vmem:[%s21891_s0 + $0x2f8] sm:$0xff] }
  0x43   :  { %15275 = vmatprep.mubr.msk.f32.mxu0 %vm291_vm0, %v58_v34  ;;  %v122_v34 = vld [vmem:[%s21891_s0 + $0x300] sm:$0xff] }
  0x46   :  { %15276 = vmatmul.mubr.msk.f32.gmra.mxu0 %vm291_vm0, %v59_v35  ;;  %v123_v35 = vld [vmem:[%s21891_s0 + $0x308] sm:$0xff] }
  0x47   :  { %15278 = vmatprep.mubr.msk.f32.mxu0 %vm291_vm0, %v60_v36  ;;  %v17231_v36 = vld [vmem:[%s21892_s2] ss:$0 sm:$0xff] }
  0x4a   :  { %15279 = vmatmul.mubr.msk.f32.gmra.mxu0 %vm291_vm0, %v61_v37  ;;  %v124_v37 = vld [vmem:[%s21891_s0 + $0x310] sm:$0xff] }
  0x4b   :  { %15281 = vmatprep.mubr.msk.f32.mxu0 %vm291_vm0, %v62_v38 }
  0x4e   :  { %15282 = vmatmul.mubr.msk.f32.gmra.mxu0 %vm291_vm0, %v63_v39 }
  0x4f   :  { %15284 = vmatprep.mubr.msk.f32.mxu0 %vm291_vm0, %v64_v40  ;;  %v125_v40 = vld [vmem:[%s21891_s0 + $0x318] sm:$0xff] }
  0x52   :  { %15285 = vmatmul.mubr.msk.f32.gmra.mxu0 %vm291_vm0, %v65_v41 }
  0x53   :  { %15287 = vmatprep.mubr.msk.f32.mxu0 %vm291_vm0, %v66_v42  ;;  %v126_v42 = vld [vmem:[%s21891_s0 + $0x320] sm:$0xff] }
  0x56   :  { %15288 = vmatmul.mubr.msk.f32.gmra.mxu0 %vm291_vm0, %v67_v43 }
  0x57   :  { %15290 = vmatprep.mubr.msk.f32.mxu0 %vm291_vm0, %v68_v44 }
  0x5a   :  { %15291 = vmatmul.mubr.msk.f32.gmra.mxu0 %vm291_vm0, %v69_v45 }
  0x5b   :  { %15293 = vmatprep.mubr.msk.f32.mxu0 %vm291_vm0, %v70_v46 }
  0x5e   :  { %15294 = vmatmul.mubr.msk.f32.gmra.mxu0 %vm291_vm0, %v71_v47 }
  0x5f   :  { %15296 = vmatprep.mubr.msk.f32.mxu0 %vm291_vm0, %v72_v48 }
  0x62   :  { %15297 = vmatmul.mubr.msk.f32.gmra.mxu0 %vm291_vm0, %v73_v49  ;;  %v127_v49 = vld [vmem:[%s21891_s0 + $0x328] sm:$0xff] }
  0x63   :  { %15299 = vmatprep.mubr.msk.f32.mxu0 %vm291_vm0, %v74_v50 }
  0x66   :  { %15300 = vmatmul.mubr.msk.f32.gmra.mxu0 %vm291_vm0, %v75_v51  ;;  %v128_v51 = vld [vmem:[%s21891_s0 + $0x330] sm:$0xff] }
  0x67   :  { %15302 = vmatprep.mubr.msk.f32.mxu0 %vm291_vm0, %v76_v52 }
  0x6a   :  { %15303 = vmatmul.mubr.msk.f32.gmra.mxu0 %vm291_vm0, %v77_v53 }
  0x6b   :  { %15305 = vmatprep.mubr.msk.f32.mxu0 %vm291_vm0, %v78_v54 }
  0x6e   :  { %15306 = vmatmul.mubr.msk.f32.gmra.mxu0 %vm291_vm0, %v79_v55 }
  0x6f   :  { %15308 = vmatprep.mubr.msk.f32.mxu0 %vm291_vm0, %v80_v56  ;;  %v13546_v56 = vld [vmem:[%s21893_s3 + $0x38] sm:$0xff] }
  0x70   :  { %15611 = vmatprep.subr.mxu1 %v13546_v56 }
  0x71   :  { %15612 = vmatpush3.msra.mxu1 %v13546_v56  ;;  %v142_v56 = vld [vmem:[%s21891_s0 + $0x3a0] sm:$0xff] }
  0x72   :  { %15309 = vmatmul.mubr.msk.f32.gmra.mxu0 %vm291_vm0, %v81_v57 }
  0x73   :  { %15311 = vmatprep.mubr.msk.f32.mxu0 %vm291_vm0, %v82_v58 }
  0x76   :  { %15312 = vmatmul.mubr.msk.f32.gmra.mxu0 %vm291_vm0, %v83_v59 }
  0x77   :  { %15314 = vmatprep.mubr.msk.f32.mxu0 %vm291_vm0, %v84_v60  ;;  %v129_v60 = vld [vmem:[%s21891_s0 + $0x338] sm:$0xff] }
  0x7a   :  { %15315 = vmatmul.mubr.msk.f32.gmra.mxu0 %vm291_vm0, %v85_v61 }
  0x7b   :  { %15317 = vmatprep.mubr.msk.f32.mxu0 %vm291_vm0, %v86_v62  ;;  %v130_v62 = vld [vmem:[%s21891_s0 + $0x340] sm:$0xff] }
  0x7e   :  { %15318 = vmatmul.mubr.msk.f32.gmra.mxu0 %vm291_vm0, %v87_v63  ;;  %v13545_v63 = vld [vmem:[%s21893_s3 + $0x30] sm:$0xff] }
  0x7f   :  { %15320 = vmatprep.mubr.msk.f32.mxu0 %vm291_vm0, %v88_v0  ;;  %15613 = vmatprep.subr.mxu1 %v13545_v63 }
  0x80   :  { %15614 = vmatpush3.msra.mxu1 %v13545_v63 }
  0x82   :  { %15321 = vmatmul.mubr.msk.f32.gmra.mxu0 %vm291_vm0, %v89_v1 }
  0x83   :  { %15323 = vmatprep.mubr.msk.f32.mxu0 %vm291_vm0, %v90_v2 }
  0x86   :  { %15324 = vmatmul.mubr.msk.f32.gmra.mxu0 %vm291_vm0, %v91_v3 }
  0x87   :  { %15326 = vmatprep.mubr.msk.f32.mxu0 %vm291_vm0, %v92_v4  ;;  %v13544_v4 = vld [vmem:[%s21893_s3 + $0x28] sm:$0xff] }
  0x88   :  { %15615 = vmatprep.subr.mxu1 %v13544_v4 }
  0x89   :  { %15616 = vmatpush3.msra.mxu1 %v13544_v4 }
  0x8a   :  { %15327 = vmatmul.mubr.msk.f32.gmra.mxu0 %vm291_vm0, %v93_v5 }
  0x8b   :  { %15329 = vmatprep.mubr.msk.f32.mxu0 %vm291_vm0, %v94_v6 }
  0x8e   :  { %15330 = vmatmul.mubr.msk.f32.gmra.mxu0 %vm291_vm0, %v95_v7  ;;  %v131_v7 = vld [vmem:[%s21891_s0 + $0x348] sm:$0xff] }
  0x8f   :  { %15332 = vmatprep.mubr.msk.f32.mxu0 %vm291_vm0, %v96_v8 }
  0x92   :  { %15333 = vmatmul.mubr.msk.f32.gmra.mxu0 %vm291_vm0, %v97_v9  ;;  %v132_v9 = vld [vmem:[%s21891_s0 + $0x350] sm:$0xff] }
  0x93   :  { %15335 = vmatprep.mubr.msk.f32.mxu0 %vm291_vm0, %v98_v10  ;;  %v13543_v10 = vld [vmem:[%s21893_s3 + $0x20] sm:$0xff] }
  0x94   :  { %15617 = vmatprep.subr.mxu1 %v13543_v10 }
  0x95   :  { %15618 = vmatpush3.msra.mxu1 %v13543_v10  ;;  %v145_v10 = vld [vmem:[%s21891_s0 + $0x3b8] sm:$0xff] }
  0x96   :  { %15336 = vmatmul.mubr.msk.f32.gmra.mxu0 %vm291_vm0, %v99_v11 }
  0x97   :  { %15338 = vmatprep.mubr.msk.f32.mxu0 %vm291_vm0, %v100_v12 }
  0x9a   :  { %15339 = vmatmul.mubr.msk.f32.gmra.mxu0 %vm291_vm0, %v101_v13 }
  0x9b   :  { %15341 = vmatprep.mubr.msk.f32.mxu0 %vm291_vm0, %v102_v14 }
  0x9e   :  { %15342 = vmatmul.mubr.msk.f32.gmra.mxu0 %vm291_vm0, %v103_v15 }
  0x9f   :  { %15344 = vmatprep.mubr.msk.f32.mxu0 %vm291_vm0, %v104_v16  ;;  %v133_v16 = vld [vmem:[%s21891_s0 + $0x358] sm:$0xff] }
  0xa2   :  { %15345 = vmatmul.mubr.msk.f32.gmra.mxu0 %vm291_vm0, %v105_v17 }
  0xa3   :  { %15347 = vmatprep.mubr.msk.f32.mxu0 %vm291_vm0, %v106_v18  ;;  %v134_v18 = vld [vmem:[%s21891_s0 + $0x360] sm:$0xff] }
  0xa6   :  { %15348 = vmatmul.mubr.msk.f32.gmra.mxu0 %vm291_vm0, %v107_v19 }
  0xa7   :  { %15350 = vmatprep.mubr.msk.f32.mxu0 %vm291_vm0, %v108_v20 }
  0xaa   :  { %15351 = vmatmul.mubr.msk.f32.gmra.mxu0 %vm291_vm0, %v109_v21 }
  0xab   :  { %15353 = vmatprep.mubr.msk.f32.mxu0 %vm291_vm0, %v110_v22 }
  0xae   :  { %15354 = vmatmul.mubr.msk.f32.gmra.mxu0 %vm291_vm0, %v111_v23 }
  0xaf   :  { %15356 = vmatprep.mubr.msk.f32.mxu0 %vm291_vm0, %v112_v24 }
  0xb2   :  { %15357 = vmatmul.mubr.msk.f32.gmra.mxu0 %vm291_vm0, %v113_v25 }
  0xb3   :  { %15359 = vmatprep.mubr.msk.f32.mxu0 %vm291_vm0, %v114_v26  ;;  %v135_v26 = vld [vmem:[%s21891_s0 + $0x368] sm:$0xff] }
  0xb6   :  { %15360 = vmatmul.mubr.msk.f32.gmra.mxu0 %vm291_vm0, %v115_v27 }
  0xb7   :  { %15362 = vmatprep.mubr.msk.f32.mxu0 %vm291_vm0, %v116_v28  ;;  %v136_v28 = vld [vmem:[%s21891_s0 + $0x370] sm:$0xff] }
  0xba   :  { %15363 = vmatmul.mubr.msk.f32.gmra.mxu0 %vm291_vm0, %v117_v29 }
  0xbb   :  { %15365 = vmatprep.mubr.msk.f32.mxu0 %vm291_vm0, %v118_v30 }
  0xbe   :  { %15366 = vmatmul.mubr.msk.f32.gmra.mxu0 %vm291_vm0, %v119_v31 }
  0xbf   :  { %15368 = vmatprep.mubr.msk.f32.mxu0 %vm291_vm0, %v120_v32 }
  0xc2   :  { %15369 = vmatmul.mubr.msk.f32.gmra.mxu0 %vm291_vm0, %v121_v33 }
  0xc3   :  { %15371 = vmatprep.mubr.msk.f32.mxu0 %vm291_vm0, %v122_v34 }
  0xc6   :  { %v15229_v38 = vpop.f32.mrf.mxu0  ;;  %15372 = vmatmul.mubr.msk.f32.gmra.mxu0 %vm291_vm0, %v123_v35 }
  0xc7   :  { %v1132_v39 = vadd.f32 %v15229_v38, %v17231_v36  ;;  %15374 = vmatprep.mubr.msk.f32.mxu0 %vm291_vm0, %v124_v37  ;;  %v137_v37 = vld [vmem:[%s21891_s0 + $0x378] sm:$0xff] }
  0xc8   :  { %v1126_v41 = vpop.f32.mrf.mxu0 }
  0xc9   :  { %vm2406_vm1 = vcmp.gt.f32.partialorder %v1132_v39, 0.0  ;;  %v2662_v43 = vmul.f32 0.01, %v1132_v39  ;;  %v1127_v44 = vadd.f32 %v17231_v36, %v1126_v41 }
  0xca   :  { %v15232_v45 = vpop.f32.mrf.mxu0  ;;  %15375 = vmatmul.mubr.msk.f32.gmra.mxu0 %vm291_vm0, %v125_v40 }
  0xcb   :  { %v2918_v46 = vsel %vm2406_vm1, %v1132_v39, %v2662_v43  ;;  %vm2405_vm3 = vcmp.gt.f32.partialorder %v1127_v44, 0.0  ;;  %v2661_v47 = vmul.f32 0.01, %v1127_v44  ;;  %v1142_v48 = vadd.f32 %v15232_v45, %v17231_v36  ;;  %15377 = vmatprep.mubr.msk.f32.mxu0 %vm291_vm0, %v126_v42  ;;  %v138_v39 = vld [vmem:[%s21891_s0 + $0x380] sm:$0xff] }
  0xcc   :  { %3175 = vst.msk [vmem:[#allocation2 + $0x8] sm:$0xff] %vm3173_vm2, %v2918_v46  ;;  %v1136_v50 = vpop.f32.mrf.mxu0  ;;  %v139_v46 = vld [vmem:[%s21891_s0 + $0x388] sm:$0xff] }
  0xcd   :  { %v2917_v52 = vsel %vm2405_vm3, %v1127_v44, %v2661_v47  ;;  %vm2408_vm4 = vcmp.gt.f32.partialorder %v1142_v48, 0.0  ;;  %v2664_v53 = vmul.f32 0.01, %v1142_v48  ;;  %v1137_v54 = vadd.f32 %v17231_v36, %v1136_v50 }
  0xce   :  { %3174 = vst.msk [vmem:[#allocation2] sm:$0xff] %vm3173_vm2, %v2917_v52  ;;  %v15235_v55 = vpop.f32.mrf.mxu0  ;;  %15378 = vmatmul.mubr.msk.f32.gmra.mxu0 %vm291_vm0, %v127_v49 }
  0xcf   :  { %v2920_v57 = vsel %vm2408_vm4, %v1142_v48, %v2664_v53  ;;  %vm2407_vm5 = vcmp.gt.f32.partialorder %v1137_v54, 0.0  ;;  %v2663_v58 = vmul.f32 0.01, %v1137_v54  ;;  %v1152_v59 = vadd.f32 %v15235_v55, %v17231_v36  ;;  %15380 = vmatprep.mubr.msk.f32.mxu0 %vm291_vm0, %v128_v51  ;;  %v140_v48 = vld [vmem:[%s21891_s0 + $0x390] sm:$0xff] }
  0xd0   :  { %3177 = vst.msk [vmem:[#allocation2 + $0x18] sm:$0xff] %vm3173_vm2, %v2920_v57  ;;  %v1146_v61 = vpop.f32.mrf.mxu0 }
  0xd1   :  { %v2919_v0 = vsel %vm2407_vm5, %v1137_v54, %v2663_v58  ;;  %vm2410_vm6 = vcmp.gt.f32.partialorder %v1152_v59, 0.0  ;;  %v2666_v1 = vmul.f32 0.01, %v1152_v59  ;;  %v1147_v2 = vadd.f32 %v17231_v36, %v1146_v61  ;;  %v141_v54 = vld [vmem:[%s21891_s0 + $0x398] sm:$0xff] }
  0xd2   :  { %3176 = vst.msk [vmem:[#allocation2 + $0x10] sm:$0xff] %vm3173_vm2, %v2919_v0  ;;  %v15238_v3 = vpop.f32.mrf.mxu0  ;;  %15381 = vmatmul.mubr.msk.f32.gmra.mxu0 %vm291_vm0, %v129_v60  ;;  %v143_v0 = vld [vmem:[%s21891_s0 + $0x3a8] sm:$0xff] }
  0xd3   :  { %v2922_v5 = vsel %vm2410_vm6, %v1152_v59, %v2666_v1  ;;  %vm2409_vm7 = vcmp.gt.f32.partialorder %v1147_v2, 0.0  ;;  %v2665_v6 = vmul.f32 0.01, %v1147_v2  ;;  %15383 = vmatprep.mubr.msk.f32.mxu0 %vm291_vm0, %v130_v62 }
  0xd4   :  { %3179 = vst.msk [vmem:[#allocation2 + $0x28] sm:$0xff] %vm3173_vm2, %v2922_v5  ;;  %v1156_v8 = vpop.f32.mrf.mxu0 }
  0xd5   :  { %v2921_v11 = vsel %vm2409_vm7, %v1147_v2, %v2665_v6  ;;  %v1157_v12 = vadd.f32 %v17231_v36, %v1156_v8  ;;  %v144_v2 = vld [vmem:[%s21891_s0 + $0x3b0] sm:$0xff] }
  0xd6   :  { %3178 = vst.msk [vmem:[#allocation2 + $0x20] sm:$0xff] %vm3173_vm2, %v2921_v11  ;;  %v15241_v13 = vpop.f32.mrf.mxu0  ;;  %15384 = vmatmul.mubr.msk.f32.gmra.mxu0 %vm291_vm0, %v131_v7 }
  0xd7   :  { %vm2411_vm8 = vcmp.gt.f32.partialorder %v1157_v12, 0.0  ;;  %v2667_v14 = vmul.f32 0.01, %v1157_v12  ;;  %v1172_v15 = vadd.f32 %v15241_v13, %v17231_v36  ;;  %15386 = vmatprep.mubr.msk.f32.mxu0 %vm291_vm0, %v132_v9  ;;  %v17375_v13 = vld [vmem:[%s21893_s3 + $0x18] sm:$0xff] }
  0xd8   :  { %v1166_v17 = vpop.f32.mrf.mxu0  ;;  %15673 = vmatprep.subr.mxu1 %v17375_v13 }
  0xd9   :  { %v2923_v19 = vsel %vm2411_vm8, %v1157_v12, %v2667_v14  ;;  %vm2414_vm9 = vcmp.gt.f32.partialorder %v1172_v15, 0.0  ;;  %v2670_v20 = vmul.f32 0.01, %v1172_v15  ;;  %v1167_v21 = vadd.f32 %v17231_v36, %v1166_v17  ;;  %v146_v12 = vld [vmem:[%s21891_s0 + $0x3c0] sm:$0xff] }
  0xda   :  { %3180 = vst.msk [vmem:[#allocation2 + $0x30] sm:$0xff] %vm3173_vm2, %v2923_v19  ;;  %v15244_v22 = vpop.f32.mrf.mxu0  ;;  %15387 = vmatmul.mubr.msk.f32.gmra.mxu0 %vm291_vm0, %v133_v16 }
  0xdb   :  { %v2926_v23 = vsel %vm2414_vm9, %v1172_v15, %v2670_v20  ;;  %vm2413_vm10 = vcmp.gt.f32.partialorder %v1167_v21, 0.0  ;;  %v2669_v24 = vmul.f32 0.01, %v1167_v21  ;;  %v1182_v25 = vadd.f32 %v15244_v22, %v17231_v36  ;;  %15389 = vmatprep.mubr.msk.f32.mxu0 %vm291_vm0, %v134_v18  ;;  %v147_v20 = vld [vmem:[%s21891_s0 + $0x3c8] sm:$0xff]  ;;  %v148_v22 = vld [vmem:[%s21891_s0 + $0x3d0] sm:$0xff] }
  0xdc   :  { %3183 = vst.msk [vmem:[#allocation2 + $0x48] sm:$0xff] %vm3173_vm2, %v2926_v23  ;;  %v1176_v27 = vpop.f32.mrf.mxu0 }
  0xdd   :  { %v2925_v29 = vsel %vm2413_vm10, %v1167_v21, %v2669_v24  ;;  %vm2416_vm11 = vcmp.gt.f32.partialorder %v1182_v25, 0.0  ;;  %v2672_v30 = vmul.f32 0.01, %v1182_v25  ;;  %v1177_v31 = vadd.f32 %v17231_v36, %v1176_v27 }
  0xde   :  { %3182 = vst.msk [vmem:[#allocation2 + $0x40] sm:$0xff] %vm3173_vm2, %v2925_v29  ;;  %v15247_v32 = vpop.f32.mrf.mxu0  ;;  %15390 = vmatmul.mubr.msk.f32.gmra.mxu0 %vm291_vm0, %v135_v26 }
  0xdf   :  { %v2928_v33 = vsel %vm2416_vm11, %v1182_v25, %v2672_v30  ;;  %vm2415_vm12 = vcmp.gt.f32.partialorder %v1177_v31, 0.0  ;;  %v2671_v34 = vmul.f32 0.01, %v1177_v31  ;;  %v1192_v35 = vadd.f32 %v15247_v32, %v17231_v36  ;;  %15392 = vmatprep.mubr.msk.f32.mxu0 %vm291_vm0, %v136_v28  ;;  %v149_v28 = vld [vmem:[%s21891_s0 + $0x3d8] sm:$0xff]  ;;  %v150_v30 = vld [vmem:[%s21891_s0 + $0x3e0] sm:$0xff] }
  0xe0   :  { %3185 = vst.msk [vmem:[#allocation2 + $0x58] sm:$0xff] %vm3173_vm2, %v2928_v33  ;;  %v1186_v38 = vpop.f32.mrf.mxu0 }
  0xe1   :  { %v2927_v40 = vsel %vm2415_vm12, %v1177_v31, %v2671_v34  ;;  %vm2418_vm13 = vcmp.gt.f32.partialorder %v1192_v35, 0.0  ;;  %v2674_v41 = vmul.f32 0.01, %v1192_v35  ;;  %v1187_v42 = vadd.f32 %v17231_v36, %v1186_v38 }
  0xe2   :  { %3184 = vst.msk [vmem:[#allocation2 + $0x50] sm:$0xff] %vm3173_vm2, %v2927_v40  ;;  %v15250_v43 = vpop.f32.mrf.mxu0  ;;  %15393 = vmatmul.mubr.msk.f32.gmra.mxu0 %vm291_vm0, %v137_v37 }
  0xe3   :  { %v2930_v44 = vsel %vm2418_vm13, %v1192_v35, %v2674_v41  ;;  %vm2417_vm14 = vcmp.gt.f32.partialorder %v1187_v42, 0.0  ;;  %v2673_v45 = vmul.f32 0.01, %v1187_v42  ;;  %15395 = vmatprep.mubr.msk.f32.mxu0 %vm291_vm0, %v138_v39  ;;  %v151_v39 = vld [vmem:[%s21891_s0 + $0x3e8] sm:$0xff]  ;;  %v152_v41 = vld [vmem:[%s21891_s0 + $0x3f0] sm:$0xff] }
  0xe4   :  { %3187 = vst.msk [vmem:[#allocation2 + $0x68] sm:$0xff] %vm3173_vm2, %v2930_v44  ;;  %v1196_v47 = vpop.f32.mrf.mxu0 }
  0xe5   :  { %v2929_v49 = vsel %vm2417_vm14, %v1187_v42, %v2673_v45  ;;  %v1197_v50 = vadd.f32 %v17231_v36, %v1196_v47 }
  0xe6   :  { %3186 = vst.msk [vmem:[#allocation2 + $0x60] sm:$0xff] %vm3173_vm2, %v2929_v49  ;;  %v15253_v51 = vpop.f32.mrf.mxu0  ;;  %15396 = vmatmul.mubr.msk.f32.gmra.mxu0 %vm291_vm0, %v139_v46  ;;  %v153_v49 = vld [vmem:[%s21891_s0 + $0x3f8] sm:$0xff] }
  0xe7   :  { %vm2419_vm15 = vcmp.gt.f32.partialorder %v1197_v50, 0.0  ;;  %v2675_v52 = vmul.f32 0.01, %v1197_v50  ;;  %v1212_v53 = vadd.f32 %v15253_v51, %v17231_v36  ;;  %15398 = vmatprep.mubr.msk.f32.mxu0 %vm291_vm0, %v140_v48  ;;  %v154_v51 = vld [vmem:[%s21891_s0 + $0x400] sm:$0xff] }
  0xe8   :  { %v1206_v55 = vpop.f32.mrf.mxu0 }
  0xe9   :  { %v2931_v57 = vsel %vm2419_vm15, %v1197_v50, %v2675_v52  ;;  %vm2422_vm1 = vcmp.gt.f32.partialorder %v1212_v53, 0.0  ;;  %v2678_v58 = vmul.f32 0.01, %v1212_v53  ;;  %v1207_v59 = vadd.f32 %v17231_v36, %v1206_v55 }
  0xea   :  { %3188 = vst.msk [vmem:[#allocation2 + $0x70] sm:$0xff] %vm3173_vm2, %v2931_v57  ;;  %v15256_v60 = vpop.f32.mrf.mxu0  ;;  %15399 = vmatmul.mubr.msk.f32.gmra.mxu0 %vm291_vm0, %v141_v54 }
  0xeb   :  { %v2934_v61 = vsel %vm2422_vm1, %v1212_v53, %v2678_v58  ;;  %vm2421_vm3 = vcmp.gt.f32.partialorder %v1207_v59, 0.0  ;;  %v2677_v62 = vmul.f32 0.01, %v1207_v59  ;;  %v1222_v63 = vadd.f32 %v15256_v60, %v17231_v36  ;;  %15401 = vmatprep.mubr.msk.f32.mxu0 %vm291_vm0, %v142_v56  ;;  %v155_v58 = vld [vmem:[%s21891_s0 + $0x408] sm:$0xff]  ;;  %v156_v60 = vld [vmem:[%s21891_s0 + $0x410] sm:$0xff] }
  0xec   :  { %3191 = vst.msk [vmem:[#allocation2 + $0x88] sm:$0xff] %vm3173_vm2, %v2934_v61  ;;  %v1216_v1 = vpop.f32.mrf.mxu0 }
  0xed   :  { %v2933_v3 = vsel %vm2421_vm3, %v1207_v59, %v2677_v62  ;;  %vm2424_vm4 = vcmp.gt.f32.partialorder %v1222_v63, 0.0  ;;  %v2680_v4 = vmul.f32 0.01, %v1222_v63  ;;  %v1217_v5 = vadd.f32 %v17231_v36, %v1216_v1 }
  0xee   :  { %3190 = vst.msk [vmem:[#allocation2 + $0x80] sm:$0xff] %vm3173_vm2, %v2933_v3  ;;  %v15259_v6 = vpop.f32.mrf.mxu0  ;;  %15402 = vmatmul.mubr.msk.f32.gmra.mxu0 %vm291_vm0, %v143_v0 }
  0xef   :  { %v2936_v7 = vsel %vm2424_vm4, %v1222_v63, %v2680_v4  ;;  %vm2423_vm5 = vcmp.gt.f32.partialorder %v1217_v5, 0.0  ;;  %v2679_v8 = vmul.f32 0.01, %v1217_v5  ;;  %v1232_v9 = vadd.f32 %v15259_v6, %v17231_v36  ;;  %15404 = vmatprep.mubr.msk.f32.mxu0 %vm291_vm0, %v144_v2  ;;  %v157_v2 = vld [vmem:[%s21891_s0 + $0x418] sm:$0xff]  ;;  %v158_v4 = vld [vmem:[%s21891_s0 + $0x420] sm:$0xff] }
  0xf0   :  { %3193 = vst.msk [vmem:[#allocation2 + $0x98] sm:$0xff] %vm3173_vm2, %v2936_v7  ;;  %v1226_v11 = vpop.f32.mrf.mxu0 }
  0xf1   :  { %v2935_v14 = vsel %vm2423_vm5, %v1217_v5, %v2679_v8  ;;  %vm2426_vm6 = vcmp.gt.f32.partialorder %v1232_v9, 0.0  ;;  %v2682_v15 = vmul.f32 0.01, %v1232_v9  ;;  %v1227_v16 = vadd.f32 %v17231_v36, %v1226_v11 }
  0xf2   :  { %3192 = vst.msk [vmem:[#allocation2 + $0x90] sm:$0xff] %vm3173_vm2, %v2935_v14  ;;  %v15262_v17 = vpop.f32.mrf.mxu0  ;;  %15405 = vmatmul.mubr.msk.f32.gmra.mxu0 %vm291_vm0, %v145_v10 }
  0xf3   :  { %v2938_v18 = vsel %vm2426_vm6, %v1232_v9, %v2682_v15  ;;  %vm2425_vm7 = vcmp.gt.f32.partialorder %v1227_v16, 0.0  ;;  %v2681_v19 = vmul.f32 0.01, %v1227_v16  ;;  %15407 = vmatprep.mubr.msk.f32.mxu0 %vm291_vm0, %v146_v12  ;;  %v159_v12 = vld [vmem:[%s21891_s0 + $0x428] sm:$0xff]  ;;  %v160_v15 = vld [vmem:[%s21891_s0 + $0x430] sm:$0xff] }
  0xf4   :  { %3195 = vst.msk [vmem:[#allocation2 + $0xa8] sm:$0xff] %vm3173_vm2, %v2938_v18  ;;  %v1236_v21 = vpop.f32.mrf.mxu0 }
  0xf5   :  { %v2937_v23 = vsel %vm2425_vm7, %v1227_v16, %v2681_v19  ;;  %v1237_v24 = vadd.f32 %v17231_v36, %v1236_v21 }
  0xf6   :  { %3194 = vst.msk [vmem:[#allocation2 + $0xa0] sm:$0xff] %vm3173_vm2, %v2937_v23  ;;  %v15265_v25 = vpop.f32.mrf.mxu0  ;;  %15408 = vmatmul.mubr.msk.f32.gmra.mxu0 %vm291_vm0, %v147_v20  ;;  %v161_v23 = vld [vmem:[%s21891_s0 + $0x438] sm:$0xff] }
  0xf7   :  { %vm2427_vm8 = vcmp.gt.f32.partialorder %v1237_v24, 0.0  ;;  %v2683_v26 = vmul.f32 0.01, %v1237_v24  ;;  %v1252_v27 = vadd.f32 %v15265_v25, %v17231_v36  ;;  %15410 = vmatprep.mubr.msk.f32.mxu0 %vm291_vm0, %v148_v22  ;;  %v162_v25 = vld [vmem:[%s21891_s0 + $0x440] sm:$0xff] }
  0xf8   :  { %v1246_v29 = vpop.f32.mrf.mxu0 }
  0xf9   :  { %v2939_v31 = vsel %vm2427_vm8, %v1237_v24, %v2683_v26  ;;  %vm2430_vm9 = vcmp.gt.f32.partialorder %v1252_v27, 0.0  ;;  %v2686_v32 = vmul.f32 0.01, %v1252_v27  ;;  %v1247_v33 = vadd.f32 %v17231_v36, %v1246_v29 }
  0xfa   :  { %3196 = vst.msk [vmem:[#allocation2 + $0xb0] sm:$0xff] %vm3173_vm2, %v2939_v31  ;;  %v15268_v34 = vpop.f32.mrf.mxu0  ;;  %15411 = vmatmul.mubr.msk.f32.gmra.mxu0 %vm291_vm0, %v149_v28 }
  0xfb   :  { %v2942_v35 = vsel %vm2430_vm9, %v1252_v27, %v2686_v32  ;;  %vm2429_vm10 = vcmp.gt.f32.partialorder %v1247_v33, 0.0  ;;  %v2685_v37 = vmul.f32 0.01, %v1247_v33  ;;  %v1262_v38 = vadd.f32 %v15268_v34, %v17231_v36  ;;  %15413 = vmatprep.mubr.msk.f32.mxu0 %vm291_vm0, %v150_v30  ;;  %v163_v32 = vld [vmem:[%s21891_s0 + $0x448] sm:$0xff]  ;;  %v164_v34 = vld [vmem:[%s21891_s0 + $0x450] sm:$0xff] }
  0xfc   :  { %3199 = vst.msk [vmem:[#allocation2 + $0xc8] sm:$0xff] %vm3173_vm2, %v2942_v35  ;;  %v1256_v40 = vpop.f32.mrf.mxu0 }
  0xfd   :  { %v2941_v42 = vsel %vm2429_vm10, %v1247_v33, %v2685_v37  ;;  %vm2432_vm11 = vcmp.gt.f32.partialorder %v1262_v38, 0.0  ;;  %v2688_v43 = vmul.f32 0.01, %v1262_v38  ;;  %v1257_v44 = vadd.f32 %v17231_v36, %v1256_v40 }
  0xfe   :  { %3198 = vst.msk [vmem:[#allocation2 + $0xc0] sm:$0xff] %vm3173_vm2, %v2941_v42  ;;  %v15271_v45 = vpop.f32.mrf.mxu0  ;;  %15414 = vmatmul.mubr.msk.f32.gmra.mxu0 %vm291_vm0, %v151_v39 }
  0xff   :  { %v2944_v46 = vsel %vm2432_vm11, %v1262_v38, %v2688_v43  ;;  %vm2431_vm12 = vcmp.gt.f32.partialorder %v1257_v44, 0.0  ;;  %v2687_v47 = vmul.f32 0.01, %v1257_v44  ;;  %v1272_v48 = vadd.f32 %v15271_v45, %v17231_v36  ;;  %15416 = vmatprep.mubr.msk.f32.mxu0 %vm291_vm0, %v152_v41  ;;  %v165_v41 = vld [vmem:[%s21891_s0 + $0x458] sm:$0xff]  ;;  %v166_v43 = vld [vmem:[%s21891_s0 + $0x460] sm:$0xff] }
 0x100   :  { %3201 = vst.msk [vmem:[#allocation2 + $0xd8] sm:$0xff] %vm3173_vm2, %v2944_v46  ;;  %v1266_v50 = vpop.f32.mrf.mxu0 }
 0x101   :  { %v2943_v52 = vsel %vm2431_vm12, %v1257_v44, %v2687_v47  ;;  %vm2434_vm13 = vcmp.gt.f32.partialorder %v1272_v48, 0.0  ;;  %v2690_v53 = vmul.f32 0.01, %v1272_v48  ;;  %v1267_v54 = vadd.f32 %v17231_v36, %v1266_v50 }
 0x102   :  { %3200 = vst.msk [vmem:[#allocation2 + $0xd0] sm:$0xff] %vm3173_vm2, %v2943_v52  ;;  %v15274_v55 = vpop.f32.mrf.mxu0  ;;  %15417 = vmatmul.mubr.msk.f32.gmra.mxu0 %vm291_vm0, %v153_v49 }
 0x103   :  { %v2946_v56 = vsel %vm2434_vm13, %v1272_v48, %v2690_v53  ;;  %vm2433_vm14 = vcmp.gt.f32.partialorder %v1267_v54, 0.0  ;;  %v2689_v57 = vmul.f32 0.01, %v1267_v54  ;;  %15419 = vmatprep.mubr.msk.f32.mxu0 %vm291_vm0, %v154_v51  ;;  %v167_v51 = vld [vmem:[%s21891_s0 + $0x468] sm:$0xff]  ;;  %v168_v53 = vld [vmem:[%s21891_s0 + $0x470] sm:$0xff] }
 0x104   :  { %3203 = vst.msk [vmem:[#allocation2 + $0xe8] sm:$0xff] %vm3173_vm2, %v2946_v56  ;;  %v1276_v59 = vpop.f32.mrf.mxu0 }
 0x105   :  { %v2945_v61 = vsel %vm2433_vm14, %v1267_v54, %v2689_v57  ;;  %v1277_v62 = vadd.f32 %v17231_v36, %v1276_v59 }
 0x106   :  { %3202 = vst.msk [vmem:[#allocation2 + $0xe0] sm:$0xff] %vm3173_vm2, %v2945_v61  ;;  %v15277_v63 = vpop.f32.mrf.mxu0  ;;  %15420 = vmatmul.mubr.msk.f32.gmra.mxu0 %vm291_vm0, %v155_v58  ;;  %v169_v61 = vld [vmem:[%s21891_s0 + $0x478] sm:$0xff] }
 0x107   :  { %vm2435_vm15 = vcmp.gt.f32.partialorder %v1277_v62, 0.0  ;;  %v2691_v0 = vmul.f32 0.01, %v1277_v62  ;;  %v1292_v1 = vadd.f32 %v15277_v63, %v17231_v36  ;;  %15422 = vmatprep.mubr.msk.f32.mxu0 %vm291_vm0, %v156_v60  ;;  %v170_v63 = vld [vmem:[%s21891_s0 + $0x480] sm:$0xff] }
 0x108   :  { %v1286_v3 = vpop.f32.mrf.mxu0 }
 0x109   :  { %v2947_v5 = vsel %vm2435_vm15, %v1277_v62, %v2691_v0  ;;  %vm2438_vm1 = vcmp.gt.f32.partialorder %v1292_v1, 0.0  ;;  %v2694_v6 = vmul.f32 0.01, %v1292_v1  ;;  %v1287_v7 = vadd.f32 %v17231_v36, %v1286_v3 }
 0x10a   :  { %3204 = vst.msk [vmem:[#allocation2 + $0xf0] sm:$0xff] %vm3173_vm2, %v2947_v5  ;;  %v15280_v8 = vpop.f32.mrf.mxu0  ;;  %15423 = vmatmul.mubr.msk.f32.gmra.mxu0 %vm291_vm0, %v157_v2 }
 0x10b   :  { %v2950_v9 = vsel %vm2438_vm1, %v1292_v1, %v2694_v6  ;;  %vm2437_vm3 = vcmp.gt.f32.partialorder %v1287_v7, 0.0  ;;  %v2693_v10 = vmul.f32 0.01, %v1287_v7  ;;  %v1302_v11 = vadd.f32 %v15280_v8, %v17231_v36  ;;  %15425 = vmatprep.mubr.msk.f32.mxu0 %vm291_vm0, %v158_v4  ;;  %v171_v6 = vld [vmem:[%s21891_s0 + $0x488] sm:$0xff]  ;;  %v172_v8 = vld [vmem:[%s21891_s0 + $0x490] sm:$0xff] }
 0x10c   :  { %3207 = vst.msk [vmem:[#allocation2 + $0x108] sm:$0xff] %vm3173_vm2, %v2950_v9  ;;  %v1296_v14 = vpop.f32.mrf.mxu0 }
 0x10d   :  { %v2949_v16 = vsel %vm2437_vm3, %v1287_v7, %v2693_v10  ;;  %vm2440_vm4 = vcmp.gt.f32.partialorder %v1302_v11, 0.0  ;;  %v2696_v17 = vmul.f32 0.01, %v1302_v11  ;;  %v1297_v18 = vadd.f32 %v17231_v36, %v1296_v14 }
 0x10e   :  { %3206 = vst.msk [vmem:[#allocation2 + $0x100] sm:$0xff] %vm3173_vm2, %v2949_v16  ;;  %v15283_v19 = vpop.f32.mrf.mxu0  ;;  %15426 = vmatmul.mubr.msk.f32.gmra.mxu0 %vm291_vm0, %v159_v12 }
 0x10f   :  { %v2952_v20 = vsel %vm2440_vm4, %v1302_v11, %v2696_v17  ;;  %vm2439_vm5 = vcmp.gt.f32.partialorder %v1297_v18, 0.0  ;;  %v2695_v21 = vmul.f32 0.01, %v1297_v18  ;;  %v1312_v22 = vadd.f32 %v15283_v19, %v17231_v36  ;;  %15428 = vmatprep.mubr.msk.f32.mxu0 %vm291_vm0, %v160_v15  ;;  %v173_v15 = vld [vmem:[%s21891_s0 + $0x498] sm:$0xff]  ;;  %v174_v17 = vld [vmem:[%s21891_s0 + $0x4a0] sm:$0xff] }
 0x110   :  { %3209 = vst.msk [vmem:[#allocation2 + $0x118] sm:$0xff] %vm3173_vm2, %v2952_v20  ;;  %v1306_v24 = vpop.f32.mrf.mxu0 }
 0x111   :  { %v2951_v26 = vsel %vm2439_vm5, %v1297_v18, %v2695_v21  ;;  %vm2442_vm6 = vcmp.gt.f32.partialorder %v1312_v22, 0.0  ;;  %v2698_v27 = vmul.f32 0.01, %v1312_v22  ;;  %v1307_v28 = vadd.f32 %v17231_v36, %v1306_v24 }
 0x112   :  { %3208 = vst.msk [vmem:[#allocation2 + $0x110] sm:$0xff] %vm3173_vm2, %v2951_v26  ;;  %v15286_v29 = vpop.f32.mrf.mxu0  ;;  %15429 = vmatmul.mubr.msk.f32.gmra.mxu0 %vm291_vm0, %v161_v23 }
 0x113   :  { %v2954_v30 = vsel %vm2442_vm6, %v1312_v22, %v2698_v27  ;;  %vm2441_vm7 = vcmp.gt.f32.partialorder %v1307_v28, 0.0  ;;  %v2697_v31 = vmul.f32 0.01, %v1307_v28  ;;  %15431 = vmatprep.mubr.msk.f32.mxu0 %vm291_vm0, %v162_v25  ;;  %v175_v25 = vld [vmem:[%s21891_s0 + $0x4a8] sm:$0xff]  ;;  %v176_v27 = vld [vmem:[%s21891_s0 + $0x4b0] sm:$0xff] }
 0x114   :  { %3211 = vst.msk [vmem:[#allocation2 + $0x128] sm:$0xff] %vm3173_vm2, %v2954_v30  ;;  %v1316_v33 = vpop.f32.mrf.mxu0 }
 0x115   :  { %v2953_v35 = vsel %vm2441_vm7, %v1307_v28, %v2697_v31  ;;  %v1317_v37 = vadd.f32 %v17231_v36, %v1316_v33 }
 0x116   :  { %3210 = vst.msk [vmem:[#allocation2 + $0x120] sm:$0xff] %vm3173_vm2, %v2953_v35  ;;  %v15289_v38 = vpop.f32.mrf.mxu0  ;;  %15432 = vmatmul.mubr.msk.f32.gmra.mxu0 %vm291_vm0, %v163_v32  ;;  %v13862_v32 = vld [vmem:[%s21893_s3 + $0x118] sm:$0xff] }
 0x117   :  { %vm2443_vm8 = vcmp.gt.f32.partialorder %v1317_v37, 0.0  ;;  %v2699_v39 = vmul.f32 0.01, %v1317_v37  ;;  %v1332_v40 = vadd.f32 %v15289_v38, %v17231_v36  ;;  %15434 = vmatprep.mubr.msk.f32.mxu0 %vm291_vm0, %v164_v34  ;;  %16107 = vmatprep.subr.mxu0 %v13862_v32 }
 0x118   :  { %v1326_v42 = vpop.f32.mrf.mxu0  ;;  %16108 = vmatpush3.msra.mxu0 %v13862_v32 }
 0x119   :  { %v2955_v44 = vsel %vm2443_vm8, %v1317_v37, %v2699_v39  ;;  %vm2446_vm9 = vcmp.gt.f32.partialorder %v1332_v40, 0.0  ;;  %v2702_v45 = vmul.f32 0.01, %v1332_v40  ;;  %v1327_v46 = vadd.f32 %v17231_v36, %v1326_v42  ;;  %v177_v37 = vld [vmem:[%s21891_s0 + $0x4b8] sm:$0xff]  ;;  %v178_v39 = vld [vmem:[%s21891_s0 + $0x4c0] sm:$0xff] }
 0x11a   :  { %3212 = vst.msk [vmem:[#allocation2 + $0x130] sm:$0xff] %vm3173_vm2, %v2955_v44  ;;  %v15292_v47 = vpop.f32.mrf.mxu0  ;;  %15435 = vmatmul.mubr.msk.f32.gmra.mxu0 %vm291_vm0, %v165_v41 }
 0x11b   :  { %v2958_v48 = vsel %vm2446_vm9, %v1332_v40, %v2702_v45  ;;  %vm2445_vm10 = vcmp.gt.f32.partialorder %v1327_v46, 0.0  ;;  %v2701_v49 = vmul.f32 0.01, %v1327_v46  ;;  %v1342_v50 = vadd.f32 %v15292_v47, %v17231_v36  ;;  %15437 = vmatprep.mubr.msk.f32.mxu0 %vm291_vm0, %v166_v43 }
 0x11c   :  { %3215 = vst.msk [vmem:[#allocation2 + $0x148] sm:$0xff] %vm3173_vm2, %v2958_v48  ;;  %v1336_v52 = vpop.f32.mrf.mxu0  ;;  %v180_v48 = vld [vmem:[%s21891_s0 + $0x4d0] sm:$0xff] }
 0x11d   :  { %v2957_v54 = vsel %vm2445_vm10, %v1327_v46, %v2701_v49  ;;  %vm2448_vm11 = vcmp.gt.f32.partialorder %v1342_v50, 0.0  ;;  %v2704_v55 = vmul.f32 0.01, %v1342_v50  ;;  %v1337_v56 = vadd.f32 %v17231_v36, %v1336_v52  ;;  %v179_v46 = vld [vmem:[%s21891_s0 + $0x4c8] sm:$0xff] }
 0x11e   :  { %3214 = vst.msk [vmem:[#allocation2 + $0x140] sm:$0xff] %vm3173_vm2, %v2957_v54  ;;  %v15295_v57 = vpop.f32.mrf.mxu0  ;;  %15438 = vmatmul.mubr.msk.f32.gmra.mxu0 %vm291_vm0, %v167_v51 }
 0x11f   :  { %v2960_v58 = vsel %vm2448_vm11, %v1342_v50, %v2704_v55  ;;  %vm2447_vm12 = vcmp.gt.f32.partialorder %v1337_v56, 0.0  ;;  %v2703_v59 = vmul.f32 0.01, %v1337_v56  ;;  %v1352_v60 = vadd.f32 %v15295_v57, %v17231_v36  ;;  %15440 = vmatprep.mubr.msk.f32.mxu0 %vm291_vm0, %v168_v53  ;;  %v181_v53 = vld [vmem:[%s21891_s0 + $0x4d8] sm:$0xff]  ;;  %v182_v55 = vld [vmem:[%s21891_s0 + $0x4e0] sm:$0xff]  ;;  %v183_v57 = vld [vmem:[%s21891_s0 + $0x4e8] sm:$0xff] }
 0x120   :  { %3217 = vst.msk [vmem:[#allocation2 + $0x158] sm:$0xff] %vm3173_vm2, %v2960_v58  ;;  %v1346_v62 = vpop.f32.mrf.mxu0 }
 0x121   :  { %v2959_v0 = vsel %vm2447_vm12, %v1337_v56, %v2703_v59  ;;  %vm2450_vm13 = vcmp.gt.f32.partialorder %v1352_v60, 0.0  ;;  %v2706_v1 = vmul.f32 0.01, %v1352_v60  ;;  %v1347_v2 = vadd.f32 %v17231_v36, %v1346_v62  ;;  %v184_v59 = vld [vmem:[%s21891_s0 + $0x4f0] sm:$0xff] }
 0x122   :  { %3216 = vst.msk [vmem:[#allocation2 + $0x150] sm:$0xff] %vm3173_vm2, %v2959_v0  ;;  %v15298_v3 = vpop.f32.mrf.mxu0  ;;  %15441 = vmatmul.mubr.msk.f32.gmra.mxu0 %vm291_vm0, %v169_v61  ;;  %v185_v61 = vld [vmem:[%s21891_s0 + $0x4f8] sm:$0xff] }
 0x123   :  { %v2962_v4 = vsel %vm2450_vm13, %v1352_v60, %v2706_v1  ;;  %vm2449_vm14 = vcmp.gt.f32.partialorder %v1347_v2, 0.0  ;;  %v2705_v5 = vmul.f32 0.01, %v1347_v2  ;;  %15443 = vmatprep.mubr.msk.f32.mxu0 %vm291_vm0, %v170_v63  ;;  %v186_v63 = vld [vmem:[%s21891_s0 + $0x500] sm:$0xff] }
 0x124   :  { %3219 = vst.msk [vmem:[#allocation2 + $0x168] sm:$0xff] %vm3173_vm2, %v2962_v4  ;;  %v1356_v7 = vpop.f32.mrf.mxu0  ;;  %v17607_v1 = vld [vmem:[%s21892_s2] ss:$0 sm:$0xff]  ;;  %v188_v4 = vld [vmem:[%s21891_s0 + $0x510] sm:$0xff] }
 0x125   :  { %v2961_v9 = vsel %vm2449_vm14, %v1347_v2, %v2705_v5  ;;  %v1357_v10 = vadd.f32 %v17231_v36, %v1356_v7  ;;  %v187_v2 = vld [vmem:[%s21891_s0 + $0x508] sm:$0xff]  ;;  %v189_v7 = vld [vmem:[%s21891_s0 + $0x518] sm:$0xff] }
 0x126   :  { %3218 = vst.msk [vmem:[#allocation2 + $0x160] sm:$0xff] %vm3173_vm2, %v2961_v9  ;;  %v15301_v11 = vpop.f32.mrf.mxu0  ;;  %15444 = vmatmul.mubr.msk.f32.gmra.mxu0 %vm291_vm0, %v171_v6  ;;  %v190_v9 = vld [vmem:[%s21891_s0 + $0x520] sm:$0xff] }
 0x127   :  { %vm2451_vm15 = vcmp.gt.f32.partialorder %v1357_v10, 0.0  ;;  %v2707_v12 = vmul.f32 0.01, %v1357_v10  ;;  %v1372_v14 = vadd.f32 %v15301_v11, %v17231_v36  ;;  %15446 = vmatprep.mubr.msk.f32.mxu0 %vm291_vm0, %v172_v8 }
 0x128   :  { %v1366_v16 = vpop.f32.mrf.mxu0 }
 0x129   :  { %v2963_v18 = vsel %vm2451_vm15, %v1357_v10, %v2707_v12  ;;  %vm2454_vm1 = vcmp.gt.f32.partialorder %v1372_v14, 0.0  ;;  %v2710_v19 = vmul.f32 0.01, %v1372_v14  ;;  %v1367_v20 = vadd.f32 %v17231_v36, %v1366_v16 }
 0x12a   :  { %3220 = vst.msk [vmem:[#allocation2 + $0x170] sm:$0xff] %vm3173_vm2, %v2963_v18  ;;  %v15304_v21 = vpop.f32.mrf.mxu0  ;;  %15447 = vmatmul.mubr.msk.f32.gmra.mxu0 %vm291_vm0, %v173_v15 }
 0x12b   :  { %v2966_v22 = vsel %vm2454_vm1, %v1372_v14, %v2710_v19  ;;  %vm2453_vm3 = vcmp.gt.f32.partialorder %v1367_v20, 0.0  ;;  %v2709_v23 = vmul.f32 0.01, %v1367_v20  ;;  %v1382_v24 = vadd.f32 %v15304_v21, %v17231_v36  ;;  %15449 = vmatprep.mubr.msk.f32.mxu0 %vm291_vm0, %v174_v17  ;;  %v191_v17 = vld [vmem:[%s21891_s0 + $0x528] sm:$0xff]  ;;  %v192_v19 = vld [vmem:[%s21891_s0 + $0x530] sm:$0xff] }
 0x12c   :  { %3223 = vst.msk [vmem:[#allocation2 + $0x188] sm:$0xff] %vm3173_vm2, %v2966_v22  ;;  %v1376_v26 = vpop.f32.mrf.mxu0 }
 0x12d   :  { %v2965_v28 = vsel %vm2453_vm3, %v1367_v20, %v2709_v23  ;;  %vm2456_vm4 = vcmp.gt.f32.partialorder %v1382_v24, 0.0  ;;  %v2712_v29 = vmul.f32 0.01, %v1382_v24  ;;  %v1377_v30 = vadd.f32 %v17231_v36, %v1376_v26 }
 0x12e   :  { %3222 = vst.msk [vmem:[#allocation2 + $0x180] sm:$0xff] %vm3173_vm2, %v2965_v28  ;;  %v15307_v31 = vpop.f32.mrf.mxu0  ;;  %15450 = vmatmul.mubr.msk.f32.gmra.mxu0 %vm291_vm0, %v175_v25 }
 0x12f   :  { %v2968_v33 = vsel %vm2456_vm4, %v1382_v24, %v2712_v29  ;;  %vm2455_vm5 = vcmp.gt.f32.partialorder %v1377_v30, 0.0  ;;  %v2711_v34 = vmul.f32 0.01, %v1377_v30  ;;  %v1392_v35 = vadd.f32 %v15307_v31, %v17231_v36  ;;  %15452 = vmatprep.mubr.msk.f32.mxu0 %vm291_vm0, %v176_v27  ;;  %v193_v27 = vld [vmem:[%s21891_s0 + $0x538] sm:$0xff]  ;;  %v194_v29 = vld [vmem:[%s21891_s0 + $0x540] sm:$0xff] }
 0x130   :  { %3225 = vst.msk [vmem:[#allocation2 + $0x198] sm:$0xff] %vm3173_vm2, %v2968_v33  ;;  %v1386_v38 = vpop.f32.mrf.mxu0 }
 0x131   :  { %v2967_v40 = vsel %vm2455_vm5, %v1377_v30, %v2711_v34  ;;  %vm2458_vm6 = vcmp.gt.f32.partialorder %v1392_v35, 0.0  ;;  %v2714_v41 = vmul.f32 0.01, %v1392_v35  ;;  %v1387_v42 = vadd.f32 %v17231_v36, %v1386_v38 }
 0x132   :  { %3224 = vst.msk [vmem:[#allocation2 + $0x190] sm:$0xff] %vm3173_vm2, %v2967_v40  ;;  %v15310_v43 = vpop.f32.mrf.mxu0  ;;  %15453 = vmatmul.mubr.msk.f32.gmra.mxu0 %vm291_vm0, %v177_v37  ;;  %v195_v37 = vld [vmem:[%s21891_s0 + $0x548] sm:$0xff] }
 0x133   :  { %v2970_v44 = vsel %vm2458_vm6, %v1392_v35, %v2714_v41  ;;  %vm2457_vm7 = vcmp.gt.f32.partialorder %v1387_v42, 0.0  ;;  %v2713_v45 = vmul.f32 0.01, %v1387_v42  ;;  %15455 = vmatprep.mubr.msk.f32.mxu0 %vm291_vm0, %v178_v39  ;;  %v196_v39 = vld [vmem:[%s21891_s0 + $0x550] sm:$0xff] }
 0x134   :  { %3227 = vst.msk [vmem:[#allocation2 + $0x1a8] sm:$0xff] %vm3173_vm2, %v2970_v44  ;;  %v1396_v47 = vpop.f32.mrf.mxu0 }
 0x135   :  { %v2969_v49 = vsel %vm2457_vm7, %v1387_v42, %v2713_v45  ;;  %v1397_v50 = vadd.f32 %v17231_v36, %v1396_v47  ;;  %v3468_v45 = vld [vmem:[%s21893_s3 + $0x10] sm:$0xff] }
 0x136   :  { %3226 = vst.msk [vmem:[#allocation2 + $0x1a0] sm:$0xff] %vm3173_vm2, %v2969_v49  ;;  %v15313_v51 = vpop.f32.mrf.mxu0  ;;  %15456 = vmatmul.mubr.msk.f32.gmra.mxu0 %vm291_vm0, %v179_v46 }
 0x137   :  { %vm2459_vm8 = vcmp.gt.f32.partialorder %v1397_v50, 0.0  ;;  %v2715_v52 = vmul.f32 0.01, %v1397_v50  ;;  %15458 = vmatprep.mubr.msk.f32.mxu0 %vm291_vm0, %v180_v48  ;;  %v197_v48 = vld [vmem:[%s21891_s0 + $0x558] sm:$0xff] }
 0x138   :  { %v1406_v54 = vpop.f32.mrf.mxu0 }
 0x139   :  { %v2971_v56 = vsel %vm2459_vm8, %v1397_v50, %v2715_v52  ;;  %v198_v50 = vld [vmem:[%s21891_s0 + $0x560] sm:$0xff] }
 0x13a   :  { %3228 = vst.msk [vmem:[#allocation2 + $0x1b0] sm:$0xff] %vm3173_vm2, %v2971_v56  ;;  %v15316_v36 = vpop.f32.mrf.mxu0  ;;  %15459 = vmatmul.mubr.msk.f32.gmra.mxu0 %vm291_vm0, %v181_v53 }
 0x13b   :  { %15461 = vmatprep.mubr.msk.f32.mxu0 %vm291_vm0, %v182_v55  ;;  %v3467_v36 = vld [vmem:[%s21893_s3 + $0x8] sm:$0xff] }
 0x13c   :  { %v1416_v58 = vpop.f32.mrf.mxu0 }
 0x13e   :  { %v15319_v60 = vpop.f32.mrf.mxu0  ;;  %15462 = vmatmul.mubr.msk.f32.gmra.mxu0 %vm291_vm0, %v183_v57 }
 0x13f   :  { %15464 = vmatprep.mubr.msk.f32.mxu0 %vm291_vm0, %v184_v59  ;;  %v199_v59 = vld [vmem:[%s21891_s0 + $0x568] sm:$0xff] }
 0x140   :  { %v1426_v62 = vpop.f32.mrf.mxu0 }
 0x142   :  { %v15322_v0 = vpop.f32.mrf.mxu0  ;;  %15465 = vmatmul.mubr.msk.f32.gmra.mxu0 %vm291_vm0, %v185_v61  ;;  %v200_v61 = vld [vmem:[%s21891_s0 + $0x570] sm:$0xff] }
 0x143   :  { %15467 = vmatprep.mubr.msk.f32.mxu0 %vm291_vm0, %v186_v63 }
 0x144   :  { %v1436_v3 = vpop.f32.mrf.mxu0 }
 0x146   :  { %v15325_v5 = vpop.f32.mrf.mxu0  ;;  %15468 = vmatmul.mubr.msk.f32.gmra.mxu0 %vm291_vm0, %v187_v2 }
 0x147   :  { %v1452_v6 = vadd.f32 %v17607_v1, %v15325_v5  ;;  %15470 = vmatprep.mubr.msk.f32.mxu0 %vm291_vm0, %v188_v4  ;;  %v3466_v5 = vld [vmem:[%s21893_s3] sm:$0xff] }
 0x148   :  { %v1446_v8 = vpop.f32.mrf.mxu0 }
 0x149   :  { %vm2470_vm9 = vcmp.gt.f32.partialorder %v1452_v6, 0.0  ;;  %v2726_v10 = vmul.f32 0.01, %v1452_v6  ;;  %v1447_v11 = vadd.f32 %v17607_v1, %v1446_v8 }
 0x14a   :  { %v15328_v12 = vpop.f32.mrf.mxu0  ;;  %15471 = vmatmul.mubr.msk.f32.gmra.mxu0 %vm291_vm0, %v189_v7 }
 0x14b   :  { %v2982_v14 = vsel %vm2470_vm9, %v1452_v6, %v2726_v10  ;;  %vm2469_vm10 = vcmp.gt.f32.partialorder %v1447_v11, 0.0  ;;  %v2725_v15 = vmul.f32 0.01, %v1447_v11  ;;  %v1462_v16 = vadd.f32 %v17607_v1, %v15328_v12  ;;  %15473 = vmatprep.mubr.msk.f32.mxu0 %vm291_vm0, %v190_v9  ;;  %v201_v9 = vld [vmem:[%s21891_s0 + $0x578] sm:$0xff] }
 0x14c   :  { %3239 = vst.msk [vmem:[#allocation2 + $0x208] sm:$0xff] %vm3173_vm2, %v2982_v14  ;;  %v1456_v18 = vpop.f32.mrf.mxu0  ;;  %v17713_v12 = vld [vmem:[%s21893_s3 + $0x58] sm:$0xff] }
 0x14d   :  { %v2981_v20 = vsel %vm2469_vm10, %v1447_v11, %v2725_v15  ;;  %vm2472_vm11 = vcmp.gt.f32.partialorder %v1462_v16, 0.0  ;;  %v2728_v21 = vmul.f32 0.01, %v1462_v16  ;;  %v1457_v22 = vadd.f32 %v17607_v1, %v1456_v18  ;;  %v202_v11 = vld [vmem:[%s21891_s0 + $0x580] sm:$0xff] }
 0x14e   :  { %3238 = vst.msk [vmem:[#allocation2 + $0x200] sm:$0xff] %vm3173_vm2, %v2981_v20  ;;  %v15331_v23 = vpop.f32.mrf.mxu0  ;;  %15474 = vmatmul.mubr.msk.f32.gmra.mxu0 %vm291_vm0, %v191_v17  ;;  %v203_v20 = vld [vmem:[%s21891_s0 + $0x588] sm:$0xff] }
 0x14f   :  { %v2984_v24 = vsel %vm2472_vm11, %v1462_v16, %v2728_v21  ;;  %vm2471_vm12 = vcmp.gt.f32.partialorder %v1457_v22, 0.0  ;;  %v2727_v25 = vmul.f32 0.01, %v1457_v22  ;;  %v1472_v26 = vadd.f32 %v17607_v1, %v15331_v23  ;;  %15476 = vmatprep.mubr.msk.f32.mxu0 %vm291_vm0, %v192_v19 }
 0x150   :  { %3241 = vst.msk [vmem:[#allocation2 + $0x218] sm:$0xff] %vm3173_vm2, %v2984_v24  ;;  %v1466_v28 = vpop.f32.mrf.mxu0 }
 0x151   :  { %v2983_v30 = vsel %vm2471_vm12, %v1457_v22, %v2727_v25  ;;  %vm2474_vm13 = vcmp.gt.f32.partialorder %v1472_v26, 0.0  ;;  %v2730_v31 = vmul.f32 0.01, %v1472_v26  ;;  %v1467_v32 = vadd.f32 %v17607_v1, %v1466_v28  ;;  %v204_v22 = vld [vmem:[%s21891_s0 + $0x590] sm:$0xff] }
 0x152   :  { %3240 = vst.msk [vmem:[#allocation2 + $0x210] sm:$0xff] %vm3173_vm2, %v2983_v30  ;;  %v15334_v33 = vpop.f32.mrf.mxu0  ;;  %15477 = vmatmul.mubr.msk.f32.gmra.mxu0 %vm291_vm0, %v193_v27  ;;  %v205_v30 = vld [vmem:[%s21891_s0 + $0x598] sm:$0xff] }
 0x153   :  { %v2986_v34 = vsel %vm2474_vm13, %v1472_v26, %v2730_v31  ;;  %vm2473_vm14 = vcmp.gt.f32.partialorder %v1467_v32, 0.0  ;;  %v2729_v35 = vmul.f32 0.01, %v1467_v32  ;;  %15479 = vmatprep.mubr.msk.f32.mxu0 %vm291_vm0, %v194_v29  ;;  %v3472_v44 = vld [vmem:[#allocation2 + $0x208] sm:$0xff] }
 0x154   :  { %3243 = vst.msk [vmem:[#allocation2 + $0x228] sm:$0xff] %vm3173_vm2, %v2986_v34  ;;  %v1476_v38 = vpop.f32.mrf.mxu0 }
 0x155   :  { %v2985_v40 = vsel %vm2473_vm14, %v1467_v32, %v2729_v35  ;;  %v1477_v41 = vadd.f32 %v17607_v1, %v1476_v38  ;;  %v3471_v42 = vld [vmem:[#allocation2 + $0x200] sm:$0xff] }
 0x156   :  { %3242 = vst.msk [vmem:[#allocation2 + $0x220] sm:$0xff] %vm3173_vm2, %v2985_v40  ;;  %v15337_v43 = vpop.f32.mrf.mxu0  ;;  %15480 = vmatmul.mubr.msk.f32.gmra.mxu0 %vm291_vm0, %v195_v37  ;;  %15619 = vmatprep.mubr.msk.f32.mxu1 %vm3173_vm2, %v3471_v42  ;;  %v206_v32 = vld [vmem:[%s21891_s0 + $0x5a0] sm:$0xff] }
 0x157   :  { %vm2475_vm15 = vcmp.gt.f32.partialorder %v1477_v41, 0.0  ;;  %v2731_v46 = vmul.f32 0.01, %v1477_v41  ;;  %v1492_v47 = vadd.f32 %v17607_v1, %v15337_v43  ;;  %15620 = vmatmul.mubr.msk.f32.vlgmr.msra.gmra.mxu1 %vm3173_vm2, %v3472_v44  ;;  %15482 = vmatprep.mubr.msk.f32.mxu0 %vm291_vm0, %v196_v39  ;;  %v3474_v56 = vld [vmem:[#allocation2 + $0x218] sm:$0xff]  ;;  %v207_v43 = vld [vmem:[%s21891_s0 + $0x5a8] sm:$0xff] }
 0x158   :  { %v1486_v49 = vpop.f32.mrf.mxu0  ;;  %15674 = vmatpush3.msra.mxu1 %v17375_v13 }
 0x159   :  { %v2987_v51 = vsel %vm2475_vm15, %v1477_v41, %v2731_v46  ;;  %vm2478_vm1 = vcmp.gt.f32.partialorder %v1492_v47, 0.0  ;;  %v2734_v52 = vmul.f32 0.01, %v1492_v47  ;;  %v1487_v53 = vadd.f32 %v17607_v1, %v1486_v49  ;;  %v3473_v54 = vld [vmem:[#allocation2 + $0x210] sm:$0xff]  ;;  %15675 = vmatprep.subr.mxu1 %v3468_v45 }
 0x15a   :  { %3244 = vst.msk [vmem:[#allocation2 + $0x230] sm:$0xff] %vm3173_vm2, %v2987_v51  ;;  %v15340_v55 = vpop.f32.mrf.mxu0  ;;  %15483 = vmatmul.mubr.msk.f32.gmra.mxu0 %vm291_vm0, %v197_v48  ;;  %15622 = vmatprep.mubr.msk.f32.mxu1 %vm3173_vm2, %v3473_v54 }
 0x15b   :  { %v2990_v13 = vsel %vm2478_vm1, %v1492_v47, %v2734_v52  ;;  %vm2477_vm3 = vcmp.gt.f32.partialorder %v1487_v53, 0.0  ;;  %v2733_v57 = vmul.f32 0.01, %v1487_v53  ;;  %v1502_v58 = vadd.f32 %v17607_v1, %v15340_v55  ;;  %15623 = vmatmul.mubr.msk.f32.gmra.mxu1 %vm3173_vm2, %v3474_v56  ;;  %15485 = vmatprep.mubr.msk.f32.mxu0 %vm291_vm0, %v198_v50  ;;  %v3476_v4 = vld [vmem:[#allocation2 + $0x228] sm:$0xff]  ;;  %v209_v55 = vld [vmem:[%s21891_s0 + $0x5b8] sm:$0xff] }
 0x15c   :  { %3247 = vst.msk [vmem:[#allocation2 + $0x248] sm:$0xff] %vm3173_vm2, %v2990_v13  ;;  %v1496_v60 = vpop.f32.mrf.mxu0  ;;  %15676 = vmatpush3.msra.mxu1 %v3468_v45  ;;  %v208_v45 = vld [vmem:[%s21891_s0 + $0x5b0] sm:$0xff] }
 0x15d   :  { %v2989_v62 = vsel %vm2477_vm3, %v1487_v53, %v2733_v57  ;;  %vm2480_vm4 = vcmp.gt.f32.partialorder %v1502_v58, 0.0  ;;  %v2736_v63 = vmul.f32 0.01, %v1502_v58  ;;  %v1497_v0 = vadd.f32 %v17607_v1, %v1496_v60  ;;  %v3475_v2 = vld [vmem:[#allocation2 + $0x220] sm:$0xff]  ;;  %15677 = vmatprep.subr.mxu1 %v3467_v36 }
 0x15e   :  { %3246 = vst.msk [vmem:[#allocation2 + $0x240] sm:$0xff] %vm3173_vm2, %v2989_v62  ;;  %v15343_v3 = vpop.f32.mrf.mxu0  ;;  %15486 = vmatmul.mubr.msk.f32.gmra.mxu0 %vm291_vm0, %v199_v59  ;;  %15625 = vmatprep.mubr.msk.f32.mxu1 %vm3173_vm2, %v3475_v2  ;;  %v211_v62 = vld [vmem:[%s21891_s0 + $0x5c8] sm:$0xff] }
 0x15f   :  { %v2992_v6 = vsel %vm2480_vm4, %v1502_v58, %v2736_v63  ;;  %vm2479_vm5 = vcmp.gt.f32.partialorder %v1497_v0, 0.0  ;;  %v2735_v7 = vmul.f32 0.01, %v1497_v0  ;;  %v1512_v8 = vadd.f32 %v17607_v1, %v15343_v3  ;;  %15626 = vmatmul.mubr.msk.f32.gmra.mxu1 %vm3173_vm2, %v3476_v4  ;;  %15488 = vmatprep.mubr.msk.f32.mxu0 %vm291_vm0, %v200_v61 }
 0x160   :  { %3249 = vst.msk [vmem:[#allocation2 + $0x258] sm:$0xff] %vm3173_vm2, %v2992_v6  ;;  %v1506_v10 = vpop.f32.mrf.mxu0  ;;  %15678 = vmatpush3.msra.mxu1 %v3467_v36  ;;  %v210_v36 = vld [vmem:[%s21891_s0 + $0x5c0] sm:$0xff] }
 0x161   :  { %v2991_v14 = vsel %vm2479_vm5, %v1497_v0, %v2735_v7  ;;  %vm2482_vm6 = vcmp.gt.f32.partialorder %v1512_v8, 0.0  ;;  %v2738_v15 = vmul.f32 0.01, %v1512_v8  ;;  %v1507_v16 = vadd.f32 %v17607_v1, %v1506_v10  ;;  %15679 = vmatprep.subr.mxu1 %v3466_v5  ;;  %v212_v0 = vld [vmem:[%s21891_s0 + $0x5d0] sm:$0xff] }
 0x162   :  { %3248 = vst.msk [vmem:[#allocation2 + $0x250] sm:$0xff] %vm3173_vm2, %v2991_v14  ;;  %v15346_v17 = vpop.f32.mrf.mxu0  ;;  %15489 = vmatmul.mubr.msk.f32.gmra.mxu0 %vm291_vm0, %v201_v9  ;;  %15680 = vmatpush3.msra.mxu1 %v3466_v5  ;;  %v213_v9 = vld [vmem:[%s21891_s0 + $0x5d8] sm:$0xff] }
 0x163   :  { %v2994_v18 = vsel %vm2482_vm6, %v1512_v8, %v2738_v15  ;;  %vm2481_vm7 = vcmp.gt.f32.partialorder %v1507_v16, 0.0  ;;  %v2737_v19 = vmul.f32 0.01, %v1507_v16  ;;  %15491 = vmatprep.mubr.msk.f32.mxu0 %vm291_vm0, %v202_v11  ;;  %15735 = vmatprep.subr.mxu1 %v17713_v12  ;;  %v3478_v27 = vld [vmem:[#allocation2 + $0x248] sm:$0xff]  ;;  %v214_v11 = vld [vmem:[%s21891_s0 + $0x5e0] sm:$0xff] }
 0x164   :  { %3251 = vst.msk [vmem:[#allocation2 + $0x268] sm:$0xff] %vm3173_vm2, %v2994_v18  ;;  %v1516_v21 = vpop.f32.mrf.mxu0 }
 0x165   :  { %v2993_v23 = vsel %vm2481_vm7, %v1507_v16, %v2737_v19  ;;  %v1517_v24 = vadd.f32 %v17607_v1, %v1516_v21  ;;  %v3477_v25 = vld [vmem:[#allocation2 + $0x240] sm:$0xff] }
 0x166   :  { %3250 = vst.msk [vmem:[#allocation2 + $0x260] sm:$0xff] %vm3173_vm2, %v2993_v23  ;;  %v15349_v26 = vpop.f32.mrf.mxu0  ;;  %15492 = vmatmul.mubr.msk.f32.gmra.mxu0 %vm291_vm0, %v203_v20  ;;  %15628 = vmatprep.mubr.msk.f32.mxu1 %vm3173_vm2, %v3477_v25  ;;  %v215_v23 = vld [vmem:[%s21891_s0 + $0x5e8] sm:$0xff]  ;;  %v216_v25 = vld [vmem:[%s21891_s0 + $0x5f0] sm:$0xff] }
 0x167   :  { %vm2483_vm8 = vcmp.gt.f32.partialorder %v1517_v24, 0.0  ;;  %v2739_v28 = vmul.f32 0.01, %v1517_v24  ;;  %v1532_v29 = vadd.f32 %v17607_v1, %v15349_v26  ;;  %15629 = vmatmul.mubr.msk.f32.gmra.mxu1 %vm3173_vm2, %v3478_v27  ;;  %15494 = vmatprep.mubr.msk.f32.mxu0 %vm291_vm0, %v204_v22  ;;  %v3480_v39 = vld [vmem:[#allocation2 + $0x258] sm:$0xff] }
 0x168   :  { %v1526_v31 = vpop.f32.mrf.mxu0 }
 0x169   :  { %v2995_v33 = vsel %vm2483_vm8, %v1517_v24, %v2739_v28  ;;  %vm2486_vm9 = vcmp.gt.f32.partialorder %v1532_v29, 0.0  ;;  %v2742_v34 = vmul.f32 0.01, %v1532_v29  ;;  %v1527_v35 = vadd.f32 %v17607_v1, %v1526_v31  ;;  %v3479_v37 = vld [vmem:[#allocation2 + $0x250] sm:$0xff] }
 0x16a   :  { %3252 = vst.msk [vmem:[#allocation2 + $0x270] sm:$0xff] %vm3173_vm2, %v2995_v33  ;;  %v15352_v38 = vpop.f32.mrf.mxu0  ;;  %15495 = vmatmul.mubr.msk.f32.gmra.mxu0 %vm291_vm0, %v205_v30  ;;  %15631 = vmatprep.mubr.msk.f32.mxu1 %vm3173_vm2, %v3479_v37  ;;  %v13861_v37 = vld [vmem:[%s21893_s3 + $0x110] sm:$0xff] }
 0x16b   :  { %v2998_v40 = vsel %vm2486_vm9, %v1532_v29, %v2742_v34  ;;  %vm2485_vm10 = vcmp.gt.f32.partialorder %v1527_v35, 0.0  ;;  %v2741_v41 = vmul.f32 0.01, %v1527_v35  ;;  %v1542_v42 = vadd.f32 %v17607_v1, %v15352_v38  ;;  %15632 = vmatmul.mubr.msk.f32.gmra.mxu1 %vm3173_vm2, %v3480_v39  ;;  %15497 = vmatprep.mubr.msk.f32.mxu0 %vm291_vm0, %v206_v32  ;;  %v3482_v51 = vld [vmem:[#allocation2 + $0x268] sm:$0xff]  ;;  %v218_v39 = vld [vmem:[%s21891_s0 + $0x600] sm:$0xff] }
 0x16c   :  { %3255 = vst.msk [vmem:[#allocation2 + $0x288] sm:$0xff] %vm3173_vm2, %v2998_v40  ;;  %v1536_v44 = vpop.f32.mrf.mxu0  ;;  %16109 = vmatprep.subr.mxu0 %v13861_v37 }
 0x16d   :  { %v2997_v46 = vsel %vm2485_vm10, %v1527_v35, %v2741_v41  ;;  %vm2488_vm11 = vcmp.gt.f32.partialorder %v1542_v42, 0.0  ;;  %v2744_v47 = vmul.f32 0.01, %v1542_v42  ;;  %v1537_v48 = vadd.f32 %v17607_v1, %v1536_v44  ;;  %v3481_v49 = vld [vmem:[#allocation2 + $0x260] sm:$0xff]  ;;  %v217_v35 = vld [vmem:[%s21891_s0 + $0x5f8] sm:$0xff]  ;;  %16110 = vmatpush3.msra.mxu0 %v13861_v37 }
 0x16e   :  { %3254 = vst.msk [vmem:[#allocation2 + $0x280] sm:$0xff] %vm3173_vm2, %v2997_v46  ;;  %v15355_v50 = vpop.f32.mrf.mxu0  ;;  %15498 = vmatmul.mubr.msk.f32.gmra.mxu0 %vm291_vm0, %v207_v43  ;;  %15634 = vmatprep.mubr.msk.f32.mxu1 %vm3173_vm2, %v3481_v49  ;;  %v13860_v43 = vld [vmem:[%s21893_s3 + $0x108] sm:$0xff] }
 0x16f   :  { %v3000_v52 = vsel %vm2488_vm11, %v1542_v42, %v2744_v47  ;;  %vm2487_vm12 = vcmp.gt.f32.partialorder %v1537_v48, 0.0  ;;  %v2743_v53 = vmul.f32 0.01, %v1537_v48  ;;  %v1552_v54 = vadd.f32 %v17607_v1, %v15355_v50  ;;  %15635 = vmatmul.mubr.msk.f32.gmra.mxu1 %vm3173_vm2, %v3482_v51  ;;  %15500 = vmatprep.mubr.msk.f32.mxu0 %vm291_vm0, %v208_v45  ;;  %v219_v47 = vld [vmem:[%s21891_s0 + $0x608] sm:$0xff]  ;;  %v220_v50 = vld [vmem:[%s21891_s0 + $0x610] sm:$0xff] }
 0x170   :  { %3257 = vst.msk [vmem:[#allocation2 + $0x298] sm:$0xff] %vm3173_vm2, %v3000_v52  ;;  %v1546_v56 = vpop.f32.mrf.mxu0  ;;  %16111 = vmatprep.subr.mxu0 %v13860_v43 }
 0x171   :  { %v2999_v13 = vsel %vm2487_vm12, %v1537_v48, %v2743_v53  ;;  %vm2490_vm13 = vcmp.gt.f32.partialorder %v1552_v54, 0.0  ;;  %v2746_v57 = vmul.f32 0.01, %v1552_v54  ;;  %v1547_v58 = vadd.f32 %v17607_v1, %v1546_v56  ;;  %16112 = vmatpush3.msra.mxu0 %v13860_v43  ;;  %v13859_v48 = vld [vmem:[%s21893_s3 + $0x100] sm:$0xff] }
 0x172   :  { %3256 = vst.msk [vmem:[#allocation2 + $0x290] sm:$0xff] %vm3173_vm2, %v2999_v13  ;;  %v15358_v59 = vpop.f32.mrf.mxu0  ;;  %15501 = vmatmul.mubr.msk.f32.gmra.mxu0 %vm291_vm0, %v209_v55  ;;  %16113 = vmatprep.subr.mxu0 %v13859_v48  ;;  %v221_v13 = vld [vmem:[%s21891_s0 + $0x618] sm:$0xff] }
 0x173   :  { %v3002_v60 = vsel %vm2490_vm13, %v1552_v54, %v2746_v57  ;;  %vm2489_vm14 = vcmp.gt.f32.partialorder %v1547_v58, 0.0  ;;  %v2745_v61 = vmul.f32 0.01, %v1547_v58  ;;  %15503 = vmatprep.mubr.msk.f32.mxu0 %vm291_vm0, %v210_v36  ;;  %v3484_v6 = vld [vmem:[#allocation2 + $0x288] sm:$0xff]  ;;  %16114 = vmatpush3.msra.mxu0 %v13859_v48 }
 0x174   :  { %3259 = vst.msk [vmem:[#allocation2 + $0x2a8] sm:$0xff] %vm3173_vm2, %v3002_v60  ;;  %v1556_v63 = vpop.f32.mrf.mxu0 }
 0x175   :  { %v3001_v2 = vsel %vm2489_vm14, %v1547_v58, %v2745_v61  ;;  %v1557_v3 = vadd.f32 %v17607_v1, %v1556_v63  ;;  %v3483_v4 = vld [vmem:[#allocation2 + $0x280] sm:$0xff] }
 0x176   :  { %3258 = vst.msk [vmem:[#allocation2 + $0x2a0] sm:$0xff] %vm3173_vm2, %v3001_v2  ;;  %v15361_v5 = vpop.f32.mrf.mxu0  ;;  %15504 = vmatmul.mubr.msk.f32.gmra.mxu0 %vm291_vm0, %v211_v62  ;;  %15637 = vmatprep.mubr.msk.f32.mxu1 %vm3173_vm2, %v3483_v4  ;;  %v222_v58 = vld [vmem:[%s21891_s0 + $0x620] sm:$0xff] }
 0x177   :  { %vm2491_vm15 = vcmp.gt.f32.partialorder %v1557_v3, 0.0  ;;  %v2747_v7 = vmul.f32 0.01, %v1557_v3  ;;  %v1572_v8 = vadd.f32 %v17607_v1, %v15361_v5  ;;  %15638 = vmatmul.mubr.msk.f32.gmra.mxu1 %vm3173_vm2, %v3484_v6  ;;  %15506 = vmatprep.mubr.msk.f32.mxu0 %vm291_vm0, %v212_v0  ;;  %v3486_v19 = vld [vmem:[#allocation2 + $0x298] sm:$0xff]  ;;  %v223_v5 = vld [vmem:[%s21891_s0 + $0x628] sm:$0xff] }
 0x178   :  { %v1566_v10 = vpop.f32.mrf.mxu0 }
 0x179   :  { %v3003_v14 = vsel %vm2491_vm15, %v1557_v3, %v2747_v7  ;;  %vm2494_vm1 = vcmp.gt.f32.partialorder %v1572_v8, 0.0  ;;  %v2750_v15 = vmul.f32 0.01, %v1572_v8  ;;  %v1567_v16 = vadd.f32 %v17607_v1, %v1566_v10  ;;  %v3485_v17 = vld [vmem:[#allocation2 + $0x290] sm:$0xff] }
 0x17a   :  { %3260 = vst.msk [vmem:[#allocation2 + $0x2b0] sm:$0xff] %vm3173_vm2, %v3003_v14  ;;  %v15364_v18 = vpop.f32.mrf.mxu0  ;;  %15507 = vmatmul.mubr.msk.f32.gmra.mxu0 %vm291_vm0, %v213_v9  ;;  %15640 = vmatprep.mubr.msk.f32.mxu1 %vm3173_vm2, %v3485_v17  ;;  %v224_v7 = vld [vmem:[%s21891_s0 + $0x630] sm:$0xff] }
 0x17b   :  { %v3006_v20 = vsel %vm2494_vm1, %v1572_v8, %v2750_v15  ;;  %vm2493_vm3 = vcmp.gt.f32.partialorder %v1567_v16, 0.0  ;;  %v2749_v21 = vmul.f32 0.01, %v1567_v16  ;;  %v1582_v22 = vadd.f32 %v17607_v1, %v15364_v18  ;;  %15641 = vmatmul.mubr.msk.f32.gmra.mxu1 %vm3173_vm2, %v3486_v19  ;;  %15509 = vmatprep.mubr.msk.f32.mxu0 %vm291_vm0, %v214_v11  ;;  %v3488_v31 = vld [vmem:[#allocation2 + $0x2a8] sm:$0xff]  ;;  %v225_v19 = vld [vmem:[%s21891_s0 + $0x638] sm:$0xff] }
 0x17c   :  { %3263 = vst.msk [vmem:[#allocation2 + $0x2c8] sm:$0xff] %vm3173_vm2, %v3006_v20  ;;  %v1576_v24 = vpop.f32.mrf.mxu0 }
 0x17d   :  { %v3005_v26 = vsel %vm2493_vm3, %v1567_v16, %v2749_v21  ;;  %vm2496_vm4 = vcmp.gt.f32.partialorder %v1582_v22, 0.0  ;;  %v2752_v27 = vmul.f32 0.01, %v1582_v22  ;;  %v1577_v28 = vadd.f32 %v17607_v1, %v1576_v24  ;;  %v3487_v29 = vld [vmem:[#allocation2 + $0x2a0] sm:$0xff] }
 0x17e   :  { %3262 = vst.msk [vmem:[#allocation2 + $0x2c0] sm:$0xff] %vm3173_vm2, %v3005_v26  ;;  %v15367_v30 = vpop.f32.mrf.mxu0  ;;  %15510 = vmatmul.mubr.msk.f32.gmra.mxu0 %vm291_vm0, %v215_v23  ;;  %15643 = vmatprep.mubr.msk.f32.mxu1 %vm3173_vm2, %v3487_v29  ;;  %v226_v21 = vld [vmem:[%s21891_s0 + $0x640] sm:$0xff] }
 0x17f   :  { %v3008_v32 = vsel %vm2496_vm4, %v1582_v22, %v2752_v27  ;;  %vm2495_vm5 = vcmp.gt.f32.partialorder %v1577_v28, 0.0  ;;  %v2751_v33 = vmul.f32 0.01, %v1577_v28  ;;  %v1592_v34 = vadd.f32 %v17607_v1, %v15367_v30  ;;  %15644 = vmatmul.mubr.msk.f32.gmra.mxu1 %vm3173_vm2, %v3488_v31  ;;  %15512 = vmatprep.mubr.msk.f32.mxu0 %vm291_vm0, %v216_v25  ;;  %v228_v30 = vld [vmem:[%s21891_s0 + $0x650] sm:$0xff] }
 0x180   :  { %3265 = vst.msk [vmem:[#allocation2 + $0x2d8] sm:$0xff] %vm3173_vm2, %v3008_v32  ;;  %v1586_v38 = vpop.f32.mrf.mxu0 }
 0x181   :  { %v3007_v40 = vsel %vm2495_vm5, %v1577_v28, %v2751_v33  ;;  %vm2498_vm6 = vcmp.gt.f32.partialorder %v1592_v34, 0.0  ;;  %v2754_v41 = vmul.f32 0.01, %v1592_v34  ;;  %v1587_v42 = vadd.f32 %v17607_v1, %v1586_v38  ;;  %v227_v28 = vld [vmem:[%s21891_s0 + $0x648] sm:$0xff] }
 0x182   :  { %3264 = vst.msk [vmem:[#allocation2 + $0x2d0] sm:$0xff] %vm3173_vm2, %v3007_v40  ;;  %v15370_v44 = vpop.f32.mrf.mxu0  ;;  %15513 = vmatmul.mubr.msk.f32.gmra.mxu0 %vm291_vm0, %v217_v35 }
 0x183   :  { %v3010_v45 = vsel %vm2498_vm6, %v1592_v34, %v2754_v41  ;;  %vm2497_vm7 = vcmp.gt.f32.partialorder %v1587_v42, 0.0  ;;  %v2753_v46 = vmul.f32 0.01, %v1587_v42  ;;  %15515 = vmatprep.mubr.msk.f32.mxu0 %vm291_vm0, %v218_v39  ;;  %v3490_v55 = vld [vmem:[#allocation2 + $0x2c8] sm:$0xff]  ;;  %v229_v39 = vld [vmem:[%s21891_s0 + $0x658] sm:$0xff]  ;;  %v230_v41 = vld [vmem:[%s21891_s0 + $0x660] sm:$0xff] }
 0x184   :  { %3267 = vst.msk [vmem:[#allocation2 + $0x2e8] sm:$0xff] %vm3173_vm2, %v3010_v45  ;;  %v1596_v49 = vpop.f32.mrf.mxu0 }
 0x185   :  { %v3009_v51 = vsel %vm2497_vm7, %v1587_v42, %v2753_v46  ;;  %v1597_v52 = vadd.f32 %v17607_v1, %v1596_v49  ;;  %v3489_v53 = vld [vmem:[#allocation2 + $0x2c0] sm:$0xff] }
 0x186   :  { %3266 = vst.msk [vmem:[#allocation2 + $0x2e0] sm:$0xff] %vm3173_vm2, %v3009_v51  ;;  %v15373_v54 = vpop.f32.mrf.mxu0  ;;  %15516 = vmatmul.mubr.msk.f32.gmra.mxu0 %vm291_vm0, %v219_v47  ;;  %15646 = vmatprep.mubr.msk.f32.mxu1 %vm3173_vm2, %v3489_v53  ;;  %v231_v51 = vld [vmem:[%s21891_s0 + $0x668] sm:$0xff]  ;;  %v232_v53 = vld [vmem:[%s21891_s0 + $0x670] sm:$0xff] }
 0x187   :  { %vm2499_vm8 = vcmp.gt.f32.partialorder %v1597_v52, 0.0  ;;  %v2755_v56 = vmul.f32 0.01, %v1597_v52  ;;  %v1612_v36 = vadd.f32 %v17607_v1, %v15373_v54  ;;  %15647 = vmatmul.mubr.msk.f32.gmra.mxu1 %vm3173_vm2, %v3490_v55  ;;  %15518 = vmatprep.mubr.msk.f32.mxu0 %vm291_vm0, %v220_v50  ;;  %v3492_v0 = vld [vmem:[#allocation2 + $0x2d8] sm:$0xff] }
 0x188   :  { %v1606_v57 = vpop.f32.mrf.mxu0 }
 0x189   :  { %v3011_v59 = vsel %vm2499_vm8, %v1597_v52, %v2755_v56  ;;  %vm2502_vm9 = vcmp.gt.f32.partialorder %v1612_v36, 0.0  ;;  %v2758_v60 = vmul.f32 0.01, %v1612_v36  ;;  %v1607_v61 = vadd.f32 %v17607_v1, %v1606_v57  ;;  %v3491_v62 = vld [vmem:[#allocation2 + $0x2d0] sm:$0xff] }
 0x18a   :  { %3268 = vst.msk [vmem:[#allocation2 + $0x2f0] sm:$0xff] %vm3173_vm2, %v3011_v59  ;;  %v15376_v63 = vpop.f32.mrf.mxu0  ;;  %15519 = vmatmul.mubr.msk.f32.gmra.mxu0 %vm291_vm0, %v221_v13  ;;  %15649 = vmatprep.mubr.msk.f32.mxu1 %vm3173_vm2, %v3491_v62 }
 0x18b   :  { %v3014_v2 = vsel %vm2502_vm9, %v1612_v36, %v2758_v60  ;;  %vm2501_vm10 = vcmp.gt.f32.partialorder %v1607_v61, 0.0  ;;  %v2757_v3 = vmul.f32 0.01, %v1607_v61  ;;  %v1622_v4 = vadd.f32 %v17607_v1, %v15376_v63  ;;  %15650 = vmatmul.mubr.msk.f32.gmra.mxu1 %vm3173_vm2, %v3492_v0  ;;  %15521 = vmatprep.mubr.msk.f32.mxu0 %vm291_vm0, %v222_v58  ;;  %v3494_v15 = vld [vmem:[#allocation2 + $0x2e8] sm:$0xff]  ;;  %v234_v63 = vld [vmem:[%s21891_s0 + $0x680] sm:$0xff] }
 0x18c   :  { %3271 = vst.msk [vmem:[#allocation2 + $0x308] sm:$0xff] %vm3173_vm2, %v3014_v2  ;;  %v1616_v6 = vpop.f32.mrf.mxu0 }
 0x18d   :  { %v3013_v8 = vsel %vm2501_vm10, %v1607_v61, %v2757_v3  ;;  %vm2504_vm11 = vcmp.gt.f32.partialorder %v1622_v4, 0.0  ;;  %v2760_v9 = vmul.f32 0.01, %v1622_v4  ;;  %v1617_v10 = vadd.f32 %v17607_v1, %v1616_v6  ;;  %v3493_v11 = vld [vmem:[#allocation2 + $0x2e0] sm:$0xff]  ;;  %v233_v61 = vld [vmem:[%s21891_s0 + $0x678] sm:$0xff] }
 0x18e   :  { %3270 = vst.msk [vmem:[#allocation2 + $0x300] sm:$0xff] %vm3173_vm2, %v3013_v8  ;;  %v15379_v14 = vpop.f32.mrf.mxu0  ;;  %15522 = vmatmul.mubr.msk.f32.gmra.mxu0 %vm291_vm0, %v223_v5  ;;  %15652 = vmatprep.mubr.msk.f32.mxu1 %vm3173_vm2, %v3493_v11 }
 0x18f   :  { %v3016_v16 = vsel %vm2504_vm11, %v1622_v4, %v2760_v9  ;;  %vm2503_vm12 = vcmp.gt.f32.partialorder %v1617_v10, 0.0  ;;  %v2759_v17 = vmul.f32 0.01, %v1617_v10  ;;  %v1632_v18 = vadd.f32 %v17607_v1, %v15379_v14  ;;  %15653 = vmatmul.mubr.msk.f32.gmra.mxu1 %vm3173_vm2, %v3494_v15  ;;  %15524 = vmatprep.mubr.msk.f32.mxu0 %vm291_vm0, %v224_v7  ;;  %v235_v7 = vld [vmem:[%s21891_s0 + $0x688] sm:$0xff]  ;;  %v236_v9 = vld [vmem:[%s21891_s0 + $0x690] sm:$0xff] }
 0x190   :  { %3273 = vst.msk [vmem:[#allocation2 + $0x318] sm:$0xff] %vm3173_vm2, %v3016_v16  ;;  %v1626_v20 = vpop.f32.mrf.mxu0 }
 0x191   :  { %v3015_v22 = vsel %vm2503_vm12, %v1617_v10, %v2759_v17  ;;  %vm2506_vm13 = vcmp.gt.f32.partialorder %v1632_v18, 0.0  ;;  %v2762_v23 = vmul.f32 0.01, %v1632_v18  ;;  %v1627_v24 = vadd.f32 %v17607_v1, %v1626_v20 }
 0x192   :  { %3272 = vst.msk [vmem:[#allocation2 + $0x310] sm:$0xff] %vm3173_vm2, %v3015_v22  ;;  %v15382_v25 = vpop.f32.mrf.mxu0  ;;  %15525 = vmatmul.mubr.msk.f32.gmra.mxu0 %vm291_vm0, %v225_v19  ;;  %v237_v19 = vld [vmem:[%s21891_s0 + $0x698] sm:$0xff] }
 0x193   :  { %v3018_v26 = vsel %vm2506_vm13, %v1632_v18, %v2762_v23  ;;  %vm2505_vm14 = vcmp.gt.f32.partialorder %v1627_v24, 0.0  ;;  %v2761_v27 = vmul.f32 0.01, %v1627_v24  ;;  %15527 = vmatprep.mubr.msk.f32.mxu0 %vm291_vm0, %v226_v21  ;;  %v3496_v35 = vld [vmem:[#allocation2 + $0x308] sm:$0xff]  ;;  %v238_v21 = vld [vmem:[%s21891_s0 + $0x6a0] sm:$0xff] }
 0x194   :  { %3275 = vst.msk [vmem:[#allocation2 + $0x328] sm:$0xff] %vm3173_vm2, %v3018_v26  ;;  %v1636_v29 = vpop.f32.mrf.mxu0 }
 0x195   :  { %v3017_v31 = vsel %vm2505_vm14, %v1627_v24, %v2761_v27  ;;  %v1637_v32 = vadd.f32 %v17607_v1, %v1636_v29  ;;  %v3495_v33 = vld [vmem:[#allocation2 + $0x300] sm:$0xff] }
 0x196   :  { %3274 = vst.msk [vmem:[#allocation2 + $0x320] sm:$0xff] %vm3173_vm2, %v3017_v31  ;;  %v15385_v34 = vpop.f32.mrf.mxu0  ;;  %15528 = vmatmul.mubr.msk.f32.gmra.mxu0 %vm291_vm0, %v227_v28  ;;  %15655 = vmatprep.mubr.msk.f32.mxu1 %vm3173_vm2, %v3495_v33  ;;  %v239_v31 = vld [vmem:[%s21891_s0 + $0x6a8] sm:$0xff]  ;;  %v240_v33 = vld [vmem:[%s21891_s0 + $0x6b0] sm:$0xff] }
 0x197   :  { %vm2507_vm15 = vcmp.gt.f32.partialorder %v1637_v32, 0.0  ;;  %v2763_v37 = vmul.f32 0.01, %v1637_v32  ;;  %v1652_v38 = vadd.f32 %v17607_v1, %v15385_v34  ;;  %15656 = vmatmul.mubr.msk.f32.gmra.mxu1 %vm3173_vm2, %v3496_v35  ;;  %15530 = vmatprep.mubr.msk.f32.mxu0 %vm291_vm0, %v228_v30  ;;  %v3498_v47 = vld [vmem:[#allocation2 + $0x318] sm:$0xff] }
 0x198   :  { %v1646_v40 = vpop.f32.mrf.mxu0 }
 0x199   :  { %v3019_v42 = vsel %vm2507_vm15, %v1637_v32, %v2763_v37  ;;  %vm2510_vm1 = vcmp.gt.f32.partialorder %v1652_v38, 0.0  ;;  %v2766_v43 = vmul.f32 0.01, %v1652_v38  ;;  %v1647_v44 = vadd.f32 %v17607_v1, %v1646_v40  ;;  %v3497_v45 = vld [vmem:[#allocation2 + $0x310] sm:$0xff] }
 0x19a   :  { %3276 = vst.msk [vmem:[#allocation2 + $0x330] sm:$0xff] %vm3173_vm2, %v3019_v42  ;;  %v15388_v46 = vpop.f32.mrf.mxu0  ;;  %15531 = vmatmul.mubr.msk.f32.gmra.mxu0 %vm291_vm0, %v229_v39  ;;  %15658 = vmatprep.mubr.msk.f32.mxu1 %vm3173_vm2, %v3497_v45  ;;  %v241_v45 = vld [vmem:[%s21891_s0 + $0x6b8] sm:$0xff] }
 0x19b   :  { %v3022_v48 = vsel %vm2510_vm1, %v1652_v38, %v2766_v43  ;;  %vm2509_vm3 = vcmp.gt.f32.partialorder %v1647_v44, 0.0  ;;  %v2765_v49 = vmul.f32 0.01, %v1647_v44  ;;  %v1662_v50 = vadd.f32 %v17607_v1, %v15388_v46  ;;  %15659 = vmatmul.mubr.msk.f32.gmra.mxu1 %vm3173_vm2, %v3498_v47  ;;  %15533 = vmatprep.mubr.msk.f32.mxu0 %vm291_vm0, %v230_v41  ;;  %v3500_v57 = vld [vmem:[#allocation2 + $0x328] sm:$0xff]  ;;  %v242_v47 = vld [vmem:[%s21891_s0 + $0x6c0] sm:$0xff] }
 0x19c   :  { %3279 = vst.msk [vmem:[#allocation2 + $0x348] sm:$0xff] %vm3173_vm2, %v3022_v48  ;;  %v1656_v52 = vpop.f32.mrf.mxu0 }
 0x19d   :  { %v3021_v54 = vsel %vm2509_vm3, %v1647_v44, %v2765_v49  ;;  %vm2512_vm4 = vcmp.gt.f32.partialorder %v1662_v50, 0.0  ;;  %v2768_v55 = vmul.f32 0.01, %v1662_v50  ;;  %v1657_v56 = vadd.f32 %v17607_v1, %v1656_v52  ;;  %v3499_v36 = vld [vmem:[#allocation2 + $0x320] sm:$0xff]  ;;  %v17994_v52 = vld [vmem:[#allocation2 + $0x8] sm:$0xff] }
 0x19e   :  { %3278 = vst.msk [vmem:[#allocation2 + $0x340] sm:$0xff] %vm3173_vm2, %v3021_v54  ;;  %v15391_v13 = vpop.f32.mrf.mxu0  ;;  %15534 = vmatmul.mubr.msk.f32.gmra.mxu0 %vm291_vm0, %v231_v51  ;;  %15661 = vmatprep.mubr.msk.f32.mxu1 %vm3173_vm2, %v3499_v36  ;;  %v3430_v44 = vld [vmem:[#allocation2] sm:$0xff]  ;;  %v243_v36 = vld [vmem:[%s21891_s0 + $0x6c8] sm:$0xff] }
 0x19f   :  { %v3024_v58 = vsel %vm2512_vm4, %v1662_v50, %v2768_v55  ;;  %vm2511_vm5 = vcmp.gt.f32.partialorder %v1657_v56, 0.0  ;;  %v2767_v59 = vmul.f32 0.01, %v1657_v56  ;;  %v1672_v60 = vadd.f32 %v17607_v1, %v15391_v13  ;;  %15662 = vmatmul.mubr.msk.f32.gmra.mxu1 %vm3173_vm2, %v3500_v57  ;;  %15536 = vmatprep.mubr.msk.f32.mxu0 %vm291_vm0, %v232_v53  ;;  %v13621_v53 = vld [vmem:[%s21893_s3 + $0x50] sm:$0xff] }
 0x1a0   :  { %3281 = vst.msk [vmem:[#allocation2 + $0x358] sm:$0xff] %vm3173_vm2, %v3024_v58  ;;  %v1666_v62 = vpop.f32.mrf.mxu0  ;;  %v244_v57 = vld [vmem:[%s21891_s0 + $0x6d0] sm:$0xff] }
 0x1a1   :  { %v3023_v0 = vsel %vm2511_vm5, %v1657_v56, %v2767_v59  ;;  %vm2514_vm6 = vcmp.gt.f32.partialorder %v1672_v60, 0.0  ;;  %v2770_v2 = vmul.f32 0.01, %v1672_v60  ;;  %v1667_v3 = vadd.f32 %v17607_v1, %v1666_v62  ;;  %v18001_v56 = vld [vmem:[#allocation2 + $0x10] sm:$0xff] }
 0x1a2   :  { %3280 = vst.msk [vmem:[#allocation2 + $0x350] sm:$0xff] %vm3173_vm2, %v3023_v0  ;;  %v15394_v4 = vpop.f32.mrf.mxu0  ;;  %15537 = vmatmul.mubr.msk.f32.gmra.mxu0 %vm291_vm0, %v233_v61  ;;  %v245_v0 = vld [vmem:[%s21891_s0 + $0x6d8] sm:$0xff] }
 0x1a3   :  { %v3026_v5 = vsel %vm2514_vm6, %v1672_v60, %v2770_v2  ;;  %vm2513_vm7 = vcmp.gt.f32.partialorder %v1667_v3, 0.0  ;;  %v2769_v6 = vmul.f32 0.01, %v1667_v3  ;;  %15539 = vmatprep.mubr.msk.f32.mxu0 %vm291_vm0, %v234_v63  ;;  %v3502_v16 = vld [vmem:[#allocation2 + $0x348] sm:$0xff]  ;;  %v18024_v63 = vld [vmem:[#allocation2 + $0x20] sm:$0xff] }
 0x1a4   :  { %3283 = vst.msk [vmem:[#allocation2 + $0x368] sm:$0xff] %vm3173_vm2, %v3026_v5  ;;  %v1676_v8 = vpop.f32.mrf.mxu0  ;;  %v13620_v60 = vld [vmem:[%s21893_s3 + $0x48] sm:$0xff]  ;;  %v13619_v2 = vld [vmem:[%s21893_s3 + $0x40] sm:$0xff] }
 0x1a5   :  { %v3025_v10 = vsel %vm2513_vm7, %v1667_v3, %v2769_v6  ;;  %v1677_v11 = vadd.f32 %v17607_v1, %v1676_v8  ;;  %v3501_v14 = vld [vmem:[#allocation2 + $0x340] sm:$0xff]  ;;  %v18045_v8 = vld [vmem:[%s21893_s3 + $0x78] sm:$0xff] }
 0x1a6   :  { %3282 = vst.msk [vmem:[#allocation2 + $0x360] sm:$0xff] %vm3173_vm2, %v3025_v10  ;;  %v15397_v15 = vpop.f32.mrf.mxu0  ;;  %15540 = vmatmul.mubr.msk.f32.gmra.mxu0 %vm291_vm0, %v235_v7  ;;  %15664 = vmatprep.mubr.msk.f32.mxu1 %vm3173_vm2, %v3501_v14  ;;  %v246_v4 = vld [vmem:[%s21891_s0 + $0x6e0] sm:$0xff]  ;;  %v18040_v7 = vld [vmem:[#allocation2 + $0x28] sm:$0xff]  ;;  %v248_v14 = vld [vmem:[%s21891_s0 + $0x6f0] sm:$0xff] }
 0x1a7   :  { %vm2515_vm8 = vcmp.gt.f32.partialorder %v1677_v11, 0.0  ;;  %v2771_v17 = vmul.f32 0.01, %v1677_v11  ;;  %v1692_v18 = vadd.f32 %v17607_v1, %v15397_v15  ;;  %15665 = vmatmul.mubr.msk.f32.gmra.mxu1 %vm3173_vm2, %v3502_v16  ;;  %15542 = vmatprep.mubr.msk.f32.mxu0 %vm291_vm0, %v236_v9  ;;  %v3504_v27 = vld [vmem:[#allocation2 + $0x358] sm:$0xff]  ;;  %v18049_v9 = vld [vmem:[#allocation2 + $0x40] sm:$0xff]  ;;  %v247_v10 = vld [vmem:[%s21891_s0 + $0x6e8] sm:$0xff] }
 0x1a8   :  { %v1686_v20 = vpop.f32.mrf.mxu0  ;;  %v18062_v16 = vld [vmem:[#allocation2 + $0x48] sm:$0xff] }
 0x1a9   :  { %v3027_v22 = vsel %vm2515_vm8, %v1677_v11, %v2771_v17  ;;  %vm2518_vm9 = vcmp.gt.f32.partialorder %v1692_v18, 0.0  ;;  %v2774_v23 = vmul.f32 0.01, %v1692_v18  ;;  %v1687_v24 = vadd.f32 %v17607_v1, %v1686_v20  ;;  %v3503_v25 = vld [vmem:[#allocation2 + $0x350] sm:$0xff]  ;;  %v250_v20 = vld [vmem:[%s21891_s0 + $0x700] sm:$0xff] }
 0x1aa   :  { %3284 = vst.msk [vmem:[#allocation2 + $0x370] sm:$0xff] %vm3173_vm2, %v3027_v22  ;;  %v15400_v26 = vpop.f32.mrf.mxu0  ;;  %15543 = vmatmul.mubr.msk.f32.gmra.mxu0 %vm291_vm0, %v237_v19  ;;  %15667 = vmatprep.mubr.msk.f32.mxu1 %vm3173_vm2, %v3503_v25  ;;  %v18066_v17 = vld [vmem:[#allocation2 + $0x50] sm:$0xff]  ;;  %v18078_v22 = vld [vmem:[#allocation2 + $0x58] sm:$0xff] }
 0x1ab   :  { %v3030_v28 = vsel %vm2518_vm9, %v1692_v18, %v2774_v23  ;;  %vm2517_vm10 = vcmp.gt.f32.partialorder %v1687_v24, 0.0  ;;  %v2773_v29 = vmul.f32 0.01, %v1687_v24  ;;  %v1702_v30 = vadd.f32 %v17607_v1, %v15400_v26  ;;  %15668 = vmatmul.mubr.msk.f32.gmra.mxu1 %vm3173_vm2, %v3504_v27  ;;  %15545 = vmatprep.mubr.msk.f32.mxu0 %vm291_vm0, %v238_v21  ;;  %v17974_v1 = vld [vmem:[%s21892_s2] ss:$0 sm:$0xff]  ;;  %v3506_v40 = vld [vmem:[#allocation2 + $0x368] sm:$0xff] }
 0x1ac   :  { %3287 = vst.msk [vmem:[#allocation2 + $0x388] sm:$0xff] %vm3173_vm2, %v3030_v28  ;;  %v1696_v32 = vpop.f32.mrf.mxu0  ;;  %v249_v18 = vld [vmem:[%s21891_s0 + $0x6f8] sm:$0xff]  ;;  %v18082_v23 = vld [vmem:[#allocation2 + $0x60] sm:$0xff]  ;;  %v252_v26 = vld [vmem:[%s21891_s0 + $0x710] sm:$0xff] }
 0x1ad   :  { %v3029_v34 = vsel %vm2517_vm10, %v1687_v24, %v2773_v29  ;;  %vm2520_vm11 = vcmp.gt.f32.partialorder %v1702_v30, 0.0  ;;  %v2776_v35 = vmul.f32 0.01, %v1702_v30  ;;  %v1697_v37 = vadd.f32 %v17974_v1, %v1696_v32  ;;  %v3505_v38 = vld [vmem:[#allocation2 + $0x360] sm:$0xff]  ;;  %v251_v24 = vld [vmem:[%s21891_s0 + $0x708] sm:$0xff]  ;;  %v18096_v27 = vld [vmem:[%s21893_s3 + $0x158] sm:$0xff] }
 0x1ae   :  { %3286 = vst.msk [vmem:[#allocation2 + $0x380] sm:$0xff] %vm3173_vm2, %v3029_v34  ;;  %v15403_v39 = vpop.f32.mrf.mxu0  ;;  %15546 = vmatmul.mubr.msk.f32.gmra.mxu0 %vm291_vm0, %v239_v31  ;;  %15670 = vmatprep.mubr.msk.f32.mxu1 %vm3173_vm2, %v3505_v38  ;;  %v18099_v29 = vld [vmem:[#allocation2 + $0x68] sm:$0xff]  ;;  %v18105_v31 = vld [vmem:[#allocation2 + $0x80] sm:$0xff]  ;;  %v253_v32 = vld [vmem:[%s21891_s0 + $0x718] sm:$0xff] }
 0x1af   :  { %v3032_v41 = vsel %vm2520_vm11, %v1702_v30, %v2776_v35  ;;  %vm2519_vm12 = vcmp.gt.f32.partialorder %v1697_v37, 0.0  ;;  %v2775_v42 = vmul.f32 0.01, %v1697_v37  ;;  %v1712_v43 = vadd.f32 %v17974_v1, %v15403_v39  ;;  %15671 = vmatmul.mubr.msk.f32.gmra.mxu1 %vm3173_vm2, %v3506_v40  ;;  %15548 = vmatprep.mubr.msk.f32.mxu0 %vm291_vm0, %v240_v33  ;;  %v254_v34 = vld [vmem:[%s21891_s0 + $0x720] sm:$0xff]  ;;  %v18118_v39 = vld [vmem:[#allocation2 + $0x88] sm:$0xff] }
 0x1b0   :  { %3289 = vst.msk [vmem:[#allocation2 + $0x398] sm:$0xff] %vm3173_vm2, %v3032_v41  ;;  %v1706_v46 = vpop.f32.mrf.mxu0  ;;  %15681 = vmatprep.mubr.msk.f32.mxu1 %vm3173_vm2, %v3430_v44  ;;  %16231 = vmatprep.subr.mxu0 %v18096_v27  ;;  %v255_v44 = vld [vmem:[%s21891_s0 + $0x728] sm:$0xff] }
 0x1b1   :  { %v3031_v48 = vsel %vm2519_vm12, %v1697_v37, %v2775_v42  ;;  %vm2522_vm13 = vcmp.gt.f32.partialorder %v1712_v43, 0.0  ;;  %v2778_v49 = vmul.f32 0.01, %v1712_v43  ;;  %v1707_v50 = vadd.f32 %v17974_v1, %v1706_v46  ;;  %v256_v46 = vld [vmem:[%s21891_s0 + $0x730] sm:$0xff] }
 0x1b2   :  { %3288 = vst.msk [vmem:[#allocation2 + $0x390] sm:$0xff] %vm3173_vm2, %v3031_v48  ;;  %v15406_v51 = vpop.f32.mrf.mxu0  ;;  %15549 = vmatmul.mubr.msk.f32.gmra.mxu0 %vm291_vm0, %v241_v45 }
 0x1b3   :  { %v3034_v54 = vsel %vm2522_vm13, %v1712_v43, %v2778_v49  ;;  %vm2521_vm14 = vcmp.gt.f32.partialorder %v1707_v50, 0.0  ;;  %v2777_v55 = vmul.f32 0.01, %v1707_v50  ;;  %15682 = vmatmul.mubr.msk.f32.vlgmr.msra.gmra.mxu1 %vm3173_vm2, %v17994_v52  ;;  %15551 = vmatprep.mubr.msk.f32.mxu0 %vm291_vm0, %v242_v47  ;;  %v18123_v43 = vld [vmem:[#allocation2 + $0x90] sm:$0xff]  ;;  %v18138_v51 = vld [vmem:[#allocation2 + $0x98] sm:$0xff] }
 0x1b4   :  { %3291 = vst.msk [vmem:[#allocation2 + $0x3a8] sm:$0xff] %vm3173_vm2, %v3034_v54  ;;  %15736 = vmatpush3.msra.mxu1 %v17713_v12  ;;  %v1716_v13 = vpop.f32.mrf.mxu0  ;;  %15684 = vmatprep.mubr.msk.f32.mxu1 %vm3173_vm2, %v18001_v56  ;;  %v18020_v12 = vld [vmem:[#allocation2 + $0x18] sm:$0xff] }
 0x1b5   :  { %v3033_v58 = vsel %vm2521_vm14, %v1707_v50, %v2777_v55  ;;  %v1717_v59 = vadd.f32 %v17974_v1, %v1716_v13  ;;  %15737 = vmatprep.subr.mxu1 %v13621_v53  ;;  %v257_v13 = vld [vmem:[%s21891_s0 + $0x738] sm:$0xff] }
 0x1b6   :  { %3290 = vst.msk [vmem:[#allocation2 + $0x3a0] sm:$0xff] %vm3173_vm2, %v3033_v58  ;;  %v15409_v61 = vpop.f32.mrf.mxu0  ;;  %15552 = vmatmul.mubr.msk.f32.gmra.mxu0 %vm291_vm0, %v243_v36  ;;  %15738 = vmatpush3.msra.mxu1 %v13621_v53  ;;  %v18143_v36 = vld [vmem:[#allocation2 + $0xa0] sm:$0xff] }
 0x1b7   :  { %vm2523_vm15 = vcmp.gt.f32.partialorder %v1717_v59, 0.0  ;;  %v2779_v62 = vmul.f32 0.01, %v1717_v59  ;;  %15685 = vmatmul.mubr.msk.f32.gmra.mxu1 %vm3173_vm2, %v18020_v12  ;;  %15554 = vmatprep.mubr.msk.f32.mxu0 %vm291_vm0, %v244_v57  ;;  %v258_v58 = vld [vmem:[%s21891_s0 + $0x740] sm:$0xff] }
 0x1b8   :  { %v1726_v3 = vpop.f32.mrf.mxu0  ;;  %15687 = vmatprep.mubr.msk.f32.mxu1 %vm3173_vm2, %v18024_v63  ;;  %15739 = vmatprep.subr.mxu1 %v13620_v60 }
 0x1b9   :  { %v3035_v5 = vsel %vm2523_vm15, %v1717_v59, %v2779_v62  ;;  %15740 = vmatpush3.msra.mxu1 %v13620_v60 }
 0x1ba   :  { %3292 = vst.msk [vmem:[#allocation2 + $0x3b0] sm:$0xff] %vm3173_vm2, %v3035_v5  ;;  %v15412_v6 = vpop.f32.mrf.mxu0  ;;  %15555 = vmatmul.mubr.msk.f32.gmra.mxu0 %vm291_vm0, %v245_v0  ;;  %15741 = vmatprep.subr.mxu1 %v13619_v2  ;;  %v18158_v0 = vld [vmem:[#allocation2 + $0xa8] sm:$0xff] }
 0x1bb   :  { %15688 = vmatmul.mubr.msk.f32.gmra.mxu1 %vm3173_vm2, %v18040_v7  ;;  %15557 = vmatprep.mubr.msk.f32.mxu0 %vm291_vm0, %v246_v4  ;;  %v18162_v4 = vld [vmem:[#allocation2 + $0xc0] sm:$0xff]  ;;  %v259_v5 = vld [vmem:[%s21891_s0 + $0x748] sm:$0xff] }
 0x1bc   :  { %v1736_v11 = vpop.f32.mrf.mxu0  ;;  %15690 = vmatprep.mubr.msk.f32.mxu1 %vm3173_vm2, %v18049_v9  ;;  %15742 = vmatpush3.msra.mxu1 %v13619_v2 }
 0x1bd   :  { %15797 = vmatprep.subr.mxu1 %v18045_v8 }
 0x1be   :  { %v15415_v15 = vpop.f32.mrf.mxu0  ;;  %15558 = vmatmul.mubr.msk.f32.gmra.mxu0 %vm291_vm0, %v247_v10  ;;  %v260_v10 = vld [vmem:[%s21891_s0 + $0x750] sm:$0xff] }
 0x1bf   :  { %15691 = vmatmul.mubr.msk.f32.gmra.mxu1 %vm3173_vm2, %v18062_v16  ;;  %15560 = vmatprep.mubr.msk.f32.mxu0 %vm291_vm0, %v248_v14 }
 0x1c0   :  { %v1746_v19 = vpop.f32.mrf.mxu0  ;;  %15693 = vmatprep.mubr.msk.f32.mxu1 %vm3173_vm2, %v18066_v17 }
 0x1c2   :  { %v15418_v21 = vpop.f32.mrf.mxu0  ;;  %15561 = vmatmul.mubr.msk.f32.gmra.mxu0 %vm291_vm0, %v249_v18  ;;  %v18177_v18 = vld [vmem:[#allocation2 + $0xc8] sm:$0xff] }
 0x1c3   :  { %15694 = vmatmul.mubr.msk.f32.gmra.mxu1 %vm3173_vm2, %v18078_v22  ;;  %15563 = vmatprep.mubr.msk.f32.mxu0 %vm291_vm0, %v250_v20  ;;  %v18182_v21 = vld [vmem:[#allocation2 + $0xd0] sm:$0xff] }
 0x1c4   :  { %v1756_v25 = vpop.f32.mrf.mxu0  ;;  %15696 = vmatprep.mubr.msk.f32.mxu1 %vm3173_vm2, %v18082_v23 }
 0x1c6   :  { %v15421_v28 = vpop.f32.mrf.mxu0  ;;  %15564 = vmatmul.mubr.msk.f32.gmra.mxu0 %vm291_vm0, %v251_v24  ;;  %v261_v24 = vld [vmem:[%s21891_s0 + $0x758] sm:$0xff] }
 0x1c7   :  { %v1772_v30 = vadd.f32 %v17974_v1, %v15421_v28  ;;  %15697 = vmatmul.mubr.msk.f32.gmra.mxu1 %vm3173_vm2, %v18099_v29  ;;  %15566 = vmatprep.mubr.msk.f32.mxu0 %vm291_vm0, %v252_v26  ;;  %v262_v26 = vld [vmem:[%s21891_s0 + $0x760] sm:$0xff] }
 0x1c8   :  { %v1766_v33 = vpop.f32.mrf.mxu0  ;;  %15699 = vmatprep.mubr.msk.f32.mxu1 %vm3173_vm2, %v18105_v31 }
 0x1c9   :  { %vm2534_vm1 = vcmp.gt.f32.partialorder %v1772_v30, 0.0  ;;  %v2790_v35 = vmul.f32 0.01, %v1772_v30  ;;  %v1767_v37 = vadd.f32 %v17974_v1, %v1766_v33 }
 0x1ca   :  { %v15424_v38 = vpop.f32.mrf.mxu0  ;;  %15567 = vmatmul.mubr.msk.f32.gmra.mxu0 %vm291_vm0, %v253_v32 }
 0x1cb   :  { %v3046_v40 = vsel %vm2534_vm1, %v1772_v30, %v2790_v35  ;;  %vm2533_vm3 = vcmp.gt.f32.partialorder %v1767_v37, 0.0  ;;  %v2789_v41 = vmul.f32 0.01, %v1767_v37  ;;  %v1782_v42 = vadd.f32 %v17974_v1, %v15424_v38  ;;  %15700 = vmatmul.mubr.msk.f32.gmra.mxu1 %vm3173_vm2, %v18118_v39  ;;  %15569 = vmatprep.mubr.msk.f32.mxu0 %vm291_vm0, %v254_v34  ;;  %v18196_v34 = vld [vmem:[#allocation2 + $0xd8] sm:$0xff] }
 0x1cc   :  { %3303 = vst.msk [vmem:[#allocation2 + $0x408] sm:$0xff] %vm3173_vm2, %v3046_v40  ;;  %v1776_v45 = vpop.f32.mrf.mxu0  ;;  %15702 = vmatprep.mubr.msk.f32.mxu1 %vm3173_vm2, %v18123_v43  ;;  %v18201_v40 = vld [vmem:[#allocation2 + $0xe0] sm:$0xff] }
 0x1cd   :  { %v3045_v47 = vsel %vm2533_vm3, %v1767_v37, %v2789_v41  ;;  %vm2536_vm4 = vcmp.gt.f32.partialorder %v1782_v42, 0.0  ;;  %v2792_v48 = vmul.f32 0.01, %v1782_v42  ;;  %v1777_v49 = vadd.f32 %v17974_v1, %v1776_v45  ;;  %v263_v41 = vld [vmem:[%s21891_s0 + $0x768] sm:$0xff] }
 0x1ce   :  { %3302 = vst.msk [vmem:[#allocation2 + $0x400] sm:$0xff] %vm3173_vm2, %v3045_v47  ;;  %v15427_v50 = vpop.f32.mrf.mxu0  ;;  %15570 = vmatmul.mubr.msk.f32.gmra.mxu0 %vm291_vm0, %v255_v44  ;;  %v264_v44 = vld [vmem:[%s21891_s0 + $0x770] sm:$0xff] }
 0x1cf   :  { %v3048_v53 = vsel %vm2536_vm4, %v1782_v42, %v2792_v48  ;;  %vm2535_vm5 = vcmp.gt.f32.partialorder %v1777_v49, 0.0  ;;  %v2791_v54 = vmul.f32 0.01, %v1777_v49  ;;  %v1792_v55 = vadd.f32 %v17974_v1, %v15427_v50  ;;  %15703 = vmatmul.mubr.msk.f32.gmra.mxu1 %vm3173_vm2, %v18138_v51  ;;  %15572 = vmatprep.mubr.msk.f32.mxu0 %vm291_vm0, %v256_v46 }
 0x1d0   :  { %3305 = vst.msk [vmem:[#allocation2 + $0x418] sm:$0xff] %vm3173_vm2, %v3048_v53  ;;  %v1786_v57 = vpop.f32.mrf.mxu0  ;;  %15705 = vmatprep.mubr.msk.f32.mxu1 %vm3173_vm2, %v18143_v36 }
 0x1d1   :  { %v3047_v59 = vsel %vm2535_vm5, %v1777_v49, %v2791_v54  ;;  %vm2538_vm6 = vcmp.gt.f32.partialorder %v1792_v55, 0.0  ;;  %v2794_v60 = vmul.f32 0.01, %v1792_v55  ;;  %v1787_v61 = vadd.f32 %v17974_v1, %v1786_v57  ;;  %v18216_v49 = vld [vmem:[#allocation2 + $0xe8] sm:$0xff] }
 0x1d2   :  { %3304 = vst.msk [vmem:[#allocation2 + $0x410] sm:$0xff] %vm3173_vm2, %v3047_v59  ;;  %v15430_v62 = vpop.f32.mrf.mxu0  ;;  %15573 = vmatmul.mubr.msk.f32.gmra.mxu0 %vm291_vm0, %v257_v13  ;;  %v265_v13 = vld [vmem:[%s21891_s0 + $0x778] sm:$0xff] }
 0x1d3   :  { %v3050_v2 = vsel %vm2538_vm6, %v1792_v55, %v2794_v60  ;;  %vm2537_vm7 = vcmp.gt.f32.partialorder %v1787_v61, 0.0  ;;  %v2793_v3 = vmul.f32 0.01, %v1787_v61  ;;  %15706 = vmatmul.mubr.msk.f32.gmra.mxu1 %vm3173_vm2, %v18158_v0  ;;  %15575 = vmatprep.mubr.msk.f32.mxu0 %vm291_vm0, %v258_v58  ;;  %v18221_v55 = vld [vmem:[#allocation2 + $0x100] sm:$0xff] }
 0x1d4   :  { %3307 = vst.msk [vmem:[#allocation2 + $0x428] sm:$0xff] %vm3173_vm2, %v3050_v2  ;;  %v1796_v6 = vpop.f32.mrf.mxu0  ;;  %15708 = vmatprep.mubr.msk.f32.mxu1 %vm3173_vm2, %v18162_v4  ;;  %v266_v58 = vld [vmem:[%s21891_s0 + $0x780] sm:$0xff]  ;;  %v18236_v2 = vld [vmem:[#allocation2 + $0x108] sm:$0xff] }
 0x1d5   :  { %v3049_v11 = vsel %vm2537_vm7, %v1787_v61, %v2793_v3  ;;  %v1797_v14 = vadd.f32 %v17974_v1, %v1796_v6  ;;  %v18240_v6 = vld [vmem:[#allocation2 + $0x110] sm:$0xff] }
 0x1d6   :  { %3306 = vst.msk [vmem:[#allocation2 + $0x420] sm:$0xff] %vm3173_vm2, %v3049_v11  ;;  %v15433_v15 = vpop.f32.mrf.mxu0  ;;  %15576 = vmatmul.mubr.msk.f32.gmra.mxu0 %vm291_vm0, %v259_v5 }
 0x1d7   :  { %vm2539_vm8 = vcmp.gt.f32.partialorder %v1797_v14, 0.0  ;;  %v2795_v19 = vmul.f32 0.01, %v1797_v14  ;;  %v1812_v20 = vadd.f32 %v17974_v1, %v15433_v15  ;;  %15709 = vmatmul.mubr.msk.f32.gmra.mxu1 %vm3173_vm2, %v18177_v18  ;;  %15578 = vmatprep.mubr.msk.f32.mxu0 %vm291_vm0, %v260_v10  ;;  %v267_v10 = vld [vmem:[%s21891_s0 + $0x788] sm:$0xff] }
 0x1d8   :  { %v1806_v25 = vpop.f32.mrf.mxu0  ;;  %15711 = vmatprep.mubr.msk.f32.mxu1 %vm3173_vm2, %v18182_v21 }
 0x1d9   :  { %v3051_v28 = vsel %vm2539_vm8, %v1797_v14, %v2795_v19  ;;  %vm2542_vm9 = vcmp.gt.f32.partialorder %v1812_v20, 0.0  ;;  %v2798_v30 = vmul.f32 0.01, %v1812_v20  ;;  %v1807_v32 = vadd.f32 %v17974_v1, %v1806_v25  ;;  %v268_v14 = vld [vmem:[%s21891_s0 + $0x790] sm:$0xff] }
 0x1da   :  { %3308 = vst.msk [vmem:[#allocation2 + $0x430] sm:$0xff] %vm3173_vm2, %v3051_v28  ;;  %v15436_v33 = vpop.f32.mrf.mxu0  ;;  %15579 = vmatmul.mubr.msk.f32.gmra.mxu0 %vm291_vm0, %v261_v24  ;;  %v18255_v24 = vld [vmem:[#allocation2 + $0x118] sm:$0xff]  ;;  %v18260_v28 = vld [vmem:[#allocation2 + $0x120] sm:$0xff] }
 0x1db   :  { %v3054_v35 = vsel %vm2542_vm9, %v1812_v20, %v2798_v30  ;;  %vm2541_vm10 = vcmp.gt.f32.partialorder %v1807_v32, 0.0  ;;  %v2797_v37 = vmul.f32 0.01, %v1807_v32  ;;  %v1822_v38 = vadd.f32 %v17974_v1, %v15436_v33  ;;  %15712 = vmatmul.mubr.msk.f32.gmra.mxu1 %vm3173_vm2, %v18196_v34  ;;  %15581 = vmatprep.mubr.msk.f32.mxu0 %vm291_vm0, %v262_v26  ;;  %v269_v30 = vld [vmem:[%s21891_s0 + $0x798] sm:$0xff]  ;;  %v270_v33 = vld [vmem:[%s21891_s0 + $0x7a0] sm:$0xff] }
 0x1dc   :  { %3311 = vst.msk [vmem:[#allocation2 + $0x448] sm:$0xff] %vm3173_vm2, %v3054_v35  ;;  %v1816_v42 = vpop.f32.mrf.mxu0  ;;  %15714 = vmatprep.mubr.msk.f32.mxu1 %vm3173_vm2, %v18201_v40 }
 0x1dd   :  { %v3053_v45 = vsel %vm2541_vm10, %v1807_v32, %v2797_v37  ;;  %vm2544_vm11 = vcmp.gt.f32.partialorder %v1822_v38, 0.0  ;;  %v2800_v46 = vmul.f32 0.01, %v1822_v38  ;;  %v1817_v47 = vadd.f32 %v17974_v1, %v1816_v42  ;;  %v18274_v42 = vld [vmem:[#allocation2 + $0x128] sm:$0xff] }
 0x1de   :  { %3310 = vst.msk [vmem:[#allocation2 + $0x440] sm:$0xff] %vm3173_vm2, %v3053_v45  ;;  %v15439_v48 = vpop.f32.mrf.mxu0  ;;  %15582 = vmatmul.mubr.msk.f32.gmra.mxu0 %vm291_vm0, %v263_v41 }
 0x1df   :  { %v3056_v50 = vsel %vm2544_vm11, %v1822_v38, %v2800_v46  ;;  %vm2543_vm12 = vcmp.gt.f32.partialorder %v1817_v47, 0.0  ;;  %v2799_v53 = vmul.f32 0.01, %v1817_v47  ;;  %v1832_v54 = vadd.f32 %v17974_v1, %v15439_v48  ;;  %15715 = vmatmul.mubr.msk.f32.gmra.mxu1 %vm3173_vm2, %v18216_v49  ;;  %15584 = vmatprep.mubr.msk.f32.mxu0 %vm291_vm0, %v264_v44  ;;  %v271_v48 = vld [vmem:[%s21891_s0 + $0x7a8] sm:$0xff] }
 0x1e0   :  { %3313 = vst.msk [vmem:[#allocation2 + $0x458] sm:$0xff] %vm3173_vm2, %v3056_v50  ;;  %v1826_v57 = vpop.f32.mrf.mxu0  ;;  %15717 = vmatprep.mubr.msk.f32.mxu1 %vm3173_vm2, %v18221_v55 }
 0x1e1   :  { %v3055_v59 = vsel %vm2543_vm12, %v1817_v47, %v2799_v53  ;;  %vm2546_vm13 = vcmp.gt.f32.partialorder %v1832_v54, 0.0  ;;  %v2802_v60 = vmul.f32 0.01, %v1832_v54  ;;  %v1827_v61 = vadd.f32 %v17974_v1, %v1826_v57  ;;  %v18279_v47 = vld [vmem:[#allocation2 + $0x140] sm:$0xff]  ;;  %v272_v53 = vld [vmem:[%s21891_s0 + $0x7b0] sm:$0xff] }
 0x1e2   :  { %3312 = vst.msk [vmem:[#allocation2 + $0x450] sm:$0xff] %vm3173_vm2, %v3055_v59  ;;  %v15442_v62 = vpop.f32.mrf.mxu0  ;;  %15585 = vmatmul.mubr.msk.f32.gmra.mxu0 %vm291_vm0, %v265_v13  ;;  %v18294_v59 = vld [vmem:[#allocation2 + $0x148] sm:$0xff] }
 0x1e3   :  { %v3058_v3 = vsel %vm2546_vm13, %v1832_v54, %v2802_v60  ;;  %vm2545_vm14 = vcmp.gt.f32.partialorder %v1827_v61, 0.0  ;;  %v2801_v5 = vmul.f32 0.01, %v1827_v61  ;;  %15718 = vmatmul.mubr.msk.f32.gmra.mxu1 %vm3173_vm2, %v18236_v2  ;;  %15587 = vmatprep.mubr.msk.f32.mxu0 %vm291_vm0, %v266_v58 }
 0x1e4   :  { %3315 = vst.msk [vmem:[#allocation2 + $0x468] sm:$0xff] %vm3173_vm2, %v3058_v3  ;;  %v1836_v11 = vpop.f32.mrf.mxu0  ;;  %15720 = vmatprep.mubr.msk.f32.mxu1 %vm3173_vm2, %v18240_v6  ;;  %v18299_v3 = vld [vmem:[#allocation2 + $0x150] sm:$0xff] }
 0x1e5   :  { %v3057_v15 = vsel %vm2545_vm14, %v1827_v61, %v2801_v5  ;;  %v1837_v19 = vadd.f32 %v17974_v1, %v1836_v11  ;;  %v273_v5 = vld [vmem:[%s21891_s0 + $0x7b8] sm:$0xff]  ;;  %v274_v11 = vld [vmem:[%s21891_s0 + $0x7c0] sm:$0xff] }
 0x1e6   :  { %3314 = vst.msk [vmem:[#allocation2 + $0x460] sm:$0xff] %vm3173_vm2, %v3057_v15  ;;  %v15445_v20 = vpop.f32.mrf.mxu0  ;;  %15588 = vmatmul.mubr.msk.f32.gmra.mxu0 %vm291_vm0, %v267_v10 }
 0x1e7   :  { %vm2547_vm15 = vcmp.gt.f32.partialorder %v1837_v19, 0.0  ;;  %v2803_v25 = vmul.f32 0.01, %v1837_v19  ;;  %v1852_v26 = vadd.f32 %v17974_v1, %v15445_v20  ;;  %15721 = vmatmul.mubr.msk.f32.gmra.mxu1 %vm3173_vm2, %v18255_v24  ;;  %15590 = vmatprep.mubr.msk.f32.mxu0 %vm291_vm0, %v268_v14 }
 0x1e8   :  { %v1846_v32 = vpop.f32.mrf.mxu0  ;;  %15723 = vmatprep.mubr.msk.f32.mxu1 %vm3173_vm2, %v18260_v28 }
 0x1e9   :  { %v3059_v35 = vsel %vm2547_vm15, %v1837_v19, %v2803_v25  ;;  %vm2550_vm1 = vcmp.gt.f32.partialorder %v1852_v26, 0.0  ;;  %v2806_v37 = vmul.f32 0.01, %v1852_v26  ;;  %v1847_v38 = vadd.f32 %v17974_v1, %v1846_v32  ;;  %v18314_v25 = vld [vmem:[#allocation2 + $0x158] sm:$0xff]  ;;  %v18318_v32 = vld [vmem:[#allocation2 + $0x160] sm:$0xff] }
 0x1ea   :  { %3316 = vst.msk [vmem:[#allocation2 + $0x470] sm:$0xff] %vm3173_vm2, %v3059_v35  ;;  %v15448_v41 = vpop.f32.mrf.mxu0  ;;  %15591 = vmatmul.mubr.msk.f32.gmra.mxu0 %vm291_vm0, %v269_v30 }
 0x1eb   :  { %v3062_v44 = vsel %vm2550_vm1, %v1852_v26, %v2806_v37  ;;  %vm2549_vm3 = vcmp.gt.f32.partialorder %v1847_v38, 0.0  ;;  %v2805_v45 = vmul.f32 0.01, %v1847_v38  ;;  %v1862_v46 = vadd.f32 %v17974_v1, %v15448_v41  ;;  %15724 = vmatmul.mubr.msk.f32.gmra.mxu1 %vm3173_vm2, %v18274_v42  ;;  %15593 = vmatprep.mubr.msk.f32.mxu0 %vm291_vm0, %v270_v33  ;;  %v275_v33 = vld [vmem:[%s21891_s0 + $0x7c8] sm:$0xff]  ;;  %v276_v37 = vld [vmem:[%s21891_s0 + $0x7d0] sm:$0xff] }
 0x1ec   :  { %3319 = vst.msk [vmem:[#allocation2 + $0x488] sm:$0xff] %vm3173_vm2, %v3062_v44  ;;  %v1856_v50 = vpop.f32.mrf.mxu0  ;;  %15726 = vmatprep.mubr.msk.f32.mxu1 %vm3173_vm2, %v18279_v47 }
 0x1ed   :  { %v3061_v54 = vsel %vm2549_vm3, %v1847_v38, %v2805_v45  ;;  %vm2552_vm4 = vcmp.gt.f32.partialorder %v1862_v46, 0.0  ;;  %v2808_v13 = vmul.f32 0.01, %v1862_v46  ;;  %v1857_v57 = vadd.f32 %v17974_v1, %v1856_v50  ;;  %v18333_v45 = vld [vmem:[#allocation2 + $0x168] sm:$0xff]  ;;  %v277_v50 = vld [vmem:[%s21891_s0 + $0x7d8] sm:$0xff] }
 0x1ee   :  { %3318 = vst.msk [vmem:[#allocation2 + $0x480] sm:$0xff] %vm3173_vm2, %v3061_v54  ;;  %v15451_v58 = vpop.f32.mrf.mxu0  ;;  %15594 = vmatmul.mubr.msk.f32.gmra.mxu0 %vm291_vm0, %v271_v48  ;;  %v278_v54 = vld [vmem:[%s21891_s0 + $0x7e0] sm:$0xff] }
 0x1ef   :  { %v3064_v60 = vsel %vm2552_vm4, %v1862_v46, %v2808_v13  ;;  %vm2551_vm5 = vcmp.gt.f32.partialorder %v1857_v57, 0.0  ;;  %v2807_v61 = vmul.f32 0.01, %v1857_v57  ;;  %v1872_v62 = vadd.f32 %v17974_v1, %v15451_v58  ;;  %15727 = vmatmul.mubr.msk.f32.gmra.mxu1 %vm3173_vm2, %v18294_v59  ;;  %15596 = vmatprep.mubr.msk.f32.mxu0 %vm291_vm0, %v272_v53 }
 0x1f0   :  { %3321 = vst.msk [vmem:[#allocation2 + $0x498] sm:$0xff] %vm3173_vm2, %v3064_v60  ;;  %v1866_v10 = vpop.f32.mrf.mxu0  ;;  %15729 = vmatprep.mubr.msk.f32.mxu1 %vm3173_vm2, %v18299_v3 }
 0x1f1   :  { %v3063_v14 = vsel %vm2551_vm5, %v1857_v57, %v2807_v61  ;;  %vm2554_vm6 = vcmp.gt.f32.partialorder %v1872_v62, 0.0  ;;  %v2810_v15 = vmul.f32 0.01, %v1872_v62  ;;  %v1867_v19 = vadd.f32 %v17974_v1, %v1866_v10  ;;  %v13661_v61 = vld [vmem:[%s21893_s3 + $0x70] sm:$0xff]  ;;  %v279_v10 = vld [vmem:[%s21891_s0 + $0x7e8] sm:$0xff] }
 0x1f2   :  { %3320 = vst.msk [vmem:[#allocation2 + $0x490] sm:$0xff] %vm3173_vm2, %v3063_v14  ;;  %v15454_v20 = vpop.f32.mrf.mxu0  ;;  %15597 = vmatmul.mubr.msk.f32.gmra.mxu0 %vm291_vm0, %v273_v5  ;;  %v280_v14 = vld [vmem:[%s21891_s0 + $0x7f0] sm:$0xff] }
 0x1f3   :  { %v3066_v26 = vsel %vm2554_vm6, %v1872_v62, %v2810_v15  ;;  %vm2553_vm7 = vcmp.gt.f32.partialorder %v1867_v19, 0.0  ;;  %v2809_v30 = vmul.f32 0.01, %v1867_v19  ;;  %15730 = vmatmul.mubr.msk.f32.gmra.mxu1 %vm3173_vm2, %v18314_v25  ;;  %15599 = vmatprep.mubr.msk.f32.mxu0 %vm291_vm0, %v274_v11  ;;  %v13660_v20 = vld [vmem:[%s21893_s3 + $0x68] sm:$0xff] }
 0x1f4   :  { %3323 = vst.msk [vmem:[#allocation2 + $0x4a8] sm:$0xff] %vm3173_vm2, %v3066_v26  ;;  %v1876_v35 = vpop.f32.mrf.mxu0  ;;  %15732 = vmatprep.mubr.msk.f32.mxu1 %vm3173_vm2, %v18318_v32 }
 0x1f5   :  { %v3065_v38 = vsel %vm2553_vm7, %v1867_v19, %v2809_v30  ;;  %v1877_v41 = vadd.f32 %v17974_v1, %v1876_v35  ;;  %v13659_v35 = vld [vmem:[%s21893_s3 + $0x60] sm:$0xff] }
 0x1f6   :  { %3322 = vst.msk [vmem:[#allocation2 + $0x4a0] sm:$0xff] %vm3173_vm2, %v3065_v38  ;;  %v15457_v44 = vpop.f32.mrf.mxu0  ;;  %15600 = vmatmul.mubr.msk.f32.gmra.mxu0 %vm291_vm0, %v275_v33  ;;  %v281_v33 = vld [vmem:[%s21891_s0 + $0x7f8] sm:$0xff] }
 0x1f7   :  { %vm2555_vm8 = vcmp.gt.f32.partialorder %v1877_v41, 0.0  ;;  %v2811_v46 = vmul.f32 0.01, %v1877_v41  ;;  %v1892_v48 = vadd.f32 %v17974_v1, %v15457_v44  ;;  %15733 = vmatmul.mubr.msk.f32.gmra.mxu1 %vm3173_vm2, %v18333_v45  ;;  %15602 = vmatprep.mubr.msk.f32.mxu0 %vm291_vm0, %v276_v37 }
 0x1f8   :  { %v1886_v53 = vpop.f32.mrf.mxu0  ;;  %15743 = vmatprep.mubr.msk.f32.mxu1 %vm3173_vm2, %v17994_v52 }
 0x1f9   :  { %v3067_v13 = vsel %vm2555_vm8, %v1877_v41, %v2811_v46  ;;  %vm2558_vm9 = vcmp.gt.f32.partialorder %v1892_v48, 0.0  ;;  %v2814_v57 = vmul.f32 0.01, %v1892_v48  ;;  %v1887_v58 = vadd.f32 %v17974_v1, %v1886_v53  ;;  %v4224_v46 = vld [vmem:[#allocation2 + $0x30] sm:$0xff] }
 0x1fa   :  { %3324 = vst.msk [vmem:[#allocation2 + $0x4b0] sm:$0xff] %vm3173_vm2, %v3067_v13  ;;  %v15460_v60 = vpop.f32.mrf.mxu0  ;;  %15603 = vmatmul.mubr.msk.f32.gmra.mxu0 %vm291_vm0, %v277_v50 }
 0x1fb   :  { %v3070_v62 = vsel %vm2558_vm9, %v1892_v48, %v2814_v57  ;;  %vm2557_vm10 = vcmp.gt.f32.partialorder %v1887_v58, 0.0  ;;  %v2813_v52 = vmul.f32 0.01, %v1887_v58  ;;  %v1902_v5 = vadd.f32 %v17974_v1, %v15460_v60  ;;  %15744 = vmatmul.mubr.msk.f32.vlgmr.msra.gmra.mxu1 %vm3173_vm2, %v18001_v56  ;;  %15605 = vmatprep.mubr.msk.f32.mxu0 %vm291_vm0, %v278_v54  ;;  %v18392_v48 = vld [vmem:[%s21893_s3 + $0x98] sm:$0xff] }
 0x1fc   :  { %3327 = vst.msk [vmem:[#allocation2 + $0x4c8] sm:$0xff] %vm3173_vm2, %v3070_v62  ;;  %15798 = vmatpush3.msra.mxu1 %v18045_v8  ;;  %v1896_v11 = vpop.f32.mrf.mxu0  ;;  %15746 = vmatprep.mubr.msk.f32.mxu1 %vm3173_vm2, %v18020_v12 }
 0x1fd   :  { %v3069_v15 = vsel %vm2557_vm10, %v1887_v58, %v2813_v52  ;;  %vm2560_vm11 = vcmp.gt.f32.partialorder %v1902_v5, 0.0  ;;  %v2816_v56 = vmul.f32 0.01, %v1902_v5  ;;  %v1897_v19 = vadd.f32 %v17974_v1, %v1896_v11  ;;  %15799 = vmatprep.subr.mxu1 %v13661_v61 }
 0x1fe   :  { %3326 = vst.msk [vmem:[#allocation2 + $0x4c0] sm:$0xff] %vm3173_vm2, %v3069_v15  ;;  %v15463_v8 = vpop.f32.mrf.mxu0  ;;  %15606 = vmatmul.mubr.msk.f32.gmra.mxu0 %vm291_vm0, %v279_v10  ;;  %15800 = vmatpush3.msra.mxu1 %v13661_v61 }
 0x1ff   :  { %v3072_v12 = vsel %vm2560_vm11, %v1902_v5, %v2816_v56  ;;  %vm2559_vm12 = vcmp.gt.f32.partialorder %v1897_v19, 0.0  ;;  %v2815_v26 = vmul.f32 0.01, %v1897_v19  ;;  %v1912_v30 = vadd.f32 %v17974_v1, %v15463_v8  ;;  %15747 = vmatmul.mubr.msk.f32.gmra.mxu1 %vm3173_vm2, %v18024_v63  ;;  %15608 = vmatprep.mubr.msk.f32.mxu0 %vm291_vm0, %v280_v14 }
 0x200   :  { %3329 = vst.msk [vmem:[#allocation2 + $0x4d8] sm:$0xff] %vm3173_vm2, %v3072_v12  ;;  %v1906_v37 = vpop.f32.mrf.mxu0  ;;  %15749 = vmatprep.mubr.msk.f32.mxu1 %vm3173_vm2, %v18040_v7  ;;  %15801 = vmatprep.subr.mxu1 %v13660_v20 }
 0x201   :  { %v3071_v38 = vsel %vm2559_vm12, %v1897_v19, %v2815_v26  ;;  %vm2562_vm13 = vcmp.gt.f32.partialorder %v1912_v30, 0.0  ;;  %v2818_v63 = vmul.f32 0.01, %v1912_v30  ;;  %v1907_v41 = vadd.f32 %v17974_v1, %v1906_v37  ;;  %15802 = vmatpush3.msra.mxu1 %v13660_v20  ;;  %v13939_v20 = vld [vmem:[%s21893_s3 + $0x140] sm:$0xff]  ;;  %v18460_v37 = vld [vmem:[%s21893_s3 + $0x198] sm:$0xff] }
 0x202   :  { %3328 = vst.msk [vmem:[#allocation2 + $0x4d0] sm:$0xff] %vm3173_vm2, %v3071_v38  ;;  %v15466_v44 = vpop.f32.mrf.mxu0  ;;  %15609 = vmatmul.mubr.msk.f32.gmra.mxu0 %vm291_vm0, %v281_v33  ;;  %15803 = vmatprep.subr.mxu1 %v13659_v35 }
 0x203   :  { %v3074_v7 = vsel %vm2562_vm13, %v1912_v30, %v2818_v63  ;;  %vm2561_vm14 = vcmp.gt.f32.partialorder %v1907_v41, 0.0  ;;  %v2817_v50 = vmul.f32 0.01, %v1907_v41  ;;  %15750 = vmatmul.mubr.msk.f32.gmra.mxu1 %vm3173_vm2, %v4224_v46  ;;  %16115 = vmatprep.mubr.msk.f32.mxu0 %vm3173_vm2, %v18049_v9  ;;  %v13941_v9 = vld [vmem:[%s21893_s3 + $0x150] sm:$0xff] }
 0x204   :  { %3331 = vst.msk [vmem:[#allocation2 + $0x4e8] sm:$0xff] %vm3173_vm2, %v3074_v7  ;;  %v1916_v53 = vpop.f32.mrf.mxu0  ;;  %15752 = vmatprep.mubr.msk.f32.mxu1 %vm3173_vm2, %v18062_v16  ;;  %15804 = vmatpush3.msra.mxu1 %v13659_v35 }
 0x205   :  { %v3073_v54 = vsel %vm2561_vm14, %v1907_v41, %v2817_v50  ;;  %v1917_v13 = vadd.f32 %v17974_v1, %v1916_v53  ;;  %15859 = vmatprep.subr.mxu1 %v18392_v48 }
 0x206   :  { %3330 = vst.msk [vmem:[#allocation2 + $0x4e0] sm:$0xff] %vm3173_vm2, %v3073_v54  ;;  %v15469_v57 = vpop.f32.mrf.mxu0  ;;  %16116 = vmatmul.mubr.msk.f32.vlgmr.msra.gmra.mxu0 %vm3173_vm2, %v18062_v16 }
 0x207   :  { %vm2563_vm0 = vcmp.gt.f32.partialorder %v1917_v13, 0.0  ;;  %v2819_v58 = vmul.f32 0.01, %v1917_v13  ;;  %v1932_v60 = vadd.f32 %v17974_v1, %v15469_v57  ;;  %15753 = vmatmul.mubr.msk.f32.gmra.mxu1 %vm3173_vm2, %v18066_v17  ;;  %16118 = vmatprep.mubr.msk.f32.mxu0 %vm3173_vm2, %v18066_v17  ;;  %v13940_v17 = vld [vmem:[%s21893_s3 + $0x148] sm:$0xff] }
 0x208   :  { %v1926_v61 = vpop.f32.mrf.mxu0  ;;  %15755 = vmatprep.mubr.msk.f32.mxu1 %vm3173_vm2, %v18078_v22  ;;  %16232 = vmatpush3.msra.mxu0 %v18096_v27 }
 0x209   :  { %v3075_v16 = vsel %vm2563_vm0, %v1917_v13, %v2819_v58  ;;  %vm2566_vm15 = vcmp.gt.f32.partialorder %v1932_v60, 0.0  ;;  %v2822_v62 = vmul.f32 0.01, %v1932_v60  ;;  %v1927_v52 = vadd.f32 %v17974_v1, %v1926_v61  ;;  %16233 = vmatprep.subr.mxu0 %v13941_v9  ;;  %v18489_v58 = vld [vmem:[#allocation2 + $0xb0] sm:$0xff] }
 0x20a   :  { %3332 = vst.msk [vmem:[#allocation2 + $0x4f0] sm:$0xff] %vm3173_vm2, %v3075_v16  ;;  %v15472_v5 = vpop.f32.mrf.mxu0  ;;  %16119 = vmatmul.mubr.msk.f32.gmra.mxu0 %vm3173_vm2, %v18078_v22 }
 0x20b   :  { %v3078_v10 = vsel %vm2566_vm15, %v1932_v60, %v2822_v62  ;;  %vm2565_vm1 = vcmp.gt.f32.partialorder %v1927_v52, 0.0  ;;  %v2821_v11 = vmul.f32 0.01, %v1927_v52  ;;  %v1942_v27 = vadd.f32 %v17974_v1, %v15472_v5  ;;  %15756 = vmatmul.mubr.msk.f32.gmra.mxu1 %vm3173_vm2, %v18082_v23  ;;  %16121 = vmatprep.mubr.msk.f32.mxu0 %vm3173_vm2, %v18082_v23  ;;  %v18435_v23 = vld [vmem:[#allocation2 + $0x70] sm:$0xff] }
 0x20c   :  { %3335 = vst.msk [vmem:[#allocation2 + $0x508] sm:$0xff] %vm3173_vm2, %v3078_v10  ;;  %v1936_v14 = vpop.f32.mrf.mxu0  ;;  %15758 = vmatprep.mubr.msk.f32.mxu1 %vm3173_vm2, %v18099_v29  ;;  %16234 = vmatpush3.msra.mxu0 %v13941_v9 }
 0x20d   :  { %v3077_v22 = vsel %vm2565_vm1, %v1927_v52, %v2821_v11  ;;  %vm2568_vm3 = vcmp.gt.f32.partialorder %v1942_v27, 0.0  ;;  %v2824_v15 = vmul.f32 0.01, %v1942_v27  ;;  %v1937_v56 = vadd.f32 %v17974_v1, %v1936_v14  ;;  %16235 = vmatprep.subr.mxu0 %v13940_v17 }
 0x20e   :  { %3334 = vst.msk [vmem:[#allocation2 + $0x500] sm:$0xff] %vm3173_vm2, %v3077_v22  ;;  %v15475_v19 = vpop.f32.mrf.mxu0  ;;  %16122 = vmatmul.mubr.msk.f32.gmra.mxu0 %vm3173_vm2, %v18099_v29 }
 0x20f   :  { %v3080_v8 = vsel %vm2568_vm3, %v1942_v27, %v2824_v15  ;;  %vm2567_vm4 = vcmp.gt.f32.partialorder %v1937_v56, 0.0  ;;  %v2823_v12 = vmul.f32 0.01, %v1937_v56  ;;  %v1952_v26 = vadd.f32 %v17974_v1, %v15475_v19  ;;  %15759 = vmatmul.mubr.msk.f32.gmra.mxu1 %vm3173_vm2, %v18435_v23  ;;  %16124 = vmatprep.mubr.msk.f32.mxu0 %vm3173_vm2, %v18105_v31  ;;  %v18451_v1 = vld [vmem:[%s21892_s2] ss:$0 sm:$0xff] }
 0x210   :  { %3337 = vst.msk [vmem:[#allocation2 + $0x518] sm:$0xff] %vm3173_vm2, %v3080_v8  ;;  %v1946_v29 = vpop.f32.mrf.mxu0  ;;  %15761 = vmatprep.mubr.msk.f32.mxu1 %vm3173_vm2, %v18118_v39  ;;  %16236 = vmatpush3.msra.mxu0 %v13940_v17 }
 0x211   :  { %v3079_v30 = vsel %vm2567_vm4, %v1937_v56, %v2823_v12  ;;  %vm2570_vm5 = vcmp.gt.f32.partialorder %v1952_v26, 0.0  ;;  %v2826_v33 = vmul.f32 0.01, %v1952_v26  ;;  %v1947_v35 = vadd.f32 %v18451_v1, %v1946_v29  ;;  %16237 = vmatprep.subr.mxu0 %v13939_v20 }
 0x212   :  { %3336 = vst.msk [vmem:[#allocation2 + $0x510] sm:$0xff] %vm3173_vm2, %v3079_v30  ;;  %v15478_v31 = vpop.f32.mrf.mxu0  ;;  %16125 = vmatmul.mubr.msk.f32.gmra.mxu0 %vm3173_vm2, %v18118_v39  ;;  %v18534_v30 = vld [vmem:[#allocation2 + $0xf0] sm:$0xff] }
 0x213   :  { %v3082_v38 = vsel %vm2570_vm5, %v1952_v26, %v2826_v33  ;;  %vm2569_vm6 = vcmp.gt.f32.partialorder %v1947_v35, 0.0  ;;  %v2825_v63 = vmul.f32 0.01, %v1947_v35  ;;  %15762 = vmatmul.mubr.msk.f32.gmra.mxu1 %vm3173_vm2, %v18123_v43  ;;  %16127 = vmatprep.mubr.msk.f32.mxu0 %vm3173_vm2, %v18123_v43 }
 0x214   :  { %3339 = vst.msk [vmem:[#allocation2 + $0x528] sm:$0xff] %vm3173_vm2, %v3082_v38  ;;  %v1956_v41 = vpop.f32.mrf.mxu0  ;;  %15764 = vmatprep.mubr.msk.f32.mxu1 %vm3173_vm2, %v18138_v51  ;;  %16238 = vmatpush3.msra.mxu0 %v13939_v20 }
 0x215   :  { %v3081_v39 = vsel %vm2569_vm6, %v1947_v35, %v2825_v63  ;;  %v1957_v44 = vadd.f32 %v18451_v1, %v1956_v41  ;;  %16355 = vmatprep.subr.mxu0 %v18460_v37 }
 0x216   :  { %3338 = vst.msk [vmem:[#allocation2 + $0x520] sm:$0xff] %vm3173_vm2, %v3081_v39  ;;  %v15481_v46 = vpop.f32.mrf.mxu0  ;;  %16128 = vmatmul.mubr.msk.f32.gmra.mxu0 %vm3173_vm2, %v18138_v51 }
 0x217   :  { %vm2571_vm7 = vcmp.gt.f32.partialorder %v1957_v44, 0.0  ;;  %v2827_v43 = vmul.f32 0.01, %v1957_v44  ;;  %v1972_v7 = vadd.f32 %v18451_v1, %v15481_v46  ;;  %v18475_v50 = vpop.f32.mrf.mxu1  ;;  %15765 = vmatmul.mubr.msk.f32.gmra.mxu1 %vm3173_vm2, %v18143_v36  ;;  %16130 = vmatprep.mubr.msk.f32.mxu0 %vm3173_vm2, %v18143_v36 }
 0x218   :  { %v1966_v53 = vpop.f32.mrf.mxu0  ;;  %15767 = vmatprep.mubr.msk.f32.mxu1 %vm3173_vm2, %v18158_v0 }
 0x219   :  { %v3083_v54 = vsel %vm2571_vm7, %v1957_v44, %v2827_v43  ;;  %vm2574_vm8 = vcmp.gt.f32.partialorder %v1972_v7, 0.0  ;;  %v2830_v13 = vmul.f32 0.01, %v1972_v7  ;;  %v1967_v51 = vadd.f32 %v18451_v1, %v1966_v53  ;;  %v18484_v57 = vpop.f32.mrf.mxu1 }
 0x21a   :  { %3340 = vst.msk [vmem:[#allocation2 + $0x530] sm:$0xff] %vm3173_vm2, %v3083_v54  ;;  %v15484_v9 = vpop.f32.mrf.mxu0  ;;  %16131 = vmatmul.mubr.msk.f32.gmra.mxu0 %vm3173_vm2, %v18158_v0 }
 0x21b   :  { %v3086_v36 = vsel %vm2574_vm8, %v1972_v7, %v2830_v13  ;;  %vm2573_vm9 = vcmp.gt.f32.partialorder %v1967_v51, 0.0  ;;  %v2829_v60 = vmul.f32 0.01, %v1967_v51  ;;  %v1982_v61 = vadd.f32 %v18451_v1, %v15484_v9  ;;  %v18492_v16 = vpop.f32.mrf.mxu1  ;;  %15768 = vmatmul.mubr.msk.f32.gmra.mxu1 %vm3173_vm2, %v18489_v58  ;;  %16133 = vmatprep.mubr.msk.f32.mxu0 %vm3173_vm2, %v18162_v4 }
 0x21c   :  { %3343 = vst.msk [vmem:[#allocation2 + $0x548] sm:$0xff] %vm3173_vm2, %v3086_v36  ;;  %v1976_v62 = vpop.f32.mrf.mxu0  ;;  %15770 = vmatprep.mubr.msk.f32.mxu1 %vm3173_vm2, %v18177_v18 }
 0x21d   :  { %v3085_v0 = vsel %vm2573_vm9, %v1967_v51, %v2829_v60  ;;  %vm2576_vm10 = vcmp.gt.f32.partialorder %v1982_v61, 0.0  ;;  %v2832_v52 = vmul.f32 0.01, %v1982_v61  ;;  %v1977_v5 = vadd.f32 %v18451_v1, %v1976_v62  ;;  %v18502_v17 = vpop.f32.mrf.mxu1 }
 0x21e   :  { %3342 = vst.msk [vmem:[#allocation2 + $0x540] sm:$0xff] %vm3173_vm2, %v3085_v0  ;;  %v15487_v10 = vpop.f32.mrf.mxu0  ;;  %16134 = vmatmul.mubr.msk.f32.gmra.mxu0 %vm3173_vm2, %v18177_v18 }
 0x21f   :  { %v3088_v4 = vsel %vm2576_vm10, %v1982_v61, %v2832_v52  ;;  %vm2575_vm11 = vcmp.gt.f32.partialorder %v1977_v5, 0.0  ;;  %v2831_v11 = vmul.f32 0.01, %v1977_v5  ;;  %v1992_v27 = vadd.f32 %v18451_v1, %v15487_v10  ;;  %15771 = vmatmul.mubr.msk.f32.gmra.mxu1 %vm3173_vm2, %v18182_v21  ;;  %16136 = vmatprep.mubr.msk.f32.mxu0 %vm3173_vm2, %v18182_v21  ;;  %v18515_v15 = vpop.f32.mrf.mxu1 }
 0x220   :  { %3345 = vst.msk [vmem:[#allocation2 + $0x558] sm:$0xff] %vm3173_vm2, %v3088_v4  ;;  %v1986_v14 = vpop.f32.mrf.mxu0  ;;  %15773 = vmatprep.mubr.msk.f32.mxu1 %vm3173_vm2, %v18196_v34 }
 0x221   :  { %v3087_v22 = vsel %vm2575_vm11, %v1977_v5, %v2831_v11  ;;  %vm2578_vm12 = vcmp.gt.f32.partialorder %v1992_v27, 0.0  ;;  %v2834_v18 = vmul.f32 0.01, %v1992_v27  ;;  %v1987_v56 = vadd.f32 %v18451_v1, %v1986_v14  ;;  %v18528_v26 = vpop.f32.mrf.mxu1 }
 0x222   :  { %3344 = vst.msk [vmem:[#allocation2 + $0x550] sm:$0xff] %vm3173_vm2, %v3087_v22  ;;  %v15490_v19 = vpop.f32.mrf.mxu0  ;;  %16137 = vmatmul.mubr.msk.f32.gmra.mxu0 %vm3173_vm2, %v18196_v34 }
 0x223   :  { %v3090_v21 = vsel %vm2578_vm12, %v1992_v27, %v2834_v18  ;;  %vm2577_vm13 = vcmp.gt.f32.partialorder %v1987_v56, 0.0  ;;  %v2833_v20 = vmul.f32 0.01, %v1987_v56  ;;  %15774 = vmatmul.mubr.msk.f32.gmra.mxu1 %vm3173_vm2, %v18201_v40  ;;  %16139 = vmatprep.mubr.msk.f32.mxu0 %vm3173_vm2, %v18201_v40 }
 0x224   :  { %3347 = vst.msk [vmem:[#allocation2 + $0x568] sm:$0xff] %vm3173_vm2, %v3090_v21  ;;  %v1996_v8 = vpop.f32.mrf.mxu0  ;;  %15776 = vmatprep.mubr.msk.f32.mxu1 %vm3173_vm2, %v18216_v49 }
 0x225   :  { %v3089_v12 = vsel %vm2577_vm13, %v1987_v56, %v2833_v20  ;;  %v1997_v34 = vadd.f32 %v18451_v1, %v1996_v8 }
 0x226   :  { %3346 = vst.msk [vmem:[#allocation2 + $0x560] sm:$0xff] %vm3173_vm2, %v3089_v12  ;;  %v15493_v29 = vpop.f32.mrf.mxu0  ;;  %16140 = vmatmul.mubr.msk.f32.gmra.mxu0 %vm3173_vm2, %v18216_v49  ;;  %v18621_v12 = vld [vmem:[#allocation2 + $0x170] sm:$0xff] }
 0x227   :  { %vm2579_vm14 = vcmp.gt.f32.partialorder %v1997_v34, 0.0  ;;  %v2835_v40 = vmul.f32 0.01, %v1997_v34  ;;  %v2012_v33 = vadd.f32 %v18451_v1, %v15493_v29  ;;  %v18537_v35 = vpop.f32.mrf.mxu1  ;;  %15777 = vmatmul.mubr.msk.f32.gmra.mxu1 %vm3173_vm2, %v18534_v30  ;;  %16142 = vmatprep.mubr.msk.f32.mxu0 %vm3173_vm2, %v18221_v55 }
 0x228   :  { %v2006_v31 = vpop.f32.mrf.mxu0  ;;  %15779 = vmatprep.mubr.msk.f32.mxu1 %vm3173_vm2, %v18236_v2 }
 0x229   :  { %v3091_v38 = vsel %vm2579_vm14, %v1997_v34, %v2835_v40  ;;  %vm2582_vm0 = vcmp.gt.f32.partialorder %v2012_v33, 0.0  ;;  %v2838_v49 = vmul.f32 0.01, %v2012_v33  ;;  %v2007_v63 = vadd.f32 %v18451_v1, %v2006_v31  ;;  %v18546_v41 = vpop.f32.mrf.mxu1  ;;  %v4650_v34 = vld [vmem:[#allocation2 + $0x208] sm:$0xff]  ;;  %v18633_v31 = vld [vmem:[#allocation2 + $0x190] sm:$0xff] }
 0x22a   :  { %3348 = vst.msk [vmem:[#allocation2 + $0x570] sm:$0xff] %vm3173_vm2, %v3091_v38  ;;  %v15496_v39 = vpop.f32.mrf.mxu0  ;;  %16143 = vmatmul.mubr.msk.f32.gmra.mxu0 %vm3173_vm2, %v18236_v2  ;;  %v18629_v40 = vld [vmem:[#allocation2 + $0x188] sm:$0xff]  ;;  %v13701_v38 = vld [vmem:[%s21893_s3 + $0x90] sm:$0xff] }
 0x22b   :  { %v3094_v44 = vsel %vm2582_vm0, %v2012_v33, %v2838_v49  ;;  %vm2581_vm15 = vcmp.gt.f32.partialorder %v2007_v63, 0.0  ;;  %v2837_v55 = vmul.f32 0.01, %v2007_v63  ;;  %v2022_v46 = vadd.f32 %v18451_v1, %v15496_v39  ;;  %v18552_v43 = vpop.f32.mrf.mxu1  ;;  %15780 = vmatmul.mubr.msk.f32.gmra.mxu1 %vm3173_vm2, %v18240_v6  ;;  %16145 = vmatprep.mubr.msk.f32.mxu0 %vm3173_vm2, %v18240_v6  ;;  %v4652_v49 = vld [vmem:[#allocation2 + $0x218] sm:$0xff] }
 0x22c   :  { %3351 = vst.msk [vmem:[#allocation2 + $0x588] sm:$0xff] %vm3173_vm2, %v3094_v44  ;;  %v2016_v7 = vpop.f32.mrf.mxu0  ;;  %15782 = vmatprep.mubr.msk.f32.mxu1 %vm3173_vm2, %v18255_v24  ;;  %v18645_v44 = vld [vmem:[#allocation2 + $0x198] sm:$0xff] }
 0x22d   :  { %v3093_v2 = vsel %vm2581_vm15, %v2007_v63, %v2837_v55  ;;  %vm2584_vm1 = vcmp.gt.f32.partialorder %v2022_v46, 0.0  ;;  %v2840_v53 = vmul.f32 0.01, %v2022_v46  ;;  %v2017_v54 = vadd.f32 %v18451_v1, %v2016_v7  ;;  %v18562_v13 = vpop.f32.mrf.mxu1  ;;  %v13700_v55 = vld [vmem:[%s21893_s3 + $0x88] sm:$0xff]  ;;  %v4653_v7 = vld [vmem:[#allocation2 + $0x220] sm:$0xff] }
 0x22e   :  { %3350 = vst.msk [vmem:[#allocation2 + $0x580] sm:$0xff] %vm3173_vm2, %v3093_v2  ;;  %v15499_v51 = vpop.f32.mrf.mxu0  ;;  %16146 = vmatmul.mubr.msk.f32.gmra.mxu0 %vm3173_vm2, %v18255_v24  ;;  %v18652_v2 = vld [vmem:[#allocation2 + $0x1a0] sm:$0xff] }
 0x22f   :  { %v3096_v6 = vsel %vm2584_vm1, %v2022_v46, %v2840_v53  ;;  %vm2583_vm3 = vcmp.gt.f32.partialorder %v2017_v54, 0.0  ;;  %v2839_v9 = vmul.f32 0.01, %v2017_v54  ;;  %v2032_v36 = vadd.f32 %v18451_v1, %v15499_v51  ;;  %15783 = vmatmul.mubr.msk.f32.gmra.mxu1 %vm3173_vm2, %v18260_v28  ;;  %16148 = vmatprep.mubr.msk.f32.mxu0 %vm3173_vm2, %v18260_v28  ;;  %v18575_v62 = vpop.f32.mrf.mxu1  ;;  %v18581_v28 = vld [vmem:[#allocation2 + $0x130] sm:$0xff]  ;;  %v13699_v51 = vld [vmem:[%s21893_s3 + $0x80] sm:$0xff] }
 0x230   :  { %3353 = vst.msk [vmem:[#allocation2 + $0x598] sm:$0xff] %vm3173_vm2, %v3096_v6  ;;  %v2026_v60 = vpop.f32.mrf.mxu0  ;;  %15785 = vmatprep.mubr.msk.f32.mxu1 %vm3173_vm2, %v18274_v42 }
 0x231   :  { %v3095_v61 = vsel %vm2583_vm3, %v2017_v54, %v2839_v9  ;;  %vm2586_vm4 = vcmp.gt.f32.partialorder %v2032_v36, 0.0  ;;  %v2842_v24 = vmul.f32 0.01, %v2032_v36  ;;  %v2027_v0 = vadd.f32 %v18451_v1, %v2026_v60  ;;  %v18590_v27 = vpop.f32.mrf.mxu1  ;;  %v4654_v54 = vld [vmem:[#allocation2 + $0x228] sm:$0xff] }
 0x232   :  { %3352 = vst.msk [vmem:[#allocation2 + $0x590] sm:$0xff] %vm3173_vm2, %v3095_v61  ;;  %v15502_v52 = vpop.f32.mrf.mxu0  ;;  %16149 = vmatmul.mubr.msk.f32.gmra.mxu0 %vm3173_vm2, %v18274_v42  ;;  %v18667_v61 = vld [vmem:[#allocation2 + $0x1a8] sm:$0xff] }
 0x233   :  { %v3098_v5 = vsel %vm2586_vm4, %v2032_v36, %v2842_v24  ;;  %vm2585_vm5 = vcmp.gt.f32.partialorder %v2027_v0, 0.0  ;;  %v2841_v10 = vmul.f32 0.01, %v2027_v0  ;;  %15786 = vmatmul.mubr.msk.f32.gmra.mxu1 %vm3173_vm2, %v18581_v28  ;;  %16151 = vmatprep.mubr.msk.f32.mxu0 %vm3173_vm2, %v18279_v47  ;;  %v7667_v52 = vld [vmem:[#allocation2 + $0x48] sm:$0xff] }
 0x234   :  { %3355 = vst.msk [vmem:[#allocation2 + $0x5a8] sm:$0xff] %vm3173_vm2, %v3098_v5  ;;  %v2036_v4 = vpop.f32.mrf.mxu0  ;;  %15788 = vmatprep.mubr.msk.f32.mxu1 %vm3173_vm2, %v18294_v59  ;;  %v18674_v5 = vld [vmem:[%s21893_s3 + $0xb8] sm:$0xff] }
 0x235   :  { %v3097_v11 = vsel %vm2585_vm5, %v2027_v0, %v2841_v10  ;;  %v2037_v42 = vadd.f32 %v18451_v1, %v2036_v4  ;;  %v4655_v0 = vld [vmem:[#allocation2 + $0x230] sm:$0xff] }
 0x236   :  { %3354 = vst.msk [vmem:[#allocation2 + $0x5a0] sm:$0xff] %vm3173_vm2, %v3097_v11  ;;  %v15505_v14 = vpop.f32.mrf.mxu0  ;;  %16152 = vmatmul.mubr.msk.f32.gmra.mxu0 %vm3173_vm2, %v18294_v59 }
 0x237   :  { %vm2587_vm6 = vcmp.gt.f32.partialorder %v2037_v42, 0.0  ;;  %v2843_v22 = vmul.f32 0.01, %v2037_v42  ;;  %v18596_v47 = vpop.f32.mrf.mxu1  ;;  %15789 = vmatmul.mubr.msk.f32.gmra.mxu1 %vm3173_vm2, %v18299_v3  ;;  %16154 = vmatprep.mubr.msk.f32.mxu0 %vm3173_vm2, %v18299_v3  ;;  %v4656_v14 = vld [vmem:[#allocation2 + $0x248] sm:$0xff] }
 0x238   :  { %v2046_v18 = vpop.f32.mrf.mxu0  ;;  %15791 = vmatprep.mubr.msk.f32.mxu1 %vm3173_vm2, %v18314_v25 }
 0x239   :  { %v3099_v56 = vsel %vm2587_vm6, %v2037_v42, %v2843_v22  ;;  %v18604_v19 = vpop.f32.mrf.mxu1 }
 0x23a   :  { %3356 = vst.msk [vmem:[#allocation2 + $0x5b0] sm:$0xff] %vm3173_vm2, %v3099_v56  ;;  %v15508_v59 = vpop.f32.mrf.mxu0  ;;  %16155 = vmatmul.mubr.msk.f32.gmra.mxu0 %vm3173_vm2, %v18314_v25  ;;  %v6835_v25 = vld [vmem:[#allocation2 + $0x180] sm:$0xff] }
 0x23b   :  { %v18609_v21 = vpop.f32.mrf.mxu1  ;;  %15792 = vmatmul.mubr.msk.f32.gmra.mxu1 %vm3173_vm2, %v18318_v32  ;;  %16157 = vmatprep.mubr.msk.f32.mxu0 %vm3173_vm2, %v18318_v32 }
 0x23c   :  { %v2056_v3 = vpop.f32.mrf.mxu0  ;;  %15794 = vmatprep.mubr.msk.f32.mxu1 %vm3173_vm2, %v18333_v45 }
 0x23d   :  { %v18617_v20 = vpop.f32.mrf.mxu1 }
 0x23e   :  { %v15511_v8 = vpop.f32.mrf.mxu0  ;;  %16158 = vmatmul.mubr.msk.f32.gmra.mxu0 %vm3173_vm2, %v18333_v45  ;;  %v4651_v45 = vld [vmem:[#allocation2 + $0x210] sm:$0xff] }
 0x23f   :  { %15795 = vmatmul.mubr.msk.f32.gmra.mxu1 %vm3173_vm2, %v18621_v12  ;;  %16160 = vmatprep.mubr.msk.f32.mxu0 %vm3173_vm2, %v6835_v25  ;;  %v18627_v29 = vpop.f32.mrf.mxu1  ;;  %v7668_v8 = vld [vmem:[#allocation2 + $0x50] sm:$0xff] }
 0x240   :  { %v2066_v32 = vpop.f32.mrf.mxu0  ;;  %15805 = vmatprep.mubr.msk.f32.mxu1 %vm3173_vm2, %v4650_v34  ;;  %v4657_v34 = vld [vmem:[#allocation2 + $0x250] sm:$0xff] }
 0x241   :  { %v18643_v39 = vpop.f32.mrf.mxu1  ;;  %v7669_v32 = vld [vmem:[#allocation2 + $0x58] sm:$0xff] }
 0x242   :  { %v15514_v33 = vpop.f32.mrf.mxu0  ;;  %16161 = vmatmul.mubr.msk.f32.gmra.mxu0 %vm3173_vm2, %v18629_v40 }
 0x243   :  { %15806 = vmatmul.mubr.msk.f32.vlgmr.msra.gmra.mxu1 %vm3173_vm2, %v4651_v45  ;;  %16163 = vmatprep.mubr.msk.f32.mxu0 %vm3173_vm2, %v18633_v31  ;;  %v14021_v33 = vld [vmem:[%s21893_s3 + $0x190] sm:$0xff] }
 0x244   :  { %15860 = vmatpush3.msra.mxu1 %v18392_v48  ;;  %v2076_v63 = vpop.f32.mrf.mxu0  ;;  %15808 = vmatprep.mubr.msk.f32.mxu1 %vm3173_vm2, %v4652_v49 }
 0x245   :  { %15861 = vmatprep.subr.mxu1 %v13701_v38  ;;  %v4658_v63 = vld [vmem:[#allocation2 + $0x258] sm:$0xff] }
 0x246   :  { %v15517_v46 = vpop.f32.mrf.mxu0  ;;  %16164 = vmatmul.mubr.msk.f32.gmra.mxu0 %vm3173_vm2, %v18645_v44  ;;  %15862 = vmatpush3.msra.mxu1 %v13701_v38 }
 0x247   :  { %v2092_v48 = vadd.f32 %v18451_v1, %v15517_v46  ;;  %v18655_v53 = vpop.f32.mrf.mxu1  ;;  %15809 = vmatmul.mubr.msk.f32.gmra.mxu1 %vm3173_vm2, %v4653_v7  ;;  %16166 = vmatprep.mubr.msk.f32.mxu0 %vm3173_vm2, %v18652_v2 }
 0x248   :  { %v2086_v6 = vpop.f32.mrf.mxu0  ;;  %15811 = vmatprep.mubr.msk.f32.mxu1 %vm3173_vm2, %v4654_v54  ;;  %15863 = vmatprep.subr.mxu1 %v13700_v55 }
 0x249   :  { %vm2598_vm7 = vcmp.gt.f32.partialorder %v2092_v48, 0.0  ;;  %v2854_v9 = vmul.f32 0.01, %v2092_v48  ;;  %v2087_v36 = vadd.f32 %v18451_v1, %v2086_v6  ;;  %v18665_v60 = vpop.f32.mrf.mxu1  ;;  %15864 = vmatpush3.msra.mxu1 %v13700_v55 }
 0x24a   :  { %v15520_v24 = vpop.f32.mrf.mxu0  ;;  %16167 = vmatmul.mubr.msk.f32.gmra.mxu0 %vm3173_vm2, %v18667_v61  ;;  %15865 = vmatprep.subr.mxu1 %v13699_v51 }
 0x24b   :  { %v3110_v10 = vsel %vm2598_vm7, %v2092_v48, %v2854_v9  ;;  %vm2597_vm8 = vcmp.gt.f32.partialorder %v2087_v36, 0.0  ;;  %v2853_v4 = vmul.f32 0.01, %v2087_v36  ;;  %v2102_v11 = vadd.f32 %v18451_v1, %v15520_v24  ;;  %v18677_v42 = vpop.f32.mrf.mxu1  ;;  %15812 = vmatmul.mubr.msk.f32.gmra.mxu1 %vm3173_vm2, %v4655_v0  ;;  %16239 = vmatprep.mubr.msk.f32.mxu0 %vm3173_vm2, %v7667_v52  ;;  %v4659_v9 = vld [vmem:[#allocation2 + $0x260] sm:$0xff]  ;;  %v4660_v52 = vld [vmem:[#allocation2 + $0x268] sm:$0xff] }
 0x24c   :  { %3367 = vst.msk [vmem:[#allocation2 + $0x608] sm:$0xff] %vm3173_vm2, %v3110_v10  ;;  %v2096_v22 = vpop.f32.mrf.mxu0  ;;  %15814 = vmatprep.mubr.msk.f32.mxu1 %vm3173_vm2, %v4656_v14  ;;  %15866 = vmatpush3.msra.mxu1 %v13699_v51  ;;  %v7670_v51 = vld [vmem:[#allocation2 + $0x60] sm:$0xff] }
 0x24d   :  { %v3109_v18 = vsel %vm2597_vm8, %v2087_v36, %v2853_v4  ;;  %vm2600_vm9 = vcmp.gt.f32.partialorder %v2102_v11, 0.0  ;;  %v2856_v56 = vmul.f32 0.01, %v2102_v11  ;;  %v2097_v59 = vadd.f32 %v18451_v1, %v2096_v22  ;;  %v18684_v3 = vpop.f32.mrf.mxu1  ;;  %15921 = vmatprep.subr.mxu1 %v18674_v5  ;;  %v7671_v36 = vld [vmem:[#allocation2 + $0x68] sm:$0xff] }
 0x24e   :  { %3366 = vst.msk [vmem:[#allocation2 + $0x600] sm:$0xff] %vm3173_vm2, %v3109_v18  ;;  %v15523_v25 = vpop.f32.mrf.mxu0  ;;  %16240 = vmatmul.mubr.msk.f32.vlgmr.msra.gmra.mxu0 %vm3173_vm2, %v7668_v8  ;;  %v4661_v18 = vld [vmem:[#allocation2 + $0x270] sm:$0xff] }
 0x24f   :  { %v3112_v45 = vsel %vm2600_vm9, %v2102_v11, %v2856_v56  ;;  %vm2599_vm10 = vcmp.gt.f32.partialorder %v2097_v59, 0.0  ;;  %v2855_v38 = vmul.f32 0.01, %v2097_v59  ;;  %v2112_v49 = vadd.f32 %v18451_v1, %v15523_v25  ;;  %15815 = vmatmul.mubr.msk.f32.gmra.mxu1 %vm3173_vm2, %v4657_v34  ;;  %16242 = vmatprep.mubr.msk.f32.mxu0 %vm3173_vm2, %v7669_v32  ;;  %v18698_v48 = vpop.f32.mrf.mxu1  ;;  %v7673_v56 = vld [vmem:[#allocation2 + $0x88] sm:$0xff] }
 0x250   :  { %3369 = vst.msk [vmem:[#allocation2 + $0x618] sm:$0xff] %vm3173_vm2, %v3112_v45  ;;  %v2106_v55 = vpop.f32.mrf.mxu0  ;;  %15817 = vmatprep.mubr.msk.f32.mxu1 %vm3173_vm2, %v4658_v63  ;;  %16356 = vmatpush3.msra.mxu0 %v18460_v37  ;;  %21945 = vst [vmem:[#allocation3_spill] sm:$0xff] %v18698_v48  ;;  %v14020_v37 = vld [vmem:[%s21893_s3 + $0x188] sm:$0xff]  ;;  %v7674_v63 = vld [vmem:[#allocation2 + $0x90] sm:$0xff] }
 0x251   :  { %v3111_v46 = vsel %vm2599_vm10, %v2097_v59, %v2855_v38  ;;  %vm2602_vm11 = vcmp.gt.f32.partialorder %v2112_v49, 0.0  ;;  %v2858_v7 = vmul.f32 0.01, %v2112_v49  ;;  %v2107_v54 = vadd.f32 %v18451_v1, %v2106_v55  ;;  %16357 = vmatprep.subr.mxu0 %v14021_v33  ;;  %v18710_v11 = vpop.f32.mrf.mxu1  ;;  %v14019_v59 = vld [vmem:[%s21893_s3 + $0x180] sm:$0xff]  ;;  %v4662_v32 = vld [vmem:[#allocation2 + $0x288] sm:$0xff] }
 0x252   :  { %3368 = vst.msk [vmem:[#allocation2 + $0x610] sm:$0xff] %vm3173_vm2, %v3111_v46  ;;  %v15526_v6 = vpop.f32.mrf.mxu0  ;;  %16243 = vmatmul.mubr.msk.f32.gmra.mxu0 %vm3173_vm2, %v7670_v51  ;;  %21946 = vst [vmem:[#allocation4_spill] sm:$0xff] %v18710_v11  ;;  %v4663_v46 = vld [vmem:[#allocation2 + $0x290] sm:$0xff] }
 0x253   :  { %v3114_v24 = vsel %vm2602_vm11, %v2112_v49, %v2858_v7  ;;  %vm2601_vm12 = vcmp.gt.f32.partialorder %v2107_v54, 0.0  ;;  %v2857_v0 = vmul.f32 0.01, %v2107_v54  ;;  %15818 = vmatmul.mubr.msk.f32.gmra.mxu1 %vm3173_vm2, %v4659_v9  ;;  %16245 = vmatprep.mubr.msk.f32.mxu0 %vm3173_vm2, %v7671_v36  ;;  %v7675_v7 = vld [vmem:[#allocation2 + $0x98] sm:$0xff] }
 0x254   :  { %3371 = vst.msk [vmem:[#allocation2 + $0x628] sm:$0xff] %vm3173_vm2, %v3114_v24  ;;  %v2116_v10 = vpop.f32.mrf.mxu0  ;;  %15820 = vmatprep.mubr.msk.f32.mxu1 %vm3173_vm2, %v4660_v52  ;;  %16358 = vmatpush3.msra.mxu0 %v14021_v33 }
 0x255   :  { %v3113_v4 = vsel %vm2601_vm12, %v2107_v54, %v2857_v0  ;;  %v2117_v14 = vadd.f32 %v18451_v1, %v2116_v10  ;;  %16359 = vmatprep.subr.mxu0 %v14020_v37  ;;  %v18733_v54 = vld [vmem:[%s21893_s3 + $0x1d8] sm:$0xff] }
 0x256   :  { %3370 = vst.msk [vmem:[#allocation2 + $0x620] sm:$0xff] %vm3173_vm2, %v3113_v4  ;;  %v15529_v22 = vpop.f32.mrf.mxu0  ;;  %16246 = vmatmul.mubr.msk.f32.gmra.mxu0 %vm3173_vm2, %v18435_v23 }
 0x257   :  { %vm2603_vm13 = vcmp.gt.f32.partialorder %v2117_v14, 0.0  ;;  %v2859_v8 = vmul.f32 0.01, %v2117_v14  ;;  %v2132_v25 = vadd.f32 %v18451_v1, %v15529_v22  ;;  %v18720_v34 = vpop.f32.mrf.mxu1  ;;  %15821 = vmatmul.mubr.msk.f32.gmra.mxu1 %vm3173_vm2, %v4661_v18  ;;  %16248 = vmatprep.mubr.msk.f32.mxu0 %vm3173_vm2, %v7673_v56  ;;  %v4665_v18 = vld [vmem:[#allocation2 + $0x2a0] sm:$0xff]  ;;  %v7677_v56 = vld [vmem:[#allocation2 + $0xa8] sm:$0xff] }
 0x258   :  { %21947 = vst [vmem:[#allocation5_spill] sm:$0xff] %v18720_v34  ;;  %v2126_v33 = vpop.f32.mrf.mxu0  ;;  %15823 = vmatprep.mubr.msk.f32.mxu1 %vm3173_vm2, %v4662_v32  ;;  %16360 = vmatpush3.msra.mxu0 %v14020_v37  ;;  %v4664_v37 = vld [vmem:[#allocation2 + $0x298] sm:$0xff]  ;;  %v4666_v32 = vld [vmem:[#allocation2 + $0x2a8] sm:$0xff] }
 0x259   :  { %v3115_v23 = vsel %vm2603_vm13, %v2117_v14, %v2859_v8  ;;  %vm2606_vm14 = vcmp.gt.f32.partialorder %v2132_v25, 0.0  ;;  %v2862_v45 = vmul.f32 0.01, %v2132_v25  ;;  %v2127_v38 = vadd.f32 %v18451_v1, %v2126_v33  ;;  %v18726_v49 = vpop.f32.mrf.mxu1  ;;  %16361 = vmatprep.subr.mxu0 %v14019_v59  ;;  %v7676_v14 = vld [vmem:[#allocation2 + $0xa0] sm:$0xff] }
 0x25a   :  { %21948 = vst [vmem:[#allocation6_spill] sm:$0xff] %v18726_v49  ;;  %3372 = vst.msk [vmem:[#allocation2 + $0x630] sm:$0xff] %vm3173_vm2, %v3115_v23  ;;  %v15532_v55 = vpop.f32.mrf.mxu0  ;;  %16249 = vmatmul.mubr.msk.f32.gmra.mxu0 %vm3173_vm2, %v7674_v63  ;;  %v18979_v49 = vld [vmem:[#allocation2 + $0x468] sm:$0xff] }
 0x25b   :  { %v3118_v51 = vsel %vm2606_vm14, %v2132_v25, %v2862_v45  ;;  %vm2605_vm0 = vcmp.gt.f32.partialorder %v2127_v38, 0.0  ;;  %v2861_v6 = vmul.f32 0.01, %v2127_v38  ;;  %v2142_v9 = vadd.f32 %v18451_v1, %v15532_v55  ;;  %v18736_v36 = vpop.f32.mrf.mxu1  ;;  %15824 = vmatmul.mubr.msk.f32.gmra.mxu1 %vm3173_vm2, %v4663_v46  ;;  %16251 = vmatprep.mubr.msk.f32.mxu0 %vm3173_vm2, %v7675_v7  ;;  %v4667_v46 = vld [vmem:[#allocation2 + $0x2b0] sm:$0xff]  ;;  %v7679_v7 = vld [vmem:[#allocation2 + $0xc8] sm:$0xff] }
 0x25c   :  { %21949 = vst [vmem:[#allocation7_spill] sm:$0xff] %v18736_v36  ;;  %3375 = vst.msk [vmem:[#allocation2 + $0x648] sm:$0xff] %vm3173_vm2, %v3118_v51  ;;  %v2136_v24 = vpop.f32.mrf.mxu0  ;;  %15826 = vmatprep.mubr.msk.f32.mxu1 %vm3173_vm2, %v4664_v37  ;;  %16362 = vmatpush3.msra.mxu0 %v14019_v59 }
 0x25d   :  { %v3117_v0 = vsel %vm2605_vm0, %v2127_v38, %v2861_v6  ;;  %vm2608_vm15 = vcmp.gt.f32.partialorder %v2142_v9, 0.0  ;;  %v2864_v52 = vmul.f32 0.01, %v2142_v9  ;;  %v2137_v10 = vadd.f32 %v18451_v1, %v2136_v24  ;;  %v18743_v4 = vpop.f32.mrf.mxu1  ;;  %16479 = vmatprep.subr.mxu0 %v18733_v54 }
 0x25e   :  { %21950 = vst [vmem:[#allocation8_spill] sm:$0xff] %v18743_v4  ;;  %3374 = vst.msk [vmem:[#allocation2 + $0x640] sm:$0xff] %vm3173_vm2, %v3117_v0  ;;  %v15535_v22 = vpop.f32.mrf.mxu0  ;;  %16252 = vmatmul.mubr.msk.f32.gmra.mxu0 %vm3173_vm2, %v7676_v14  ;;  %v4669_v14 = vld [vmem:[#allocation2 + $0x2d0] sm:$0xff] }
 0x25f   :  { %v3120_v8 = vsel %vm2608_vm15, %v2142_v9, %v2864_v52  ;;  %vm2607_vm1 = vcmp.gt.f32.partialorder %v2137_v10, 0.0  ;;  %v2863_v59 = vmul.f32 0.01, %v2137_v10  ;;  %v2152_v25 = vadd.f32 %v18451_v1, %v15535_v22  ;;  %15827 = vmatmul.mubr.msk.f32.gmra.mxu1 %vm3173_vm2, %v4665_v18  ;;  %16254 = vmatprep.mubr.msk.f32.mxu0 %vm3173_vm2, %v7677_v56  ;;  %v18753_v38 = vpop.f32.mrf.mxu1  ;;  %v4668_v9 = vld [vmem:[#allocation2 + $0x2c8] sm:$0xff]  ;;  %v7680_v52 = vld [vmem:[#allocation2 + $0xd0] sm:$0xff]  ;;  %v7681_v22 = vld [vmem:[#allocation2 + $0xd8] sm:$0xff] }
 0x260   :  { %3377 = vst.msk [vmem:[#allocation2 + $0x658] sm:$0xff] %vm3173_vm2, %v3120_v8  ;;  %v2146_v33 = vpop.f32.mrf.mxu0  ;;  %15829 = vmatprep.mubr.msk.f32.mxu1 %vm3173_vm2, %v4666_v32  ;;  %21951 = vst [vmem:[#allocation9_spill] sm:$0xff] %v18753_v38  ;;  %v18961_v38 = vld [vmem:[#allocation2 + $0x460] sm:$0xff] }
 0x261   :  { %v3119_v23 = vsel %vm2607_vm1, %v2137_v10, %v2863_v59  ;;  %vm2610_vm3 = vcmp.gt.f32.partialorder %v2152_v25, 0.0  ;;  %v2866_v45 = vmul.f32 0.01, %v2152_v25  ;;  %v2147_v63 = vadd.f32 %v18451_v1, %v2146_v33  ;;  %v18763_v0 = vpop.f32.mrf.mxu1  ;;  %v4670_v59 = vld [vmem:[#allocation2 + $0x2d8] sm:$0xff] }
 0x262   :  { %3376 = vst.msk [vmem:[#allocation2 + $0x650] sm:$0xff] %vm3173_vm2, %v3119_v23  ;;  %v15538_v55 = vpop.f32.mrf.mxu0  ;;  %16255 = vmatmul.mubr.msk.f32.gmra.mxu0 %vm3173_vm2, %v18489_v58  ;;  %21952 = vst [vmem:[#allocation10_spill] sm:$0xff] %v18763_v0 }
 0x263   :  { %v3122_v51 = vsel %vm2610_vm3, %v2152_v25, %v2866_v45  ;;  %vm2609_vm4 = vcmp.gt.f32.partialorder %v2147_v63, 0.0  ;;  %v2865_v6 = vmul.f32 0.01, %v2147_v63  ;;  %15830 = vmatmul.mubr.msk.f32.gmra.mxu1 %vm3173_vm2, %v4667_v46  ;;  %16257 = vmatprep.mubr.msk.f32.mxu0 %vm3173_vm2, %v7679_v7  ;;  %v4671_v46 = vld [vmem:[#allocation2 + $0x2e0] sm:$0xff]  ;;  %v7683_v7 = vld [vmem:[#allocation2 + $0xe8] sm:$0xff] }
 0x264   :  { %3379 = vst.msk [vmem:[#allocation2 + $0x668] sm:$0xff] %vm3173_vm2, %v3122_v51  ;;  %v2156_v37 = vpop.f32.mrf.mxu0  ;;  %15832 = vmatprep.mubr.msk.f32.mxu1 %vm3173_vm2, %v4668_v9 }
 0x265   :  { %v3121_v24 = vsel %vm2609_vm4, %v2147_v63, %v2865_v6  ;;  %v2157_v58 = vadd.f32 %v18451_v1, %v2156_v37  ;;  %v7682_v63 = vld [vmem:[#allocation2 + $0xe0] sm:$0xff] }
 0x266   :  { %3378 = vst.msk [vmem:[#allocation2 + $0x660] sm:$0xff] %vm3173_vm2, %v3121_v24  ;;  %v15541_v10 = vpop.f32.mrf.mxu0  ;;  %16258 = vmatmul.mubr.msk.f32.gmra.mxu0 %vm3173_vm2, %v7680_v52  ;;  %v4672_v24 = vld [vmem:[#allocation2 + $0x2e8] sm:$0xff] }
 0x267   :  { %vm2611_vm5 = vcmp.gt.f32.partialorder %v2157_v58, 0.0  ;;  %v2867_v18 = vmul.f32 0.01, %v2157_v58  ;;  %v2172_v56 = vadd.f32 %v18451_v1, %v15541_v10  ;;  %v18769_v8 = vpop.f32.mrf.mxu1  ;;  %15833 = vmatmul.mubr.msk.f32.gmra.mxu1 %vm3173_vm2, %v4669_v14  ;;  %16260 = vmatprep.mubr.msk.f32.mxu0 %vm3173_vm2, %v7681_v22 }
 0x268   :  { %21953 = vst [vmem:[#allocation11_spill] sm:$0xff] %v18769_v8  ;;  %v2166_v25 = vpop.f32.mrf.mxu0  ;;  %15835 = vmatprep.mubr.msk.f32.mxu1 %vm3173_vm2, %v4670_v59  ;;  %v7685_v59 = vld [vmem:[#allocation2 + $0x108] sm:$0xff]  ;;  %v18956_v8 = vld [vmem:[#allocation2 + $0x458] sm:$0xff] }
 0x269   :  { %v3123_v32 = vsel %vm2611_vm5, %v2157_v58, %v2867_v18  ;;  %vm2614_vm6 = vcmp.gt.f32.partialorder %v2172_v56, 0.0  ;;  %v2870_v33 = vmul.f32 0.01, %v2172_v56  ;;  %v2167_v23 = vadd.f32 %v18451_v1, %v2166_v25  ;;  %v18775_v45 = vpop.f32.mrf.mxu1 }
 0x26a   :  { %21954 = vst [vmem:[#allocation12_spill] sm:$0xff] %v18775_v45  ;;  %3380 = vst.msk [vmem:[#allocation2 + $0x670] sm:$0xff] %vm3173_vm2, %v3123_v32  ;;  %v15544_v55 = vpop.f32.mrf.mxu0  ;;  %16261 = vmatmul.mubr.msk.f32.gmra.mxu0 %vm3173_vm2, %v7682_v63  ;;  %v4674_v63 = vld [vmem:[#allocation2 + $0x308] sm:$0xff] }
 0x26b   :  { %v3126_v51 = vsel %vm2614_vm6, %v2172_v56, %v2870_v33  ;;  %vm2613_vm7 = vcmp.gt.f32.partialorder %v2167_v23, 0.0  ;;  %v2869_v6 = vmul.f32 0.01, %v2167_v23  ;;  %v2182_v9 = vadd.f32 %v18451_v1, %v15544_v55  ;;  %v18780_v37 = vpop.f32.mrf.mxu1  ;;  %15836 = vmatmul.mubr.msk.f32.gmra.mxu1 %vm3173_vm2, %v4671_v46  ;;  %16263 = vmatprep.mubr.msk.f32.mxu0 %vm3173_vm2, %v7683_v7  ;;  %v4673_v56 = vld [vmem:[#allocation2 + $0x2f0] sm:$0xff] }
 0x26c   :  { %21955 = vst [vmem:[#allocation13_spill] sm:$0xff] %v18780_v37  ;;  %3383 = vst.msk [vmem:[#allocation2 + $0x688] sm:$0xff] %vm3173_vm2, %v3126_v51  ;;  %v2176_v58 = vpop.f32.mrf.mxu0  ;;  %15838 = vmatprep.mubr.msk.f32.mxu1 %vm3173_vm2, %v4672_v24  ;;  %v4675_v24 = vld [vmem:[#allocation2 + $0x310] sm:$0xff] }
 0x26d   :  { %v3125_v52 = vsel %vm2613_vm7, %v2167_v23, %v2869_v6  ;;  %vm2616_vm8 = vcmp.gt.f32.partialorder %v2182_v9, 0.0  ;;  %v2872_v10 = vmul.f32 0.01, %v2182_v9  ;;  %v2177_v14 = vadd.f32 %v18451_v1, %v2176_v58  ;;  %v18787_v22 = vpop.f32.mrf.mxu1  ;;  %v7686_v6 = vld [vmem:[#allocation2 + $0x110] sm:$0xff]  ;;  %v7687_v58 = vld [vmem:[#allocation2 + $0x118] sm:$0xff] }
 0x26e   :  { %21956 = vst [vmem:[#allocation14_spill] sm:$0xff] %v18787_v22  ;;  %3382 = vst.msk [vmem:[#allocation2 + $0x680] sm:$0xff] %vm3173_vm2, %v3125_v52  ;;  %v15547_v18 = vpop.f32.mrf.mxu0  ;;  %16264 = vmatmul.mubr.msk.f32.gmra.mxu0 %vm3173_vm2, %v18534_v30 }
 0x26f   :  { %v3128_v25 = vsel %vm2616_vm8, %v2182_v9, %v2872_v10  ;;  %vm2615_vm9 = vcmp.gt.f32.partialorder %v2177_v14, 0.0  ;;  %v2871_v32 = vmul.f32 0.01, %v2177_v14  ;;  %v2192_v33 = vadd.f32 %v18451_v1, %v15547_v18  ;;  %v18793_v23 = vpop.f32.mrf.mxu1  ;;  %15839 = vmatmul.mubr.msk.f32.gmra.mxu1 %vm3173_vm2, %v4673_v56  ;;  %16266 = vmatprep.mubr.msk.f32.mxu0 %vm3173_vm2, %v7685_v59  ;;  %v18813_v59 = vld [vmem:[%s21892_s2] ss:$0 sm:$0xff] }
 0x270   :  { %21957 = vst [vmem:[#allocation15_spill] sm:$0xff] %v18793_v23  ;;  %3385 = vst.msk [vmem:[#allocation2 + $0x698] sm:$0xff] %vm3173_vm2, %v3128_v25  ;;  %v2186_v55 = vpop.f32.mrf.mxu0  ;;  %15841 = vmatprep.mubr.msk.f32.mxu1 %vm3173_vm2, %v4674_v63 }
 0x271   :  { %v3127_v30 = vsel %vm2615_vm9, %v2177_v14, %v2871_v32  ;;  %vm2618_vm10 = vcmp.gt.f32.partialorder %v2192_v33, 0.0  ;;  %v2874_v46 = vmul.f32 0.01, %v2192_v33  ;;  %v2187_v7 = vadd.f32 %v18451_v1, %v2186_v55  ;;  %v18800_v51 = vpop.f32.mrf.mxu1  ;;  %v4676_v1 = vld [vmem:[#allocation2 + $0x318] sm:$0xff]  ;;  %v4677_v55 = vld [vmem:[#allocation2 + $0x320] sm:$0xff] }
 0x272   :  { %21958 = vst [vmem:[#allocation16_spill] sm:$0xff] %v18800_v51  ;;  %3384 = vst.msk [vmem:[#allocation2 + $0x690] sm:$0xff] %vm3173_vm2, %v3127_v30  ;;  %v15550_v9 = vpop.f32.mrf.mxu0  ;;  %16267 = vmatmul.mubr.msk.f32.gmra.mxu0 %vm3173_vm2, %v7686_v6  ;;  %v7689_v30 = vld [vmem:[#allocation2 + $0x128] sm:$0xff] }
 0x273   :  { %v3130_v52 = vsel %vm2618_vm10, %v2192_v33, %v2874_v46  ;;  %vm2617_vm11 = vcmp.gt.f32.partialorder %v2187_v7, 0.0  ;;  %v2873_v10 = vmul.f32 0.01, %v2187_v7  ;;  %v18804_v18 = vpop.f32.mrf.mxu1  ;;  %15842 = vmatmul.mubr.msk.f32.gmra.mxu1 %vm3173_vm2, %v4675_v24  ;;  %16269 = vmatprep.mubr.msk.f32.mxu0 %vm3173_vm2, %v7687_v58  ;;  %v7688_v33 = vld [vmem:[#allocation2 + $0x120] sm:$0xff]  ;;  %v4678_v9 = vld [vmem:[#allocation2 + $0x328] sm:$0xff] }
 0x274   :  { %3387 = vst.msk [vmem:[#allocation2 + $0x6a8] sm:$0xff] %vm3173_vm2, %v3130_v52  ;;  %v2196_v14 = vpop.f32.mrf.mxu0  ;;  %15844 = vmatprep.mubr.msk.f32.mxu1 %vm3173_vm2, %v4676_v1 }
 0x275   :  { %v3129_v56 = vsel %vm2617_vm11, %v2187_v7, %v2873_v10  ;;  %v2197_v25 = vadd.f32 %v18813_v59, %v2196_v14  ;;  %v18816_v32 = vpop.f32.mrf.mxu1 }
 0x276   :  { %3386 = vst.msk [vmem:[#allocation2 + $0x6a0] sm:$0xff] %vm3173_vm2, %v3129_v56  ;;  %v15553_v63 = vpop.f32.mrf.mxu0  ;;  %16270 = vmatmul.mubr.msk.f32.gmra.mxu0 %vm3173_vm2, %v7688_v33  ;;  %v4679_v56 = vld [vmem:[#allocation2 + $0x330] sm:$0xff]  ;;  %v7691_v33 = vld [vmem:[#allocation2 + $0x148] sm:$0xff] }
 0x277   :  { %vm2619_vm12 = vcmp.gt.f32.partialorder %v2197_v25, 0.0  ;;  %v2875_v46 = vmul.f32 0.01, %v2197_v25  ;;  %v2212_v7 = vadd.f32 %v18813_v59, %v15553_v63  ;;  %v18821_v6 = vpop.f32.mrf.mxu1  ;;  %15845 = vmatmul.mubr.msk.f32.gmra.mxu1 %vm3173_vm2, %v4677_v55  ;;  %16272 = vmatprep.mubr.msk.f32.mxu0 %vm3173_vm2, %v7689_v30 }
 0x278   :  { %v2206_v24 = vpop.f32.mrf.mxu0  ;;  %15847 = vmatprep.mubr.msk.f32.mxu1 %vm3173_vm2, %v4678_v9 }
 0x279   :  { %v3131_v58 = vsel %vm2619_vm12, %v2197_v25, %v2875_v46  ;;  %vm2622_vm13 = vcmp.gt.f32.partialorder %v2212_v7, 0.0  ;;  %v2878_v52 = vmul.f32 0.01, %v2212_v7  ;;  %v2207_v10 = vadd.f32 %v18813_v59, %v2206_v24  ;;  %v18827_v1 = vpop.f32.mrf.mxu1  ;;  %v4680_v46 = vld [vmem:[#allocation2 + $0x348] sm:$0xff] }
 0x27a   :  { %3388 = vst.msk [vmem:[#allocation2 + $0x6b0] sm:$0xff] %vm3173_vm2, %v3131_v58  ;;  %v15556_v14 = vpop.f32.mrf.mxu0  ;;  %16273 = vmatmul.mubr.msk.f32.gmra.mxu0 %vm3173_vm2, %v18581_v28 }
 0x27b   :  { %v3134_v63 = vsel %vm2622_vm13, %v2212_v7, %v2878_v52  ;;  %vm2621_vm14 = vcmp.gt.f32.partialorder %v2207_v10, 0.0  ;;  %v2877_v55 = vmul.f32 0.01, %v2207_v10  ;;  %v2222_v30 = vadd.f32 %v18813_v59, %v15556_v14  ;;  %v18833_v25 = vpop.f32.mrf.mxu1  ;;  %15848 = vmatmul.mubr.msk.f32.gmra.mxu1 %vm3173_vm2, %v4679_v56  ;;  %16275 = vmatprep.mubr.msk.f32.mxu0 %vm3173_vm2, %v7691_v33  ;;  %v7692_v52 = vld [vmem:[#allocation2 + $0x150] sm:$0xff]  ;;  %v7693_v33 = vld [vmem:[#allocation2 + $0x158] sm:$0xff] }
 0x27c   :  { %3391 = vst.msk [vmem:[#allocation2 + $0x6c8] sm:$0xff] %vm3173_vm2, %v3134_v63  ;;  %v2216_v9 = vpop.f32.mrf.mxu0  ;;  %15850 = vmatprep.mubr.msk.f32.mxu1 %vm3173_vm2, %v4680_v46  ;;  %v4681_v56 = vld [vmem:[#allocation2 + $0x350] sm:$0xff] }
 0x27d   :  { %v3133_v28 = vsel %vm2621_vm14, %v2207_v10, %v2877_v55  ;;  %vm2624_vm0 = vcmp.gt.f32.partialorder %v2222_v30, 0.0  ;;  %v2880_v24 = vmul.f32 0.01, %v2222_v30  ;;  %v2217_v7 = vadd.f32 %v18813_v59, %v2216_v9  ;;  %v18840_v58 = vpop.f32.mrf.mxu1  ;;  %v4682_v55 = vld [vmem:[#allocation2 + $0x358] sm:$0xff] }
 0x27e   :  { %3390 = vst.msk [vmem:[#allocation2 + $0x6c0] sm:$0xff] %vm3173_vm2, %v3133_v28  ;;  %v15559_v14 = vpop.f32.mrf.mxu0  ;;  %16276 = vmatmul.mubr.msk.f32.gmra.mxu0 %vm3173_vm2, %v7692_v52 }
 0x27f   :  { %v3136_v51 = vsel %vm2624_vm0, %v2222_v30, %v2880_v24  ;;  %vm2623_vm15 = vcmp.gt.f32.partialorder %v2217_v7, 0.0  ;;  %v2879_v63 = vmul.f32 0.01, %v2217_v7  ;;  %v2232_v46 = vadd.f32 %v18813_v59, %v15559_v14  ;;  %v18845_v10 = vpop.f32.mrf.mxu1  ;;  %15851 = vmatmul.mubr.msk.f32.gmra.mxu1 %vm3173_vm2, %v4681_v56  ;;  %16278 = vmatprep.mubr.msk.f32.mxu0 %vm3173_vm2, %v7693_v33  ;;  %v7694_v14 = vld [vmem:[#allocation2 + $0x160] sm:$0xff]  ;;  %v7695_v33 = vld [vmem:[#allocation2 + $0x168] sm:$0xff] }
 0x280   :  { %3393 = vst.msk [vmem:[#allocation2 + $0x6d8] sm:$0xff] %vm3173_vm2, %v3136_v51  ;;  %v2226_v9 = vpop.f32.mrf.mxu0  ;;  %15853 = vmatprep.mubr.msk.f32.mxu1 %vm3173_vm2, %v4682_v55  ;;  %v4683_v56 = vld [vmem:[#allocation2 + $0x360] sm:$0xff] }
 0x281   :  { %v3135_v28 = vsel %vm2623_vm15, %v2217_v7, %v2879_v63  ;;  %vm2626_vm1 = vcmp.gt.f32.partialorder %v2232_v46, 0.0  ;;  %v2882_v52 = vmul.f32 0.01, %v2232_v46  ;;  %v2227_v30 = vadd.f32 %v18813_v59, %v2226_v9  ;;  %v18852_v24 = vpop.f32.mrf.mxu1  ;;  %v4684_v7 = vld [vmem:[#allocation2 + $0x368] sm:$0xff] }
 0x282   :  { %3392 = vst.msk [vmem:[#allocation2 + $0x6d0] sm:$0xff] %vm3173_vm2, %v3135_v28  ;;  %v15562_v23 = vpop.f32.mrf.mxu0  ;;  %16279 = vmatmul.mubr.msk.f32.gmra.mxu0 %vm3173_vm2, %v7694_v14  ;;  %v4685_v28 = vld [vmem:[#allocation2 + $0x370] sm:$0xff] }
 0x283   :  { %v3138_v22 = vsel %vm2626_vm1, %v2232_v46, %v2882_v52  ;;  %vm2625_vm3 = vcmp.gt.f32.partialorder %v2227_v30, 0.0  ;;  %v2881_v51 = vmul.f32 0.01, %v2227_v30  ;;  %v18856_v37 = vpop.f32.mrf.mxu1  ;;  %15854 = vmatmul.mubr.msk.f32.gmra.mxu1 %vm3173_vm2, %v4683_v56  ;;  %16281 = vmatprep.mubr.msk.f32.mxu0 %vm3173_vm2, %v7695_v33 }
 0x284   :  { %3395 = vst.msk [vmem:[#allocation2 + $0x6e8] sm:$0xff] %vm3173_vm2, %v3138_v22  ;;  %v2236_v63 = vpop.f32.mrf.mxu0  ;;  %15856 = vmatprep.mubr.msk.f32.mxu1 %vm3173_vm2, %v4684_v7 }
 0x285   :  { %v3137_v23 = vsel %vm2625_vm3, %v2227_v30, %v2881_v51  ;;  %v2237_v55 = vadd.f32 %v18813_v59, %v2236_v63  ;;  %v18863_v9 = vpop.f32.mrf.mxu1  ;;  %v5081_v30 = vld [vmem:[#allocation2 + $0x400] sm:$0xff] }
 0x286   :  { %3394 = vst.msk [vmem:[#allocation2 + $0x6e0] sm:$0xff] %vm3173_vm2, %v3137_v23  ;;  %v15565_v46 = vpop.f32.mrf.mxu0  ;;  %16282 = vmatmul.mubr.msk.f32.gmra.mxu0 %vm3173_vm2, %v18621_v12  ;;  %v5082_v23 = vld [vmem:[#allocation2 + $0x408] sm:$0xff] }
 0x287   :  { %vm2627_vm4 = vcmp.gt.f32.partialorder %v2237_v55, 0.0  ;;  %v2883_v52 = vmul.f32 0.01, %v2237_v55  ;;  %v2252_v14 = vadd.f32 %v18813_v59, %v15565_v46  ;;  %v18869_v22 = vpop.f32.mrf.mxu1  ;;  %15857 = vmatmul.mubr.msk.f32.gmra.mxu1 %vm3173_vm2, %v4685_v28  ;;  %16284 = vmatprep.mubr.msk.f32.mxu0 %vm3173_vm2, %v18629_v40  ;;  %v13741_v40 = vld [vmem:[%s21893_s3 + $0xb0] sm:$0xff] }
 0x288   :  { %v2246_v56 = vpop.f32.mrf.mxu0  ;;  %15867 = vmatprep.mubr.msk.f32.mxu1 %vm3173_vm2, %v5081_v30  ;;  %v5083_v30 = vld [vmem:[#allocation2 + $0x410] sm:$0xff] }
 0x289   :  { %v3139_v33 = vsel %vm2627_vm4, %v2237_v55, %v2883_v52  ;;  %vm2630_vm5 = vcmp.gt.f32.partialorder %v2252_v14, 0.0  ;;  %v2886_v51 = vmul.f32 0.01, %v2252_v14  ;;  %v2247_v12 = vadd.f32 %v18813_v59, %v2246_v56  ;;  %v18876_v7 = vpop.f32.mrf.mxu1 }
 0x28a   :  { %3396 = vst.msk [vmem:[#allocation2 + $0x6f0] sm:$0xff] %vm3173_vm2, %v3139_v33  ;;  %v15568_v63 = vpop.f32.mrf.mxu0  ;;  %16285 = vmatmul.mubr.msk.f32.gmra.mxu0 %vm3173_vm2, %v18633_v31 }
 0x28b   :  { %v3142_v46 = vsel %vm2630_vm5, %v2252_v14, %v2886_v51  ;;  %vm2629_vm6 = vcmp.gt.f32.partialorder %v2247_v12, 0.0  ;;  %v2885_v55 = vmul.f32 0.01, %v2247_v12  ;;  %v2262_v28 = vadd.f32 %v18813_v59, %v15568_v63  ;;  %v18885_v52 = vpop.f32.mrf.mxu1  ;;  %15868 = vmatmul.mubr.msk.f32.vlgmr.msra.gmra.mxu1 %vm3173_vm2, %v5082_v23  ;;  %16287 = vmatprep.mubr.msk.f32.mxu0 %vm3173_vm2, %v18645_v44  ;;  %v13740_v44 = vld [vmem:[%s21893_s3 + $0xa8] sm:$0xff] }
 0x28c   :  { %3399 = vst.msk [vmem:[#allocation2 + $0x708] sm:$0xff] %vm3173_vm2, %v3142_v46  ;;  %15922 = vmatpush3.msra.mxu1 %v18674_v5  ;;  %v2256_v31 = vpop.f32.mrf.mxu0  ;;  %15870 = vmatprep.mubr.msk.f32.mxu1 %vm3173_vm2, %v5083_v30  ;;  %v5084_v5 = vld [vmem:[#allocation2 + $0x418] sm:$0xff]  ;;  %v5085_v30 = vld [vmem:[#allocation2 + $0x420] sm:$0xff] }
 0x28d   :  { %v3141_v14 = vsel %vm2629_vm6, %v2247_v12, %v2885_v55  ;;  %vm2632_vm7 = vcmp.gt.f32.partialorder %v2262_v28, 0.0  ;;  %v2888_v56 = vmul.f32 0.01, %v2262_v28  ;;  %v2257_v33 = vadd.f32 %v18813_v59, %v2256_v31  ;;  %v18894_v51 = vpop.f32.mrf.mxu1  ;;  %15923 = vmatprep.subr.mxu1 %v13741_v40  ;;  %v13739_v31 = vld [vmem:[%s21893_s3 + $0xa0] sm:$0xff] }
 0x28e   :  { %3398 = vst.msk [vmem:[#allocation2 + $0x700] sm:$0xff] %vm3173_vm2, %v3141_v14  ;;  %v15571_v63 = vpop.f32.mrf.mxu0  ;;  %16288 = vmatmul.mubr.msk.f32.gmra.mxu0 %vm3173_vm2, %v18652_v2  ;;  %15924 = vmatpush3.msra.mxu1 %v13741_v40 }
 0x28f   :  { %v3144_v12 = vsel %vm2632_vm7, %v2262_v28, %v2888_v56  ;;  %vm2631_vm8 = vcmp.gt.f32.partialorder %v2257_v33, 0.0  ;;  %v2887_v23 = vmul.f32 0.01, %v2257_v33  ;;  %v2272_v46 = vadd.f32 %v18813_v59, %v15571_v63  ;;  %v18903_v55 = vpop.f32.mrf.mxu1  ;;  %15871 = vmatmul.mubr.msk.f32.gmra.mxu1 %vm3173_vm2, %v5084_v5  ;;  %16290 = vmatprep.mubr.msk.f32.mxu0 %vm3173_vm2, %v18667_v61  ;;  %v7702_v63 = vld [vmem:[#allocation2 + $0x1b0] sm:$0xff]  ;;  %v5086_v5 = vld [vmem:[#allocation2 + $0x428] sm:$0xff] }
 0x290   :  { %3401 = vst.msk [vmem:[#allocation2 + $0x718] sm:$0xff] %vm3173_vm2, %v3144_v12  ;;  %v2266_v2 = vpop.f32.mrf.mxu0  ;;  %15873 = vmatprep.mubr.msk.f32.mxu1 %vm3173_vm2, %v5085_v30  ;;  %15925 = vmatprep.subr.mxu1 %v13740_v44  ;;  %v8529_v12 = vld [vmem:[#allocation2 + $0x440] sm:$0xff] }
 0x291   :  { %v3143_v40 = vsel %vm2631_vm8, %v2257_v33, %v2887_v23  ;;  %vm2634_vm9 = vcmp.gt.f32.partialorder %v2272_v46, 0.0  ;;  %v2890_v28 = vmul.f32 0.01, %v2272_v46  ;;  %v2267_v14 = vadd.f32 %v18813_v59, %v2266_v2  ;;  %v18914_v56 = vpop.f32.mrf.mxu1  ;;  %15926 = vmatpush3.msra.mxu1 %v13740_v44  ;;  %v18921_v33 = vld [vmem:[%s21893_s3 + $0xd8] sm:$0xff] }
 0x292   :  { %3400 = vst.msk [vmem:[#allocation2 + $0x710] sm:$0xff] %vm3173_vm2, %v3143_v40  ;;  %v15574_v61 = vpop.f32.mrf.mxu0  ;;  %16291 = vmatmul.mubr.msk.f32.gmra.mxu0 %vm3173_vm2, %v7702_v63  ;;  %15927 = vmatprep.subr.mxu1 %v13739_v31 }
 0x293   :  { %v3146_v23 = vsel %vm2634_vm9, %v2272_v46, %v2890_v28  ;;  %vm2633_vm10 = vcmp.gt.f32.partialorder %v2267_v14, 0.0  ;;  %v2889_v30 = vmul.f32 0.01, %v2267_v14  ;;  %v18923_v2 = vpop.f32.mrf.mxu1  ;;  %15874 = vmatmul.mubr.msk.f32.gmra.mxu1 %vm3173_vm2, %v5086_v5  ;;  %16363 = vmatprep.mubr.msk.f32.mxu0 %vm3173_vm2, %v8529_v12  ;;  %v18932_v46 = vld [vmem:[#allocation2 + $0x448] sm:$0xff]  ;;  %v18938_v5 = vld [vmem:[#allocation2 + $0x450] sm:$0xff] }
 0x294   :  { %3403 = vst.msk [vmem:[#allocation2 + $0x728] sm:$0xff] %vm3173_vm2, %v3146_v23  ;;  %v2276_v44 = vpop.f32.mrf.mxu0  ;;  %15876 = vmatprep.mubr.msk.f32.mxu1 %vm3173_vm2, %v8529_v12  ;;  %15928 = vmatpush3.msra.mxu1 %v13739_v31  ;;  %v14101_v31 = vld [vmem:[%s21893_s3 + $0x1d0] sm:$0xff] }
 0x295   :  { %v3145_v40 = vsel %vm2633_vm10, %v2267_v14, %v2889_v30  ;;  %v2277_v63 = vadd.f32 %v18813_v59, %v2276_v44  ;;  %v18930_v61 = vpop.f32.mrf.mxu1  ;;  %15983 = vmatprep.subr.mxu1 %v18921_v33 }
 0x296   :  { %3402 = vst.msk [vmem:[#allocation2 + $0x720] sm:$0xff] %vm3173_vm2, %v3145_v40  ;;  %v15577_v28 = vpop.f32.mrf.mxu0  ;;  %16364 = vmatmul.mubr.msk.f32.vlgmr.msra.gmra.mxu0 %vm3173_vm2, %v18932_v46 }
 0x297   :  { %vm2635_vm11 = vcmp.gt.f32.partialorder %v2277_v63, 0.0  ;;  %v2891_v14 = vmul.f32 0.01, %v2277_v63  ;;  %v2292_v12 = vadd.f32 %v18813_v59, %v15577_v28  ;;  %v18944_v23 = vpop.f32.mrf.mxu1  ;;  %15877 = vmatmul.mubr.msk.f32.gmra.mxu1 %vm3173_vm2, %v18932_v46  ;;  %16366 = vmatprep.mubr.msk.f32.mxu0 %vm3173_vm2, %v18938_v5 }
 0x298   :  { %v2286_v30 = vpop.f32.mrf.mxu0  ;;  %15879 = vmatprep.mubr.msk.f32.mxu1 %vm3173_vm2, %v18938_v5  ;;  %16480 = vmatpush3.msra.mxu0 %v18733_v54  ;;  %v14100_v54 = vld [vmem:[%s21893_s3 + $0x1c8] sm:$0xff] }
 0x299   :  { %v3147_v44 = vsel %vm2635_vm11, %v2277_v63, %v2891_v14  ;;  %vm2638_vm12 = vcmp.gt.f32.partialorder %v2292_v12, 0.0  ;;  %v2894_v40 = vmul.f32 0.01, %v2292_v12  ;;  %v2287_v45 = vadd.f32 %v18813_v59, %v2286_v30  ;;  %v18954_v28 = vpop.f32.mrf.mxu1  ;;  %16481 = vmatprep.subr.mxu0 %v14101_v31 }
 0x29a   :  { %3404 = vst.msk [vmem:[#allocation2 + $0x730] sm:$0xff] %vm3173_vm2, %v3147_v44  ;;  %v15580_v0 = vpop.f32.mrf.mxu0  ;;  %16367 = vmatmul.mubr.msk.f32.gmra.mxu0 %vm3173_vm2, %v18956_v8  ;;  %vm16790_vm11 = vmmov 0  }
 0x29b   :  { %v3150_v63 = vsel %vm2638_vm12, %v2292_v12, %v2894_v40  ;;  %vm2637_vm13 = vcmp.gt.f32.partialorder %v2287_v45, 0.0  ;;  %v2893_v14 = vmul.f32 0.01, %v2287_v45  ;;  %v2302_v30 = vadd.f32 %v18813_v59, %v15580_v0  ;;  %v18967_v4 = vpop.f32.mrf.mxu1  ;;  %15880 = vmatmul.mubr.msk.f32.gmra.mxu1 %vm3173_vm2, %v18956_v8  ;;  %16369 = vmatprep.mubr.msk.f32.mxu0 %vm3173_vm2, %v18961_v38 }
 0x29c   :  { %3407 = vst.msk [vmem:[#allocation2 + $0x748] sm:$0xff] %vm3173_vm2, %v3150_v63  ;;  %v2296_v44 = vpop.f32.mrf.mxu0  ;;  %15882 = vmatprep.mubr.msk.f32.mxu1 %vm3173_vm2, %v18961_v38  ;;  %16482 = vmatpush3.msra.mxu0 %v14101_v31  ;;  %v8535_v63 = vld [vmem:[#allocation2 + $0x480] sm:$0xff] }
 0x29d   :  { %v3149_v12 = vsel %vm2637_vm13, %v2287_v45, %v2893_v14  ;;  %vm2640_vm14 = vcmp.gt.f32.partialorder %v2302_v30, 0.0  ;;  %v2896_v40 = vmul.f32 0.01, %v2302_v30  ;;  %v2297_v0 = vadd.f32 %v18813_v59, %v2296_v44  ;;  %v18977_v36 = vpop.f32.mrf.mxu1  ;;  %16483 = vmatprep.subr.mxu0 %v14100_v54  ;;  %v14099_v45 = vld [vmem:[%s21893_s3 + $0x1c0] sm:$0xff] }
 0x29e   :  { %21959 = vst [vmem:[#allocation17_spill] sm:$0xff] %v18977_v36  ;;  %3406 = vst.msk [vmem:[#allocation2 + $0x740] sm:$0xff] %vm3173_vm2, %v3149_v12  ;;  %v15583_v34 = vpop.f32.mrf.mxu0  ;;  %16370 = vmatmul.mubr.msk.f32.gmra.mxu0 %vm3173_vm2, %v18979_v49 }
 0x29f   :  { %v3152_v31 = vsel %vm2640_vm14, %v2302_v30, %v2896_v40  ;;  %vm2639_vm0 = vcmp.gt.f32.partialorder %v2297_v0, 0.0  ;;  %v2895_v14 = vmul.f32 0.01, %v2297_v0  ;;  %v2312_v44 = vadd.f32 %v18813_v59, %v15583_v34  ;;  %v18988_v11 = vpop.f32.mrf.mxu1  ;;  %15883 = vmatmul.mubr.msk.f32.gmra.mxu1 %vm3173_vm2, %v18979_v49  ;;  %16372 = vmatprep.mubr.msk.f32.mxu0 %vm3173_vm2, %v8535_v63  ;;  %v18998_v34 = vld [vmem:[#allocation2 + $0x488] sm:$0xff] }
 0x2a0   :  { %21960 = vst [vmem:[#allocation18_spill] sm:$0xff] %v18988_v11  ;;  %3409 = vst.msk [vmem:[#allocation2 + $0x758] sm:$0xff] %vm3173_vm2, %v3152_v31  ;;  %v2306_v12 = vpop.f32.mrf.mxu0  ;;  %15885 = vmatprep.mubr.msk.f32.mxu1 %vm3173_vm2, %v8535_v63  ;;  %16484 = vmatpush3.msra.mxu0 %v14100_v54  ;;  %v19003_v31 = vld [vmem:[#allocation2 + $0x490] sm:$0xff] }
 0x2a1   :  { %v3151_v48 = vsel %vm2639_vm0, %v2297_v0, %v2895_v14  ;;  %vm2642_vm15 = vcmp.gt.f32.partialorder %v2312_v44, 0.0  ;;  %v2898_v30 = vmul.f32 0.01, %v2312_v44  ;;  %v2307_v40 = vadd.f32 %v18813_v59, %v2306_v12  ;;  %v18996_v36 = vpop.f32.mrf.mxu1  ;;  %21962 = vst [vmem:[#allocation20_spill] sm:$0xff] %v18998_v34  ;;  %16485 = vmatprep.subr.mxu0 %v14099_v45  ;;  %21963 = vst [vmem:[#allocation21_spill] sm:$0xff] %v19003_v31  ;;  %v19017_v12 = vld [vmem:[#allocation2 + $0x498] sm:$0xff] }
 0x2a2   :  { %21961 = vst [vmem:[#allocation19_spill] sm:$0xff] %v18996_v36  ;;  %3408 = vst.msk [vmem:[#allocation2 + $0x750] sm:$0xff] %vm3173_vm2, %v3151_v48  ;;  %v15586_v11 = vpop.f32.mrf.mxu0  ;;  %16373 = vmatmul.mubr.msk.f32.gmra.mxu0 %vm3173_vm2, %v18998_v34 }
 0x2a3   :  { %v3154_v63 = vsel %vm2642_vm15, %v2312_v44, %v2898_v30  ;;  %vm2641_vm1 = vcmp.gt.f32.partialorder %v2307_v40, 0.0  ;;  %v2897_v54 = vmul.f32 0.01, %v2307_v40  ;;  %v19005_v0 = vpop.f32.mrf.mxu1  ;;  %15886 = vmatmul.mubr.msk.f32.gmra.mxu1 %vm3173_vm2, %v18998_v34  ;;  %16375 = vmatprep.mubr.msk.f32.mxu0 %vm3173_vm2, %v19003_v31  ;;  %21966 = vst [vmem:[#allocation24_spill] sm:$0xff] %v19017_v12 }
 0x2a4   :  { %21964 = vst [vmem:[#allocation22_spill] sm:$0xff] %v19005_v0  ;;  %3411 = vst.msk [vmem:[#allocation2 + $0x768] sm:$0xff] %vm3173_vm2, %v3154_v63  ;;  %v2316_v48 = vpop.f32.mrf.mxu0  ;;  %15888 = vmatprep.mubr.msk.f32.mxu1 %vm3173_vm2, %v19003_v31  ;;  %16486 = vmatpush3.msra.mxu0 %v14099_v45  ;;  %v19022_v0 = vld [vmem:[#allocation2 + $0x4a0] sm:$0xff] }
 0x2a5   :  { %v3153_v11 = vsel %vm2641_vm1, %v2307_v40, %v2897_v54  ;;  %v2317_v14 = vadd.f32 %v18813_v59, %v2316_v48  ;;  %v19015_v44 = vpop.f32.mrf.mxu1 }
 0x2a6   :  { %21965 = vst [vmem:[#allocation23_spill] sm:$0xff] %v19015_v44  ;;  %3410 = vst.msk [vmem:[#allocation2 + $0x760] sm:$0xff] %vm3173_vm2, %v3153_v11  ;;  %v15589_v30 = vpop.f32.mrf.mxu0  ;;  %16376 = vmatmul.mubr.msk.f32.gmra.mxu0 %vm3173_vm2, %v19017_v12 }
 0x2a7   :  { %vm2643_vm3 = vcmp.gt.f32.partialorder %v2317_v14, 0.0  ;;  %v2899_v63 = vmul.f32 0.01, %v2317_v14  ;;  %v2332_v31 = vadd.f32 %v18813_v59, %v15589_v30  ;;  %v19025_v45 = vpop.f32.mrf.mxu1  ;;  %15889 = vmatmul.mubr.msk.f32.gmra.mxu1 %vm3173_vm2, %v19017_v12  ;;  %16378 = vmatprep.mubr.msk.f32.mxu0 %vm3173_vm2, %v19022_v0  ;;  %v19036_v30 = vld [vmem:[#allocation2 + $0x4a8] sm:$0xff]  ;;  %v8541_v12 = vld [vmem:[#allocation2 + $0x4c0] sm:$0xff] }
 0x2a8   :  { %21967 = vst [vmem:[#allocation25_spill] sm:$0xff] %v19025_v45  ;;  %v2326_v40 = vpop.f32.mrf.mxu0  ;;  %15891 = vmatprep.mubr.msk.f32.mxu1 %vm3173_vm2, %v19022_v0  ;;  %21969 = vst [vmem:[#allocation27_spill] sm:$0xff] %v19036_v30 }
 0x2a9   :  { %v3155_v54 = vsel %vm2643_vm3, %v2317_v14, %v2899_v63  ;;  %vm2646_vm4 = vcmp.gt.f32.partialorder %v2332_v31, 0.0  ;;  %v2902_v48 = vmul.f32 0.01, %v2332_v31  ;;  %v2327_v11 = vadd.f32 %v18813_v59, %v2326_v40  ;;  %v19034_v44 = vpop.f32.mrf.mxu1 }
 0x2aa   :  { %21968 = vst [vmem:[#allocation26_spill] sm:$0xff] %v19034_v44  ;;  %3412 = vst.msk [vmem:[#allocation2 + $0x770] sm:$0xff] %vm3173_vm2, %v3155_v54  ;;  %v15592_v45 = vpop.f32.mrf.mxu0  ;;  %16379 = vmatmul.mubr.msk.f32.gmra.mxu0 %vm3173_vm2, %v19036_v30 }
 0x2ab   :  { %v3158_v36 = vsel %vm2646_vm4, %v2332_v31, %v2902_v48  ;;  %vm2645_vm5 = vcmp.gt.f32.partialorder %v2327_v11, 0.0  ;;  %v2901_v34 = vmul.f32 0.01, %v2327_v11  ;;  %v2342_v14 = vadd.f32 %v18813_v59, %v15592_v45  ;;  %v19042_v63 = vpop.f32.mrf.mxu1  ;;  %15892 = vmatmul.mubr.msk.f32.gmra.mxu1 %vm3173_vm2, %v19036_v30  ;;  %16381 = vmatprep.mubr.msk.f32.mxu0 %vm3173_vm2, %v8541_v12  ;;  %v19052_v45 = vld [vmem:[#allocation2 + $0x4c8] sm:$0xff]  ;;  %v19057_v30 = vld [vmem:[#allocation2 + $0x4d0] sm:$0xff] }
 0x2ac   :  { %21970 = vst [vmem:[#allocation28_spill] sm:$0xff] %v19042_v63  ;;  %3415 = vst.msk [vmem:[#allocation2 + $0x788] sm:$0xff] %vm3173_vm2, %v3158_v36  ;;  %v2336_v40 = vpop.f32.mrf.mxu0  ;;  %15894 = vmatprep.mubr.msk.f32.mxu1 %vm3173_vm2, %v8541_v12 }
 0x2ad   :  { %v3157_v54 = vsel %vm2645_vm5, %v2327_v11, %v2901_v34  ;;  %vm2648_vm6 = vcmp.gt.f32.partialorder %v2342_v14, 0.0  ;;  %v2904_v44 = vmul.f32 0.01, %v2342_v14  ;;  %v2337_v31 = vadd.f32 %v18813_v59, %v2336_v40  ;;  %v19050_v48 = vpop.f32.mrf.mxu1  ;;  %21972 = vst [vmem:[#allocation30_spill] sm:$0xff] %v19052_v45  ;;  %21973 = vst [vmem:[#allocation31_spill] sm:$0xff] %v19057_v30 }
 0x2ae   :  { %21971 = vst [vmem:[#allocation29_spill] sm:$0xff] %v19050_v48  ;;  %3414 = vst.msk [vmem:[#allocation2 + $0x780] sm:$0xff] %vm3173_vm2, %v3157_v54  ;;  %v15595_v63 = vpop.f32.mrf.mxu0  ;;  %16382 = vmatmul.mubr.msk.f32.gmra.mxu0 %vm3173_vm2, %v19052_v45 }
 0x2af   :  { %v3160_v36 = vsel %vm2648_vm6, %v2342_v14, %v2904_v44  ;;  %vm2647_vm7 = vcmp.gt.f32.partialorder %v2337_v31, 0.0  ;;  %v2903_v12 = vmul.f32 0.01, %v2337_v31  ;;  %v2352_v34 = vadd.f32 %v18813_v59, %v15595_v63  ;;  %v19060_v11 = vpop.f32.mrf.mxu1  ;;  %15895 = vmatmul.mubr.msk.f32.gmra.mxu1 %vm3173_vm2, %v19052_v45  ;;  %16384 = vmatprep.mubr.msk.f32.mxu0 %vm3173_vm2, %v19057_v30 }
 0x2b0   :  { %21974 = vst [vmem:[#allocation32_spill] sm:$0xff] %v19060_v11  ;;  %3417 = vst.msk [vmem:[#allocation2 + $0x798] sm:$0xff] %vm3173_vm2, %v3160_v36  ;;  %v2346_v40 = vpop.f32.mrf.mxu0  ;;  %15897 = vmatprep.mubr.msk.f32.mxu1 %vm3173_vm2, %v19057_v30  ;;  %v19072_v11 = vld [vmem:[#allocation2 + $0x4d8] sm:$0xff]  ;;  %v19077_v36 = vld [vmem:[#allocation2 + $0x4e0] sm:$0xff] }
 0x2b1   :  { %v3159_v54 = vsel %vm2647_vm7, %v2337_v31, %v2903_v12  ;;  %vm2650_vm8 = vcmp.gt.f32.partialorder %v2352_v34, 0.0  ;;  %v2906_v44 = vmul.f32 0.01, %v2352_v34  ;;  %v2347_v14 = vadd.f32 %v18813_v59, %v2346_v40  ;;  %v19070_v63 = vpop.f32.mrf.mxu1 }
 0x2b2   :  { %21975 = vst [vmem:[#allocation33_spill] sm:$0xff] %v19070_v63  ;;  %3416 = vst.msk [vmem:[#allocation2 + $0x790] sm:$0xff] %vm3173_vm2, %v3159_v54  ;;  %v15598_v48 = vpop.f32.mrf.mxu0  ;;  %16385 = vmatmul.mubr.msk.f32.gmra.mxu0 %vm3173_vm2, %v19072_v11  ;;  %v19091_v54 = vld [vmem:[#allocation2 + $0x4e8] sm:$0xff] }
 0x2b3   :  { %v3162_v45 = vsel %vm2650_vm8, %v2352_v34, %v2906_v44  ;;  %vm2649_vm9 = vcmp.gt.f32.partialorder %v2347_v14, 0.0  ;;  %v2905_v30 = vmul.f32 0.01, %v2347_v14  ;;  %v19079_v31 = vpop.f32.mrf.mxu1  ;;  %15898 = vmatmul.mubr.msk.f32.gmra.mxu1 %vm3173_vm2, %v19072_v11  ;;  %16387 = vmatprep.mubr.msk.f32.mxu0 %vm3173_vm2, %v19077_v36 }
 0x2b4   :  { %21976 = vst [vmem:[#allocation34_spill] sm:$0xff] %v19079_v31  ;;  %3419 = vst.msk [vmem:[#allocation2 + $0x7a8] sm:$0xff] %vm3173_vm2, %v3162_v45  ;;  %v2356_v12 = vpop.f32.mrf.mxu0  ;;  %15900 = vmatprep.mubr.msk.f32.mxu1 %vm3173_vm2, %v19077_v36  ;;  %v8547_v31 = vld [vmem:[#allocation2 + $0x500] sm:$0xff] }
 0x2b5   :  { %v3161_v48 = vsel %vm2649_vm9, %v2347_v14, %v2905_v30  ;;  %v2357_v40 = vadd.f32 %v18813_v59, %v2356_v12  ;;  %v19089_v34 = vpop.f32.mrf.mxu1  ;;  %v19104_v12 = vld [vmem:[#allocation2 + $0x508] sm:$0xff] }
 0x2b6   :  { %21977 = vst [vmem:[#allocation35_spill] sm:$0xff] %v19089_v34  ;;  %3418 = vst.msk [vmem:[#allocation2 + $0x7a0] sm:$0xff] %vm3173_vm2, %v3161_v48  ;;  %v15601_v44 = vpop.f32.mrf.mxu0  ;;  %16388 = vmatmul.mubr.msk.f32.gmra.mxu0 %vm3173_vm2, %v19091_v54  ;;  %v4045_v48 = vadd.f32 %v18804_v18, %v18475_v50 }
 0x2b7   :  { %vm2651_vm10 = vcmp.gt.f32.partialorder %v2357_v40, 0.0  ;;  %v2907_v45 = vmul.f32 0.01, %v2357_v40  ;;  %v19096_v63 = vpop.f32.mrf.mxu1  ;;  %15901 = vmatmul.mubr.msk.f32.gmra.mxu1 %vm3173_vm2, %v19091_v54  ;;  %16390 = vmatprep.mubr.msk.f32.mxu0 %vm3173_vm2, %v8547_v31 }
 0x2b8   :  { %21978 = vst [vmem:[#allocation36_spill] sm:$0xff] %v19096_v63  ;;  %v2366_v59 = vpop.f32.mrf.mxu0  ;;  %15903 = vmatprep.mubr.msk.f32.mxu1 %vm3173_vm2, %v8547_v31  ;;  %v19111_v63 = vld [vmem:[#allocation2 + $0x510] sm:$0xff]  ;;  %v4040_v31 = vadd.f32 %v18816_v32, %v18484_v57  ;;  %v4050_v32 = vadd.f32 %v18827_v1, %v18502_v17  ;;  %v4060_v1 = vadd.f32 %v18840_v58, %v18528_v26 }
 0x2b9   :  { %v3163_v30 = vsel %vm2651_vm10, %v2357_v40, %v2907_v45  ;;  %v19102_v14 = vpop.f32.mrf.mxu1  ;;  %v19123_v45 = vld [vmem:[#allocation2 + $0x518] sm:$0xff]  ;;  %v4055_v59 = vadd.f32 %v18821_v6, %v18492_v16  ;;  %v4070_v58 = vadd.f32 %v18852_v24, %v18546_v41  ;;  %v19193_v41 = vld [vmem:[#allocation2 + $0x560] sm:$0xff] }
 0x2ba   :  { %21979 = vst [vmem:[#allocation37_spill] sm:$0xff] %v19102_v14  ;;  %3420 = vst.msk [vmem:[#allocation2 + $0x7b0] sm:$0xff] %vm3173_vm2, %v3163_v30  ;;  %v15604_v44 = vpop.f32.mrf.mxu0  ;;  %16391 = vmatmul.mubr.msk.f32.gmra.mxu0 %vm3173_vm2, %v19104_v12  ;;  %v19131_v14 = vld [vmem:[#allocation2 + $0x520] sm:$0xff] }
 0x2bb   :  { %v15745_v34 = vpop.f32.mrf.mxu1  ;;  %15904 = vmatmul.mubr.msk.f32.gmra.mxu1 %vm3173_vm2, %v19104_v12  ;;  %16393 = vmatprep.mubr.msk.f32.mxu0 %vm3173_vm2, %v19111_v63 }
 0x2bc   :  { %v19119_v40 = vadd.f32 %v15745_v34, %v4045_v48  ;;  %v2376_v50 = vpop.f32.mrf.mxu0  ;;  %15906 = vmatprep.mubr.msk.f32.mxu1 %vm3173_vm2, %v19111_v63  ;;  %v19143_v48 = vld [vmem:[#allocation2 + $0x528] sm:$0xff] }
 0x2bd   :  { %v4434_v18 = vpop.f32.mrf.mxu1 }
 0x2be   :  { %v19127_v30 = vadd.f32 %v4434_v18, %v4040_v31  ;;  %v15607_v44 = vpop.f32.mrf.mxu0  ;;  %16394 = vmatmul.mubr.msk.f32.gmra.mxu0 %vm3173_vm2, %v19123_v45  ;;  %v4065_v31 = vadd.f32 %v18833_v25, %v18515_v15  ;;  %v19159_v25 = vld [vmem:[#allocation2 + $0x548] sm:$0xff] }
 0x2bf   :  { %v15748_v57 = vpop.f32.mrf.mxu1  ;;  %15907 = vmatmul.mubr.msk.f32.gmra.mxu1 %vm3173_vm2, %v19123_v45  ;;  %16396 = vmatprep.mubr.msk.f32.mxu0 %vm3173_vm2, %v19131_v14  ;;  %v8553_v44 = vld [vmem:[#allocation2 + $0x540] sm:$0xff] }
 0x2c0   :  { %v19139_v34 = vadd.f32 %v15748_v57, %v4055_v59  ;;  %v2386_v16 = vpop.f32.mrf.mxu0  ;;  %15909 = vmatprep.mubr.msk.f32.mxu1 %vm3173_vm2, %v19131_v14 }
 0x2c1   :  { %v4444_v6 = vpop.f32.mrf.mxu1 }
 0x2c2   :  { %v19147_v50 = vadd.f32 %v4444_v6, %v4050_v32  ;;  %v15610_v18 = vpop.f32.mrf.mxu0  ;;  %16397 = vmatmul.mubr.msk.f32.gmra.mxu0 %vm3173_vm2, %v19143_v48  ;;  %v4075_v32 = vadd.f32 %v18845_v10, %v18537_v35 }
 0x2c3   :  { %v15751_v17 = vpop.f32.mrf.mxu1  ;;  %15910 = vmatmul.mubr.msk.f32.gmra.mxu1 %vm3173_vm2, %v19143_v48  ;;  %16399 = vmatprep.mubr.msk.f32.mxu0 %vm3173_vm2, %v8553_v44  ;;  %v19169_v18 = vld [vmem:[#allocation2 + $0x550] sm:$0xff] }
 0x2c4   :  { %v19156_v59 = vadd.f32 %v15751_v17, %v4065_v31  ;;  %v2396_v57 = vpop.f32.mrf.mxu0  ;;  %15912 = vmatprep.mubr.msk.f32.mxu1 %vm3173_vm2, %v8553_v44  ;;  %v19183_v44 = vld [vmem:[#allocation2 + $0x558] sm:$0xff]  ;;  %v4085_v17 = vadd.f32 %v18856_v37, %v18552_v43 }
 0x2c5   :  { %v4454_v15 = vpop.f32.mrf.mxu1 }
 0x2c6   :  { %v19163_v16 = vadd.f32 %v4454_v15, %v4060_v1  ;;  %v19165_v6 = vpop.f32.mrf.mxu0  ;;  %16400 = vmatmul.mubr.msk.f32.gmra.mxu0 %vm3173_vm2, %v19159_v25  ;;  %v4080_v15 = vadd.f32 %v18863_v9, %v18562_v13  ;;  %v8559_v13 = vld [vmem:[#allocation2 + $0x580] sm:$0xff] }
 0x2c7   :  { %21980 = vst [vmem:[#allocation38_spill] sm:$0xff] %v19165_v6  ;;  %v15754_v26 = vpop.f32.mrf.mxu1  ;;  %15913 = vmatmul.mubr.msk.f32.gmra.mxu1 %vm3173_vm2, %v19159_v25  ;;  %16402 = vmatprep.mubr.msk.f32.mxu0 %vm3173_vm2, %v19169_v18  ;;  %v4125_v6 = vadd.f32 %v18923_v2, %v18627_v29  ;;  %v5518_v29 = vld [vmem:[#allocation2 + $0x640] sm:$0xff]  ;;  %v4120_v2 = vadd.f32 %v18930_v61, %v18643_v39  ;;  %v19330_v39 = vld [vmem:[#allocation2 + $0x648] sm:$0xff] }
 0x2c8   :  { %v19177_v35 = vadd.f32 %v15754_v26, %v4075_v32  ;;  %15915 = vmatprep.mubr.msk.f32.mxu1 %vm3173_vm2, %v19169_v18  ;;  %v19181_v10 = vpop.f32.mrf.mxu0  ;;  %v19207_v26 = vld [vmem:[#allocation2 + $0x568] sm:$0xff]  ;;  %21998 = vst [vmem:[#allocation56_spill] sm:$0xff] %v19330_v39 }
 0x2c9   :  { %21981 = vst [vmem:[#allocation39_spill] sm:$0xff] %v19181_v10  ;;  %v4464_v31 = vpop.f32.mrf.mxu1 }
 0x2ca   :  { %v19187_v1 = vadd.f32 %v4464_v31, %v4070_v58  ;;  %v19189_v57 = vpop.f32.mrf.mxu0  ;;  %16403 = vmatmul.mubr.msk.f32.gmra.mxu0 %vm3173_vm2, %v19183_v44  ;;  %v4095_v58 = vadd.f32 %v18869_v22, %v18575_v62 }
 0x2cb   :  { %21982 = vst [vmem:[#allocation40_spill] sm:$0xff] %v19189_v57  ;;  %v15757_v24 = vpop.f32.mrf.mxu1  ;;  %15916 = vmatmul.mubr.msk.f32.gmra.mxu1 %vm3173_vm2, %v19183_v44  ;;  %16405 = vmatprep.mubr.msk.f32.mxu0 %vm3173_vm2, %v19193_v41 }
 0x2cc   :  { %v19201_v43 = vadd.f32 %v15757_v24, %v4085_v17  ;;  %15918 = vmatprep.mubr.msk.f32.mxu1 %vm3173_vm2, %v19193_v41  ;;  %v19205_v37 = vpop.f32.mrf.mxu0  ;;  %v5512_v17 = vld [vmem:[#allocation2 + $0x600] sm:$0xff]  ;;  %v4090_v24 = vadd.f32 %v18876_v7, %v18590_v27  ;;  %v19237_v27 = vld [vmem:[#allocation2 + $0x608] sm:$0xff]  ;;  %v19239_v7 = vld [vmem:[#allocation2 + $0x590] sm:$0xff] }
 0x2cd   :  { %21983 = vst [vmem:[#allocation41_spill] sm:$0xff] %v19205_v37  ;;  %v4474_v32 = vpop.f32.mrf.mxu1  ;;  %21987 = vst [vmem:[#allocation45_spill] sm:$0xff] %v19237_v27 }
 0x2ce   :  { %v19211_v31 = vadd.f32 %v4474_v32, %v4080_v15  ;;  %v19213_v57 = vpop.f32.mrf.mxu0  ;;  %16406 = vmatmul.mubr.msk.f32.gmra.mxu0 %vm3173_vm2, %v19207_v26  ;;  %v19227_v15 = vld [vmem:[#allocation2 + $0x588] sm:$0xff]  ;;  %v4105_v32 = vadd.f32 %v18885_v52, %v18596_v47  ;;  %v19248_v47 = vld [vmem:[#allocation2 + $0x610] sm:$0xff]  ;;  %v4100_v52 = vadd.f32 %v18894_v51, %v18604_v19  ;;  %v4115_v19 = vadd.f32 %v18903_v55, %v18609_v21  ;;  %v19280_v21 = vld [vmem:[#allocation2 + $0x620] sm:$0xff] }
 0x2cf   :  { %21984 = vst [vmem:[#allocation42_spill] sm:$0xff] %v19213_v57  ;;  %v15760_v9 = vpop.f32.mrf.mxu1  ;;  %15919 = vmatmul.mubr.msk.f32.gmra.mxu1 %vm3173_vm2, %v19207_v26  ;;  %16408 = vmatprep.mubr.msk.f32.mxu0 %vm3173_vm2, %v8559_v13  ;;  %21988 = vst [vmem:[#allocation46_spill] sm:$0xff] %v19248_v47  ;;  %v13779_v55 = vld [vmem:[%s21893_s3 + $0xc0] sm:$0xff] }
 0x2d0   :  { %v19222_v37 = vadd.f32 %v15760_v9, %v4095_v58  ;;  %15929 = vmatprep.mubr.msk.f32.mxu1 %vm3173_vm2, %v5512_v17  ;;  %v19225_v62 = vpop.f32.mrf.mxu0  ;;  %v13781_v58 = vld [vmem:[%s21893_s3 + $0xd0] sm:$0xff]  ;;  %21992 = vst [vmem:[#allocation50_spill] sm:$0xff] %v19280_v21 }
 0x2d1   :  { %21985 = vst [vmem:[#allocation43_spill] sm:$0xff] %v19225_v62  ;;  %v4484_v22 = vpop.f32.mrf.mxu1  ;;  %v19293_v62 = vld [vmem:[#allocation2 + $0x5a8] sm:$0xff] }
 0x2d2   :  { %v19231_v57 = vadd.f32 %v4484_v22, %v4090_v24  ;;  %v19233_v10 = vpop.f32.mrf.mxu0  ;;  %16409 = vmatmul.mubr.msk.f32.gmra.mxu0 %vm3173_vm2, %v19227_v15  ;;  %v19259_v22 = vld [vmem:[#allocation2 + $0x598] sm:$0xff] }
 0x2d3   :  { %21986 = vst [vmem:[#allocation44_spill] sm:$0xff] %v19233_v10  ;;  %v15763_v13 = vpop.f32.mrf.mxu1  ;;  %15930 = vmatmul.mubr.msk.f32.vlgmr.msra.gmra.mxu1 %vm3173_vm2, %v19237_v27  ;;  %16411 = vmatprep.mubr.msk.f32.mxu0 %vm3173_vm2, %v19239_v7  ;;  %v13780_v10 = vld [vmem:[%s21893_s3 + $0xc8] sm:$0xff] }
 0x2d4   :  { %v19252_v9 = vadd.f32 %v15763_v13, %v4105_v32  ;;  %15984 = vmatpush3.msra.mxu1 %v18921_v33  ;;  %15932 = vmatprep.mubr.msk.f32.mxu1 %vm3173_vm2, %v19248_v47  ;;  %v19257_v17 = vpop.f32.mrf.mxu0  ;;  %v19272_v33 = vld [vmem:[#allocation2 + $0x618] sm:$0xff]  ;;  %v19274_v13 = vld [vmem:[#allocation2 + $0x5a0] sm:$0xff] }
 0x2d5   :  { %21989 = vst [vmem:[#allocation47_spill] sm:$0xff] %v19257_v17  ;;  %v4494_v24 = vpop.f32.mrf.mxu1  ;;  %15985 = vmatprep.subr.mxu1 %v13781_v58  ;;  %21991 = vst [vmem:[#allocation49_spill] sm:$0xff] %v19272_v33 }
 0x2d6   :  { %v19266_v51 = vadd.f32 %v4494_v24, %v4100_v52  ;;  %v19268_v32 = vpop.f32.mrf.mxu0  ;;  %16412 = vmatmul.mubr.msk.f32.gmra.mxu0 %vm3173_vm2, %v19259_v22  ;;  %15986 = vmatpush3.msra.mxu1 %v13781_v58  ;;  %v4110_v52 = vadd.f32 %v18914_v56, %v18617_v20  ;;  %v19303_v20 = vld [vmem:[#allocation2 + $0x628] sm:$0xff]  ;;  %v19308_v56 = vld [vmem:[%s21893_s3 + $0xf8] sm:$0xff] }
 0x2d7   :  { %21990 = vst [vmem:[#allocation48_spill] sm:$0xff] %v19268_v32  ;;  %v15766_v17 = vpop.f32.mrf.mxu1  ;;  %15933 = vmatmul.mubr.msk.f32.gmra.mxu1 %vm3173_vm2, %v19272_v33  ;;  %16414 = vmatprep.mubr.msk.f32.mxu0 %vm3173_vm2, %v19274_v13  ;;  %21995 = vst [vmem:[#allocation53_spill] sm:$0xff] %v19303_v20 }
 0x2d8   :  { %v19287_v24 = vadd.f32 %v15766_v17, %v4115_v19  ;;  %15935 = vmatprep.mubr.msk.f32.mxu1 %vm3173_vm2, %v19280_v21  ;;  %v19291_v58 = vpop.f32.mrf.mxu0  ;;  %15987 = vmatprep.subr.mxu1 %v13780_v10 }
 0x2d9   :  { %21993 = vst [vmem:[#allocation51_spill] sm:$0xff] %v19291_v58  ;;  %v4504_v32 = vpop.f32.mrf.mxu1  ;;  %15988 = vmatpush3.msra.mxu1 %v13780_v10 }
 0x2da   :  { %v19297_v33 = vadd.f32 %v4504_v32, %v4110_v52  ;;  %v19299_v47 = vpop.f32.mrf.mxu0  ;;  %16415 = vmatmul.mubr.msk.f32.gmra.mxu0 %vm3173_vm2, %v19293_v62  ;;  %15989 = vmatprep.subr.mxu1 %v13779_v55  ;;  %v4135_v52 = vadd.f32 %v18944_v23, %v18655_v53  ;;  %v4130_v53 = vadd.f32 %v18954_v28, %v18665_v60  ;;  %v19360_v28 = vld [vmem:[#allocation2 + $0x660] sm:$0xff] }
 0x2db   :  { %21994 = vst [vmem:[#allocation52_spill] sm:$0xff] %v19299_v47  ;;  %v15769_v17 = vpop.f32.mrf.mxu1  ;;  %15936 = vmatmul.mubr.msk.f32.gmra.mxu1 %vm3173_vm2, %v19303_v20  ;;  %16487 = vmatprep.mubr.msk.f32.mxu0 %vm3173_vm2, %v18932_v46  ;;  %22003 = vst [vmem:[#allocation61_spill] sm:$0xff] %v19360_v28 }
 0x2dc   :  { %v19316_v10 = vadd.f32 %v15769_v17, %v4125_v6  ;;  %15938 = vmatprep.mubr.msk.f32.mxu1 %vm3173_vm2, %v5518_v29  ;;  %v19319_v19 = vpop.f32.mrf.mxu0  ;;  %15990 = vmatpush3.msra.mxu1 %v13779_v55  ;;  %v19336_v6 = vld [vmem:[#allocation2 + $0x650] sm:$0xff]  ;;  %v4145_v17 = vadd.f32 %v18967_v4, %v18677_v42 }
 0x2dd   :  { %21996 = vst [vmem:[#allocation54_spill] sm:$0xff] %v19319_v19  ;;  %v4514_v32 = vpop.f32.mrf.mxu1  ;;  %16045 = vmatprep.subr.mxu1 %v19308_v56  ;;  %21999 = vst [vmem:[#allocation57_spill] sm:$0xff] %v19336_v6  ;;  %v22004_v42 = vld [vmem:[#allocation17_spill] sm:$0xff] }
 0x2de   :  { %v19324_v47 = vadd.f32 %v4514_v32, %v4120_v2  ;;  %v19326_v46 = vpop.f32.mrf.mxu0  ;;  %16488 = vmatmul.mubr.msk.f32.vlgmr.msra.gmra.mxu0 %vm3173_vm2, %v18938_v5  ;;  %v4140_v4 = vadd.f32 %v22004_v42, %v18684_v3  ;;  %v19380_v3 = vld [vmem:[#allocation2 + $0x668] sm:$0xff]  ;;  %v5524_v42 = vld [vmem:[#allocation2 + $0x680] sm:$0xff] }
 0x2df   :  { %21997 = vst [vmem:[#allocation55_spill] sm:$0xff] %v19326_v46  ;;  %v15772_v61 = vpop.f32.mrf.mxu1  ;;  %15939 = vmatmul.mubr.msk.f32.gmra.mxu1 %vm3173_vm2, %v19330_v39  ;;  %16490 = vmatprep.mubr.msk.f32.mxu0 %vm3173_vm2, %v18956_v8  ;;  %v19354_v8 = vld [vmem:[#allocation2 + $0x658] sm:$0xff]  ;;  %v22012_v46 = vld [vmem:[#allocation19_spill] sm:$0xff] }
 0x2e0   :  { %v19340_v23 = vadd.f32 %v15772_v61, %v4135_v52  ;;  %15941 = vmatprep.mubr.msk.f32.mxu1 %vm3173_vm2, %v19336_v6  ;;  %v19344_v5 = vpop.f32.mrf.mxu0  ;;  %22002 = vst [vmem:[#allocation60_spill] sm:$0xff] %v19354_v8  ;;  %v19370_v61 = vld [vmem:[#allocation2 + $0x470] sm:$0xff] }
 0x2e1   :  { %22000 = vst [vmem:[#allocation58_spill] sm:$0xff] %v19344_v5  ;;  %v4524_v55 = vpop.f32.mrf.mxu1 }
 0x2e2   :  { %v19348_v29 = vadd.f32 %v4524_v55, %v4130_v53  ;;  %v19350_v2 = vpop.f32.mrf.mxu0  ;;  %16491 = vmatmul.mubr.msk.f32.gmra.mxu0 %vm3173_vm2, %v18961_v38  ;;  %v22006_v53 = vld [vmem:[#allocation3_spill] sm:$0xff]  ;;  %v22007_v55 = vld [vmem:[#allocation18_spill] sm:$0xff] }
 0x2e3   :  { %22001 = vst [vmem:[#allocation59_spill] sm:$0xff] %v19350_v2  ;;  %v15775_v60 = vpop.f32.mrf.mxu1  ;;  %15942 = vmatmul.mubr.msk.f32.gmra.mxu1 %vm3173_vm2, %v19354_v8  ;;  %16493 = vmatprep.mubr.msk.f32.mxu0 %vm3173_vm2, %v18979_v49  ;;  %v4155_v2 = vadd.f32 %v22007_v55, %v22006_v53  ;;  %22009 = vst [vmem:[#allocation18_spill] sm:$0xff] %v19380_v3  ;;  %v22013_v55 = vld [vmem:[#allocation5_spill] sm:$0xff] }
 0x2e4   :  { %v19364_v32 = vadd.f32 %v15775_v60, %v4145_v17  ;;  %15944 = vmatprep.mubr.msk.f32.mxu1 %vm3173_vm2, %v19360_v28  ;;  %v19368_v38 = vpop.f32.mrf.mxu0  ;;  %v22010_v60 = vld [vmem:[#allocation20_spill] sm:$0xff] }
 0x2e5   :  { %22005 = vst [vmem:[#allocation17_spill] sm:$0xff] %v19368_v38  ;;  %v4534_v52 = vpop.f32.mrf.mxu1  ;;  %v22011_v38 = vld [vmem:[#allocation4_spill] sm:$0xff] }
 0x2e6   :  { %v19374_v5 = vadd.f32 %v4534_v52, %v4140_v4  ;;  %v19376_v49 = vpop.f32.mrf.mxu0  ;;  %16494 = vmatmul.mubr.msk.f32.gmra.mxu0 %vm3173_vm2, %v19370_v61  ;;  %v4150_v53 = vadd.f32 %v22012_v46, %v22011_v38  ;;  %v22018_v46 = vld [vmem:[#allocation24_spill] sm:$0xff]  ;;  %v22020_v38 = vld [vmem:[#allocation6_spill] sm:$0xff] }
 0x2e7   :  { %22008 = vst [vmem:[#allocation3_spill] sm:$0xff] %v19376_v49  ;;  %v15778_v17 = vpop.f32.mrf.mxu1  ;;  %15945 = vmatmul.mubr.msk.f32.gmra.mxu1 %vm3173_vm2, %v19380_v3  ;;  %16496 = vmatprep.mubr.msk.f32.mxu0 %vm3173_vm2, %v22010_v60  ;;  %v22014_v49 = vld [vmem:[#allocation22_spill] sm:$0xff]  ;;  %v22016_v3 = vld [vmem:[#allocation21_spill] sm:$0xff]  ;;  %v19399_v60 = vld [vmem:[#allocation2 + $0x688] sm:$0xff] }
 0x2e8   :  { %v19388_v4 = vadd.f32 %v15778_v17, %v4155_v2  ;;  %15947 = vmatprep.mubr.msk.f32.mxu1 %vm3173_vm2, %v5524_v42  ;;  %v4165_v19 = vadd.f32 %v22014_v49, %v22013_v55  ;;  %v19393_v58 = vpop.f32.mrf.mxu0  ;;  %22017 = vst [vmem:[#allocation4_spill] sm:$0xff] %v19399_v60  ;;  %v19405_v2 = vld [vmem:[#allocation2 + $0x690] sm:$0xff]  ;;  %v22021_v49 = vld [vmem:[#allocation23_spill] sm:$0xff] }
 0x2e9   :  { %v4544_v52 = vpop.f32.mrf.mxu1  ;;  %22015 = vst [vmem:[#allocation20_spill] sm:$0xff] %v19393_v58  ;;  %22019 = vst [vmem:[#allocation19_spill] sm:$0xff] %v19405_v2  ;;  %v4160_v17 = vadd.f32 %v22021_v49, %v22020_v38  ;;  %v22028_v38 = vld [vmem:[#allocation8_spill] sm:$0xff]  ;;  %v22029_v49 = vld [vmem:[#allocation26_spill] sm:$0xff] }
 0x2ea   :  { %v19395_v28 = vadd.f32 %v4544_v52, %v4150_v53  ;;  %16497 = vmatmul.mubr.msk.f32.gmra.mxu0 %vm3173_vm2, %v22016_v3  ;;  %v22022_v53 = vld [vmem:[#allocation7_spill] sm:$0xff]  ;;  %v22023_v52 = vld [vmem:[#allocation25_spill] sm:$0xff]  ;;  %v19415_v58 = vpop.f32.mrf.mxu0 }
 0x2eb   :  { %v15781_v8 = vpop.f32.mrf.mxu1  ;;  %15948 = vmatmul.mubr.msk.f32.gmra.mxu1 %vm3173_vm2, %v19399_v60  ;;  %16499 = vmatprep.mubr.msk.f32.mxu0 %vm3173_vm2, %v22018_v46  ;;  %v4175_v55 = vadd.f32 %v22023_v52, %v22022_v53  ;;  %22024 = vst [vmem:[#allocation5_spill] sm:$0xff] %v19415_v58  ;;  %v19421_v46 = vld [vmem:[#allocation2 + $0x698] sm:$0xff]  ;;  %v4170_v53 = vadd.f32 %v22029_v49, %v22028_v38  ;;  %v22032_v58 = vld [vmem:[#allocation28_spill] sm:$0xff]  ;;  %v5530_v38 = vld [vmem:[#allocation2 + $0x6c0] sm:$0xff] }
 0x2ec   :  { %v19409_v42 = vadd.f32 %v15781_v8, %v4165_v19  ;;  %15950 = vmatprep.mubr.msk.f32.mxu1 %vm3173_vm2, %v19405_v2  ;;  %22025 = vst [vmem:[#allocation22_spill] sm:$0xff] %v19421_v46  ;;  %v22026_v19 = vld [vmem:[#allocation27_spill] sm:$0xff]  ;;  %v22036_v49 = vld [vmem:[#allocation10_spill] sm:$0xff] }
 0x2ed   :  { %v4554_v3 = vpop.f32.mrf.mxu1  ;;  %v19427_v8 = vld [vmem:[#allocation2 + $0x6a0] sm:$0xff] }
 0x2ee   :  { %v19417_v60 = vadd.f32 %v4554_v3, %v4160_v17  ;;  %16500 = vmatmul.mubr.msk.f32.gmra.mxu0 %vm3173_vm2, %v19022_v0  ;;  %22027 = vst [vmem:[#allocation21_spill] sm:$0xff] %v19427_v8  ;;  %v19435_v17 = vld [vmem:[#allocation2 + $0x4b0] sm:$0xff] }
 0x2ef   :  { %v15784_v6 = vpop.f32.mrf.mxu1  ;;  %15951 = vmatmul.mubr.msk.f32.gmra.mxu1 %vm3173_vm2, %v19421_v46  ;;  %16502 = vmatprep.mubr.msk.f32.mxu0 %vm3173_vm2, %v22026_v19  ;;  %22030 = vst [vmem:[#allocation24_spill] sm:$0xff] %v19435_v17  ;;  %v22031_v3 = vld [vmem:[#allocation9_spill] sm:$0xff]  ;;  %v19439_v46 = vpop.f32.mrf.mxu0  ;;  %v19445_v19 = vld [vmem:[#allocation2 + $0x6a8] sm:$0xff] }
 0x2f0   :  { %v19431_v52 = vadd.f32 %v15784_v6, %v4175_v55  ;;  %15953 = vmatprep.mubr.msk.f32.mxu1 %vm3173_vm2, %v19427_v8  ;;  %v4185_v2 = vadd.f32 %v22032_v58, %v22031_v3  ;;  %22033 = vst [vmem:[#allocation6_spill] sm:$0xff] %v19439_v46  ;;  %22034 = vst [vmem:[#allocation23_spill] sm:$0xff] %v19445_v19  ;;  %v22035_v55 = vld [vmem:[#allocation30_spill] sm:$0xff]  ;;  %v22037_v8 = vld [vmem:[#allocation29_spill] sm:$0xff] }
 0x2f1   :  { %v4564_v0 = vpop.f32.mrf.mxu1  ;;  %v4180_v58 = vadd.f32 %v22037_v8, %v22036_v49  ;;  %v22039_v46 = vld [vmem:[#allocation32_spill] sm:$0xff]  ;;  %v19458_v21 = vpop.f32.mrf.mxu0  ;;  %v22046_v49 = vld [vmem:[#allocation13_spill] sm:$0xff] }
 0x2f2   :  { %v19441_v39 = vadd.f32 %v4564_v0, %v4170_v53  ;;  %16503 = vmatmul.mubr.msk.f32.gmra.mxu0 %vm3173_vm2, %v19435_v17  ;;  %v22038_v0 = vld [vmem:[#allocation11_spill] sm:$0xff]  ;;  %22040 = vst [vmem:[#allocation7_spill] sm:$0xff] %v19458_v21  ;;  %v22044_v8 = vld [vmem:[#allocation12_spill] sm:$0xff] }
 0x2f3   :  { %v15787_v6 = vpop.f32.mrf.mxu1  ;;  %15954 = vmatmul.mubr.msk.f32.gmra.mxu1 %vm3173_vm2, %v19445_v19  ;;  %16505 = vmatprep.mubr.msk.f32.mxu0 %vm3173_vm2, %v22035_v55  ;;  %v4195_v20 = vadd.f32 %v22039_v46, %v22038_v0  ;;  %v22041_v19 = vld [vmem:[#allocation31_spill] sm:$0xff]  ;;  %v19464_v55 = vld [vmem:[#allocation2 + $0x6c8] sm:$0xff]  ;;  %v22045_v46 = vld [vmem:[#allocation33_spill] sm:$0xff]  ;;  %v19480_v0 = vpop.f32.mrf.mxu0 }
 0x2f4   :  { %v19453_v3 = vadd.f32 %v15787_v6, %v4185_v2  ;;  %15956 = vmatprep.mubr.msk.f32.mxu1 %vm3173_vm2, %v5530_v38  ;;  %22042 = vst [vmem:[#allocation25_spill] sm:$0xff] %v19464_v55  ;;  %v19470_v2 = vld [vmem:[#allocation2 + $0x6d0] sm:$0xff]  ;;  %v4190_v6 = vadd.f32 %v22045_v46, %v22044_v8  ;;  %22048 = vst [vmem:[#allocation8_spill] sm:$0xff] %v19480_v0  ;;  %v22052_v8 = vld [vmem:[#allocation35_spill] sm:$0xff] }
 0x2f5   :  { %v4574_v53 = vpop.f32.mrf.mxu1  ;;  %22043 = vst [vmem:[#allocation27_spill] sm:$0xff] %v19470_v2 }
 0x2f6   :  { %v19460_v27 = vadd.f32 %v4574_v53, %v4180_v58  ;;  %16506 = vmatmul.mubr.msk.f32.gmra.mxu0 %vm3173_vm2, %v22041_v19  ;;  %v22047_v58 = vld [vmem:[#allocation34_spill] sm:$0xff] }
 0x2f7   :  { %v15790_v17 = vpop.f32.mrf.mxu1  ;;  %15957 = vmatmul.mubr.msk.f32.gmra.mxu1 %vm3173_vm2, %v19464_v55  ;;  %16508 = vmatprep.mubr.msk.f32.mxu0 %vm3173_vm2, %v19072_v11  ;;  %v4205_v53 = vadd.f32 %v22047_v58, %v22046_v49  ;;  %v19486_v11 = vld [vmem:[#allocation2 + $0x6d8] sm:$0xff]  ;;  %v22054_v58 = vld [vmem:[#allocation36_spill] sm:$0xff] }
 0x2f8   :  { %v19474_v38 = vadd.f32 %v15790_v17, %v4195_v20  ;;  %15959 = vmatprep.mubr.msk.f32.mxu1 %vm3173_vm2, %v19470_v2  ;;  %22049 = vst [vmem:[#allocation26_spill] sm:$0xff] %v19486_v11  ;;  %v19492_v20 = vld [vmem:[#allocation2 + $0x6e0] sm:$0xff]  ;;  %v22051_v17 = vld [vmem:[#allocation14_spill] sm:$0xff] }
 0x2f9   :  { %v4584_v19 = vpop.f32.mrf.mxu1  ;;  %22050 = vst [vmem:[#allocation9_spill] sm:$0xff] %v19492_v20  ;;  %v4200_v46 = vadd.f32 %v22052_v8, %v22051_v17  ;;  %v22057_v17 = vld [vmem:[#allocation16_spill] sm:$0xff]  ;;  %v22058_v8 = vld [vmem:[#allocation37_spill] sm:$0xff] }
 0x2fa   :  { %v19482_v21 = vadd.f32 %v4584_v19, %v4190_v6  ;;  %16509 = vmatmul.mubr.msk.f32.gmra.mxu0 %vm3173_vm2, %v19077_v36  ;;  %v19500_v6 = vld [vmem:[#allocation2 + $0x4f0] sm:$0xff]  ;;  %v22053_v19 = vld [vmem:[#allocation15_spill] sm:$0xff] }
 0x2fb   :  { %v15793_v55 = vpop.f32.mrf.mxu1  ;;  %15960 = vmatmul.mubr.msk.f32.gmra.mxu1 %vm3173_vm2, %v19486_v11  ;;  %16511 = vmatprep.mubr.msk.f32.mxu0 %vm3173_vm2, %v19091_v54  ;;  %v4215_v0 = vadd.f32 %v22054_v58, %v22053_v19  ;;  %v19504_v11 = vpop.f32.mrf.mxu0  ;;  %v19510_v54 = vld [vmem:[#allocation2 + $0x6e8] sm:$0xff]  ;;  %v4210_v19 = vadd.f32 %v22058_v8, %v22057_v17  ;;  %v19547_v17 = vld [vmem:[#allocation2 + $0x718] sm:$0xff] }
 0x2fc   :  { %v19496_v49 = vadd.f32 %v15793_v55, %v4205_v53  ;;  %15962 = vmatprep.mubr.msk.f32.mxu1 %vm3173_vm2, %v19492_v20  ;;  %22055 = vst [vmem:[#allocation28_spill] sm:$0xff] %v19504_v11  ;;  %22056 = vst [vmem:[#allocation30_spill] sm:$0xff] %v19510_v54  ;;  %v5536_v53 = vld [vmem:[#allocation2 + $0x700] sm:$0xff] }
 0x2fd   :  { %v4594_v36 = vpop.f32.mrf.mxu1  ;;  %22061 = vst [vmem:[#allocation11_spill] sm:$0xff] %v19547_v17 }
 0x2fe   :  { %v19506_v2 = vadd.f32 %v4594_v36, %v4200_v46  ;;  %16512 = vmatmul.mubr.msk.f32.gmra.mxu0 %vm3173_vm2, %v19500_v6  ;;  %v19521_v36 = vpop.f32.mrf.mxu0 }
 0x2ff   :  { %v15796_v55 = vpop.f32.mrf.mxu1  ;;  %15963 = vmatmul.mubr.msk.f32.gmra.mxu1 %vm3173_vm2, %v19510_v54  ;;  %16514 = vmatprep.mubr.msk.f32.mxu0 %vm3173_vm2, %v19104_v12  ;;  %22059 = vst [vmem:[#allocation10_spill] sm:$0xff] %v19521_v36  ;;  %v19527_v54 = vld [vmem:[#allocation2 + $0x708] sm:$0xff]  ;;  %v19533_v12 = vld [vmem:[#allocation2 + $0x710] sm:$0xff] }
 0x300   :  { %v19518_v58 = vadd.f32 %v15796_v55, %v4215_v0  ;;  %15965 = vmatprep.mubr.msk.f32.mxu1 %vm3173_vm2, %v5536_v53  ;;  %v19540_v53 = vpop.f32.mrf.mxu0 }
 0x301   :  { %v4604_v46 = vpop.f32.mrf.mxu1  ;;  %22060 = vst [vmem:[#allocation29_spill] sm:$0xff] %v19540_v53  ;;  %v19569_v53 = vld [vmem:[#allocation2 + $0x728] sm:$0xff] }
 0x302   :  { %v19523_v11 = vadd.f32 %v4604_v46, %v4210_v19  ;;  %16515 = vmatmul.mubr.msk.f32.gmra.mxu0 %vm3173_vm2, %v19111_v63  ;;  %v19560_v19 = vld [vmem:[#allocation2 + $0x530] sm:$0xff]  ;;  %v19562_v46 = vpop.f32.mrf.mxu0  ;;  %22064 = vst [vmem:[#allocation12_spill] sm:$0xff] %v19569_v53 }
 0x303   :  { %v15807_v20 = vpop.f32.mrf.mxu1  ;;  %15966 = vmatmul.mubr.msk.f32.gmra.mxu1 %vm3173_vm2, %v19527_v54  ;;  %16517 = vmatprep.mubr.msk.f32.mxu0 %vm3173_vm2, %v19123_v45  ;;  %22063 = vst [vmem:[#allocation31_spill] sm:$0xff] %v19562_v46 }
 0x304   :  { %v19536_v0 = vadd.f32 %v15807_v20, %v19119_v40  ;;  %15968 = vmatprep.mubr.msk.f32.mxu1 %vm3173_vm2, %v19533_v12  ;;  %v19553_v40 = vld [vmem:[#allocation2 + $0x720] sm:$0xff] }
 0x305   :  { %v4865_v55 = vpop.f32.mrf.mxu1  ;;  %22062 = vst [vmem:[#allocation32_spill] sm:$0xff] %v19553_v40 }
 0x306   :  { %v19543_v63 = vadd.f32 %v4865_v55, %v19127_v30  ;;  %16518 = vmatmul.mubr.msk.f32.gmra.mxu0 %vm3173_vm2, %v19131_v14 }
 0x307   :  { %v15810_v8 = vpop.f32.mrf.mxu1  ;;  %15969 = vmatmul.mubr.msk.f32.gmra.mxu1 %vm3173_vm2, %v19547_v17  ;;  %16520 = vmatprep.mubr.msk.f32.mxu0 %vm3173_vm2, %v19143_v48 }
 0x308   :  { %v19556_v20 = vadd.f32 %v15810_v8, %v19139_v34  ;;  %15971 = vmatprep.mubr.msk.f32.mxu1 %vm3173_vm2, %v19553_v40  ;;  %v5542_v34 = vld [vmem:[#allocation2 + $0x740] sm:$0xff]  ;;  %v19586_v40 = vld [vmem:[#allocation2 + $0x748] sm:$0xff] }
 0x309   :  { %v4875_v30 = vpop.f32.mrf.mxu1  ;;  %22066 = vst [vmem:[#allocation13_spill] sm:$0xff] %v19586_v40 }
 0x30a   :  { %v19565_v55 = vadd.f32 %v4875_v30, %v19147_v50  ;;  %16521 = vmatmul.mubr.msk.f32.gmra.mxu0 %vm3173_vm2, %v19560_v19  ;;  %v19579_v30 = vpop.f32.mrf.mxu0 }
 0x30b   :  { %v15813_v36 = vpop.f32.mrf.mxu1  ;;  %15972 = vmatmul.mubr.msk.f32.gmra.mxu1 %vm3173_vm2, %v19569_v53  ;;  %16523 = vmatprep.mubr.msk.f32.mxu0 %vm3173_vm2, %v19159_v25  ;;  %22065 = vst [vmem:[#allocation33_spill] sm:$0xff] %v19579_v30  ;;  %v19606_v30 = vld [vmem:[#allocation2 + $0x758] sm:$0xff] }
 0x30c   :  { %v19576_v8 = vadd.f32 %v15813_v36, %v19156_v59  ;;  %15974 = vmatprep.mubr.msk.f32.mxu1 %vm3173_vm2, %v5542_v34  ;;  %v19592_v59 = vld [vmem:[#allocation2 + $0x750] sm:$0xff]  ;;  %v19599_v34 = vpop.f32.mrf.mxu0  ;;  %22069 = vst [vmem:[#allocation35_spill] sm:$0xff] %v19606_v30 }
 0x30d   :  { %v4885_v50 = vpop.f32.mrf.mxu1  ;;  %22067 = vst [vmem:[#allocation34_spill] sm:$0xff] %v19592_v59  ;;  %22068 = vst [vmem:[#allocation14_spill] sm:$0xff] %v19599_v34 }
 0x30e   :  { %v19582_v46 = vadd.f32 %v4885_v50, %v19163_v16  ;;  %16524 = vmatmul.mubr.msk.f32.gmra.mxu0 %vm3173_vm2, %v19169_v18  ;;  %v19621_v34 = vpop.f32.mrf.mxu0 }
 0x30f   :  { %v15816_v53 = vpop.f32.mrf.mxu1  ;;  %15975 = vmatmul.mubr.msk.f32.gmra.mxu1 %vm3173_vm2, %v19586_v40  ;;  %16526 = vmatprep.mubr.msk.f32.mxu0 %vm3173_vm2, %v19183_v44  ;;  %22071 = vst [vmem:[#allocation36_spill] sm:$0xff] %v19621_v34 }
 0x310   :  { %v19595_v36 = vadd.f32 %v15816_v53, %v19177_v35  ;;  %15977 = vmatprep.mubr.msk.f32.mxu1 %vm3173_vm2, %v19592_v59  ;;  %v19612_v35 = vld [vmem:[#allocation2 + $0x760] sm:$0xff] }
 0x311   :  { %v4895_v16 = vpop.f32.mrf.mxu1  ;;  %22070 = vst [vmem:[#allocation15_spill] sm:$0xff] %v19612_v35 }
 0x312   :  { %v19602_v50 = vadd.f32 %v4895_v16, %v19187_v1  ;;  %16527 = vmatmul.mubr.msk.f32.gmra.mxu0 %vm3173_vm2, %v19193_v41  ;;  %v19619_v16 = vld [vmem:[#allocation2 + $0x570] sm:$0xff] }
 0x313   :  { %v15819_v40 = vpop.f32.mrf.mxu1  ;;  %15978 = vmatmul.mubr.msk.f32.gmra.mxu1 %vm3173_vm2, %v19606_v30  ;;  %16529 = vmatprep.mubr.msk.f32.mxu0 %vm3173_vm2, %v19207_v26  ;;  %v19628_v30 = vld [vmem:[#allocation2 + $0x768] sm:$0xff] }
 0x314   :  { %v19615_v53 = vadd.f32 %v15819_v40, %v19201_v43  ;;  %15980 = vmatprep.mubr.msk.f32.mxu1 %vm3173_vm2, %v19612_v35  ;;  %22072 = vst [vmem:[#allocation16_spill] sm:$0xff] %v19628_v30  ;;  %v5943_v43 = vld [vmem:[#allocation2 + $0x408] sm:$0xff]  ;;  %v5944_v35 = vld [vmem:[#allocation2 + $0x410] sm:$0xff] }
 0x315   :  { %v4905_v1 = vpop.f32.mrf.mxu1 }
 0x316   :  { %v19624_v59 = vadd.f32 %v4905_v1, %v19211_v31  ;;  %16530 = vmatmul.mubr.msk.f32.gmra.mxu0 %vm3173_vm2, %v19619_v16  ;;  %v19638_v1 = vpop.f32.mrf.mxu0 }
 0x317   :  { %v15822_v17 = vpop.f32.mrf.mxu1  ;;  %15981 = vmatmul.mubr.msk.f32.gmra.mxu1 %vm3173_vm2, %v19628_v30  ;;  %16532 = vmatprep.mubr.msk.f32.mxu0 %vm3173_vm2, %v19227_v15  ;;  %22073 = vst [vmem:[#allocation37_spill] sm:$0xff] %v19638_v1  ;;  %v13821_v15 = vld [vmem:[%s21893_s3 + $0xf0] sm:$0xff]  ;;  %v7260_v1 = vld [vmem:[#allocation2 + $0x340] sm:$0xff] }
 0x318   :  { %v19635_v40 = vadd.f32 %v15822_v17, %v19222_v37  ;;  %15991 = vmatprep.mubr.msk.f32.mxu1 %vm3173_vm2, %v5943_v43  ;;  %v5945_v37 = vld [vmem:[#allocation2 + $0x418] sm:$0xff]  ;;  %v19659_v43 = vpop.f32.mrf.mxu0 }
 0x319   :  { %v4915_v31 = vpop.f32.mrf.mxu1  ;;  %22074 = vst [vmem:[#allocation62_spill] sm:$0xff] %v19659_v43 }
 0x31a   :  { %v19641_v34 = vadd.f32 %v4915_v31, %v19231_v57  ;;  %16533 = vmatmul.mubr.msk.f32.gmra.mxu0 %vm3173_vm2, %v19239_v7  ;;  %v13820_v7 = vld [vmem:[%s21893_s3 + $0xe8] sm:$0xff] }
 0x31b   :  { %v15825_v30 = vpop.f32.mrf.mxu1  ;;  %15992 = vmatmul.mubr.msk.f32.vlgmr.msra.gmra.mxu1 %vm3173_vm2, %v5944_v35  ;;  %16535 = vmatprep.mubr.msk.f32.mxu0 %vm3173_vm2, %v19259_v22 }
 0x31c   :  { %v19652_v17 = vadd.f32 %v15825_v30, %v19252_v9  ;;  %16046 = vmatpush3.msra.mxu1 %v19308_v56  ;;  %15994 = vmatprep.mubr.msk.f32.mxu1 %vm3173_vm2, %v5945_v37  ;;  %v5946_v9 = vld [vmem:[#allocation2 + $0x420] sm:$0xff]  ;;  %v5947_v56 = vld [vmem:[#allocation2 + $0x428] sm:$0xff] }
 0x31d   :  { %v4925_v57 = vpop.f32.mrf.mxu1  ;;  %16047 = vmatprep.subr.mxu1 %v13821_v15  ;;  %v13819_v30 = vld [vmem:[%s21893_s3 + $0xe0] sm:$0xff] }
 0x31e   :  { %v19662_v35 = vadd.f32 %v4925_v57, %v19266_v51  ;;  %16536 = vmatmul.mubr.msk.f32.gmra.mxu0 %vm3173_vm2, %v19274_v13  ;;  %16048 = vmatpush3.msra.mxu1 %v13821_v15  ;;  %v9426_v13 = vld [vmem:[#allocation2 + $0x5b0] sm:$0xff]  ;;  %v19676_v15 = vpop.f32.mrf.mxu0 }
 0x31f   :  { %v15828_v22 = vpop.f32.mrf.mxu1  ;;  %15995 = vmatmul.mubr.msk.f32.gmra.mxu1 %vm3173_vm2, %v5946_v9  ;;  %16538 = vmatprep.mubr.msk.f32.mxu0 %vm3173_vm2, %v19293_v62  ;;  %22075 = vst [vmem:[#allocation63_spill] sm:$0xff] %v19676_v15  ;;  %v5948_v62 = vld [vmem:[#allocation2 + $0x430] sm:$0xff]  ;;  %v5949_v9 = vld [vmem:[#allocation2 + $0x448] sm:$0xff] }
 0x320   :  { %v19673_v31 = vadd.f32 %v15828_v22, %v19287_v24  ;;  %15997 = vmatprep.mubr.msk.f32.mxu1 %vm3173_vm2, %v5947_v56  ;;  %16049 = vmatprep.subr.mxu1 %v13820_v7  ;;  %v19685_v24 = vld [vmem:[%s21893_s3 + $0x138] sm:$0xff]  ;;  %v5950_v56 = vld [vmem:[#allocation2 + $0x450] sm:$0xff] }
 0x321   :  { %v4935_v51 = vpop.f32.mrf.mxu1  ;;  %16050 = vmatpush3.msra.mxu1 %v13820_v7 }
 0x322   :  { %v19679_v37 = vadd.f32 %v4935_v51, %v19297_v33  ;;  %16539 = vmatmul.mubr.msk.f32.gmra.mxu0 %vm3173_vm2, %v9426_v13  ;;  %16051 = vmatprep.subr.mxu1 %v13819_v30  ;;  %v5951_v13 = vld [vmem:[#allocation2 + $0x458] sm:$0xff] }
 0x323   :  { %v15831_v57 = vpop.f32.mrf.mxu1  ;;  %15998 = vmatmul.mubr.msk.f32.gmra.mxu1 %vm3173_vm2, %v5948_v62 }
 0x324   :  { %v19689_v7 = vadd.f32 %v15831_v57, %v19316_v10  ;;  %16000 = vmatprep.mubr.msk.f32.mxu1 %vm3173_vm2, %v5949_v9  ;;  %16052 = vmatpush3.msra.mxu1 %v13819_v30  ;;  %v5952_v30 = vld [vmem:[#allocation2 + $0x460] sm:$0xff] }
 0x325   :  { %v4945_v33 = vpop.f32.mrf.mxu1  ;;  %16169 = vmatprep.subr.mxu1 %v19685_v24 }
 0x326   :  { %v19694_v22 = vadd.f32 %v4945_v33, %v19324_v47  ;;  %v5953_v47 = vld [vmem:[#allocation2 + $0x468] sm:$0xff] }
 0x327   :  { %v15834_v51 = vpop.f32.mrf.mxu1  ;;  %16001 = vmatmul.mubr.msk.f32.gmra.mxu1 %vm3173_vm2, %v5950_v56 }
 0x328   :  { %v19698_v62 = vadd.f32 %v15834_v51, %v19340_v23  ;;  %16003 = vmatprep.mubr.msk.f32.mxu1 %vm3173_vm2, %v5951_v13 }
 0x329   :  { %v4955_v10 = vpop.f32.mrf.mxu1 }
 0x32a   :  { %v19702_v57 = vadd.f32 %v4955_v10, %v19348_v29  ;;  %v5955_v29 = vld [vmem:[#allocation2 + $0x488] sm:$0xff] }
 0x32b   :  { %v15837_v9 = vpop.f32.mrf.mxu1  ;;  %16004 = vmatmul.mubr.msk.f32.gmra.mxu1 %vm3173_vm2, %v5952_v30  ;;  %v5956_v30 = vld [vmem:[#allocation2 + $0x490] sm:$0xff] }
 0x32c   :  { %v19706_v33 = vadd.f32 %v15837_v9, %v19364_v32  ;;  %16006 = vmatprep.mubr.msk.f32.mxu1 %vm3173_vm2, %v5953_v47 }
 0x32d   :  { %v4965_v56 = vpop.f32.mrf.mxu1 }
 0x32e   :  { %v19710_v23 = vadd.f32 %v4965_v56, %v19374_v5  ;;  %v5957_v5 = vld [vmem:[#allocation2 + $0x498] sm:$0xff]  ;;  %v5958_v56 = vld [vmem:[#allocation2 + $0x4a0] sm:$0xff] }
 0x32f   :  { %v15840_v51 = vpop.f32.mrf.mxu1  ;;  %16007 = vmatmul.mubr.msk.f32.gmra.mxu1 %vm3173_vm2, %v19370_v61 }
 0x330   :  { %v19715_v13 = vadd.f32 %v15840_v51, %v19388_v4  ;;  %16009 = vmatprep.mubr.msk.f32.mxu1 %vm3173_vm2, %v5955_v29 }
 0x331   :  { %v4975_v10 = vpop.f32.mrf.mxu1 }
 0x332   :  { %v19719_v32 = vadd.f32 %v4975_v10, %v19395_v28  ;;  %v5959_v28 = vld [vmem:[#allocation2 + $0x4a8] sm:$0xff] }
 0x333   :  { %v15843_v9 = vpop.f32.mrf.mxu1  ;;  %16010 = vmatmul.mubr.msk.f32.gmra.mxu1 %vm3173_vm2, %v5956_v30 }
 0x334   :  { %v19723_v47 = vadd.f32 %v15843_v9, %v19409_v42  ;;  %16012 = vmatprep.mubr.msk.f32.mxu1 %vm3173_vm2, %v5957_v5  ;;  %v22076_v9 = vld [vmem:[#allocation24_spill] sm:$0xff] }
 0x335   :  { %v4985_v61 = vpop.f32.mrf.mxu1 }
 0x336   :  { %v19727_v4 = vadd.f32 %v4985_v61, %v19417_v60  ;;  %v5961_v60 = vld [vmem:[#allocation2 + $0x4c8] sm:$0xff] }
 0x337   :  { %v15846_v51 = vpop.f32.mrf.mxu1  ;;  %16013 = vmatmul.mubr.msk.f32.gmra.mxu1 %vm3173_vm2, %v5958_v56  ;;  %v5962_v56 = vld [vmem:[#allocation2 + $0x4d0] sm:$0xff] }
 0x338   :  { %v19731_v29 = vadd.f32 %v15846_v51, %v19431_v52  ;;  %16015 = vmatprep.mubr.msk.f32.mxu1 %vm3173_vm2, %v5959_v28 }
 0x339   :  { %v4995_v10 = vpop.f32.mrf.mxu1 }
 0x33a   :  { %v19735_v42 = vadd.f32 %v4995_v10, %v19441_v39  ;;  %v5963_v39 = vld [vmem:[#allocation2 + $0x4d8] sm:$0xff] }
 0x33b   :  { %v15849_v30 = vpop.f32.mrf.mxu1  ;;  %16016 = vmatmul.mubr.msk.f32.gmra.mxu1 %vm3173_vm2, %v22076_v9 }
 0x33c   :  { %v19740_v5 = vadd.f32 %v15849_v30, %v19453_v3  ;;  %16018 = vmatprep.mubr.msk.f32.mxu1 %vm3173_vm2, %v5961_v60  ;;  %v5964_v30 = vld [vmem:[#allocation2 + $0x4e0] sm:$0xff] }
 0x33d   :  { %v5005_v61 = vpop.f32.mrf.mxu1 }
 0x33e   :  { %v19744_v52 = vadd.f32 %v5005_v61, %v19460_v27  ;;  %v5965_v27 = vld [vmem:[#allocation2 + $0x4e8] sm:$0xff] }
 0x33f   :  { %v15852_v51 = vpop.f32.mrf.mxu1  ;;  %16019 = vmatmul.mubr.msk.f32.gmra.mxu1 %vm3173_vm2, %v5962_v56 }
 0x340   :  { %v19748_v28 = vadd.f32 %v15852_v51, %v19474_v38  ;;  %16021 = vmatprep.mubr.msk.f32.mxu1 %vm3173_vm2, %v5963_v39 }
 0x341   :  { %v5015_v10 = vpop.f32.mrf.mxu1 }
 0x342   :  { %v19752_v3 = vadd.f32 %v5015_v10, %v19482_v21  ;;  %v5967_v21 = vld [vmem:[#allocation2 + $0x508] sm:$0xff]  ;;  %v5968_v10 = vld [vmem:[#allocation2 + $0x510] sm:$0xff] }
 0x343   :  { %v15855_v9 = vpop.f32.mrf.mxu1  ;;  %16022 = vmatmul.mubr.msk.f32.gmra.mxu1 %vm3173_vm2, %v5964_v30 }
 0x344   :  { %v19756_v60 = vadd.f32 %v15855_v9, %v19496_v49  ;;  %16024 = vmatprep.mubr.msk.f32.mxu1 %vm3173_vm2, %v5965_v27 }
 0x345   :  { %v5025_v61 = vpop.f32.mrf.mxu1 }
 0x346   :  { %v19760_v38 = vadd.f32 %v5025_v61, %v19506_v2 }
 0x347   :  { %v15858_v56 = vpop.f32.mrf.mxu1  ;;  %16025 = vmatmul.mubr.msk.f32.gmra.mxu1 %vm3173_vm2, %v19500_v6 }
 0x348   :  { %v19765_v51 = vadd.f32 %v15858_v56, %v19518_v58  ;;  %16027 = vmatprep.mubr.msk.f32.mxu1 %vm3173_vm2, %v5967_v21  ;;  %v22078_v56 = vld [vmem:[#allocation46_spill] sm:$0xff] }
 0x349   :  { %v5035_v39 = vpop.f32.mrf.mxu1 }
 0x34a   :  { %v19769_v49 = vadd.f32 %v5035_v39, %v19523_v11 }
 0x34b   :  { %v15869_v30 = vpop.f32.mrf.mxu1  ;;  %16028 = vmatmul.mubr.msk.f32.gmra.mxu1 %vm3173_vm2, %v5968_v10 }
 0x34c   :  { %v19773_v2 = vadd.f32 %v15869_v30, %v19536_v0  ;;  %16030 = vmatprep.mubr.msk.f32.mxu1 %vm3173_vm2, %v19123_v45  ;;  %v22080_v30 = vld [vmem:[#allocation50_spill] sm:$0xff] }
 0x34d   :  { %v5296_v6 = vpop.f32.mrf.mxu1 }
 0x34e   :  { %v19778_v58 = vadd.f32 %v5296_v6, %v19543_v63  ;;  %v22081_v6 = vld [vmem:[#allocation53_spill] sm:$0xff] }
 0x34f   :  { %v15872_v9 = vpop.f32.mrf.mxu1  ;;  %16031 = vmatmul.mubr.msk.f32.gmra.mxu1 %vm3173_vm2, %v19131_v14 }
 0x350   :  { %v19783_v11 = vadd.f32 %v15872_v9, %v19556_v20  ;;  %16033 = vmatprep.mubr.msk.f32.mxu1 %vm3173_vm2, %v19143_v48 }
 0x351   :  { %v5306_v27 = vpop.f32.mrf.mxu1 }
 0x352   :  { %v19788_v0 = vadd.f32 %v5306_v27, %v19565_v55 }
 0x353   :  { %v15875_v61 = vpop.f32.mrf.mxu1  ;;  %16034 = vmatmul.mubr.msk.f32.gmra.mxu1 %vm3173_vm2, %v19560_v19 }
 0x354   :  { %v19793_v45 = vadd.f32 %v15875_v61, %v19576_v8  ;;  %16036 = vmatprep.mubr.msk.f32.mxu1 %vm3173_vm2, %v19159_v25  ;;  %v6379_v61 = vld [vmem:[#allocation2 + $0x630] sm:$0xff] }
 0x355   :  { %v5316_v14 = vpop.f32.mrf.mxu1 }
 0x356   :  { %v19798_v63 = vadd.f32 %v5316_v14, %v19582_v46 }
 0x357   :  { %v15878_v20 = vpop.f32.mrf.mxu1  ;;  %16037 = vmatmul.mubr.msk.f32.gmra.mxu1 %vm3173_vm2, %v19169_v18 }
 0x358   :  { %v19803_v48 = vadd.f32 %v15878_v20, %v19595_v36  ;;  %16039 = vmatprep.mubr.msk.f32.mxu1 %vm3173_vm2, %v19183_v44  ;;  %v22082_v20 = vld [vmem:[#allocation56_spill] sm:$0xff] }
 0x359   :  { %v5326_v19 = vpop.f32.mrf.mxu1 }
 0x35a   :  { %v19808_v55 = vadd.f32 %v5326_v19, %v19602_v50  ;;  %v22077_v50 = vld [vmem:[#allocation45_spill] sm:$0xff] }
 0x35b   :  { %v15881_v8 = vpop.f32.mrf.mxu1  ;;  %16040 = vmatmul.mubr.msk.f32.gmra.mxu1 %vm3173_vm2, %v19193_v41 }
 0x35c   :  { %v19813_v25 = vadd.f32 %v15881_v8, %v19615_v53  ;;  %16042 = vmatprep.mubr.msk.f32.mxu1 %vm3173_vm2, %v19207_v26  ;;  %v13901_v26 = vld [vmem:[%s21893_s3 + $0x130] sm:$0xff] }
 0x35d   :  { %v5336_v18 = vpop.f32.mrf.mxu1 }
 0x35e   :  { %v19818_v46 = vadd.f32 %v5336_v18, %v19624_v59 }
 0x35f   :  { %v15884_v36 = vpop.f32.mrf.mxu1  ;;  %16043 = vmatmul.mubr.msk.f32.gmra.mxu1 %vm3173_vm2, %v19619_v16 }
 0x360   :  { %v19823_v44 = vadd.f32 %v15884_v36, %v19635_v40  ;;  %16053 = vmatprep.mubr.msk.f32.mxu1 %vm3173_vm2, %v22077_v50  ;;  %v22079_v40 = vld [vmem:[#allocation49_spill] sm:$0xff]  ;;  %v22084_v50 = vld [vmem:[#allocation60_spill] sm:$0xff] }
 0x361   :  { %v5346_v41 = vpop.f32.mrf.mxu1 }
 0x362   :  { %v19828_v53 = vadd.f32 %v5346_v41, %v19641_v34  ;;  %v13900_v34 = vld [vmem:[%s21893_s3 + $0x128] sm:$0xff] }
 0x363   :  { %v15887_v59 = vpop.f32.mrf.mxu1  ;;  %16054 = vmatmul.mubr.msk.f32.vlgmr.msra.gmra.mxu1 %vm3173_vm2, %v22078_v56  ;;  %v22086_v56 = vld [vmem:[#allocation18_spill] sm:$0xff] }
 0x364   :  { %v19836_v16 = vadd.f32 %v15887_v59, %v19652_v17  ;;  %16170 = vmatpush3.msra.mxu1 %v19685_v24  ;;  %16056 = vmatprep.mubr.msk.f32.mxu1 %vm3173_vm2, %v22079_v40  ;;  %v13899_v17 = vld [vmem:[%s21893_s3 + $0x120] sm:$0xff]  ;;  %v22085_v59 = vld [vmem:[#allocation61_spill] sm:$0xff] }
 0x365   :  { %v5356_v21 = vpop.f32.mrf.mxu1  ;;  %16171 = vmatprep.subr.mxu1 %v13901_v26 }
 0x366   :  { %v19845_v39 = vadd.f32 %v5356_v21, %v19662_v35  ;;  %16172 = vmatpush3.msra.mxu1 %v13901_v26  ;;  %v19860_v35 = vld [vmem:[%s21893_s3 + $0x178] sm:$0xff] }
 0x367   :  { %v15890_v10 = vpop.f32.mrf.mxu1  ;;  %16057 = vmatmul.mubr.msk.f32.gmra.mxu1 %vm3173_vm2, %v22080_v30  ;;  %16173 = vmatprep.subr.mxu1 %v13900_v34 }
 0x368   :  { %v19853_v24 = vadd.f32 %v15890_v10, %v19673_v31  ;;  %16059 = vmatprep.mubr.msk.f32.mxu1 %vm3173_vm2, %v22081_v6  ;;  %16174 = vmatpush3.msra.mxu1 %v13900_v34  ;;  %v6385_v34 = vld [vmem:[#allocation2 + $0x670] sm:$0xff]  ;;  %v22088_v6 = vld [vmem:[#allocation19_spill] sm:$0xff] }
 0x369   :  { %v5366_v9 = vpop.f32.mrf.mxu1  ;;  %16175 = vmatprep.subr.mxu1 %v13899_v17 }
 0x36a   :  { %v19863_v27 = vadd.f32 %v5366_v9, %v19679_v37  ;;  %16176 = vmatpush3.msra.mxu1 %v13899_v17  ;;  %v22083_v37 = vld [vmem:[#allocation57_spill] sm:$0xff]  ;;  %v22087_v17 = vld [vmem:[#allocation4_spill] sm:$0xff]  ;;  %v22089_v9 = vld [vmem:[#allocation22_spill] sm:$0xff] }
 0x36b   :  { %v15893_v14 = vpop.f32.mrf.mxu1  ;;  %16060 = vmatmul.mubr.msk.f32.gmra.mxu1 %vm3173_vm2, %v6379_v61  ;;  %16293 = vmatprep.subr.mxu1 %v19860_v35 }
 0x36c   :  { %v19868_v31 = vadd.f32 %v15893_v14, %v19689_v7  ;;  %16062 = vmatprep.mubr.msk.f32.mxu1 %vm3173_vm2, %v22082_v20  ;;  %v22090_v20 = vld [vmem:[#allocation21_spill] sm:$0xff] }
 0x36d   :  { %v5376_v19 = vpop.f32.mrf.mxu1 }
 0x36e   :  { %v19873_v8 = vadd.f32 %v5376_v19, %v19694_v22  ;;  %v22091_v19 = vld [vmem:[#allocation23_spill] sm:$0xff] }
 0x36f   :  { %v15896_v18 = vpop.f32.mrf.mxu1  ;;  %16063 = vmatmul.mubr.msk.f32.gmra.mxu1 %vm3173_vm2, %v22083_v37  ;;  %v6391_v37 = vld [vmem:[#allocation2 + $0x6b0] sm:$0xff] }
 0x370   :  { %v19878_v36 = vadd.f32 %v15896_v18, %v19698_v62  ;;  %16065 = vmatprep.mubr.msk.f32.mxu1 %vm3173_vm2, %v22084_v50 }
 0x371   :  { %v5386_v41 = vpop.f32.mrf.mxu1 }
 0x372   :  { %v19883_v7 = vadd.f32 %v5386_v41, %v19702_v57  ;;  %v22092_v41 = vld [vmem:[#allocation25_spill] sm:$0xff] }
 0x373   :  { %v15899_v26 = vpop.f32.mrf.mxu1  ;;  %16066 = vmatmul.mubr.msk.f32.gmra.mxu1 %vm3173_vm2, %v22085_v59 }
 0x374   :  { %v19888_v22 = vadd.f32 %v15899_v26, %v19706_v33  ;;  %16068 = vmatprep.mubr.msk.f32.mxu1 %vm3173_vm2, %v22086_v56  ;;  %v22093_v56 = vld [vmem:[#allocation27_spill] sm:$0xff] }
 0x375   :  { %v5396_v40 = vpop.f32.mrf.mxu1 }
 0x376   :  { %v19893_v62 = vadd.f32 %v5396_v40, %v19710_v23  ;;  %v22094_v40 = vld [vmem:[#allocation26_spill] sm:$0xff] }
 0x377   :  { %v15902_v21 = vpop.f32.mrf.mxu1  ;;  %16069 = vmatmul.mubr.msk.f32.gmra.mxu1 %vm3173_vm2, %v6385_v34 }
 0x378   :  { %v19897_v57 = vadd.f32 %v15902_v21, %v19715_v13  ;;  %16071 = vmatprep.mubr.msk.f32.mxu1 %vm3173_vm2, %v22087_v17  ;;  %v22095_v17 = vld [vmem:[#allocation9_spill] sm:$0xff] }
 0x379   :  { %v5406_v10 = vpop.f32.mrf.mxu1 }
 0x37a   :  { %v19902_v33 = vadd.f32 %v5406_v10, %v19719_v32  ;;  %v22096_v10 = vld [vmem:[#allocation30_spill] sm:$0xff] }
 0x37b   :  { %v15905_v30 = vpop.f32.mrf.mxu1  ;;  %16072 = vmatmul.mubr.msk.f32.gmra.mxu1 %vm3173_vm2, %v22088_v6  ;;  %v6397_v6 = vld [vmem:[#allocation2 + $0x6f0] sm:$0xff] }
 0x37c   :  { %v19907_v23 = vadd.f32 %v15905_v30, %v19723_v47  ;;  %16074 = vmatprep.mubr.msk.f32.mxu1 %vm3173_vm2, %v22089_v9 }
 0x37d   :  { %v5416_v61 = vpop.f32.mrf.mxu1 }
 0x37e   :  { %v19912_v13 = vadd.f32 %v5416_v61, %v19727_v4 }
 0x37f   :  { %v15908_v14 = vpop.f32.mrf.mxu1  ;;  %16075 = vmatmul.mubr.msk.f32.gmra.mxu1 %vm3173_vm2, %v22090_v20  ;;  %v22097_v20 = vld [vmem:[#allocation11_spill] sm:$0xff] }
 0x380   :  { %v19917_v32 = vadd.f32 %v15908_v14, %v19731_v29  ;;  %16077 = vmatprep.mubr.msk.f32.mxu1 %vm3173_vm2, %v22091_v19 }
 0x381   :  { %v5426_v18 = vpop.f32.mrf.mxu1 }
 0x382   :  { %v19922_v47 = vadd.f32 %v5426_v18, %v19735_v42 }
 0x383   :  { %v15911_v50 = vpop.f32.mrf.mxu1  ;;  %16078 = vmatmul.mubr.msk.f32.gmra.mxu1 %vm3173_vm2, %v6391_v37  ;;  %v22099_v37 = vld [vmem:[#allocation12_spill] sm:$0xff] }
 0x384   :  { %v19926_v4 = vadd.f32 %v15911_v50, %v19740_v5  ;;  %16080 = vmatprep.mubr.msk.f32.mxu1 %vm3173_vm2, %v22092_v41  ;;  %v6403_v50 = vld [vmem:[#allocation2 + $0x730] sm:$0xff] }
 0x385   :  { %v5436_v26 = vpop.f32.mrf.mxu1 }
 0x386   :  { %v19931_v29 = vadd.f32 %v5436_v26, %v19744_v52  ;;  %v22100_v26 = vld [vmem:[#allocation13_spill] sm:$0xff] }
 0x387   :  { %v15914_v59 = vpop.f32.mrf.mxu1  ;;  %16081 = vmatmul.mubr.msk.f32.gmra.mxu1 %vm3173_vm2, %v22093_v56 }
 0x388   :  { %v19936_v42 = vadd.f32 %v15914_v59, %v19748_v28  ;;  %16083 = vmatprep.mubr.msk.f32.mxu1 %vm3173_vm2, %v22094_v40  ;;  %v22101_v40 = vld [vmem:[#allocation34_spill] sm:$0xff] }
 0x389   :  { %v5446_v34 = vpop.f32.mrf.mxu1 }
 0x38a   :  { %v19941_v5 = vadd.f32 %v5446_v34, %v19752_v3  ;;  %v22102_v34 = vld [vmem:[#allocation35_spill] sm:$0xff] }
 0x38b   :  { %v15917_v21 = vpop.f32.mrf.mxu1  ;;  %16084 = vmatmul.mubr.msk.f32.gmra.mxu1 %vm3173_vm2, %v22095_v17 }
 0x38c   :  { %v19946_v52 = vadd.f32 %v15917_v21, %v19756_v60  ;;  %16086 = vmatprep.mubr.msk.f32.mxu1 %vm3173_vm2, %v22096_v10  ;;  %v22103_v10 = vld [vmem:[#allocation15_spill] sm:$0xff] }
 0x38d   :  { %v5456_v30 = vpop.f32.mrf.mxu1 }
 0x38e   :  { %v19951_v28 = vadd.f32 %v5456_v30, %v19760_v38  ;;  %v22104_v30 = vld [vmem:[#allocation16_spill] sm:$0xff] }
 0x38f   :  { %v15920_v9 = vpop.f32.mrf.mxu1  ;;  %16087 = vmatmul.mubr.msk.f32.gmra.mxu1 %vm3173_vm2, %v6397_v6 }
 0x390   :  { %v19955_v3 = vadd.f32 %v15920_v9, %v19765_v51  ;;  %16089 = vmatprep.mubr.msk.f32.mxu1 %vm3173_vm2, %v19527_v54  ;;  %v22098_v54 = vld [vmem:[#allocation32_spill] sm:$0xff]  ;;  %v6409_v9 = vld [vmem:[#allocation2 + $0x770] sm:$0xff] }
 0x391   :  { %v5466_v61 = vpop.f32.mrf.mxu1 }
 0x392   :  { %v19960_v60 = vadd.f32 %v5466_v61, %v19769_v49 }
 0x393   :  { %v15931_v14 = vpop.f32.mrf.mxu1  ;;  %16090 = vmatmul.mubr.msk.f32.gmra.mxu1 %vm3173_vm2, %v19533_v12 }
 0x394   :  { %v19965_v38 = vadd.f32 %v15931_v14, %v19773_v2  ;;  %16092 = vmatprep.mubr.msk.f32.mxu1 %vm3173_vm2, %v22097_v20 }
 0x395   :  { %v5727_v19 = vpop.f32.mrf.mxu1 }
 0x396   :  { %v19970_v51 = vadd.f32 %v5727_v19, %v19778_v58  ;;  %v20019_v19 = vld [vmem:[#allocation2 + $0x248] sm:$0xff] }
 0x397   :  { %v15934_v18 = vpop.f32.mrf.mxu1  ;;  %16093 = vmatmul.mubr.msk.f32.gmra.mxu1 %vm3173_vm2, %v22098_v54  ;;  %v20026_v54 = vld [vmem:[#allocation2 + $0x250] sm:$0xff] }
 0x398   :  { %v19975_v49 = vadd.f32 %v15934_v18, %v19783_v11  ;;  %16095 = vmatprep.mubr.msk.f32.mxu1 %vm3173_vm2, %v22099_v37 }
 0x399   :  { %v5737_v12 = vpop.f32.mrf.mxu1 }
 0x39a   :  { %v19980_v2 = vadd.f32 %v5737_v12, %v19788_v0 }
 0x39b   :  { %v15937_v41 = vpop.f32.mrf.mxu1  ;;  %16096 = vmatmul.mubr.msk.f32.gmra.mxu1 %vm3173_vm2, %v6403_v50  ;;  %v20040_v50 = vld [vmem:[#allocation2 + $0x258] sm:$0xff] }
 0x39c   :  { %v19984_v58 = vadd.f32 %v15937_v41, %v19793_v45  ;;  %16098 = vmatprep.mubr.msk.f32.mxu1 %vm3173_vm2, %v22100_v26  ;;  %v20047_v41 = vld [vmem:[#allocation2 + $0x260] sm:$0xff] }
 0x39d   :  { %v5747_v59 = vpop.f32.mrf.mxu1 }
 0x39e   :  { %v19989_v11 = vadd.f32 %v5747_v59, %v19798_v63 }
 0x39f   :  { %v15940_v56 = vpop.f32.mrf.mxu1  ;;  %16099 = vmatmul.mubr.msk.f32.gmra.mxu1 %vm3173_vm2, %v22101_v40  ;;  %v20062_v40 = vld [vmem:[#allocation2 + $0x268] sm:$0xff] }
 0x3a0   :  { %v19994_v0 = vadd.f32 %v15940_v56, %v19803_v48  ;;  %16101 = vmatprep.mubr.msk.f32.mxu1 %vm3173_vm2, %v22102_v34 }
 0x3a1   :  { %v5757_v21 = vpop.f32.mrf.mxu1 }
 0x3a2   :  { %v19999_v45 = vadd.f32 %v5757_v21, %v19808_v55  ;;  %v7236_v55 = vld [vmem:[#allocation2 + $0x240] sm:$0xff] }
 0x3a3   :  { %v15943_v17 = vpop.f32.mrf.mxu1  ;;  %16102 = vmatmul.mubr.msk.f32.gmra.mxu1 %vm3173_vm2, %v22103_v10 }
 0x3a4   :  { %v20004_v63 = vadd.f32 %v15943_v17, %v19813_v25  ;;  %16104 = vmatprep.mubr.msk.f32.mxu1 %vm3173_vm2, %v22104_v30 }
 0x3a5   :  { %v5767_v6 = vpop.f32.mrf.mxu1 }
 0x3a6   :  { %v20009_v48 = vadd.f32 %v5767_v6, %v19818_v46  ;;  %v13981_v46 = vld [vmem:[%s21893_s3 + $0x170] sm:$0xff] }
 0x3a7   :  { %v15946_v61 = vpop.f32.mrf.mxu1  ;;  %16105 = vmatmul.mubr.msk.f32.gmra.mxu1 %vm3173_vm2, %v6409_v9  ;;  %v20078_v6 = vld [vmem:[#allocation2 + $0x290] sm:$0xff] }
 0x3a8   :  { %v20013_v14 = vadd.f32 %v15946_v61, %v19823_v44  ;;  %16177 = vmatprep.mubr.msk.f32.mxu1 %vm3173_vm2, %v7236_v55 }
 0x3a9   :  { %v5777_v20 = vpop.f32.mrf.mxu1 }
 0x3aa   :  { %v20017_v25 = vadd.f32 %v5777_v20, %v19828_v53  ;;  %v13980_v53 = vld [vmem:[%s21893_s3 + $0x168] sm:$0xff]  ;;  %v20092_v20 = vld [vmem:[#allocation2 + $0x2a0] sm:$0xff] }
 0x3ab   :  { %v15949_v18 = vpop.f32.mrf.mxu1  ;;  %16178 = vmatmul.mubr.msk.f32.vlgmr.msra.gmra.mxu1 %vm3173_vm2, %v20019_v19 }
 0x3ac   :  { %v20029_v44 = vadd.f32 %v15949_v18, %v19836_v16  ;;  %16294 = vmatpush3.msra.mxu1 %v19860_v35  ;;  %16180 = vmatprep.mubr.msk.f32.mxu1 %vm3173_vm2, %v20026_v54  ;;  %v13979_v16 = vld [vmem:[%s21893_s3 + $0x160] sm:$0xff] }
 0x3ad   :  { %v5787_v37 = vpop.f32.mrf.mxu1  ;;  %16295 = vmatprep.subr.mxu1 %v13981_v46 }
 0x3ae   :  { %v20038_v12 = vadd.f32 %v5787_v37, %v19845_v39  ;;  %16296 = vmatpush3.msra.mxu1 %v13981_v46  ;;  %v20057_v39 = vld [vmem:[%s21893_s3 + $0x1b8] sm:$0xff]  ;;  %v7248_v37 = vld [vmem:[#allocation2 + $0x2c0] sm:$0xff] }
 0x3af   :  { %v15952_v35 = vpop.f32.mrf.mxu1  ;;  %16181 = vmatmul.mubr.msk.f32.gmra.mxu1 %vm3173_vm2, %v20040_v50  ;;  %16297 = vmatprep.subr.mxu1 %v13980_v53 }
 0x3b0   :  { %v20050_v26 = vadd.f32 %v15952_v35, %v19853_v24  ;;  %16183 = vmatprep.mubr.msk.f32.mxu1 %vm3173_vm2, %v20047_v41  ;;  %16298 = vmatpush3.msra.mxu1 %v13980_v53  ;;  %v7242_v24 = vld [vmem:[#allocation2 + $0x280] sm:$0xff] }
 0x3b1   :  { %v5797_v59 = vpop.f32.mrf.mxu1  ;;  %16299 = vmatprep.subr.mxu1 %v13979_v16 }
 0x3b2   :  { %v20060_v56 = vadd.f32 %v5797_v59, %v19863_v27  ;;  %16300 = vmatpush3.msra.mxu1 %v13979_v16  ;;  %v20074_v27 = vld [vmem:[#allocation2 + $0x288] sm:$0xff] }
 0x3b3   :  { %v15955_v34 = vpop.f32.mrf.mxu1  ;;  %16184 = vmatmul.mubr.msk.f32.gmra.mxu1 %vm3173_vm2, %v20062_v40  ;;  %16417 = vmatprep.subr.mxu1 %v20057_v39  ;;  %v20113_v59 = vld [vmem:[#allocation2 + $0x2c8] sm:$0xff] }
 0x3b4   :  { %v20068_v21 = vadd.f32 %v15955_v34, %v19868_v31  ;;  %16186 = vmatprep.mubr.msk.f32.mxu1 %vm3173_vm2, %v7242_v24  ;;  %v20117_v34 = vld [vmem:[#allocation2 + $0x2d0] sm:$0xff] }
 0x3b5   :  { %v5807_v17 = vpop.f32.mrf.mxu1 }
 0x3b6   :  { %v20072_v10 = vadd.f32 %v5807_v17, %v19873_v8  ;;  %v20088_v8 = vld [vmem:[#allocation2 + $0x298] sm:$0xff] }
 0x3b7   :  { %v15958_v30 = vpop.f32.mrf.mxu1  ;;  %16187 = vmatmul.mubr.msk.f32.gmra.mxu1 %vm3173_vm2, %v20074_v27 }
 0x3b8   :  { %v20081_v9 = vadd.f32 %v15958_v30, %v19878_v36  ;;  %16189 = vmatprep.mubr.msk.f32.mxu1 %vm3173_vm2, %v20078_v6 }
 0x3b9   :  { %v5817_v31 = vpop.f32.mrf.mxu1 }
 0x3ba   :  { %v20086_v61 = vadd.f32 %v5817_v31, %v19883_v7  ;;  %v20102_v7 = vld [vmem:[#allocation2 + $0x2a8] sm:$0xff]  ;;  %v20131_v31 = vld [vmem:[#allocation2 + $0x2e0] sm:$0xff] }
 0x3bb   :  { %v15961_v55 = vpop.f32.mrf.mxu1  ;;  %16190 = vmatmul.mubr.msk.f32.gmra.mxu1 %vm3173_vm2, %v20088_v8 }
 0x3bc   :  { %v20095_v46 = vadd.f32 %v15961_v55, %v19888_v22  ;;  %16192 = vmatprep.mubr.msk.f32.mxu1 %vm3173_vm2, %v20092_v20 }
 0x3bd   :  { %v5827_v36 = vpop.f32.mrf.mxu1 }
 0x3be   :  { %v20100_v18 = vadd.f32 %v5827_v36, %v19893_v62 }
 0x3bf   :  { %v15964_v53 = vpop.f32.mrf.mxu1  ;;  %16193 = vmatmul.mubr.msk.f32.gmra.mxu1 %vm3173_vm2, %v20102_v7 }
 0x3c0   :  { %v20107_v16 = vadd.f32 %v15964_v53, %v19897_v57  ;;  %16195 = vmatprep.mubr.msk.f32.mxu1 %vm3173_vm2, %v7248_v37  ;;  %v7254_v37 = vld [vmem:[#allocation2 + $0x300] sm:$0xff] }
 0x3c1   :  { %v5837_v22 = vpop.f32.mrf.mxu1 }
 0x3c2   :  { %v20111_v35 = vadd.f32 %v5837_v22, %v19902_v33  ;;  %v20127_v33 = vld [vmem:[#allocation2 + $0x2d8] sm:$0xff]  ;;  %v20145_v22 = vpop.f32.mrf.mxu0 }
 0x3c3   :  { %v15967_v62 = vpop.f32.mrf.mxu1  ;;  %16196 = vmatmul.mubr.msk.f32.gmra.mxu1 %vm3173_vm2, %v20113_v59  ;;  %22105 = vst [vmem:[#allocation24_spill] sm:$0xff] %v20145_v22 }
 0x3c4   :  { %v20120_v24 = vadd.f32 %v15967_v62, %v19907_v23  ;;  %16198 = vmatprep.mubr.msk.f32.mxu1 %vm3173_vm2, %v20117_v34  ;;  %v20160_v15 = vpop.f32.mrf.mxu0 }
 0x3c5   :  { %v5847_v57 = vpop.f32.mrf.mxu1  ;;  %22106 = vst [vmem:[#allocation45_spill] sm:$0xff] %v20160_v15 }
 0x3c6   :  { %v20125_v17 = vadd.f32 %v5847_v57, %v19912_v13  ;;  %v20141_v13 = vld [vmem:[#allocation2 + $0x2e8] sm:$0xff]  ;;  %v20176_v43 = vpop.f32.mrf.mxu0 }
 0x3c7   :  { %v15970_v30 = vpop.f32.mrf.mxu1  ;;  %16199 = vmatmul.mubr.msk.f32.gmra.mxu1 %vm3173_vm2, %v20127_v33  ;;  %22108 = vst [vmem:[#allocation49_spill] sm:$0xff] %v20176_v43 }
 0x3c8   :  { %v20134_v55 = vadd.f32 %v15970_v30, %v19917_v32  ;;  %16201 = vmatprep.mubr.msk.f32.mxu1 %vm3173_vm2, %v20131_v31 }
 0x3c9   :  { %v5857_v23 = vpop.f32.mrf.mxu1 }
 0x3ca   :  { %v20139_v36 = vadd.f32 %v5857_v23, %v19922_v47  ;;  %v20154_v47 = vld [vmem:[#allocation2 + $0x308] sm:$0xff]  ;;  %v20158_v23 = vld [vmem:[#allocation2 + $0x310] sm:$0xff] }
 0x3cb   :  { %v15973_v53 = vpop.f32.mrf.mxu1  ;;  %16202 = vmatmul.mubr.msk.f32.gmra.mxu1 %vm3173_vm2, %v20141_v13 }
 0x3cc   :  { %v20148_v62 = vadd.f32 %v15973_v53, %v19926_v4  ;;  %16204 = vmatprep.mubr.msk.f32.mxu1 %vm3173_vm2, %v7254_v37  ;;  %v20170_v53 = vld [vmem:[#allocation2 + $0x318] sm:$0xff] }
 0x3cd   :  { %v5867_v32 = vpop.f32.mrf.mxu1 }
 0x3ce   :  { %v20152_v57 = vadd.f32 %v5867_v32, %v19931_v29  ;;  %v20174_v32 = vld [vmem:[#allocation2 + $0x320] sm:$0xff] }
 0x3cf   :  { %v15976_v30 = vpop.f32.mrf.mxu1  ;;  %16205 = vmatmul.mubr.msk.f32.gmra.mxu1 %vm3173_vm2, %v20154_v47 }
 0x3d0   :  { %v20163_v22 = vadd.f32 %v15976_v30, %v19936_v42  ;;  %16207 = vmatprep.mubr.msk.f32.mxu1 %vm3173_vm2, %v20158_v23 }
 0x3d1   :  { %v5877_v4 = vpop.f32.mrf.mxu1 }
 0x3d2   :  { %v20168_v29 = vadd.f32 %v5877_v4, %v19941_v5  ;;  %v20186_v4 = vld [vmem:[#allocation2 + $0x328] sm:$0xff] }
 0x3d3   :  { %v15979_v37 = vpop.f32.mrf.mxu1  ;;  %16208 = vmatmul.mubr.msk.f32.gmra.mxu1 %vm3173_vm2, %v20170_v53  ;;  %22110 = vst [vmem:[#allocation53_spill] sm:$0xff] %v20186_v4 }
 0x3d4   :  { %22107 = vst [vmem:[#allocation46_spill] sm:$0xff] %v20168_v29  ;;  %v20179_v42 = vadd.f32 %v15979_v37, %v19946_v52  ;;  %16210 = vmatprep.mubr.msk.f32.mxu1 %vm3173_vm2, %v20174_v32  ;;  %v20190_v29 = vpop.f32.mrf.mxu0 }
 0x3d5   :  { %v5887_v30 = vpop.f32.mrf.mxu1  ;;  %22111 = vst [vmem:[#allocation56_spill] sm:$0xff] %v20190_v29 }
 0x3d6   :  { %v20184_v5 = vadd.f32 %v5887_v30, %v19951_v28  ;;  %v20199_v28 = vld [vmem:[#allocation2 + $0x348] sm:$0xff] }
 0x3d7   :  { %v15982_v15 = vpop.f32.mrf.mxu1  ;;  %16211 = vmatmul.mubr.msk.f32.gmra.mxu1 %vm3173_vm2, %v20186_v4  ;;  %v20205_v4 = vpop.f32.mrf.mxu0 }
 0x3d8   :  { %22109 = vst [vmem:[#allocation50_spill] sm:$0xff] %v20184_v5  ;;  %v20193_v43 = vadd.f32 %v15982_v15, %v19955_v3  ;;  %16213 = vmatprep.mubr.msk.f32.mxu1 %vm3173_vm2, %v7260_v1  ;;  %v20203_v5 = vld [vmem:[#allocation2 + $0x350] sm:$0xff]  ;;  %22113 = vst [vmem:[#allocation60_spill] sm:$0xff] %v20205_v4  ;;  %v20215_v3 = vld [vmem:[#allocation2 + $0x358] sm:$0xff] }
 0x3d9   :  { %v5897_v52 = vpop.f32.mrf.mxu1  ;;  %22115 = vst [vmem:[#allocation18_spill] sm:$0xff] %v20215_v3 }
 0x3da   :  { %v20197_v37 = vadd.f32 %v5897_v52, %v19960_v60  ;;  %v20219_v52 = vld [vmem:[#allocation2 + $0x360] sm:$0xff] }
 0x3db   :  { %v15993_v30 = vpop.f32.mrf.mxu1  ;;  %16214 = vmatmul.mubr.msk.f32.gmra.mxu1 %vm3173_vm2, %v20199_v28 }
 0x3dc   :  { %22112 = vst [vmem:[#allocation57_spill] sm:$0xff] %v20197_v37  ;;  %v20208_v29 = vadd.f32 %v15993_v30, %v19965_v38  ;;  %16216 = vmatprep.mubr.msk.f32.mxu1 %vm3173_vm2, %v20203_v5  ;;  %v20221_v37 = vpop.f32.mrf.mxu0 }
 0x3dd   :  { %v6158_v1 = vpop.f32.mrf.mxu1  ;;  %22116 = vst [vmem:[#allocation4_spill] sm:$0xff] %v20221_v37 }
 0x3de   :  { %v20213_v15 = vadd.f32 %v6158_v1, %v19970_v51  ;;  %v20231_v1 = vld [vmem:[#allocation2 + $0x368] sm:$0xff] }
 0x3df   :  { %v15996_v60 = vpop.f32.mrf.mxu1  ;;  %16217 = vmatmul.mubr.msk.f32.gmra.mxu1 %vm3173_vm2, %v20215_v3  ;;  %22118 = vst [vmem:[#allocation22_spill] sm:$0xff] %v20231_v1  ;;  %v20235_v3 = vpop.f32.mrf.mxu0 }
 0x3e0   :  { %22114 = vst [vmem:[#allocation61_spill] sm:$0xff] %v20213_v15  ;;  %v20224_v38 = vadd.f32 %v15996_v60, %v19975_v49  ;;  %16219 = vmatprep.mubr.msk.f32.mxu1 %vm3173_vm2, %v20219_v52  ;;  %v7266_v15 = vld [vmem:[#allocation2 + $0x380] sm:$0xff]  ;;  %22119 = vst [vmem:[#allocation21_spill] sm:$0xff] %v20235_v3 }
 0x3e1   :  { %v6168_v30 = vpop.f32.mrf.mxu1 }
 0x3e2   :  { %v20229_v51 = vadd.f32 %v6168_v30, %v19980_v2  ;;  %v20244_v2 = vld [vmem:[#allocation2 + $0x388] sm:$0xff] }
 0x3e3   :  { %v15999_v4 = vpop.f32.mrf.mxu1  ;;  %16220 = vmatmul.mubr.msk.f32.gmra.mxu1 %vm3173_vm2, %v20231_v1  ;;  %v20250_v1 = vpop.f32.mrf.mxu0 }
 0x3e4   :  { %22117 = vst [vmem:[#allocation19_spill] sm:$0xff] %v20229_v51  ;;  %v20238_v37 = vadd.f32 %v15999_v4, %v19984_v58  ;;  %16222 = vmatprep.mubr.msk.f32.mxu1 %vm3173_vm2, %v7266_v15  ;;  %v20248_v51 = vld [vmem:[#allocation2 + $0x390] sm:$0xff]  ;;  %22121 = vst [vmem:[#allocation25_spill] sm:$0xff] %v20250_v1  ;;  %v20260_v4 = vld [vmem:[#allocation2 + $0x398] sm:$0xff] }
 0x3e5   :  { %v6178_v49 = vpop.f32.mrf.mxu1 }
 0x3e6   :  { %v20242_v60 = vadd.f32 %v6178_v49, %v19989_v11  ;;  %v20264_v49 = vld [vmem:[#allocation2 + $0x3a0] sm:$0xff] }
 0x3e7   :  { %v16002_v30 = vpop.f32.mrf.mxu1  ;;  %16223 = vmatmul.mubr.msk.f32.gmra.mxu1 %vm3173_vm2, %v20244_v2 }
 0x3e8   :  { %22120 = vst [vmem:[#allocation23_spill] sm:$0xff] %v20242_v60  ;;  %v20253_v3 = vadd.f32 %v16002_v30, %v19994_v0  ;;  %16225 = vmatprep.mubr.msk.f32.mxu1 %vm3173_vm2, %v20248_v51  ;;  %v20266_v60 = vpop.f32.mrf.mxu0 }
 0x3e9   :  { %v6188_v58 = vpop.f32.mrf.mxu1  ;;  %22123 = vst [vmem:[#allocation26_spill] sm:$0xff] %v20266_v60 }
 0x3ea   :  { %v20258_v11 = vadd.f32 %v6188_v58, %v19999_v45  ;;  %v20276_v58 = vld [vmem:[#allocation2 + $0x3a8] sm:$0xff] }
 0x3eb   :  { %v16005_v15 = vpop.f32.mrf.mxu1  ;;  %16226 = vmatmul.mubr.msk.f32.gmra.mxu1 %vm3173_vm2, %v20260_v4 }
 0x3ec   :  { %22122 = vst [vmem:[#allocation27_spill] sm:$0xff] %v20258_v11  ;;  %v20269_v0 = vadd.f32 %v16005_v15, %v20004_v63  ;;  %16228 = vmatprep.mubr.msk.f32.mxu1 %vm3173_vm2, %v20264_v49  ;;  %v20280_v11 = vpop.f32.mrf.mxu0 }
 0x3ed   :  { %v6198_v30 = vpop.f32.mrf.mxu1  ;;  %22125 = vst [vmem:[#allocation30_spill] sm:$0xff] %v20280_v11 }
 0x3ee   :  { %v20274_v45 = vadd.f32 %v6198_v30, %v20009_v48  ;;  %v14061_v48 = vld [vmem:[%s21893_s3 + $0x1b0] sm:$0xff] }
 0x3ef   :  { %v16008_v1 = vpop.f32.mrf.mxu1  ;;  %16229 = vmatmul.mubr.msk.f32.gmra.mxu1 %vm3173_vm2, %v20276_v58 }
 0x3f0   :  { %22124 = vst [vmem:[#allocation9_spill] sm:$0xff] %v20274_v45  ;;  %v20283_v60 = vadd.f32 %v16008_v1, %v20013_v14  ;;  %16301 = vmatprep.mubr.msk.f32.mxu1 %vm3173_vm2, %v20019_v19  ;;  %v20295_v45 = vpop.f32.mrf.mxu0 }
 0x3f1   :  { %v6208_v63 = vpop.f32.mrf.mxu1  ;;  %22126 = vst [vmem:[#allocation11_spill] sm:$0xff] %v20295_v45 }
 0x3f2   :  { %v20288_v15 = vadd.f32 %v6208_v63, %v20017_v25  ;;  %v14060_v25 = vld [vmem:[%s21893_s3 + $0x1a8] sm:$0xff] }
 0x3f3   :  { %v16011_v30 = vpop.f32.mrf.mxu1  ;;  %16302 = vmatmul.mubr.msk.f32.vlgmr.msra.gmra.mxu1 %vm3173_vm2, %v20026_v54  ;;  %v14059_v54 = vld [vmem:[%s21893_s3 + $0x1a0] sm:$0xff] }
 0x3f4   :  { %v20298_v14 = vadd.f32 %v16011_v30, %v20029_v44  ;;  %16418 = vmatpush3.msra.mxu1 %v20057_v39  ;;  %16304 = vmatprep.mubr.msk.f32.mxu1 %vm3173_vm2, %v20040_v50  ;;  %v20314_v50 = vpop.f32.mrf.mxu0 }
 0x3f5   :  { %v6218_v19 = vpop.f32.mrf.mxu1  ;;  %16419 = vmatprep.subr.mxu1 %v14061_v48  ;;  %22127 = vst [vmem:[#allocation32_spill] sm:$0xff] %v20314_v50 }
 0x3f6   :  { %v20307_v1 = vadd.f32 %v6218_v19, %v20038_v12  ;;  %16420 = vmatpush3.msra.mxu1 %v14061_v48  ;;  %v20324_v12 = vld [vmem:[%s21893_s3 + $0x1f8] sm:$0xff] }
 0x3f7   :  { %v16014_v44 = vpop.f32.mrf.mxu1  ;;  %16305 = vmatmul.mubr.msk.f32.gmra.mxu1 %vm3173_vm2, %v20047_v41  ;;  %16421 = vmatprep.subr.mxu1 %v14060_v25  ;;  %v8103_v41 = vld [vmem:[#allocation2 + $0x270] sm:$0xff] }
 0x3f8   :  { %v20317_v39 = vadd.f32 %v16014_v44, %v20050_v26  ;;  %16307 = vmatprep.mubr.msk.f32.mxu1 %vm3173_vm2, %v20062_v40  ;;  %16422 = vmatpush3.msra.mxu1 %v14060_v25  ;;  %v20331_v26 = vpop.f32.mrf.mxu0 }
 0x3f9   :  { %v6228_v63 = vpop.f32.mrf.mxu1  ;;  %16423 = vmatprep.subr.mxu1 %v14059_v54  ;;  %22128 = vst [vmem:[#allocation12_spill] sm:$0xff] %v20331_v26  ;;  %v8984_v26 = vld [vmem:[#allocation2 + $0x740] sm:$0xff] }
 0x3fa   :  { %v20327_v48 = vadd.f32 %v6228_v63, %v20060_v56  ;;  %16424 = vmatpush3.msra.mxu1 %v14059_v54  ;;  %v20343_v54 = vpop.f32.mrf.mxu0 }
 0x3fb   :  { %v16017_v30 = vpop.f32.mrf.mxu1  ;;  %16308 = vmatmul.mubr.msk.f32.gmra.mxu1 %vm3173_vm2, %v8103_v41  ;;  %16541 = vmatprep.subr.mxu1 %v20324_v12  ;;  %22129 = vst [vmem:[#allocation13_spill] sm:$0xff] %v20343_v54 }
 0x3fc   :  { %v20334_v40 = vadd.f32 %v16017_v30, %v20068_v21  ;;  %16310 = vmatprep.mubr.msk.f32.mxu1 %vm3173_vm2, %v20074_v27 }
 0x3fd   :  { %v6238_v25 = vpop.f32.mrf.mxu1 }
 0x3fe   :  { %v20339_v19 = vadd.f32 %v6238_v25, %v20072_v10  ;;  %v20355_v10 = vpop.f32.mrf.mxu0 }
 0x3ff   :  { %v16020_v56 = vpop.f32.mrf.mxu1  ;;  %16311 = vmatmul.mubr.msk.f32.gmra.mxu1 %vm3173_vm2, %v20078_v6  ;;  %22130 = vst [vmem:[#allocation34_spill] sm:$0xff] %v20355_v10 }
 0x400   :  { %v20346_v44 = vadd.f32 %v16020_v56, %v20081_v9  ;;  %16313 = vmatprep.mubr.msk.f32.mxu1 %vm3173_vm2, %v20088_v8  ;;  %v8109_v8 = vld [vmem:[#allocation2 + $0x2b0] sm:$0xff] }
 0x401   :  { %v6248_v21 = vpop.f32.mrf.mxu1 }
 0x402   :  { %v20351_v63 = vadd.f32 %v6248_v21, %v20086_v61  ;;  %v20366_v61 = vpop.f32.mrf.mxu0 }
 0x403   :  { %v16023_v27 = vpop.f32.mrf.mxu1  ;;  %16314 = vmatmul.mubr.msk.f32.gmra.mxu1 %vm3173_vm2, %v20092_v20  ;;  %22131 = vst [vmem:[#allocation35_spill] sm:$0xff] %v20366_v61  ;;  %v20538_v61 = vld [vmem:[#allocation2 + $0x658] sm:$0xff] }
 0x404   :  { %v20358_v6 = vadd.f32 %v16023_v27, %v20095_v46  ;;  %16316 = vmatprep.mubr.msk.f32.mxu1 %vm3173_vm2, %v20102_v7 }
 0x405   :  { %v6258_v9 = vpop.f32.mrf.mxu1 }
 0x406   :  { %v20363_v41 = vadd.f32 %v6258_v9, %v20100_v18  ;;  %v20378_v18 = vpop.f32.mrf.mxu0 }
 0x407   :  { %v16026_v30 = vpop.f32.mrf.mxu1  ;;  %16317 = vmatmul.mubr.msk.f32.gmra.mxu1 %vm3173_vm2, %v8109_v8  ;;  %22132 = vst [vmem:[#allocation15_spill] sm:$0xff] %v20378_v18 }
 0x408   :  { %v20369_v20 = vadd.f32 %v16026_v30, %v20107_v16  ;;  %16319 = vmatprep.mubr.msk.f32.mxu1 %vm3173_vm2, %v20113_v59 }
 0x409   :  { %v6268_v46 = vpop.f32.mrf.mxu1 }
 0x40a   :  { %v20374_v25 = vadd.f32 %v6268_v46, %v20111_v35  ;;  %v20390_v35 = vpop.f32.mrf.mxu0  ;;  %v22136_v46 = vld [vmem:[#allocation46_spill] sm:$0xff] }
 0x40b   :  { %v16029_v7 = vpop.f32.mrf.mxu1  ;;  %16320 = vmatmul.mubr.msk.f32.gmra.mxu1 %vm3173_vm2, %v20117_v34  ;;  %22133 = vst [vmem:[#allocation16_spill] sm:$0xff] %v20390_v35 }
 0x40c   :  { %v20381_v56 = vadd.f32 %v16029_v7, %v20120_v24  ;;  %16322 = vmatprep.mubr.msk.f32.mxu1 %vm3173_vm2, %v20127_v33  ;;  %v8115_v33 = vld [vmem:[#allocation2 + $0x2f0] sm:$0xff] }
 0x40d   :  { %v6278_v16 = vpop.f32.mrf.mxu1 }
 0x40e   :  { %v20386_v21 = vadd.f32 %v6278_v16, %v20125_v17  ;;  %v20401_v17 = vpop.f32.mrf.mxu0  ;;  %v22138_v16 = vld [vmem:[#allocation53_spill] sm:$0xff] }
 0x40f   :  { %v16032_v59 = vpop.f32.mrf.mxu1  ;;  %16323 = vmatmul.mubr.msk.f32.gmra.mxu1 %vm3173_vm2, %v20131_v31  ;;  %22134 = vst [vmem:[#allocation64_spill] sm:$0xff] %v20401_v17  ;;  %v20664_v17 = vld [vmem:[#allocation2 + $0x710] sm:$0xff] }
 0x410   :  { %v20393_v34 = vadd.f32 %v16032_v59, %v20134_v55  ;;  %16325 = vmatprep.mubr.msk.f32.mxu1 %vm3173_vm2, %v20141_v13  ;;  %v22139_v59 = vld [vmem:[#allocation50_spill] sm:$0xff] }
 0x411   :  { %v6288_v24 = vpop.f32.mrf.mxu1 }
 0x412   :  { %v20398_v27 = vadd.f32 %v6288_v24, %v20139_v36  ;;  %v20413_v36 = vpop.f32.mrf.mxu0 }
 0x413   :  { %v16035_v9 = vpop.f32.mrf.mxu1  ;;  %16326 = vmatmul.mubr.msk.f32.gmra.mxu1 %vm3173_vm2, %v8115_v33  ;;  %22135 = vst [vmem:[#allocation65_spill] sm:$0xff] %v20413_v36 }
 0x414   :  { %v20404_v31 = vadd.f32 %v16035_v9, %v20148_v62  ;;  %16328 = vmatprep.mubr.msk.f32.mxu1 %vm3173_vm2, %v20154_v47 }
 0x415   :  { %v6298_v55 = vpop.f32.mrf.mxu1 }
 0x416   :  { %v20409_v8 = vadd.f32 %v6298_v55, %v20152_v57  ;;  %v20425_v57 = vpop.f32.mrf.mxu0  ;;  %v22141_v55 = vld [vmem:[#allocation57_spill] sm:$0xff] }
 0x417   :  { %v16038_v13 = vpop.f32.mrf.mxu1  ;;  %16329 = vmatmul.mubr.msk.f32.gmra.mxu1 %vm3173_vm2, %v20158_v23  ;;  %22137 = vst [vmem:[#allocation46_spill] sm:$0xff] %v20425_v57  ;;  %v8978_v57 = vld [vmem:[#allocation2 + $0x700] sm:$0xff] }
 0x418   :  { %v20416_v30 = vadd.f32 %v16038_v13, %v20163_v22  ;;  %16331 = vmatprep.mubr.msk.f32.mxu1 %vm3173_vm2, %v20170_v53  ;;  %v8121_v53 = vld [vmem:[#allocation2 + $0x330] sm:$0xff]  ;;  %v20436_v9 = vpop.f32.mrf.mxu0 }
 0x419   :  { %v6308_v62 = vpop.f32.mrf.mxu1  ;;  %22140 = vst [vmem:[#allocation53_spill] sm:$0xff] %v20436_v9 }
 0x41a   :  { %v20421_v7 = vadd.f32 %v6308_v62, %v22136_v46  ;;  %v20448_v46 = vpop.f32.mrf.mxu0 }
 0x41b   :  { %v16041_v47 = vpop.f32.mrf.mxu1  ;;  %16332 = vmatmul.mubr.msk.f32.gmra.mxu1 %vm3173_vm2, %v20174_v32  ;;  %22142 = vst [vmem:[#allocation50_spill] sm:$0xff] %v20448_v46 }
 0x41c   :  { %v20428_v23 = vadd.f32 %v16041_v47, %v20179_v42  ;;  %16334 = vmatprep.mubr.msk.f32.mxu1 %vm3173_vm2, %v22138_v16  ;;  %v22143_v16 = vld [vmem:[#allocation18_spill] sm:$0xff] }
 0x41d   :  { %v6318_v22 = vpop.f32.mrf.mxu1 }
 0x41e   :  { %v20433_v24 = vadd.f32 %v6318_v22, %v22139_v59  ;;  %v22144_v22 = vld [vmem:[#allocation61_spill] sm:$0xff] }
 0x41f   :  { %v16044_v33 = vpop.f32.mrf.mxu1  ;;  %16335 = vmatmul.mubr.msk.f32.gmra.mxu1 %vm3173_vm2, %v8121_v53  ;;  %v20460_v53 = vpop.f32.mrf.mxu0 }
 0x420   :  { %v20439_v32 = vadd.f32 %v16044_v33, %v20193_v43  ;;  %16337 = vmatprep.mubr.msk.f32.mxu1 %vm3173_vm2, %v20199_v28  ;;  %22145 = vst [vmem:[#allocation57_spill] sm:$0xff] %v20460_v53  ;;  %v22146_v33 = vld [vmem:[#allocation22_spill] sm:$0xff]  ;;  %v20619_v53 = vld [vmem:[#allocation2 + $0x6d0] sm:$0xff] }
 0x421   :  { %v6328_v42 = vpop.f32.mrf.mxu1 }
 0x422   :  { %v20444_v13 = vadd.f32 %v6328_v42, %v22141_v55  ;;  %v22147_v42 = vld [vmem:[#allocation19_spill] sm:$0xff] }
 0x423   :  { %v16055_v62 = vpop.f32.mrf.mxu1  ;;  %16338 = vmatmul.mubr.msk.f32.gmra.mxu1 %vm3173_vm2, %v20203_v5 }
 0x424   :  { %v20451_v47 = vadd.f32 %v16055_v62, %v20208_v29  ;;  %16340 = vmatprep.mubr.msk.f32.mxu1 %vm3173_vm2, %v22143_v16  ;;  %v8127_v62 = vld [vmem:[#allocation2 + $0x370] sm:$0xff] }
 0x425   :  { %v6589_v43 = vpop.f32.mrf.mxu1 }
 0x426   :  { %v20456_v59 = vadd.f32 %v6589_v43, %v22144_v22  ;;  %v20471_v43 = vpop.f32.mrf.mxu0  ;;  %v22149_v22 = vld [vmem:[#allocation23_spill] sm:$0xff] }
 0x427   :  { %v16058_v28 = vpop.f32.mrf.mxu1  ;;  %16341 = vmatmul.mubr.msk.f32.gmra.mxu1 %vm3173_vm2, %v20219_v52  ;;  %22148 = vst [vmem:[#allocation18_spill] sm:$0xff] %v20471_v43 }
 0x428   :  { %v20463_v5 = vadd.f32 %v16058_v28, %v20224_v38  ;;  %16343 = vmatprep.mubr.msk.f32.mxu1 %vm3173_vm2, %v22146_v33 }
 0x429   :  { %v6599_v29 = vpop.f32.mrf.mxu1 }
 0x42a   :  { %v20468_v55 = vadd.f32 %v6599_v29, %v22147_v42  ;;  %v20483_v29 = vpop.f32.mrf.mxu0 }
 0x42b   :  { %v16061_v16 = vpop.f32.mrf.mxu1  ;;  %16344 = vmatmul.mubr.msk.f32.gmra.mxu1 %vm3173_vm2, %v8127_v62  ;;  %22150 = vst [vmem:[#allocation61_spill] sm:$0xff] %v20483_v29  ;;  %v22151_v62 = vld [vmem:[#allocation27_spill] sm:$0xff] }
 0x42c   :  { %v20474_v52 = vadd.f32 %v16061_v16, %v20238_v37  ;;  %16346 = vmatprep.mubr.msk.f32.mxu1 %vm3173_vm2, %v20244_v2  ;;  %v8972_v29 = vld [vmem:[#allocation2 + $0x6c0] sm:$0xff] }
 0x42d   :  { %v6609_v38 = vpop.f32.mrf.mxu1 }
 0x42e   :  { %v20479_v28 = vadd.f32 %v6609_v38, %v22149_v22  ;;  %v20495_v38 = vpop.f32.mrf.mxu0  ;;  %v22153_v22 = vld [vmem:[#allocation9_spill] sm:$0xff] }
 0x42f   :  { %v16064_v33 = vpop.f32.mrf.mxu1  ;;  %16347 = vmatmul.mubr.msk.f32.gmra.mxu1 %vm3173_vm2, %v20248_v51  ;;  %22152 = vst [vmem:[#allocation22_spill] sm:$0xff] %v20495_v38 }
 0x430   :  { %v20486_v42 = vadd.f32 %v16064_v33, %v20253_v3  ;;  %16349 = vmatprep.mubr.msk.f32.mxu1 %vm3173_vm2, %v20260_v4  ;;  %v8133_v4 = vld [vmem:[#allocation2 + $0x3b0] sm:$0xff] }
 0x431   :  { %v6619_v37 = vpop.f32.mrf.mxu1 }
 0x432   :  { %v20491_v16 = vadd.f32 %v6619_v37, %v22151_v62  ;;  %v8960_v37 = vld [vmem:[#allocation2 + $0x640] sm:$0xff]  ;;  %v20506_v62 = vpop.f32.mrf.mxu0 }
 0x433   :  { %v16067_v2 = vpop.f32.mrf.mxu1  ;;  %16350 = vmatmul.mubr.msk.f32.gmra.mxu1 %vm3173_vm2, %v20264_v49  ;;  %22154 = vst [vmem:[#allocation19_spill] sm:$0xff] %v20506_v62 }
 0x434   :  { %v20498_v51 = vadd.f32 %v16067_v2, %v20269_v0  ;;  %16352 = vmatprep.mubr.msk.f32.mxu1 %vm3173_vm2, %v20276_v58  ;;  %v20515_v58 = vld [vmem:[#allocation2 + $0x648] sm:$0xff] }
 0x435   :  { %v6629_v3 = vpop.f32.mrf.mxu1 }
 0x436   :  { %v20503_v33 = vadd.f32 %v6629_v3, %v22153_v22  ;;  %v14141_v3 = vld [vmem:[%s21893_s3 + $0x1f0] sm:$0xff] }
 0x437   :  { %v16070_v35 = vpop.f32.mrf.mxu1  ;;  %16353 = vmatmul.mubr.msk.f32.gmra.mxu1 %vm3173_vm2, %v8133_v4  ;;  %v20522_v4 = vld [vmem:[#allocation2 + $0x650] sm:$0xff] }
 0x438   :  { %v20509_v49 = vadd.f32 %v16070_v35, %v20283_v60  ;;  %16425 = vmatprep.mubr.msk.f32.mxu1 %vm3173_vm2, %v8960_v37  ;;  %v20524_v60 = vpop.f32.mrf.mxu0 }
 0x439   :  { %v6639_v0 = vpop.f32.mrf.mxu1  ;;  %22155 = vst [vmem:[#allocation23_spill] sm:$0xff] %v20524_v60 }
 0x43a   :  { %v20513_v2 = vadd.f32 %v6639_v0, %v20288_v15  ;;  %v14140_v15 = vld [vmem:[%s21893_s3 + $0x1e8] sm:$0xff]  ;;  %v20547_v54 = vpop.f32.mrf.mxu0 }
 0x43b   :  { %v16073_v22 = vpop.f32.mrf.mxu1  ;;  %16426 = vmatmul.mubr.msk.f32.vlgmr.msra.gmra.mxu1 %vm3173_vm2, %v20515_v58  ;;  %22156 = vst [vmem:[#allocation27_spill] sm:$0xff] %v20547_v54  ;;  %v8966_v54 = vld [vmem:[#allocation2 + $0x680] sm:$0xff] }
 0x43c   :  { %v20527_v35 = vadd.f32 %v16073_v22, %v20298_v14  ;;  %16542 = vmatpush3.msra.mxu1 %v20324_v12  ;;  %16428 = vmatprep.mubr.msk.f32.mxu1 %vm3173_vm2, %v20522_v4  ;;  %v14139_v14 = vld [vmem:[%s21893_s3 + $0x1e0] sm:$0xff]  ;;  %v20561_v60 = vpop.f32.mrf.mxu0 }
 0x43d   :  { %v6649_v37 = vpop.f32.mrf.mxu1  ;;  %16543 = vmatprep.subr.mxu1 %v14141_v3  ;;  %v20545_v22 = vld [vmem:[#allocation2 + $0x660] sm:$0xff]  ;;  %22157 = vst [vmem:[#allocation9_spill] sm:$0xff] %v20561_v60 }
 0x43e   :  { %v20536_v0 = vadd.f32 %v6649_v37, %v20307_v1  ;;  %16544 = vmatpush3.msra.mxu1 %v14141_v3  ;;  %v20557_v37 = vld [vmem:[#allocation2 + $0x668] sm:$0xff]  ;;  %v20576_v62 = vpop.f32.mrf.mxu0 }
 0x43f   :  { %v16076_v12 = vpop.f32.mrf.mxu1  ;;  %16429 = vmatmul.mubr.msk.f32.gmra.mxu1 %vm3173_vm2, %v20538_v61  ;;  %16545 = vmatprep.subr.mxu1 %v14140_v15  ;;  %22158 = vst [vmem:[#allocation66_spill] sm:$0xff] %v20576_v62 }
 0x440   :  { %v20550_v50 = vadd.f32 %v16076_v12, %v20317_v39  ;;  %16431 = vmatprep.mubr.msk.f32.mxu1 %vm3173_vm2, %v20545_v22  ;;  %16546 = vmatpush3.msra.mxu1 %v14140_v15  ;;  %v20592_v38 = vpop.f32.mrf.mxu0 }
 0x441   :  { %v6659_v1 = vpop.f32.mrf.mxu1  ;;  %16547 = vmatprep.subr.mxu1 %v14139_v14  ;;  %22159 = vst [vmem:[#allocation67_spill] sm:$0xff] %v20592_v38 }
 0x442   :  { %v20555_v3 = vadd.f32 %v6659_v1, %v20327_v48  ;;  %16548 = vmatpush3.msra.mxu1 %v14139_v14  ;;  %v20570_v48 = vld [vmem:[#allocation2 + $0x688] sm:$0xff]  ;;  %v20574_v14 = vld [vmem:[#allocation2 + $0x690] sm:$0xff]  ;;  %v20606_v43 = vpop.f32.mrf.mxu0 }
 0x443   :  { %v16079_v11 = vpop.f32.mrf.mxu1  ;;  %16432 = vmatmul.mubr.msk.f32.gmra.mxu1 %vm3173_vm2, %v20557_v37  ;;  %22160 = vst [vmem:[#allocation68_spill] sm:$0xff] %v20606_v43 }
 0x444   :  { %v20564_v39 = vadd.f32 %v16079_v11, %v20334_v40  ;;  %16434 = vmatprep.mubr.msk.f32.mxu1 %vm3173_vm2, %v8966_v54  ;;  %v20621_v46 = vpop.f32.mrf.mxu0 }
 0x445   :  { %v6669_v15 = vpop.f32.mrf.mxu1  ;;  %22161 = vst [vmem:[#allocation69_spill] sm:$0xff] %v20621_v46 }
 0x446   :  { %v20568_v12 = vadd.f32 %v6669_v15, %v20339_v19  ;;  %v20586_v19 = vld [vmem:[#allocation2 + $0x698] sm:$0xff]  ;;  %v20590_v15 = vld [vmem:[#allocation2 + $0x6a0] sm:$0xff]  ;;  %v20637_v9 = vpop.f32.mrf.mxu0 }
 0x447   :  { %v16082_v1 = vpop.f32.mrf.mxu1  ;;  %16435 = vmatmul.mubr.msk.f32.gmra.mxu1 %vm3173_vm2, %v20570_v48  ;;  %22162 = vst [vmem:[#allocation70_spill] sm:$0xff] %v20637_v9 }
 0x448   :  { %v20579_v60 = vadd.f32 %v16082_v1, %v20346_v44  ;;  %16437 = vmatprep.mubr.msk.f32.mxu1 %vm3173_vm2, %v20574_v14  ;;  %v20651_v36 = vpop.f32.mrf.mxu0 }
 0x449   :  { %v6679_v11 = vpop.f32.mrf.mxu1  ;;  %22163 = vst [vmem:[#allocation71_spill] sm:$0xff] %v20651_v36 }
 0x44a   :  { %v20584_v40 = vadd.f32 %v6679_v11, %v20351_v63  ;;  %v20602_v11 = vld [vmem:[#allocation2 + $0x6a8] sm:$0xff]  ;;  %v20666_v18 = vpop.f32.mrf.mxu0 }
 0x44b   :  { %v16085_v54 = vpop.f32.mrf.mxu1  ;;  %16438 = vmatmul.mubr.msk.f32.gmra.mxu1 %vm3173_vm2, %v20586_v19  ;;  %22164 = vst [vmem:[#allocation72_spill] sm:$0xff] %v20666_v18 }
 0x44c   :  { %v20595_v44 = vadd.f32 %v16085_v54, %v20358_v6  ;;  %16440 = vmatprep.mubr.msk.f32.mxu1 %vm3173_vm2, %v20590_v15  ;;  %v20682_v10 = vpop.f32.mrf.mxu0 }
 0x44d   :  { %v6689_v1 = vpop.f32.mrf.mxu1  ;;  %22166 = vst [vmem:[#allocation74_spill] sm:$0xff] %v20682_v10 }
 0x44e   :  { %v20600_v63 = vadd.f32 %v6689_v1, %v20363_v41  ;;  %v20615_v41 = vld [vmem:[#allocation2 + $0x6c8] sm:$0xff]  ;;  %v20696_v45 = vpop.f32.mrf.mxu0 }
 0x44f   :  { %v16088_v62 = vpop.f32.mrf.mxu1  ;;  %16441 = vmatmul.mubr.msk.f32.gmra.mxu1 %vm3173_vm2, %v20602_v11  ;;  %22169 = vst [vmem:[#allocation77_spill] sm:$0xff] %v20696_v45 }
 0x450   :  { %v20609_v38 = vadd.f32 %v16088_v62, %v20369_v20  ;;  %16443 = vmatprep.mubr.msk.f32.mxu1 %vm3173_vm2, %v8972_v29  ;;  %v20631_v29 = vld [vmem:[#allocation2 + $0x6d8] sm:$0xff]  ;;  %v20713_v45 = vpop.f32.mrf.mxu0 }
 0x451   :  { %v6699_v6 = vpop.f32.mrf.mxu1  ;;  %22173 = vst [vmem:[#allocation79_spill] sm:$0xff] %v20713_v45 }
 0x452   :  { %v20613_v54 = vadd.f32 %v6699_v6, %v20374_v25  ;;  %v20635_v6 = vld [vmem:[#allocation2 + $0x6e0] sm:$0xff] }
 0x453   :  { %v16091_v1 = vpop.f32.mrf.mxu1  ;;  %16444 = vmatmul.mubr.msk.f32.gmra.mxu1 %vm3173_vm2, %v20615_v41 }
 0x454   :  { %v20624_v43 = vadd.f32 %v16091_v1, %v20381_v56  ;;  %16446 = vmatprep.mubr.msk.f32.mxu1 %vm3173_vm2, %v20619_v53 }
 0x455   :  { %v6709_v20 = vpop.f32.mrf.mxu1 }
 0x456   :  { %v20629_v25 = vadd.f32 %v6709_v20, %v20386_v21  ;;  %v20647_v20 = vld [vmem:[#allocation2 + $0x6e8] sm:$0xff] }
 0x457   :  { %v16094_v62 = vpop.f32.mrf.mxu1  ;;  %16447 = vmatmul.mubr.msk.f32.gmra.mxu1 %vm3173_vm2, %v20631_v29 }
 0x458   :  { %v20640_v56 = vadd.f32 %v16094_v62, %v20393_v34  ;;  %16449 = vmatprep.mubr.msk.f32.mxu1 %vm3173_vm2, %v20635_v6 }
 0x459   :  { %v6719_v1 = vpop.f32.mrf.mxu1 }
 0x45a   :  { %v20645_v21 = vadd.f32 %v6719_v1, %v20398_v27  ;;  %v20660_v27 = vld [vmem:[#allocation2 + $0x708] sm:$0xff] }
 0x45b   :  { %v16097_v46 = vpop.f32.mrf.mxu1  ;;  %16450 = vmatmul.mubr.msk.f32.gmra.mxu1 %vm3173_vm2, %v20647_v20 }
 0x45c   :  { %v20654_v9 = vadd.f32 %v16097_v46, %v20404_v31  ;;  %16452 = vmatprep.mubr.msk.f32.mxu1 %vm3173_vm2, %v8978_v57  ;;  %v20676_v57 = vld [vmem:[#allocation2 + $0x718] sm:$0xff] }
 0x45d   :  { %v6729_v34 = vpop.f32.mrf.mxu1 }
 0x45e   :  { %v20658_v62 = vadd.f32 %v6729_v34, %v20409_v8  ;;  %v20680_v34 = vld [vmem:[#allocation2 + $0x720] sm:$0xff] }
 0x45f   :  { %v16100_v1 = vpop.f32.mrf.mxu1  ;;  %16453 = vmatmul.mubr.msk.f32.gmra.mxu1 %vm3173_vm2, %v20660_v27  ;;  %22165 = vst [vmem:[#allocation73_spill] sm:$0xff] %v20680_v34 }
 0x460   :  { %v20669_v36 = vadd.f32 %v16100_v1, %v20416_v30  ;;  %16455 = vmatprep.mubr.msk.f32.mxu1 %vm3173_vm2, %v20664_v17 }
 0x461   :  { %v6739_v31 = vpop.f32.mrf.mxu1 }
 0x462   :  { %v20674_v8 = vadd.f32 %v6739_v31, %v20421_v7  ;;  %v20692_v31 = vld [vmem:[#allocation2 + $0x728] sm:$0xff] }
 0x463   :  { %v16103_v46 = vpop.f32.mrf.mxu1  ;;  %16456 = vmatmul.mubr.msk.f32.gmra.mxu1 %vm3173_vm2, %v20676_v57  ;;  %22168 = vst [vmem:[#allocation76_spill] sm:$0xff] %v20692_v31 }
 0x464   :  { %v20685_v30 = vadd.f32 %v16103_v46, %v20428_v23  ;;  %16458 = vmatprep.mubr.msk.f32.mxu1 %vm3173_vm2, %v20680_v34 }
 0x465   :  { %v6749_v1 = vpop.f32.mrf.mxu1 }
 0x466   :  { %v20690_v7 = vadd.f32 %v6749_v1, %v20433_v24  ;;  %v22171_v24 = vld [vmem:[#allocation38_spill] sm:$0xff] }
 0x467   :  { %v16106_v18 = vpop.f32.mrf.mxu1  ;;  %16459 = vmatmul.mubr.msk.f32.gmra.mxu1 %vm3173_vm2, %v20692_v31  ;;  %v7200_v1 = vadd.f32 %v22171_v24, %v20451_v47  ;;  %v20711_v31 = vld [vmem:[#allocation2 + $0x750] sm:$0xff] }
 0x468   :  { %22167 = vst [vmem:[#allocation75_spill] sm:$0xff] %v20690_v7  ;;  %v20699_v10 = vadd.f32 %v16106_v18, %v20439_v32  ;;  %16461 = vmatprep.mubr.msk.f32.mxu1 %vm3173_vm2, %v8984_v26  ;;  %v20707_v7 = vld [vmem:[#allocation2 + $0x748] sm:$0xff]  ;;  %v22174_v26 = vld [vmem:[#allocation39_spill] sm:$0xff] }
 0x469   :  { %v6759_v23 = vpop.f32.mrf.mxu1  ;;  %22172 = vst [vmem:[#allocation38_spill] sm:$0xff] %v20707_v7  ;;  %v7199_v32 = vadd.f32 %v22174_v26, %v20456_v59  ;;  %v22180_v59 = vld [vmem:[#allocation41_spill] sm:$0xff] }
 0x46a   :  { %v20703_v46 = vadd.f32 %v6759_v23, %v20444_v13  ;;  %v22176_v23 = vld [vmem:[#allocation40_spill] sm:$0xff]  ;;  %v7201_v26 = vadd.f32 %v22180_v59, %v20468_v55  ;;  %v22184_v55 = vld [vmem:[#allocation43_spill] sm:$0xff] }
 0x46b   :  { %v16179_v34 = vpop.f32.mrf.mxu1  ;;  %16462 = vmatmul.mubr.msk.f32.gmra.mxu1 %vm3173_vm2, %v20707_v7  ;;  %v7202_v24 = vadd.f32 %v22176_v23, %v20463_v5  ;;  %v7203_v59 = vadd.f32 %v22184_v55, %v20479_v28  ;;  %v22188_v28 = vld [vmem:[#allocation47_spill] sm:$0xff] }
 0x46c   :  { %22170 = vst [vmem:[#allocation78_spill] sm:$0xff] %v20703_v46  ;;  %v20715_v18 = vadd.f32 %v16179_v34, %v7200_v1  ;;  %16464 = vmatprep.mubr.msk.f32.mxu1 %vm3173_vm2, %v20711_v31  ;;  %v20725_v46 = vld [vmem:[#allocation2 + $0x758] sm:$0xff]  ;;  %v20729_v34 = vld [vmem:[#allocation2 + $0x760] sm:$0xff]  ;;  %v20731_v1 = vpop.f32.mrf.mxu0 }
 0x46d   :  { %v7451_v13 = vpop.f32.mrf.mxu1  ;;  %22177 = vst [vmem:[#allocation40_spill] sm:$0xff] %v20725_v46  ;;  %22178 = vst [vmem:[#allocation80_spill] sm:$0xff] %v20729_v34 }
 0x46e   :  { %v20721_v47 = vadd.f32 %v7451_v13, %v7199_v32  ;;  %22179 = vst [vmem:[#allocation81_spill] sm:$0xff] %v20731_v1  ;;  %v22182_v13 = vld [vmem:[#allocation42_spill] sm:$0xff] }
 0x46f   :  { %v16182_v7 = vpop.f32.mrf.mxu1  ;;  %16465 = vmatmul.mubr.msk.f32.gmra.mxu1 %vm3173_vm2, %v20725_v46  ;;  %v7204_v23 = vadd.f32 %v22182_v13, %v20474_v52  ;;  %v22186_v52 = vld [vmem:[#allocation44_spill] sm:$0xff] }
 0x470   :  { %22175 = vst [vmem:[#allocation39_spill] sm:$0xff] %v20721_v47  ;;  %v20733_v45 = vadd.f32 %v16182_v7, %v7202_v24  ;;  %16467 = vmatprep.mubr.msk.f32.mxu1 %vm3173_vm2, %v20729_v34  ;;  %v20743_v47 = vld [vmem:[#allocation2 + $0x768] sm:$0xff]  ;;  %v8990_v7 = vld [vmem:[#allocation2 + $0x780] sm:$0xff]  ;;  %v20747_v24 = vpop.f32.mrf.mxu0  ;;  %v7206_v13 = vadd.f32 %v22186_v52, %v20486_v42  ;;  %v20776_v52 = vld [vmem:[#allocation2 + $0x798] sm:$0xff] }
 0x471   :  { %v7461_v32 = vpop.f32.mrf.mxu1  ;;  %22183 = vst [vmem:[#allocation42_spill] sm:$0xff] %v20747_v24  ;;  %v20762_v24 = vld [vmem:[#allocation2 + $0x790] sm:$0xff] }
 0x472   :  { %v20739_v5 = vadd.f32 %v7461_v32, %v7201_v26 }
 0x473   :  { %v16185_v46 = vpop.f32.mrf.mxu1  ;;  %16468 = vmatmul.mubr.msk.f32.gmra.mxu1 %vm3173_vm2, %v20743_v47 }
 0x474   :  { %22181 = vst [vmem:[#allocation41_spill] sm:$0xff] %v20739_v5  ;;  %v20749_v1 = vadd.f32 %v16185_v46, %v7204_v23  ;;  %16470 = vmatprep.mubr.msk.f32.mxu1 %vm3173_vm2, %v8990_v7  ;;  %v20758_v5 = vld [vmem:[#allocation2 + $0x788] sm:$0xff]  ;;  %v20764_v46 = vpop.f32.mrf.mxu0  ;;  %v7205_v7 = vadd.f32 %v22188_v28, %v20491_v16  ;;  %v22193_v16 = vld [vmem:[#allocation51_spill] sm:$0xff] }
 0x475   :  { %v7471_v26 = vpop.f32.mrf.mxu1  ;;  %22187 = vst [vmem:[#allocation44_spill] sm:$0xff] %v20764_v46  ;;  %v7207_v28 = vadd.f32 %v22193_v16, %v20503_v33  ;;  %v22196_v33 = vld [vmem:[#allocation54_spill] sm:$0xff] }
 0x476   :  { %v20754_v32 = vadd.f32 %v7471_v26, %v7203_v59  ;;  %v22190_v59 = vld [vmem:[#allocation48_spill] sm:$0xff]  ;;  %v7209_v16 = vadd.f32 %v22196_v33, %v20513_v2  ;;  %v21942_v33 = vmov 0.0  }
 0x477   :  { %v16188_v34 = vpop.f32.mrf.mxu1  ;;  %16471 = vmatmul.mubr.msk.f32.gmra.mxu1 %vm3173_vm2, %v20758_v5  ;;  %v7208_v26 = vadd.f32 %v22190_v59, %v20498_v51  ;;  %22191 = vst [vmem:[#allocation48_spill] sm:$0xff] %v20776_v52  ;;  %16603 = vmatprep.subr.mxu0 %v21942_v33 }
 0x478   :  { %22185 = vst [vmem:[#allocation43_spill] sm:$0xff] %v20754_v32  ;;  %v20766_v23 = vadd.f32 %v16188_v34, %v7206_v13  ;;  %16473 = vmatprep.mubr.msk.f32.mxu1 %vm3173_vm2, %v20762_v24  ;;  %v20780_v34 = vld [vmem:[#allocation2 + $0x7a0] sm:$0xff]  ;;  %v20782_v13 = vpop.f32.mrf.mxu0  ;;  %16693 = vmatprep.subr.mxu1 %v21942_v33 }
 0x479   :  { %v7481_v55 = vpop.f32.mrf.mxu1  ;;  %22192 = vst [vmem:[#allocation82_spill] sm:$0xff] %v20782_v13 }
 0x47a   :  { %v20772_v42 = vadd.f32 %v7481_v55, %v7205_v7  ;;  %v22195_v55 = vld [vmem:[#allocation52_spill] sm:$0xff] }
 0x47b   :  { %v16191_v32 = vpop.f32.mrf.mxu1  ;;  %16474 = vmatmul.mubr.msk.f32.gmra.mxu1 %vm3173_vm2, %v20776_v52  ;;  %v7210_v59 = vadd.f32 %v22195_v55, %v20509_v49  ;;  %v22197_v49 = vld [vmem:[#allocation55_spill] sm:$0xff] }
 0x47c   :  { %22189 = vst [vmem:[#allocation47_spill] sm:$0xff] %v20772_v42  ;;  %v20784_v46 = vadd.f32 %v16191_v32, %v7208_v26  ;;  %16476 = vmatprep.mubr.msk.f32.mxu1 %vm3173_vm2, %v20780_v34  ;;  %v20794_v42 = vld [vmem:[#allocation2 + $0x7a8] sm:$0xff]  ;;  %v20798_v32 = vpop.f32.mrf.mxu0  ;;  %v7212_v55 = vadd.f32 %v22197_v49, %v20527_v35  ;;  %v22200_v49 = vld [vmem:[#allocation17_spill] sm:$0xff] }
 0x47d   :  { %v7491_v7 = vpop.f32.mrf.mxu1 }
 0x47e   :  { %v20790_v51 = vadd.f32 %v7491_v7, %v7207_v28  ;;  %v20812_v13 = vpop.f32.mrf.mxu0 }
 0x47f   :  { %v16194_v52 = vpop.f32.mrf.mxu1  ;;  %16477 = vmatmul.mubr.msk.f32.gmra.mxu1 %vm3173_vm2, %v20794_v42 }
 0x480   :  { %22194 = vst [vmem:[#allocation51_spill] sm:$0xff] %v20790_v51  ;;  %v20800_v26 = vadd.f32 %v16194_v52, %v7210_v59  ;;  %16549 = vmatprep.mubr.msk.f32.mxu1 %vm3173_vm2, %v20515_v58  ;;  %v22198_v58 = vld [vmem:[#allocation58_spill] sm:$0xff] }
 0x481   :  { %v7501_v28 = vpop.f32.mrf.mxu1  ;;  %v7211_v2 = vadd.f32 %v22198_v58, %v20536_v0  ;;  %v20831_v0 = vpop.f32.mrf.mxu0  ;;  %v22201_v58 = vld [vmem:[#allocation3_spill] sm:$0xff] }
 0x482   :  { %v20806_v7 = vadd.f32 %v7501_v28, %v7209_v16 }
 0x483   :  { %v16197_v51 = vpop.f32.mrf.mxu1  ;;  %16550 = vmatmul.mubr.msk.f32.vlgmr.msra.gmra.mxu1 %vm3173_vm2, %v20522_v4  ;;  %v22199_v4 = vld [vmem:[#allocation59_spill] sm:$0xff] }
 0x484   :  { %v20814_v52 = vadd.f32 %v16197_v51, %v7212_v55  ;;  %16552 = vmatprep.mubr.msk.f32.mxu1 %vm3173_vm2, %v20538_v61  ;;  %v7214_v16 = vadd.f32 %v22199_v4, %v20550_v50  ;;  %v10403_v61 = vld [vmem:[%s21894_s5] sm:$0xf]  ;;  %v7213_v55 = vadd.f32 %v22200_v49, %v20555_v3  ;;  %v22202_v3 = vld [vmem:[#allocation20_spill] sm:$0xff] }
 0x485   :  { %v7511_v59 = vpop.f32.mrf.mxu1  ;;  %16604 = vmatpush3.xpose.msk.msra.mxu0 %vm3173_vm2, %v10403_v61 }
 0x486   :  { %v20822_v35 = vadd.f32 %v7511_v59, %v7211_v2  ;;  %16608 = vmatprep.subr.mxu0 %v21942_v33  ;;  %v7216_v2 = vadd.f32 %v22201_v58, %v20564_v39  ;;  %v9827_v59 = vld [vmem:[#allocation2 + $0x670] sm:$0xff] }
 0x487   :  { %v16200_v28 = vpop.f32.mrf.mxu1  ;;  %16553 = vmatmul.mubr.msk.f32.gmra.mxu1 %vm3173_vm2, %v20545_v22 }
 0x488   :  { %v20833_v51 = vadd.f32 %v16200_v28, %v7214_v16  ;;  %16555 = vmatprep.mubr.msk.f32.mxu1 %vm3173_vm2, %v20557_v37  ;;  %v20846_v16 = vpop.f32.mrf.mxu0  ;;  %v7215_v28 = vadd.f32 %v22202_v3, %v20568_v12  ;;  %v22205_v3 = vld [vmem:[#allocation7_spill] sm:$0xff] }
 0x489   :  { %v7521_v50 = vpop.f32.mrf.mxu1 }
 0x48a   :  { %v20841_v22 = vadd.f32 %v7521_v50, %v7213_v55  ;;  %v22203_v55 = vld [vmem:[#allocation5_spill] sm:$0xff]  ;;  %v20860_v58 = vpop.f32.mrf.mxu0 }
 0x48b   :  { %v16203_v4 = vpop.f32.mrf.mxu1  ;;  %16556 = vmatmul.mubr.msk.f32.gmra.mxu1 %vm3173_vm2, %v9827_v59  ;;  %v7218_v39 = vadd.f32 %v22203_v55, %v20579_v60  ;;  %v7220_v60 = vadd.f32 %v22205_v3, %v20595_v44 }
 0x48c   :  { %v20848_v37 = vadd.f32 %v16203_v4, %v7216_v2  ;;  %16558 = vmatprep.mubr.msk.f32.mxu1 %vm3173_vm2, %v20570_v48  ;;  %v22204_v48 = vld [vmem:[#allocation6_spill] sm:$0xff] }
 0x48d   :  { %v7531_v61 = vpop.f32.mrf.mxu1  ;;  %v7217_v12 = vadd.f32 %v22204_v48, %v20584_v40  ;;  %v9833_v48 = vld [vmem:[#allocation2 + $0x6b0] sm:$0xff] }
 0x48e   :  { %v20854_v49 = vadd.f32 %v7531_v61, %v7215_v28 }
 0x48f   :  { %v16206_v50 = vpop.f32.mrf.mxu1  ;;  %16559 = vmatmul.mubr.msk.f32.gmra.mxu1 %vm3173_vm2, %v20574_v14  ;;  %v20874_v14 = vpop.f32.mrf.mxu0 }
 0x490   :  { %v20862_v2 = vadd.f32 %v16206_v50, %v7218_v39  ;;  %16561 = vmatprep.mubr.msk.f32.mxu1 %vm3173_vm2, %v20586_v19  ;;  %v22206_v19 = vld [vmem:[#allocation8_spill] sm:$0xff] }
 0x491   :  { %v7541_v59 = vpop.f32.mrf.mxu1  ;;  %v7219_v40 = vadd.f32 %v22206_v19, %v20600_v63  ;;  %v22207_v50 = vld [vmem:[#allocation28_spill] sm:$0xff] }
 0x492   :  { %v20868_v4 = vadd.f32 %v7541_v59, %v7217_v12  ;;  %v7222_v44 = vadd.f32 %v22207_v50, %v20609_v38 }
 0x493   :  { %v16209_v28 = vpop.f32.mrf.mxu1  ;;  %16562 = vmatmul.mubr.msk.f32.gmra.mxu1 %vm3173_vm2, %v20590_v15  ;;  %v20887_v15 = vpop.f32.mrf.mxu0 }
 0x494   :  { %v20876_v61 = vadd.f32 %v16209_v28, %v7220_v60  ;;  %16564 = vmatprep.mubr.msk.f32.mxu1 %vm3173_vm2, %v20602_v11  ;;  %v22208_v11 = vld [vmem:[#allocation10_spill] sm:$0xff]  ;;  %v22209_v28 = vld [vmem:[#allocation29_spill] sm:$0xff] }
 0x495   :  { %v7551_v55 = vpop.f32.mrf.mxu1  ;;  %v7221_v63 = vadd.f32 %v22208_v11, %v20613_v54  ;;  %v7224_v38 = vadd.f32 %v22209_v28, %v20624_v43  ;;  %v22213_v28 = vld [vmem:[#allocation36_spill] sm:$0xff] }
 0x496   :  { %v20882_v39 = vadd.f32 %v7551_v55, %v7219_v40  ;;  %v20901_v40 = vpop.f32.mrf.mxu0 }
 0x497   :  { %v16212_v12 = vpop.f32.mrf.mxu1  ;;  %16565 = vmatmul.mubr.msk.f32.gmra.mxu1 %vm3173_vm2, %v9833_v48  ;;  %v22211_v48 = vld [vmem:[#allocation33_spill] sm:$0xff] }
 0x498   :  { %v20889_v59 = vadd.f32 %v16212_v12, %v7222_v44  ;;  %16567 = vmatprep.mubr.msk.f32.mxu1 %vm3173_vm2, %v20615_v41  ;;  %v22210_v41 = vld [vmem:[#allocation31_spill] sm:$0xff]  ;;  %v7226_v43 = vadd.f32 %v22211_v48, %v20640_v56  ;;  %v7228_v56 = vadd.f32 %v22213_v28, %v20654_v9  ;;  %v22215_v48 = vld [vmem:[#allocation62_spill] sm:$0xff]  ;;  %v22217_v28 = vld [vmem:[#allocation24_spill] sm:$0xff] }
 0x499   :  { %v7561_v3 = vpop.f32.mrf.mxu1  ;;  %v7223_v54 = vadd.f32 %v22210_v41, %v20629_v25  ;;  %v7230_v9 = vadd.f32 %v22215_v48, %v20669_v36  ;;  %v7232_v36 = vadd.f32 %v22217_v28, %v20685_v30 }
 0x49a   :  { %v20895_v60 = vadd.f32 %v7561_v3, %v7221_v63 }
 0x49b   :  { %v16215_v19 = vpop.f32.mrf.mxu1  ;;  %16568 = vmatmul.mubr.msk.f32.gmra.mxu1 %vm3173_vm2, %v20619_v53  ;;  %v20915_v53 = vpop.f32.mrf.mxu0 }
 0x49c   :  { %v20903_v55 = vadd.f32 %v16215_v19, %v7224_v38  ;;  %16570 = vmatprep.mubr.msk.f32.mxu1 %vm3173_vm2, %v20631_v29  ;;  %v22212_v29 = vld [vmem:[#allocation14_spill] sm:$0xff]  ;;  %v9839_v38 = vld [vmem:[#allocation2 + $0x6f0] sm:$0xff] }
 0x49d   :  { %v7571_v50 = vpop.f32.mrf.mxu1  ;;  %v7225_v25 = vadd.f32 %v22212_v29, %v20645_v21 }
 0x49e   :  { %v20909_v44 = vadd.f32 %v7571_v50, %v7223_v54 }
 0x49f   :  { %v16218_v12 = vpop.f32.mrf.mxu1  ;;  %16571 = vmatmul.mubr.msk.f32.gmra.mxu1 %vm3173_vm2, %v20635_v6  ;;  %v20928_v6 = vpop.f32.mrf.mxu0 }
 0x4a0   :  { %v20917_v11 = vadd.f32 %v16218_v12, %v7226_v43  ;;  %16573 = vmatprep.mubr.msk.f32.mxu1 %vm3173_vm2, %v20647_v20  ;;  %v22214_v20 = vld [vmem:[#allocation37_spill] sm:$0xff] }
 0x4a1   :  { %v7581_v63 = vpop.f32.mrf.mxu1  ;;  %v7227_v21 = vadd.f32 %v22214_v20, %v20658_v62  ;;  %v20942_v12 = vpop.f32.mrf.mxu0  ;;  %v22219_v20 = vld [vmem:[#allocation76_spill] sm:$0xff] }
 0x4a2   :  { %v20923_v3 = vadd.f32 %v7581_v63, %v7225_v25 }
 0x4a3   :  { %v16221_v19 = vpop.f32.mrf.mxu1  ;;  %16574 = vmatmul.mubr.msk.f32.gmra.mxu1 %vm3173_vm2, %v9839_v38  ;;  %v22218_v38 = vld [vmem:[#allocation73_spill] sm:$0xff] }
 0x4a4   :  { %v20930_v41 = vadd.f32 %v16221_v19, %v7228_v56  ;;  %16576 = vmatprep.mubr.msk.f32.mxu1 %vm3173_vm2, %v20660_v27  ;;  %v22216_v27 = vld [vmem:[#allocation63_spill] sm:$0xff] }
 0x4a5   :  { %v7591_v54 = vpop.f32.mrf.mxu1  ;;  %v7229_v62 = vadd.f32 %v22216_v27, %v20674_v8  ;;  %v22220_v8 = vld [vmem:[#allocation49_spill] sm:$0xff] }
 0x4a6   :  { %v20936_v50 = vadd.f32 %v7591_v54, %v7227_v21  ;;  %v7234_v21 = vadd.f32 %v22220_v8, %v20699_v10  ;;  %v9845_v54 = vld [vmem:[#allocation2 + $0x730] sm:$0xff] }
 0x4a7   :  { %v16224_v43 = vpop.f32.mrf.mxu1  ;;  %16577 = vmatmul.mubr.msk.f32.gmra.mxu1 %vm3173_vm2, %v20664_v17  ;;  %v20956_v17 = vpop.f32.mrf.mxu0 }
 0x4a8   :  { %v20944_v29 = vadd.f32 %v16224_v43, %v7230_v9  ;;  %16579 = vmatprep.mubr.msk.f32.mxu1 %vm3173_vm2, %v20676_v57  ;;  %v22222_v43 = vld [vmem:[#allocation38_spill] sm:$0xff] }
 0x4a9   :  { %v7601_v25 = vpop.f32.mrf.mxu1  ;;  %v20967_v30 = vpop.f32.mrf.mxu0 }
 0x4aa   :  { %v20950_v63 = vadd.f32 %v7601_v25, %v7229_v62  ;;  %22221 = vst [vmem:[#allocation52_spill] sm:$0xff] %v20967_v30  ;;  %v22223_v62 = vld [vmem:[#allocation60_spill] sm:$0xff] }
 0x4ab   :  { %v16227_v56 = vpop.f32.mrf.mxu1  ;;  %16580 = vmatmul.mubr.msk.f32.gmra.mxu1 %vm3173_vm2, %v22218_v38  ;;  %v8062_v25 = vadd.f32 %v22223_v62, %v20715_v18  ;;  %v20979_v10 = vpop.f32.mrf.mxu0 }
 0x4ac   :  { %v20958_v19 = vadd.f32 %v16227_v56, %v7232_v36  ;;  %16582 = vmatprep.mubr.msk.f32.mxu1 %vm3173_vm2, %v22219_v20  ;;  %22224 = vst [vmem:[#allocation54_spill] sm:$0xff] %v20979_v10  ;;  %v22225_v56 = vld [vmem:[#allocation40_spill] sm:$0xff]  ;;  %v22226_v20 = vld [vmem:[#allocation21_spill] sm:$0xff] }
 0x4ad   :  { %v20962_v57 = vpop.f32.mrf.mxu1  ;;  %v8064_v8 = vadd.f32 %v22226_v20, %v20733_v45  ;;  %v20991_v18 = vpop.f32.mrf.mxu0  ;;  %v10421_v10 = vld [vmem:[%s21894_s5 + $0x48] sm:$0xf] }
 0x4ae   :  { %22228 = vst [vmem:[#allocation55_spill] sm:$0xff] %v20991_v18  ;;  %16694 = vmatpush3.xpose.msk.msra.mxu1 %vm3173_vm2, %v10421_v10  ;;  %v22249_v10 = vld [vmem:[#allocation57_spill] sm:$0xff] }
 0x4af   :  { %v16230_v48 = vpop.f32.mrf.mxu1  ;;  %16583 = vmatmul.mubr.msk.f32.gmra.mxu1 %vm3173_vm2, %v9845_v54  ;;  %v22227_v54 = vld [vmem:[#allocation80_spill] sm:$0xff]  ;;  %v21002_v45 = vpop.f32.mrf.mxu0 }
 0x4b0   :  { %v20969_v9 = vadd.f32 %v16230_v48, %v7234_v21  ;;  %16585 = vmatprep.mubr.msk.f32.mxu1 %vm3173_vm2, %v22222_v43  ;;  %v22229_v43 = vld [vmem:[#allocation26_spill] sm:$0xff]  ;;  %22230 = vst [vmem:[#allocation58_spill] sm:$0xff] %v21002_v45 }
 0x4b1   :  { %v20973_v27 = vpop.f32.mrf.mxu1  ;;  %v8066_v62 = vadd.f32 %v22229_v43, %v20749_v1  ;;  %v21014_v1 = vpop.f32.mrf.mxu0  ;;  %v22233_v43 = vld [vmem:[#allocation48_spill] sm:$0xff] }
 0x4b2   :  { %22232 = vst [vmem:[#allocation59_spill] sm:$0xff] %v21014_v1 }
 0x4b3   :  { %v16303_v28 = vpop.f32.mrf.mxu1  ;;  %16586 = vmatmul.mubr.msk.f32.gmra.mxu1 %vm3173_vm2, %v20711_v31 }
 0x4b4   :  { %v20981_v36 = vadd.f32 %v16303_v28, %v8062_v25  ;;  %16588 = vmatprep.mubr.msk.f32.mxu1 %vm3173_vm2, %v22225_v56  ;;  %v9851_v25 = vld [vmem:[#allocation2 + $0x770] sm:$0xff] }
 0x4b5   :  { %v20985_v38 = vpop.f32.mrf.mxu1 }
 0x4b7   :  { %v16306_v21 = vpop.f32.mrf.mxu1  ;;  %16589 = vmatmul.mubr.msk.f32.gmra.mxu1 %vm3173_vm2, %v22227_v54 }
 0x4b8   :  { %v20993_v48 = vadd.f32 %v16306_v21, %v8064_v8  ;;  %16591 = vmatprep.mubr.msk.f32.mxu1 %vm3173_vm2, %v20743_v47  ;;  %v22231_v47 = vld [vmem:[#allocation11_spill] sm:$0xff] }
 0x4b9   :  { %v20997_v31 = vpop.f32.mrf.mxu1  ;;  %v8068_v8 = vadd.f32 %v22231_v47, %v20766_v23  ;;  %v21026_v23 = vpop.f32.mrf.mxu0 }
 0x4ba   :  { %22235 = vst [vmem:[#allocation17_spill] sm:$0xff] %v21026_v23 }
 0x4bb   :  { %v16309_v28 = vpop.f32.mrf.mxu1  ;;  %16592 = vmatmul.mubr.msk.f32.gmra.mxu1 %vm3173_vm2, %v9851_v25 }
 0x4bc   :  { %v21004_v56 = vadd.f32 %v16309_v28, %v8066_v62  ;;  %16594 = vmatprep.mubr.msk.f32.mxu1 %vm3173_vm2, %v20758_v5  ;;  %v22234_v5 = vld [vmem:[#allocation12_spill] sm:$0xff] }
 0x4bd   :  { %v21008_v20 = vpop.f32.mrf.mxu1  ;;  %v8070_v25 = vadd.f32 %v22234_v5, %v20784_v46  ;;  %v21037_v46 = vpop.f32.mrf.mxu0 }
 0x4be   :  { %22237 = vst [vmem:[#allocation3_spill] sm:$0xff] %v21037_v46  ;;  %v22244_v46 = vld [vmem:[#allocation46_spill] sm:$0xff] }
 0x4bf   :  { %v16312_v21 = vpop.f32.mrf.mxu1  ;;  %16595 = vmatmul.mubr.msk.f32.gmra.mxu1 %vm3173_vm2, %v20762_v24  ;;  %v8078_v18 = vadd.f32 %v22244_v46, %v20848_v37  ;;  %v22247_v37 = vld [vmem:[#allocation50_spill] sm:$0xff] }
 0x4c0   :  { %v21016_v54 = vadd.f32 %v16312_v21, %v8068_v8  ;;  %16597 = vmatprep.mubr.msk.f32.mxu1 %vm3173_vm2, %v22233_v43  ;;  %v22236_v8 = vld [vmem:[#allocation34_spill] sm:$0xff]  ;;  %v9857_v43 = vld [vmem:[#allocation2 + $0x7b0] sm:$0xff]  ;;  %v8080_v46 = vadd.f32 %v22247_v37, %v20862_v2 }
 0x4c1   :  { %v21020_v62 = vpop.f32.mrf.mxu1  ;;  %v8072_v21 = vadd.f32 %v22236_v8, %v20800_v26  ;;  %v22240_v26 = vmov 0.0   ;;  %v22252_v2 = vld [vmem:[#allocation61_spill] sm:$0xff] }
 0x4c2   :  { %16605 = vmatprep.mubr.msk.f32.mxu0 %vm16790_vm11, %v22240_v26  ;;  %16703 = vmatprep.subr.mxu1 %v22240_v26  ;;  %v8081_v37 = vadd.f32 %v22252_v2, %v20882_v39 }
 0x4c3   :  { %v16315_v28 = vpop.f32.mrf.mxu1  ;;  %16598 = vmatmul.mubr.msk.f32.gmra.mxu1 %vm3173_vm2, %v20780_v34 }
 0x4c4   :  { %v21028_v47 = vadd.f32 %v16315_v28, %v8070_v25  ;;  %16600 = vmatprep.mubr.msk.f32.mxu1 %vm3173_vm2, %v20794_v42  ;;  %v22238_v25 = vld [vmem:[#allocation15_spill] sm:$0xff]  ;;  %v21045_v42 = vpop.f32.mrf.mxu0 }
 0x4c5   :  { %v21032_v24 = vpop.f32.mrf.mxu1  ;;  %v8074_v28 = vadd.f32 %v22238_v25, %v20814_v52  ;;  %22239 = vst [vmem:[#allocation20_spill] sm:$0xff] %v21045_v42 }
 0x4c7   :  { %v16318_v33 = vpop.f32.mrf.mxu1  ;;  %16601 = vmatmul.mubr.msk.f32.gmra.mxu1 %vm3173_vm2, %v9857_v43  ;;  %v21057_v43 = vpop.f32.mrf.mxu0 }
 0x4c8   :  { %v21039_v5 = vadd.f32 %v16318_v33, %v8072_v21  ;;  %16695 = vmatprep.mubr.msk.f32.mxu1 %vm16790_vm11, %v22240_v26  ;;  %v22241_v33 = vld [vmem:[#allocation64_spill] sm:$0xff]  ;;  %22242 = vst [vmem:[#allocation5_spill] sm:$0xff] %v21057_v43 }
 0x4c9   :  { %v21041_v34 = vpop.f32.mrf.mxu1  ;;  %v8076_v8 = vadd.f32 %v22241_v33, %v20833_v51  ;;  %v21071_v51 = vpop.f32.mrf.mxu0 }
 0x4ca   :  { %22245 = vst [vmem:[#allocation6_spill] sm:$0xff] %v21071_v51 }
 0x4cb   :  { %v16321_v23 = vpop.f32.mrf.mxu1 }
 0x4cc   :  { %v21047_v1 = vadd.f32 %v16321_v23, %v8074_v28  ;;  %v22243_v23 = vld [vmem:[#allocation65_spill] sm:$0xff] }
 0x4cd   :  { %v21049_v45 = vpop.f32.mrf.mxu1  ;;  %v8075_v25 = vadd.f32 %v22243_v23, %v20841_v22 }
 0x4cf   :  { %v16324_v21 = vpop.f32.mrf.mxu1 }
 0x4d0   :  { %v21059_v52 = vadd.f32 %v16324_v21, %v8076_v8  ;;  %v22246_v8 = vld [vmem:[#allocation53_spill] sm:$0xff] }
 0x4d1   :  { %v8383_v28 = vpop.f32.mrf.mxu1  ;;  %v8077_v22 = vadd.f32 %v22246_v8, %v20854_v49  ;;  %v22250_v49 = vld [vmem:[#allocation18_spill] sm:$0xff] }
 0x4d2   :  { %v21063_v42 = vadd.f32 %v8383_v28, %v8075_v25  ;;  %v21082_v28 = vpop.f32.mrf.mxu0  ;;  %v8082_v8 = vadd.f32 %v22250_v49, %v20876_v61  ;;  %v22255_v61 = vld [vmem:[#allocation19_spill] sm:$0xff] }
 0x4d3   :  { %v16327_v30 = vpop.f32.mrf.mxu1  ;;  %22248 = vst [vmem:[#allocation7_spill] sm:$0xff] %v21082_v28  ;;  %v8083_v49 = vadd.f32 %v22255_v61, %v20895_v60 }
 0x4d4   :  { %v21073_v33 = vadd.f32 %v16327_v30, %v8078_v18  ;;  %v8079_v30 = vadd.f32 %v22249_v10, %v20868_v4 }
 0x4d5   :  { %v8393_v21 = vpop.f32.mrf.mxu1 }
 0x4d6   :  { %v21078_v23 = vadd.f32 %v8393_v21, %v8077_v22  ;;  %v21092_v22 = vpop.f32.mrf.mxu0 }
 0x4d7   :  { %v16330_v25 = vpop.f32.mrf.mxu1  ;;  %22251 = vst [vmem:[#allocation8_spill] sm:$0xff] %v21092_v22 }
 0x4d8   :  { %v21084_v43 = vadd.f32 %v16330_v25, %v8080_v46  ;;  %v22253_v25 = vld [vmem:[#allocation22_spill] sm:$0xff] }
 0x4d9   :  { %v8403_v18 = vpop.f32.mrf.mxu1  ;;  %v8084_v4 = vadd.f32 %v22253_v25, %v20889_v59  ;;  %v22258_v59 = vld [vmem:[#allocation27_spill] sm:$0xff] }
 0x4da   :  { %v21088_v51 = vadd.f32 %v8403_v18, %v8079_v30  ;;  %v21102_v30 = vpop.f32.mrf.mxu0  ;;  %v8085_v25 = vadd.f32 %v22258_v59, %v20909_v44 }
 0x4db   :  { %v16333_v26 = vpop.f32.mrf.mxu1  ;;  %22254 = vst [vmem:[#allocation28_spill] sm:$0xff] %v21102_v30 }
 0x4dc   :  { %v21094_v21 = vadd.f32 %v16333_v26, %v8082_v8  ;;  %v22256_v8 = vld [vmem:[#allocation23_spill] sm:$0xff] }
 0x4dd   :  { %v8413_v28 = vpop.f32.mrf.mxu1  ;;  %v8086_v39 = vadd.f32 %v22256_v8, %v20903_v55  ;;  %v22263_v55 = vld [vmem:[#allocation66_spill] sm:$0xff] }
 0x4de   :  { %v21098_v46 = vadd.f32 %v8413_v28, %v8081_v37  ;;  %v21112_v28 = vpop.f32.mrf.mxu0  ;;  %v8087_v8 = vadd.f32 %v22263_v55, %v20923_v3  ;;  %v22270_v3 = vld [vmem:[#allocation69_spill] sm:$0xff] }
 0x4df   :  { %v16336_v10 = vpop.f32.mrf.mxu1  ;;  %22257 = vst [vmem:[#allocation10_spill] sm:$0xff] %v21112_v28 }
 0x4e0   :  { %v21104_v18 = vadd.f32 %v16336_v10, %v8084_v4  ;;  %v22260_v10 = vld [vmem:[#allocation9_spill] sm:$0xff] }
 0x4e1   :  { %v8423_v22 = vpop.f32.mrf.mxu1  ;;  %v8088_v60 = vadd.f32 %v22260_v10, %v20917_v11  ;;  %v22267_v11 = vld [vmem:[#allocation68_spill] sm:$0xff] }
 0x4e2   :  { %v21108_v26 = vadd.f32 %v8423_v22, %v8083_v49  ;;  %v21122_v22 = vpop.f32.mrf.mxu0  ;;  %v8089_v10 = vadd.f32 %v22267_v11, %v20936_v50  ;;  %v22274_v11 = vld [vmem:[#allocation78_spill] sm:$0xff] }
 0x4e3   :  { %v16339_v2 = vpop.f32.mrf.mxu1  ;;  %22261 = vst [vmem:[#allocation31_spill] sm:$0xff] %v21122_v22 }
 0x4e4   :  { %v21114_v37 = vadd.f32 %v16339_v2, %v8086_v39  ;;  %v22264_v2 = vld [vmem:[#allocation67_spill] sm:$0xff] }
 0x4e5   :  { %v8433_v30 = vpop.f32.mrf.mxu1  ;;  %v8090_v44 = vadd.f32 %v22264_v2, %v20930_v41 }
 0x4e6   :  { %v21118_v4 = vadd.f32 %v8433_v30, %v8085_v25  ;;  %v21132_v30 = vpop.f32.mrf.mxu0 }
 0x4e7   :  { %v16342_v61 = vpop.f32.mrf.mxu1  ;;  %22265 = vst [vmem:[#allocation14_spill] sm:$0xff] %v21132_v30  ;;  %v22275_v30 = vld [vmem:[#allocation56_spill] sm:$0xff] }
 0x4e8   :  { %22259 = vst [vmem:[#allocation29_spill] sm:$0xff] %v21118_v4  ;;  %v21124_v49 = vadd.f32 %v16342_v61, %v8088_v60  ;;  %v22268_v60 = vld [vmem:[#allocation75_spill] sm:$0xff]  ;;  %v22269_v61 = vld [vmem:[#allocation45_spill] sm:$0xff] }
 0x4e9   :  { %v8443_v28 = vpop.f32.mrf.mxu1 }
 0x4ea   :  { %22262 = vst [vmem:[#allocation33_spill] sm:$0xff] %v21124_v49  ;;  %v21128_v39 = vadd.f32 %v8443_v28, %v8087_v8  ;;  %v7231_v49 = vadd.f32 %v22269_v61, %v22268_v60  ;;  %v8092_v28 = vadd.f32 %v22270_v3, %v20944_v29  ;;  %v21144_v8 = vpop.f32.mrf.mxu0 }
 0x4eb   :  { %v16345_v59 = vpop.f32.mrf.mxu1  ;;  %22271 = vst [vmem:[#allocation37_spill] sm:$0xff] %v21144_v8 }
 0x4ec   :  { %v21134_v25 = vadd.f32 %v16345_v59, %v8090_v44  ;;  %v7662_v41 = vadd.f32 %v20962_v57, %v7231_v49  ;;  %v22273_v44 = vld [vmem:[#allocation70_spill] sm:$0xff]  ;;  %v21157_v61 = vpop.f32.mrf.mxu0  ;;  %v22278_v49 = vld [vmem:[#allocation72_spill] sm:$0xff] }
 0x4ed   :  { %v8453_v22 = vpop.f32.mrf.mxu1  ;;  %v8091_v59 = vadd.f32 %v22273_v44, %v20950_v63  ;;  %22277 = vst [vmem:[#allocation63_spill] sm:$0xff] %v21157_v61  ;;  %v22279_v63 = vld [vmem:[#allocation39_spill] sm:$0xff]  ;;  %v22280_v44 = vld [vmem:[#allocation4_spill] sm:$0xff] }
 0x4ee   :  { %22266 = vst [vmem:[#allocation36_spill] sm:$0xff] %v21134_v25  ;;  %v21140_v4 = vadd.f32 %v8453_v22, %v8089_v10  ;;  %v7233_v25 = vadd.f32 %v22275_v30, %v22274_v11  ;;  %v22276_v22 = vld [vmem:[#allocation71_spill] sm:$0xff]  ;;  %v8061_v8 = vadd.f32 %v22280_v44, %v22279_v63  ;;  %v22281_v30 = vld [vmem:[#allocation74_spill] sm:$0xff] }
 0x4ef   :  { %v16348_v55 = vpop.f32.mrf.mxu1  ;;  %v8094_v10 = vadd.f32 %v22276_v22, %v20958_v19  ;;  %v21169_v19 = vpop.f32.mrf.mxu0 }
 0x4f0   :  { %v21147_v2 = vadd.f32 %v16348_v55, %v8092_v28  ;;  %v7664_v3 = vadd.f32 %v20973_v27, %v7233_v25  ;;  %v8093_v28 = vadd.f32 %v22278_v49, %v7662_v41  ;;  %22282 = vst [vmem:[#allocation24_spill] sm:$0xff] %v21169_v19  ;;  %v8492_v11 = vadd.f32 %v20985_v38, %v8061_v8  ;;  %v22283_v27 = vld [vmem:[#allocation77_spill] sm:$0xff] }
 0x4f1   :  { %v8463_v50 = vpop.f32.mrf.mxu1  ;;  %v22284_v41 = vld [vmem:[#allocation41_spill] sm:$0xff] }
 0x4f2   :  { %22272 = vst [vmem:[#allocation62_spill] sm:$0xff] %v21147_v2  ;;  %v21153_v60 = vadd.f32 %v8463_v50, %v8091_v59  ;;  %v8096_v59 = vadd.f32 %v22281_v30, %v20969_v9  ;;  %v8095_v25 = vadd.f32 %v22283_v27, %v7664_v3  ;;  %v21181_v9 = vpop.f32.mrf.mxu0  ;;  %v22288_v38 = vld [vmem:[#allocation81_spill] sm:$0xff]  ;;  %v22289_v3 = vld [vmem:[#allocation43_spill] sm:$0xff] }
 0x4f3   :  { %v16351_v29 = vpop.f32.mrf.mxu1  ;;  %22287 = vst [vmem:[#allocation73_spill] sm:$0xff] %v21181_v9  ;;  %v8923_v8 = vadd.f32 %v22288_v38, %v8492_v11  ;;  %v22293_v11 = vld [vmem:[#allocation47_spill] sm:$0xff] }
 0x4f4   :  { %v21160_v57 = vadd.f32 %v16351_v29, %v8094_v10  ;;  %v22285_v29 = vld [vmem:[#allocation25_spill] sm:$0xff] }
 0x4f5   :  { %v8473_v55 = vpop.f32.mrf.mxu1  ;;  %v8063_v49 = vadd.f32 %v22285_v29, %v22284_v41 }
 0x4f6   :  { %v21165_v2 = vadd.f32 %v8473_v55, %v8093_v28  ;;  %v22286_v28 = vld [vmem:[#allocation79_spill] sm:$0xff] }
 0x4f7   :  { %v16354_v50 = vpop.f32.mrf.mxu1  ;;  %v8924_v55 = vadd.f32 %v22286_v28, %v20981_v36  ;;  %v8494_v44 = vadd.f32 %v20997_v31, %v8063_v49  ;;  %v21193_v36 = vpop.f32.mrf.mxu0  ;;  %v22292_v31 = vld [vmem:[#allocation44_spill] sm:$0xff] }
 0x4f8   :  { %v21172_v22 = vadd.f32 %v16354_v50, %v8096_v59  ;;  %v22290_v50 = vld [vmem:[#allocation30_spill] sm:$0xff] }
 0x4f9   :  { %v8483_v10 = vpop.f32.mrf.mxu1  ;;  %v8065_v27 = vadd.f32 %v22290_v50, %v22289_v3  ;;  %v8925_v49 = vadd.f32 %v22292_v31, %v8494_v44  ;;  %v22296_v44 = vld [vmem:[#allocation51_spill] sm:$0xff] }
 0x4fa   :  { %v21177_v61 = vadd.f32 %v8483_v10, %v8095_v25  ;;  %v22291_v25 = vld [vmem:[#allocation42_spill] sm:$0xff] }
 0x4fb   :  { %v16427_v63 = vpop.f32.mrf.mxu1  ;;  %v8926_v10 = vadd.f32 %v22291_v25, %v20993_v48  ;;  %v8496_v29 = vadd.f32 %v21008_v20, %v8065_v27  ;;  %v21205_v48 = vpop.f32.mrf.mxu0 }
 0x4fc   :  { %v21184_v30 = vadd.f32 %v16427_v63, %v8924_v55  ;;  %v22294_v63 = vld [vmem:[#allocation32_spill] sm:$0xff] }
 0x4fd   :  { %v9175_v59 = vpop.f32.mrf.mxu1  ;;  %v8067_v38 = vadd.f32 %v22294_v63, %v22293_v11  ;;  %v8927_v20 = vadd.f32 %v20798_v32, %v8496_v29  ;;  %v22298_v32 = vld [vmem:[#allocation35_spill] sm:$0xff] }
 0x4fe   :  { %v21189_v19 = vadd.f32 %v9175_v59, %v8923_v8  ;;  %v22295_v8 = vld [vmem:[#allocation82_spill] sm:$0xff]  ;;  %v8071_v29 = vadd.f32 %v22298_v32, %v20806_v7  ;;  %v8934_v7 = vadd.f32 %v20874_v14, %v21039_v5 }
 0x4ff   :  { %v16430_v41 = vpop.f32.mrf.mxu1  ;;  %v8928_v59 = vadd.f32 %v22295_v8, %v21004_v56  ;;  %v8498_v50 = vadd.f32 %v21020_v62, %v8067_v38  ;;  %v21217_v56 = vpop.f32.mrf.mxu0 }
 0x500   :  { %v21196_v28 = vadd.f32 %v16430_v41, %v8926_v10  ;;  %v22297_v10 = vld [vmem:[#allocation13_spill] sm:$0xff] }
 0x501   :  { %v9185_v55 = vpop.f32.mrf.mxu1  ;;  %v8069_v41 = vadd.f32 %v22297_v10, %v22296_v44  ;;  %v8929_v62 = vadd.f32 %v20831_v0, %v8498_v50  ;;  %v22299_v0 = vld [vmem:[#allocation16_spill] sm:$0xff] }
 0x502   :  { %v21201_v9 = vadd.f32 %v9185_v55, %v8925_v49  ;;  %v8930_v49 = vadd.f32 %v20812_v13, %v21016_v54  ;;  %v21229_v13 = vpop.f32.mrf.mxu0  ;;  %v8502_v54 = vadd.f32 %v21041_v34, %v8071_v29  ;;  %v8073_v50 = vadd.f32 %v22299_v0, %v20822_v35 }
 0x503   :  { %v16433_v3 = vpop.f32.mrf.mxu1  ;;  %v8500_v11 = vadd.f32 %v21032_v24, %v8069_v41  ;;  %v8936_v35 = vadd.f32 %v20901_v40, %v21047_v1  ;;  %v8937_v40 = vadd.f32 %v20942_v12, %v21063_v42 }
 0x504   :  { %v21208_v25 = vadd.f32 %v16433_v3, %v8928_v59  ;;  %v8932_v59 = vadd.f32 %v20846_v16, %v21028_v47  ;;  %v21241_v16 = vpop.f32.mrf.mxu0  ;;  %v8504_v47 = vadd.f32 %v21049_v45, %v8073_v50  ;;  %v8933_v34 = vadd.f32 %v20887_v15, %v8502_v54  ;;  %v22301_v50 = vld [vmem:[#allocation54_spill] sm:$0xff] }
 0x505   :  { %v9195_v27 = vpop.f32.mrf.mxu1  ;;  %v8931_v24 = vadd.f32 %v20860_v58, %v8500_v11  ;;  %v8938_v45 = vadd.f32 %v20928_v6, %v21059_v52  ;;  %v22300_v6 = vld [vmem:[#allocation52_spill] sm:$0xff]  ;;  %v8942_v12 = vadd.f32 %v22301_v50, %v21084_v43  ;;  %v22304_v43 = vld [vmem:[#allocation59_spill] sm:$0xff] }
 0x506   :  { %v21213_v31 = vadd.f32 %v9195_v27, %v8927_v20  ;;  %v21251_v11 = vpop.f32.mrf.mxu0  ;;  %v8935_v14 = vadd.f32 %v20915_v53, %v8504_v47  ;;  %v8940_v53 = vadd.f32 %v20956_v17, %v21073_v33  ;;  %v8939_v52 = vadd.f32 %v22300_v6, %v21078_v23  ;;  %v22302_v17 = vld [vmem:[#allocation55_spill] sm:$0xff]  ;;  %v22307_v50 = vld [vmem:[#allocation20_spill] sm:$0xff] }
 0x507   :  { %v16436_v55 = vpop.f32.mrf.mxu1  ;;  %v8941_v33 = vadd.f32 %v22302_v17, %v21088_v51 }
 0x508   :  { %v21220_v63 = vadd.f32 %v16436_v55, %v8930_v49  ;;  %v21260_v32 = vpop.f32.mrf.mxu0 }
 0x509   :  { %v9205_v38 = vpop.f32.mrf.mxu1 }
 0x50a   :  { %v21225_v8 = vadd.f32 %v9205_v38, %v8929_v62  ;;  %v21270_v54 = vpop.f32.mrf.mxu0 }
 0x50b   :  { %v16439_v3 = vpop.f32.mrf.mxu1 }
 0x50c   :  { %v21232_v20 = vadd.f32 %v16439_v3, %v8932_v59 }
 0x50d   :  { %v9215_v27 = vpop.f32.mrf.mxu1 }
 0x50e   :  { %v21237_v44 = vadd.f32 %v9215_v27, %v8931_v24 }
 0x50f   :  { %v16442_v10 = vpop.f32.mrf.mxu1 }
 0x510   :  { %v21244_v41 = vadd.f32 %v16442_v10, %v8934_v7  ;;  %v21280_v7 = vpop.f32.mrf.mxu0 }
 0x511   :  { %v9225_v49 = vpop.f32.mrf.mxu1 }
 0x512   :  { %v21247_v58 = vadd.f32 %v9225_v49, %v8933_v34  ;;  %v22303_v49 = vld [vmem:[#allocation58_spill] sm:$0xff] }
 0x513   :  { %v16445_v55 = vpop.f32.mrf.mxu1  ;;  %v8944_v23 = vadd.f32 %v22303_v49, %v21094_v21  ;;  %v22306_v21 = vld [vmem:[#allocation3_spill] sm:$0xff] }
 0x514   :  { %v21253_v62 = vadd.f32 %v16445_v55, %v8936_v35  ;;  %v21290_v55 = vpop.f32.mrf.mxu0  ;;  %v8945_v6 = vadd.f32 %v22306_v21, %v21108_v26 }
 0x515   :  { %v9235_v5 = vpop.f32.mrf.mxu1 }
 0x516   :  { %v21256_v38 = vadd.f32 %v9235_v5, %v8935_v14  ;;  %v8943_v5 = vadd.f32 %v22304_v43, %v21098_v46  ;;  %v8948_v46 = vadd.f32 %v22307_v50, %v21114_v37  ;;  %v22311_v43 = vld [vmem:[#allocation6_spill] sm:$0xff]  ;;  %v22312_v37 = vld [vmem:[#allocation7_spill] sm:$0xff] }
 0x517   :  { %v16448_v15 = vpop.f32.mrf.mxu1 }
 0x518   :  { %v21262_v29 = vadd.f32 %v16448_v15, %v8938_v45 }
 0x519   :  { %v9245_v1 = vpop.f32.mrf.mxu1 }
 0x51a   :  { %v21266_v59 = vadd.f32 %v9245_v1, %v8937_v40  ;;  %v22305_v40 = vld [vmem:[#allocation17_spill] sm:$0xff] }
 0x51b   :  { %v16451_v3 = vpop.f32.mrf.mxu1  ;;  %v8946_v51 = vadd.f32 %v22305_v40, %v21104_v18  ;;  %v22308_v18 = vld [vmem:[#allocation29_spill] sm:$0xff] }
 0x51c   :  { %v21272_v24 = vadd.f32 %v16451_v3, %v8940_v53  ;;  %v21300_v53 = vpop.f32.mrf.mxu0 }
 0x51d   :  { %v9255_v27 = vpop.f32.mrf.mxu1 }
 0x51e   :  { %v21276_v0 = vadd.f32 %v9255_v27, %v8939_v52 }
 0x51f   :  { %v16454_v42 = vpop.f32.mrf.mxu1 }
 0x520   :  { %v21282_v10 = vadd.f32 %v16454_v42, %v8942_v12  ;;  %v21310_v42 = vpop.f32.mrf.mxu0 }
 0x521   :  { %v9265_v47 = vpop.f32.mrf.mxu1 }
 0x522   :  { %v21286_v34 = vadd.f32 %v9265_v47, %v8941_v33  ;;  %v22309_v33 = vld [vmem:[#allocation5_spill] sm:$0xff] }
 0x523   :  { %v16457_v35 = vpop.f32.mrf.mxu1  ;;  %v8947_v47 = vadd.f32 %v22309_v33, %v22308_v18  ;;  %v22316_v33 = vld [vmem:[#allocation28_spill] sm:$0xff] }
 0x524   :  { %v21292_v14 = vadd.f32 %v16457_v35, %v8944_v23  ;;  %v22310_v35 = vld [vmem:[#allocation33_spill] sm:$0xff] }
 0x525   :  { %v9275_v45 = vpop.f32.mrf.mxu1  ;;  %v8950_v26 = vadd.f32 %v22311_v43, %v22310_v35  ;;  %v22317_v43 = vld [vmem:[#allocation62_spill] sm:$0xff] }
 0x526   :  { %v21296_v15 = vadd.f32 %v9275_v45, %v8943_v5  ;;  %v21320_v45 = vpop.f32.mrf.mxu0 }
 0x527   :  { %v16460_v1 = vpop.f32.mrf.mxu1 }
 0x528   :  { %v21302_v3 = vadd.f32 %v16460_v1, %v8946_v51  ;;  %v8949_v51 = vadd.f32 %v22312_v37, %v21128_v39 }
 0x529   :  { %v9285_v52 = vpop.f32.mrf.mxu1 }
 0x52a   :  { %v21306_v27 = vadd.f32 %v9285_v52, %v8945_v6  ;;  %v22313_v6 = vld [vmem:[#allocation36_spill] sm:$0xff] }
 0x52b   :  { %v16463_v12 = vpop.f32.mrf.mxu1  ;;  %v22314_v52 = vld [vmem:[#allocation8_spill] sm:$0xff] }
 0x52c   :  { %v21312_v17 = vadd.f32 %v16463_v12, %v8948_v46  ;;  %v8952_v50 = vadd.f32 %v22314_v52, %v22313_v6  ;;  %v21330_v12 = vpop.f32.mrf.mxu0 }
 0x52d   :  { %v9295_v49 = vpop.f32.mrf.mxu1 }
 0x52e   :  { %v21316_v23 = vadd.f32 %v9295_v49, %v8947_v47  ;;  %v8951_v47 = vadd.f32 %v22316_v33, %v21140_v4  ;;  %v21340_v37 = vpop.f32.mrf.mxu0 }
 0x52f   :  { %v16466_v5 = vpop.f32.mrf.mxu1 }
 0x530   :  { %v21322_v40 = vadd.f32 %v16466_v5, %v8950_v26  ;;  %v22318_v26 = vld [vmem:[#allocation10_spill] sm:$0xff] }
 0x531   :  { %v9305_v1 = vpop.f32.mrf.mxu1  ;;  %v8954_v39 = vadd.f32 %v22318_v26, %v22317_v43  ;;  %v22322_v43 = vld [vmem:[#allocation37_spill] sm:$0xff] }
 0x532   :  { %v21326_v21 = vadd.f32 %v9305_v1, %v8949_v51  ;;  %v22320_v1 = vld [vmem:[#allocation31_spill] sm:$0xff]  ;;  %v8955_v26 = vadd.f32 %v22322_v43, %v21165_v2 }
 0x533   :  { %v16469_v46 = vpop.f32.mrf.mxu1  ;;  %v8953_v6 = vadd.f32 %v22320_v1, %v21153_v60 }
 0x534   :  { %v21332_v18 = vadd.f32 %v16469_v46, %v8952_v50  ;;  %v22321_v46 = vld [vmem:[#allocation14_spill] sm:$0xff] }
 0x535   :  { %v9315_v49 = vpop.f32.mrf.mxu1  ;;  %v8956_v4 = vadd.f32 %v22321_v46, %v21160_v57  ;;  %v22325_v57 = vld [vmem:[#allocation24_spill] sm:$0xff] }
 0x536   :  { %22315 = vst [vmem:[#allocation76_spill] sm:$0xff] %v21332_v18  ;;  %v21336_v35 = vadd.f32 %v9315_v49, %v8951_v47  ;;  %v21350_v47 = vpop.f32.mrf.mxu0  ;;  %v8957_v46 = vadd.f32 %v22325_v57, %v21177_v61 }
 0x537   :  { %v16472_v5 = vpop.f32.mrf.mxu1 }
 0x538   :  { %v21342_v51 = vadd.f32 %v16472_v5, %v8954_v39  ;;  %v22323_v5 = vld [vmem:[#allocation63_spill] sm:$0xff] }
 0x539   :  { %v9325_v52 = vpop.f32.mrf.mxu1  ;;  %v8958_v60 = vadd.f32 %v22323_v5, %v21172_v22  ;;  %v9785_v22 = vadd.f32 %v21193_v36, %v21189_v19  ;;  %v21377_v5 = vld [vmem:[%s21895_s4] ss:$0 sm:$0xff]  ;;  %v9788_v36 = vadd.f32 %v21205_v48, %v21196_v28  ;;  %v9789_v28 = vadd.f32 %v21241_v16, %v21213_v31 }
 0x53a   :  { %22319 = vst [vmem:[#allocation49_spill] sm:$0xff] %v21342_v51  ;;  %v21346_v50 = vadd.f32 %v9325_v52, %v8953_v6  ;;  %v21360_v6 = vpop.f32.mrf.mxu0  ;;  %v22327_v48 = vmov 0.0   ;;  %v9790_v16 = vadd.f32 %v21229_v13, %v21208_v25  ;;  %v9791_v13 = vadd.f32 %v21260_v32, %v21225_v8 }
 0x53b   :  { %v16475_v33 = vpop.f32.mrf.mxu1 }
 0x53c   :  { %v21352_v49 = vadd.f32 %v16475_v33, %v8956_v4  ;;  %v22326_v33 = vld [vmem:[#allocation73_spill] sm:$0xff] }
 0x53d   :  { %v9335_v18 = vpop.f32.mrf.mxu1  ;;  %v9786_v2 = vadd.f32 %v22326_v33, %v21184_v30 }
 0x53e   :  { %v21356_v39 = vadd.f32 %v9335_v18, %v8955_v26  ;;  %v21370_v18 = vpop.f32.mrf.mxu0 }
 0x53f   :  { %v16478_v1 = vpop.f32.mrf.mxu1 }
 0x540   :  { %v21362_v52 = vadd.f32 %v16478_v1, %v8958_v60 }
 0x541   :  { %v9345_v51 = vpop.f32.mrf.mxu1 }
 0x542   :  { %22324 = vst [vmem:[#allocation38_spill] sm:$0xff] %v21362_v52  ;;  %v21366_v4 = vadd.f32 %v9345_v51, %v8957_v46  ;;  %v21379_v51 = vpop.f32.mrf.mxu0  ;;  %v9787_v46 = vadd.f32 %v21217_v56, %v21201_v9 }
 0x543   :  { %v16551_v43 = vpop.f32.mrf.mxu1 }
 0x544   :  { %v10217_v26 = vadd.f32 %v16551_v43, %v9786_v2 }
 0x545   :  { %v10037_v60 = vpop.f32.mrf.mxu1 }
 0x546   :  { %v10216_v61 = vadd.f32 %v10037_v60, %v9785_v22  ;;  %v10260_v57 = vadd.f32 %v21377_v5, %v10217_v26  ;;  %v10404_v22 = vld [vmem:[%s21894_s5 + $0x4] sm:$0xf]  ;;  %v21390_v60 = vpop.f32.mrf.mxu0 }
 0x547   :  { %v16554_v1 = vpop.f32.mrf.mxu1 }
 0x548   :  { %v10259_v30 = vadd.f32 %v21377_v5, %v10216_v61  ;;  %v10332_v26 = vmul.f32 0.01, %v10260_v57  ;;  %v10219_v61 = vadd.f32 %v16554_v1, %v9788_v36  ;;  %vm10296_vm13 = vcmp.gt.f32.partialorder %v10260_v57, 0.0  ;;  %v10405_v1 = vld [vmem:[%s21894_s5 + $0x8] sm:$0xf] }
 0x549   :  { %v10047_v33 = vpop.f32.mrf.mxu1 }
 0x54a   :  { %vm10295_vm12 = vcmp.gt.f32.partialorder %v10259_v30, 0.0  ;;  %v10331_v19 = vmul.f32 0.01, %v10259_v30  ;;  %v10218_v2 = vadd.f32 %v10047_v33, %v9787_v46  ;;  %v10368_v33 = vsel %vm10296_vm13, %v10260_v57, %v10332_v26  ;;  %v10406_v57 = vld [vmem:[%s21894_s5 + $0xc] sm:$0xf] }
 0x54b   :  { %v16557_v43 = vpop.f32.mrf.mxu1 }
 0x54c   :  { %v10367_v52 = vsel %vm10295_vm12, %v10259_v30, %v10331_v19  ;;  %v10261_v9 = vadd.f32 %v21377_v5, %v10218_v2  ;;  %v21403_v30 = vpop.f32.mrf.mxu0 }
 0x54d   :  { %v10057_v56 = vpop.f32.mrf.mxu1  ;;  %16606 = vmatmul.mubr.msk.f32.vlgmr.msra.gmra.mxu0 %vm3173_vm2, %v10367_v52  ;;  %v10262_v52 = vadd.f32 %v21377_v5, %v10219_v61 }
 0x54e   :  { %16609 = vmatpush3.xpose.msk.msra.mxu0 %vm3173_vm2, %v10404_v22  ;;  %16610 = vmatprep.mubr.msk.f32.mxu0 %vm16790_vm11, %v22327_v48  ;;  %v10333_v19 = vmul.f32 0.01, %v10261_v9  ;;  %v10220_v36 = vadd.f32 %v10057_v56, %v9789_v28  ;;  %vm10297_vm14 = vcmp.gt.f32.partialorder %v10261_v9, 0.0  ;;  %v21416_v22 = vpop.f32.mrf.mxu0  ;;  %v10221_v56 = vadd.f32 %v16557_v43, %v9790_v16  ;;  %v10407_v43 = vld [vmem:[%s21894_s5 + $0x10] sm:$0xf] }
 0x54f   :  { %v16560_v46 = vpop.f32.mrf.mxu1  ;;  %16613 = vmatprep.subr.mxu0 %v22327_v48  ;;  %v10334_v26 = vmul.f32 0.01, %v10262_v52  ;;  %vm10298_vm0 = vcmp.gt.f32.partialorder %v10262_v52, 0.0  ;;  %v9792_v16 = vadd.f32 %v21251_v11, %v21220_v63 }
 0x550   :  { %v10369_v61 = vsel %vm10297_vm14, %v10261_v9, %v10333_v19  ;;  %v10263_v28 = vadd.f32 %v21377_v5, %v10220_v36  ;;  %v21431_v9 = vpop.f32.mrf.mxu0  ;;  %v10264_v19 = vadd.f32 %v21377_v5, %v10221_v56 }
 0x551   :  { %v10067_v31 = vpop.f32.mrf.mxu1  ;;  %16611 = vmatmul.mubr.msk.f32.vlgmr.msra.gmra.mxu0 %vm3173_vm2, %v10368_v33  ;;  %v10370_v33 = vsel %vm10298_vm0, %v10262_v52, %v10334_v26  ;;  %v10408_v52 = vld [vmem:[%s21894_s5 + $0x14] sm:$0xf]  ;;  %v10223_v56 = vadd.f32 %v16560_v46, %v9792_v16  ;;  %v10409_v46 = vld [vmem:[%s21894_s5 + $0x18] sm:$0xf] }
 0x552   :  { %16614 = vmatpush3.xpose.msk.msra.mxu0 %vm3173_vm2, %v10405_v1  ;;  %16615 = vmatprep.mubr.msk.f32.mxu0 %vm16790_vm11, %v22327_v48  ;;  %v10335_v36 = vmul.f32 0.01, %v10263_v28  ;;  %v10222_v8 = vadd.f32 %v10067_v31, %v9791_v13  ;;  %vm10299_vm15 = vcmp.gt.f32.partialorder %v10263_v28, 0.0  ;;  %v21446_v31 = vpop.f32.mrf.mxu0  ;;  %v10336_v26 = vmul.f32 0.01, %v10264_v19 }
 0x553   :  { %v16563_v2 = vpop.f32.mrf.mxu1  ;;  %16618 = vmatprep.subr.mxu0 %v22327_v48  ;;  %vm10300_vm1 = vcmp.gt.f32.partialorder %v10264_v19, 0.0  ;;  %v9793_v13 = vadd.f32 %v21280_v7, %v21237_v44  ;;  %v9794_v7 = vadd.f32 %v21270_v54, %v21232_v20 }
 0x554   :  { %v10265_v63 = vadd.f32 %v21377_v5, %v10222_v8 }
 0x555   :  { %v10077_v25 = vpop.f32.mrf.mxu1  ;;  %16616 = vmatmul.mubr.msk.f32.vlgmr.msra.gmra.mxu0 %vm3173_vm2, %v10369_v61  ;;  %v10371_v61 = vsel %vm10299_vm15, %v10263_v28, %v10335_v36  ;;  %v21463_v28 = vpop.f32.mrf.mxu0  ;;  %v10266_v36 = vadd.f32 %v21377_v5, %v10223_v56 }
 0x556   :  { %16619 = vmatpush3.xpose.msk.msra.mxu0 %vm3173_vm2, %v10406_v57  ;;  %16620 = vmatprep.mubr.msk.f32.mxu0 %vm16790_vm11, %v22327_v48  ;;  %v10337_v8 = vmul.f32 0.01, %v10265_v63  ;;  %v10224_v44 = vadd.f32 %v10077_v25, %v9793_v13  ;;  %vm10301_vm3 = vcmp.gt.f32.partialorder %v10265_v63, 0.0  ;;  %v10410_v25 = vld [vmem:[%s21894_s5 + $0x1c] sm:$0xf] }
 0x557   :  { %v21425_v1 = vpop.f32.mrf.mxu1  ;;  %16623 = vmatprep.subr.mxu0 %v22327_v48  ;;  %v10338_v20 = vmul.f32 0.01, %v10266_v36  ;;  %vm10302_vm4 = vcmp.gt.f32.partialorder %v10266_v36, 0.0 }
 0x558   :  { %v10373_v54 = vsel %vm10301_vm3, %v10265_v63, %v10337_v8  ;;  %v10411_v63 = vld [vmem:[%s21894_s5 + $0x20] sm:$0xf] }
 0x559   :  { %v10087_v32 = vpop.f32.mrf.mxu1  ;;  %16621 = vmatmul.mubr.msk.f32.vlgmr.msra.gmra.mxu0 %vm3173_vm2, %v10370_v33  ;;  %v10372_v33 = vsel %vm10300_vm1, %v10264_v19, %v10336_v26  ;;  %v21480_v19 = vpop.f32.mrf.mxu0  ;;  %v10267_v26 = vadd.f32 %v21377_v5, %v10224_v44  ;;  %v10374_v8 = vsel %vm10302_vm4, %v10266_v36, %v10338_v20 }
 0x55a   :  { %16624 = vmatpush3.xpose.msk.msra.mxu0 %vm3173_vm2, %v10407_v43  ;;  %16625 = vmatprep.mubr.msk.f32.mxu0 %vm16790_vm11, %v22327_v48 }
 0x55b   :  { %v21440_v57 = vpop.f32.mrf.mxu1  ;;  %16628 = vmatprep.subr.mxu0 %v22327_v48  ;;  %v10339_v44 = vmul.f32 0.01, %v10267_v26  ;;  %vm10303_vm5 = vcmp.gt.f32.partialorder %v10267_v26, 0.0 }
 0x55d   :  { %v21449_v11 = vpop.f32.mrf.mxu1  ;;  %16626 = vmatmul.mubr.msk.f32.vlgmr.msra.gmra.mxu0 %vm3173_vm2, %v10371_v61 }
 0x55e   :  { %16629 = vmatpush3.xpose.msk.msra.mxu0 %vm3173_vm2, %v10408_v52  ;;  %16630 = vmatprep.mubr.msk.f32.mxu0 %vm16790_vm11, %v22327_v48  ;;  %v10225_v52 = vadd.f32 %v16563_v2, %v9794_v7  ;;  %v9795_v2 = vadd.f32 %v21300_v53, %v21247_v58  ;;  %v9803_v53 = vadd.f32 %v21379_v51, %v21286_v34  ;;  %v10412_v51 = vld [vmem:[%s21894_s5 + $0x24] sm:$0xf] }
 0x55f   :  { %v21457_v43 = vpop.f32.mrf.mxu1  ;;  %16633 = vmatprep.subr.mxu0 %v22327_v48  ;;  %v9805_v34 = vadd.f32 %v21403_v30, %v21296_v15  ;;  %v9797_v15 = vadd.f32 %v21320_v45, %v21256_v38 }
 0x560   :  { %v10268_v13 = vadd.f32 %v21377_v5, %v10225_v52  ;;  %v10226_v58 = vadd.f32 %v10087_v32, %v9795_v2  ;;  %v9796_v52 = vadd.f32 %v21290_v55, %v21244_v41  ;;  %v10375_v41 = vsel %vm10303_vm5, %v10267_v26, %v10339_v44  ;;  %v10413_v44 = vld [vmem:[%s21894_s5 + $0x28] sm:$0xf] }
 0x561   :  { %v21468_v16 = vpop.f32.mrf.mxu1  ;;  %16631 = vmatmul.mubr.msk.f32.vlgmr.msra.gmra.mxu0 %vm3173_vm2, %v10372_v33  ;;  %v21498_v33 = vpop.f32.mrf.mxu0 }
 0x562   :  { %16634 = vmatpush3.xpose.msk.msra.mxu0 %vm3173_vm2, %v10409_v46  ;;  %16635 = vmatprep.mubr.msk.f32.mxu0 %vm16790_vm11, %v22327_v48  ;;  %vm10304_vm6 = vcmp.gt.f32.partialorder %v10268_v13, 0.0  ;;  %v10227_v55 = vadd.f32 %v21425_v1, %v9796_v52  ;;  %v10269_v20 = vadd.f32 %v21377_v5, %v10226_v58  ;;  %v9798_v52 = vadd.f32 %v21310_v42, %v21253_v62 }
 0x563   :  { %v21474_v61 = vpop.f32.mrf.mxu1  ;;  %16638 = vmatprep.subr.mxu0 %v22327_v48  ;;  %v21516_v32 = vpop.f32.mrf.mxu0  ;;  %v9809_v62 = vadd.f32 %v21463_v28, %v21316_v23  ;;  %v10425_v23 = vld [vmem:[%s21894_s5 + $0x58] sm:$0xf] }
 0x564   :  { %v10270_v38 = vadd.f32 %v21377_v5, %v10227_v55  ;;  %v10341_v45 = vmul.f32 0.01, %v10269_v20  ;;  %vm10305_vm8 = vcmp.gt.f32.partialorder %v10269_v20, 0.0 }
 0x565   :  { %v21483_v56 = vpop.f32.mrf.mxu1  ;;  %16636 = vmatmul.mubr.msk.f32.vlgmr.msra.gmra.mxu0 %vm3173_vm2, %v10373_v54  ;;  %v21533_v58 = vpop.f32.mrf.mxu0 }
 0x566   :  { %16639 = vmatpush3.xpose.msk.msra.mxu0 %vm3173_vm2, %v10410_v25  ;;  %16640 = vmatprep.mubr.msk.f32.mxu0 %vm16790_vm11, %v22327_v48  ;;  %v10340_v25 = vmul.f32 0.01, %v10268_v13  ;;  %vm10306_vm10 = vcmp.gt.f32.partialorder %v10270_v38, 0.0 }
 0x567   :  { %v21492_v46 = vpop.f32.mrf.mxu1  ;;  %16643 = vmatprep.subr.mxu0 %v22327_v48  ;;  %v21559_v42 = vpop.f32.mrf.mxu0 }
 0x569   :  { %v10127_v7 = vpop.f32.mrf.mxu1  ;;  %16641 = vmatmul.mubr.msk.f32.vlgmr.msra.gmra.mxu0 %vm3173_vm2, %v10374_v8  ;;  %v10376_v8 = vsel %vm10304_vm6, %v10268_v13, %v10340_v25  ;;  %v10423_v13 = vld [vmem:[%s21894_s5 + $0x50] sm:$0xf] }
 0x56a   :  { %16644 = vmatpush3.xpose.msk.msra.mxu0 %vm3173_vm2, %v10411_v63  ;;  %16645 = vmatprep.mubr.msk.f32.mxu0 %vm16790_vm11, %v22327_v48  ;;  %v10234_v54 = vadd.f32 %v10127_v7, %v9803_v53  ;;  %v10228_v53 = vadd.f32 %v21449_v11, %v9797_v15  ;;  %v10229_v11 = vadd.f32 %v21440_v57, %v9798_v52  ;;  %v10427_v52 = vld [vmem:[%s21894_s5 + $0x60] sm:$0xf] }
 0x56b   :  { %v21508_v36 = vpop.f32.mrf.mxu1  ;;  %16648 = vmatprep.subr.mxu0 %v22327_v48  ;;  %v10377_v57 = vsel %vm10305_vm8, %v10269_v20, %v10341_v45  ;;  %v9799_v20 = vadd.f32 %v21340_v37, %v21266_v59  ;;  %v10415_v59 = vld [vmem:[%s21894_s5 + $0x30] sm:$0xf]  ;;  %v9756_v37 = vpop.f32.mrf.mxu0 }
 0x56c   :  { %v10277_v2 = vadd.f32 %v21377_v5, %v10234_v54  ;;  %v9807_v54 = vadd.f32 %v21431_v9, %v21306_v27  ;;  %v10414_v27 = vld [vmem:[%s21894_s5 + $0x2c] sm:$0xf]  ;;  %v10342_v9 = vmul.f32 0.01, %v10270_v38 }
 0x56d   :  { %v10137_v63 = vpop.f32.mrf.mxu1  ;;  %16646 = vmatmul.mubr.msk.f32.vlgmr.msra.gmra.mxu0 %vm3173_vm2, %v10375_v41 }
 0x56e   :  { %v10236_v30 = vadd.f32 %v10137_v63, %v9805_v34  ;;  %16649 = vmatpush3.xpose.msk.msra.mxu0 %vm3173_vm2, %v10412_v51  ;;  %16650 = vmatprep.mubr.msk.f32.mxu0 %vm16790_vm11, %v22327_v48  ;;  %vm10313_vm7 = vcmp.gt.f32.partialorder %v10277_v2, 0.0  ;;  %v10349_v26 = vmul.f32 0.01, %v10277_v2  ;;  %v10378_v45 = vsel %vm10306_vm10, %v10270_v38, %v10342_v9 }
 0x56f   :  { %v21527_v1 = vpop.f32.mrf.mxu1  ;;  %16653 = vmatprep.subr.mxu0 %v22327_v48 }
 0x570   :  { %v10279_v7 = vadd.f32 %v21377_v5, %v10236_v30  ;;  %v10385_v25 = vsel %vm10313_vm7, %v10277_v2, %v10349_v26  ;;  %v10271_v2 = vadd.f32 %v21377_v5, %v10228_v53 }
 0x571   :  { %v10147_v34 = vpop.f32.mrf.mxu1  ;;  %16651 = vmatmul.mubr.msk.f32.vlgmr.msra.gmra.mxu0 %vm3173_vm2, %v10376_v8  ;;  %16696 = vmatmul.mubr.msk.f32.vlgmr.msra.gmra.mxu1 %vm3173_vm2, %v10385_v25  ;;  %v10272_v8 = vadd.f32 %v21377_v5, %v10229_v11  ;;  %v9800_v25 = vadd.f32 %v21330_v12, %v21262_v29 }
 0x572   :  { %vm10315_vm9 = vcmp.gt.f32.partialorder %v10279_v7, 0.0  ;;  %v10351_v51 = vmul.f32 0.01, %v10279_v7  ;;  %16654 = vmatpush3.xpose.msk.msra.mxu0 %vm3173_vm2, %v10413_v44  ;;  %v10238_v41 = vadd.f32 %v10147_v34, %v9807_v54  ;;  %16704 = vmatpush3.xpose.msk.msra.mxu1 %vm3173_vm2, %v10423_v13  ;;  %v10343_v53 = vmul.f32 0.01, %v10271_v2 }
 0x573   :  { %v21550_v55 = vpop.f32.mrf.mxu1  ;;  %16655 = vmatprep.mubr.msk.f32.mxu0 %vm16790_vm11, %v22327_v48  ;;  %16658 = vmatprep.subr.mxu0 %v22327_v48  ;;  %vm10307_vm13 = vcmp.gt.f32.partialorder %v10271_v2, 0.0  ;;  %v10231_v11 = vadd.f32 %v21457_v43, %v9800_v25  ;;  %vm10308_vm0 = vcmp.gt.f32.partialorder %v10272_v8, 0.0 }
 0x574   :  { %v10387_v63 = vsel %vm10315_vm9, %v10279_v7, %v10351_v51  ;;  %16705 = vmatprep.mubr.msk.f32.mxu1 %vm16790_vm11, %v22327_v48  ;;  %v10281_v28 = vadd.f32 %v21377_v5, %v10238_v41  ;;  %16713 = vmatprep.subr.mxu1 %v22327_v48  ;;  %v10230_v7 = vadd.f32 %v21468_v16, %v9799_v20  ;;  %v10344_v51 = vmul.f32 0.01, %v10272_v8  ;;  %v21614_v41 = vpop.f32.mrf.mxu0 }
 0x575   :  { %v10157_v15 = vpop.f32.mrf.mxu1  ;;  %16656 = vmatmul.mubr.msk.f32.vlgmr.msra.gmra.mxu0 %vm3173_vm2, %v10377_v57  ;;  %16706 = vmatmul.mubr.msk.f32.vlgmr.msra.gmra.mxu1 %vm3173_vm2, %v10387_v63  ;;  %v9811_v16 = vadd.f32 %v21498_v33, %v21326_v21  ;;  %v9813_v21 = vadd.f32 %v21533_v58, %v21336_v35  ;;  %v10416_v33 = vld [vmem:[%s21894_s5 + $0x34] sm:$0xf]  ;;  %v10379_v43 = vsel %vm10307_vm13, %v10271_v2, %v10343_v53  ;;  %v10429_v35 = vld [vmem:[%s21894_s5 + $0x68] sm:$0xf] }
 0x576   :  { %v10240_v30 = vadd.f32 %v10157_v15, %v9809_v62  ;;  %16659 = vmatpush3.xpose.msk.msra.mxu0 %vm3173_vm2, %v10414_v27  ;;  %vm10317_vm12 = vcmp.gt.f32.partialorder %v10281_v28, 0.0  ;;  %v10353_v26 = vmul.f32 0.01, %v10281_v28  ;;  %16714 = vmatpush3.xpose.msk.msra.mxu1 %vm3173_vm2, %v10425_v23  ;;  %v10273_v62 = vadd.f32 %v21377_v5, %v10230_v7  ;;  %v10417_v15 = vld [vmem:[%s21894_s5 + $0x38] sm:$0xf] }
 0x577   :  { %v21578_v44 = vpop.f32.mrf.mxu1  ;;  %16660 = vmatprep.mubr.msk.f32.mxu0 %vm16790_vm11, %v22327_v48  ;;  %16663 = vmatprep.subr.mxu0 %v22327_v48  ;;  %v9801_v57 = vadd.f32 %v21360_v6, %v21276_v0  ;;  %v10380_v63 = vsel %vm10308_vm0, %v10272_v8, %v10344_v51  ;;  %v9766_v0 = vpop.f32.mrf.mxu0  ;;  %v10274_v6 = vadd.f32 %v21377_v5, %v10231_v11 }
 0x578   :  { %v10283_v13 = vadd.f32 %v21377_v5, %v10240_v30  ;;  %16715 = vmatprep.mubr.msk.f32.mxu1 %vm16790_vm11, %v22327_v48  ;;  %v10389_v38 = vsel %vm10317_vm12, %v10281_v28, %v10353_v26  ;;  %16723 = vmatprep.subr.mxu1 %v22327_v48  ;;  %v10345_v20 = vmul.f32 0.01, %v10273_v62  ;;  %v10431_v26 = vld [vmem:[%s21894_s5 + $0x70] sm:$0xf]  ;;  %vm10309_vm1 = vcmp.gt.f32.partialorder %v10273_v62, 0.0 }
 0x579   :  { %v10167_v54 = vpop.f32.mrf.mxu1  ;;  %16661 = vmatmul.mubr.msk.f32.vlgmr.msra.gmra.mxu0 %vm3173_vm2, %v10378_v45  ;;  %16716 = vmatmul.mubr.msk.f32.vlgmr.msra.gmra.mxu1 %vm3173_vm2, %v10389_v38  ;;  %v10232_v30 = vadd.f32 %v21483_v56, %v9801_v57  ;;  %v9815_v53 = vadd.f32 %v9756_v37, %v21346_v50  ;;  %v9817_v50 = vadd.f32 %v9766_v0, %v21356_v39  ;;  %v21667_v37 = vpop.f32.mrf.mxu0  ;;  %v10346_v25 = vmul.f32 0.01, %v10274_v6  ;;  %v10433_v39 = vld [vmem:[%s21894_s5 + $0x78] sm:$0xf] }
 0x57a   :  { %vm10319_vm14 = vcmp.gt.f32.partialorder %v10283_v13, 0.0  ;;  %v10355_v34 = vmul.f32 0.01, %v10283_v13  ;;  %16664 = vmatpush3.xpose.msk.msra.mxu0 %vm3173_vm2, %v10415_v59  ;;  %v10242_v29 = vadd.f32 %v10167_v54, %v9811_v16  ;;  %16724 = vmatpush3.xpose.msk.msra.mxu1 %vm3173_vm2, %v10427_v52  ;;  %v9802_v59 = vadd.f32 %v21350_v47, %v21272_v24  ;;  %v10418_v47 = vld [vmem:[%s21894_s5 + $0x3c] sm:$0xf] }
 0x57b   :  { %v21605_v12 = vpop.f32.mrf.mxu1  ;;  %16665 = vmatprep.mubr.msk.f32.mxu0 %vm16790_vm11, %v22327_v48  ;;  %16668 = vmatprep.subr.mxu0 %v22327_v48  ;;  %v10381_v38 = vsel %vm10309_vm1, %v10273_v62, %v10345_v20  ;;  %vm10310_vm4 = vcmp.gt.f32.partialorder %v10274_v6, 0.0  ;;  %v9804_v54 = vadd.f32 %v21370_v18, %v21282_v10  ;;  %v10419_v10 = vld [vmem:[%s21894_s5 + $0x40] sm:$0xf]  ;;  %v9776_v18 = vpop.f32.mrf.mxu0  ;;  %v10437_v20 = vld [vmem:[%s21894_s5 + $0x88] sm:$0xf] }
 0x57c   :  { %v10391_v27 = vsel %vm10319_vm14, %v10283_v13, %v10355_v34  ;;  %16725 = vmatprep.mubr.msk.f32.mxu1 %vm16790_vm11, %v22327_v48  ;;  %v10285_v58 = vadd.f32 %v21377_v5, %v10242_v29  ;;  %16733 = vmatprep.subr.mxu1 %v22327_v48  ;;  %v10233_v13 = vadd.f32 %v21474_v61, %v9802_v59 }
 0x57d   :  { %v10177_v9 = vpop.f32.mrf.mxu1  ;;  %16666 = vmatmul.mubr.msk.f32.vlgmr.msra.gmra.mxu0 %vm3173_vm2, %v10379_v43  ;;  %16726 = vmatmul.mubr.msk.f32.vlgmr.msra.gmra.mxu1 %vm3173_vm2, %v10391_v27  ;;  %v10275_v61 = vadd.f32 %v21377_v5, %v10232_v30  ;;  %v10235_v29 = vadd.f32 %v21492_v46, %v9804_v54  ;;  %v10382_v43 = vsel %vm10310_vm4, %v10274_v6, %v10346_v25 }
 0x57e   :  { %v10244_v2 = vadd.f32 %v10177_v9, %v9813_v21  ;;  %16669 = vmatpush3.xpose.msk.msra.mxu0 %vm3173_vm2, %v10416_v33  ;;  %vm10321_vm15 = vcmp.gt.f32.partialorder %v10285_v58, 0.0  ;;  %v10357_v23 = vmul.f32 0.01, %v10285_v58  ;;  %16734 = vmatpush3.xpose.msk.msra.mxu1 %vm3173_vm2, %v10429_v35  ;;  %v10276_v62 = vadd.f32 %v21377_v5, %v10233_v13  ;;  %v10435_v35 = vld [vmem:[%s21894_s5 + $0x80] sm:$0xf] }
 0x57f   :  { %v21633_v28 = vpop.f32.mrf.mxu1  ;;  %16670 = vmatprep.mubr.msk.f32.mxu0 %vm16790_vm11, %v22327_v48  ;;  %16673 = vmatprep.subr.mxu0 %v22327_v48  ;;  %v10347_v27 = vmul.f32 0.01, %v10275_v61  ;;  %vm10311_vm6 = vcmp.gt.f32.partialorder %v10275_v61, 0.0  ;;  %v9819_v9 = vadd.f32 %v9776_v18, %v21366_v4  ;;  %v10420_v4 = vld [vmem:[%s21894_s5 + $0x44] sm:$0xf] }
 0x580   :  { %v10287_v8 = vadd.f32 %v21377_v5, %v10244_v2  ;;  %16735 = vmatprep.mubr.msk.f32.mxu1 %vm16790_vm11, %v22327_v48  ;;  %v10393_v45 = vsel %vm10321_vm15, %v10285_v58, %v10357_v23  ;;  %16743 = vmatprep.subr.mxu1 %v22327_v48  ;;  %v9806_v2 = vadd.f32 %v21390_v60, %v21292_v14  ;;  %v10348_v0 = vmul.f32 0.01, %v10276_v62 }
 0x581   :  { %v10187_v56 = vpop.f32.mrf.mxu1  ;;  %16671 = vmatmul.mubr.msk.f32.vlgmr.msra.gmra.mxu0 %vm3173_vm2, %v10380_v63  ;;  %16736 = vmatmul.mubr.msk.f32.vlgmr.msra.gmra.mxu1 %vm3173_vm2, %v10393_v45  ;;  %v10278_v23 = vadd.f32 %v21377_v5, %v10235_v29  ;;  %v10383_v14 = vsel %vm10311_vm6, %v10275_v61, %v10347_v27  ;;  %vm10312_vm8 = vcmp.gt.f32.partialorder %v10276_v62, 0.0  ;;  %v10428_v61 = vld [vmem:[%s21894_s5 + $0x64] sm:$0xf]  ;;  %v10434_v27 = vld [vmem:[%s21894_s5 + $0x7c] sm:$0xf] }
 0x582   :  { %vm10323_vm3 = vcmp.gt.f32.partialorder %v10287_v8, 0.0  ;;  %v10359_v7 = vmul.f32 0.01, %v10287_v8  ;;  %16674 = vmatpush3.xpose.msk.msra.mxu0 %vm3173_vm2, %v10417_v15  ;;  %v10246_v52 = vadd.f32 %v10187_v56, %v9815_v53  ;;  %16744 = vmatpush3.xpose.msk.msra.mxu1 %vm3173_vm2, %v10431_v26  ;;  %v10237_v60 = vadd.f32 %v21508_v36, %v9806_v2  ;;  %v10422_v26 = vld [vmem:[%s21894_s5 + $0x4c] sm:$0xf] }
 0x583   :  { %v21659_v24 = vpop.f32.mrf.mxu1  ;;  %16675 = vmatprep.mubr.msk.f32.mxu0 %vm16790_vm11, %v22327_v48  ;;  %16678 = vmatprep.subr.mxu0 %v22327_v48  ;;  %v9808_v36 = vadd.f32 %v21416_v22, %v21302_v3  ;;  %v10384_v59 = vsel %vm10312_vm8, %v10276_v62, %v10348_v0  ;;  %v10350_v45 = vmul.f32 0.01, %v10278_v23  ;;  %vm10314_vm10 = vcmp.gt.f32.partialorder %v10278_v23, 0.0 }
 0x584   :  { %v10395_v16 = vsel %vm10323_vm3, %v10287_v8, %v10359_v7  ;;  %16745 = vmatprep.mubr.msk.f32.mxu1 %vm16790_vm11, %v22327_v48  ;;  %v10289_v34 = vadd.f32 %v21377_v5, %v10246_v52  ;;  %16753 = vmatprep.subr.mxu1 %v22327_v48  ;;  %v10280_v53 = vadd.f32 %v21377_v5, %v10237_v60 }
 0x585   :  { %v10197_v51 = vpop.f32.mrf.mxu1  ;;  %16676 = vmatmul.mubr.msk.f32.vlgmr.msra.gmra.mxu0 %vm3173_vm2, %v10381_v38  ;;  %16746 = vmatmul.mubr.msk.f32.vlgmr.msra.gmra.mxu1 %vm3173_vm2, %v10395_v16  ;;  %v10239_v3 = vadd.f32 %v21527_v1, %v9808_v36  ;;  %v9810_v56 = vadd.f32 %v21446_v31, %v21312_v17  ;;  %v10424_v1 = vld [vmem:[%s21894_s5 + $0x54] sm:$0xf]  ;;  %v10386_v7 = vsel %vm10314_vm10, %v10278_v23, %v10350_v45  ;;  %v10426_v31 = vld [vmem:[%s21894_s5 + $0x5c] sm:$0xf] }
 0x586   :  { %v10248_v11 = vadd.f32 %v10197_v51, %v9817_v50  ;;  %16679 = vmatpush3.xpose.msk.msra.mxu0 %vm3173_vm2, %v10418_v47  ;;  %vm10325_vm5 = vcmp.gt.f32.partialorder %v10289_v34, 0.0  ;;  %v10361_v21 = vmul.f32 0.01, %v10289_v34  ;;  %16754 = vmatpush3.xpose.msk.msra.mxu1 %vm3173_vm2, %v10433_v39  ;;  %v10352_v13 = vmul.f32 0.01, %v10280_v53 }
 0x587   :  { %v21686_v33 = vpop.f32.mrf.mxu1  ;;  %16680 = vmatprep.mubr.msk.f32.mxu0 %vm16790_vm11, %v22327_v48  ;;  %16683 = vmatprep.subr.mxu0 %v22327_v48  ;;  %v10282_v52 = vadd.f32 %v21377_v5, %v10239_v3  ;;  %v10241_v50 = vadd.f32 %v21550_v55, %v9810_v56  ;;  %vm10316_vm12 = vcmp.gt.f32.partialorder %v10280_v53, 0.0  ;;  %v9812_v17 = vadd.f32 %v21480_v19, %v21322_v40  ;;  %v22328_v40 = vld [vmem:[#allocation76_spill] sm:$0xff] }
 0x588   :  { %v10291_v46 = vadd.f32 %v21377_v5, %v10248_v11  ;;  %16755 = vmatprep.mubr.msk.f32.mxu1 %vm16790_vm11, %v22327_v48  ;;  %v10397_v58 = vsel %vm10325_vm5, %v10289_v34, %v10361_v21  ;;  %16763 = vmatprep.subr.mxu1 %v22327_v48  ;;  %v10388_v47 = vsel %vm10316_vm12, %v10280_v53, %v10352_v13  ;;  %v10430_v51 = vld [vmem:[%s21894_s5 + $0x6c] sm:$0xf] }
 0x589   :  { %v10207_v57 = vpop.f32.mrf.mxu1  ;;  %16681 = vmatmul.mubr.msk.f32.vlgmr.msra.gmra.mxu0 %vm3173_vm2, %v10382_v43  ;;  %16756 = vmatmul.mubr.msk.f32.vlgmr.msra.gmra.mxu1 %vm3173_vm2, %v10397_v58  ;;  %v10354_v25 = vmul.f32 0.01, %v10282_v52  ;;  %v10284_v55 = vadd.f32 %v21377_v5, %v10241_v50  ;;  %v10243_v38 = vadd.f32 %v21578_v44, %v9812_v17  ;;  %vm10318_vm13 = vcmp.gt.f32.partialorder %v10282_v52, 0.0 }
 0x58a   :  { %vm10327_vm7 = vcmp.gt.f32.partialorder %v10291_v46, 0.0  ;;  %v10363_v63 = vmul.f32 0.01, %v10291_v46  ;;  %16684 = vmatpush3.xpose.msk.msra.mxu0 %vm3173_vm2, %v10419_v10  ;;  %v10250_v15 = vadd.f32 %v10207_v57, %v9819_v9  ;;  %16764 = vmatpush3.xpose.msk.msra.mxu1 %vm3173_vm2, %v10435_v35  ;;  %v9814_v19 = vadd.f32 %v21516_v32, %v22328_v40  ;;  %v22329_v32 = vld [vmem:[#allocation49_spill] sm:$0xff] }
 0x58b   :  { %16685 = vmatprep.mubr.msk.f32.mxu0 %vm16790_vm11, %v22327_v48  ;;  %16688 = vmatprep.subr.mxu0 %v22327_v48  ;;  %v10390_v16 = vsel %vm10318_vm13, %v10282_v52, %v10354_v25  ;;  %v10356_v39 = vmul.f32 0.01, %v10284_v55  ;;  %v10286_v44 = vadd.f32 %v21377_v5, %v10243_v38  ;;  %vm10320_vm14 = vcmp.gt.f32.partialorder %v10284_v55, 0.0  ;;  %v10432_v10 = vld [vmem:[%s21894_s5 + $0x74] sm:$0xf] }
 0x58c   :  { %v10399_v6 = vsel %vm10327_vm7, %v10291_v46, %v10363_v63  ;;  %16765 = vmatprep.mubr.msk.f32.mxu1 %vm16790_vm11, %v22327_v48  ;;  %v10293_v30 = vadd.f32 %v21377_v5, %v10250_v15  ;;  %16773 = vmatprep.subr.mxu1 %v22327_v48  ;;  %v10245_v54 = vadd.f32 %v21605_v12, %v9814_v19  ;;  %vm13280_vm7 = vcmask 7168  }
 0x58d   :  { %16686 = vmatmul.mubr.msk.f32.vlgmr.msra.gmra.mxu0 %vm3173_vm2, %v10383_v14  ;;  %16766 = vmatmul.mubr.msk.f32.vlgmr.msra.gmra.mxu1 %vm3173_vm2, %v10399_v6  ;;  %v9816_v34 = vadd.f32 %v21559_v42, %v22329_v32  ;;  %v10392_v11 = vsel %vm10320_vm14, %v10284_v55, %v10356_v39  ;;  %v10358_v29 = vmul.f32 0.01, %v10286_v44  ;;  %vm10322_vm0 = vcmp.gt.f32.partialorder %v10286_v44, 0.0 }
 0x58e   :  { %16689 = vmatpush3.xpose.msk.msra.mxu0 %vm3173_vm2, %v10420_v4  ;;  %vm10329_vm9 = vcmp.gt.f32.partialorder %v10293_v30, 0.0  ;;  %v10365_v8 = vmul.f32 0.01, %v10293_v30  ;;  %16774 = vmatpush3.xpose.msk.msra.mxu1 %vm3173_vm2, %v10437_v20  ;;  %v10288_v12 = vadd.f32 %v21377_v5, %v10245_v54  ;;  %v9818_v42 = vadd.f32 %v21614_v41, %v21352_v49  ;;  %v22330_v49 = vld [vmem:[#allocation38_spill] sm:$0xff] }
 0x58f   :  { %16690 = vmatprep.mubr.msk.f32.mxu0 %vm16790_vm11, %v22327_v48  ;;  %16698 = vmatprep.subr.mxu0 %v22327_v48  ;;  %v10247_v21 = vadd.f32 %v21633_v28, %v9816_v34  ;;  %v10394_v18 = vsel %vm10322_vm0, %v10286_v44, %v10358_v29  ;;  %v9820_v41 = vadd.f32 %v21667_v37, %v22330_v49  ;;  %v10436_v37 = vld [vmem:[%s21894_s5 + $0x84] sm:$0xf] }
 0x590   :  { %16775 = vmatprep.mubr.msk.f32.mxu1 %vm16790_vm11, %v22327_v48  ;;  %v10401_v22 = vsel %vm10329_vm9, %v10293_v30, %v10365_v8  ;;  %v10360_v43 = vmul.f32 0.01, %v10288_v12  ;;  %v10249_v62 = vadd.f32 %v21659_v24, %v9818_v42  ;;  %vm10324_vm15 = vcmp.gt.f32.partialorder %v10288_v12, 0.0 }
 0x591   :  { %16691 = vmatmul.mubr.msk.f32.vlgmr.msra.gmra.mxu0 %vm3173_vm2, %v10384_v59  ;;  %16776 = vmatmul.mubr.msk.f32.vlgmr.msra.gmra.mxu1 %vm3173_vm2, %v10401_v22  ;;  %v10290_v28 = vadd.f32 %v21377_v5, %v10247_v21  ;;  %v10251_v58 = vadd.f32 %v21686_v33, %v9820_v41  ;;  %v10438_v33 = vld [vmem:[%s21894_s5 + $0x8c] sm:$0xf] }
 0x592   :  { %16699 = vmatpush3.xpose.msk.msra.mxu0 %vm3173_vm2, %v10422_v26  ;;  %16700 = vmatprep.mubr.msk.f32.mxu0 %vm16790_vm11, %v22327_v48  ;;  %v10396_v46 = vsel %vm10324_vm15, %v10288_v12, %v10360_v43  ;;  %v10292_v24 = vadd.f32 %v21377_v5, %v10249_v62 }
 0x593   :  { %16708 = vmatprep.subr.mxu0 %v22327_v48  ;;  %v10362_v35 = vmul.f32 0.01, %v10290_v28  ;;  %vm10326_vm1 = vcmp.gt.f32.partialorder %v10290_v28, 0.0  ;;  %v10294_v2 = vadd.f32 %v21377_v5, %v10251_v58 }
 0x594   :  { %v10364_v57 = vmul.f32 0.01, %v10292_v24  ;;  %vm10328_vm3 = vcmp.gt.f32.partialorder %v10292_v24, 0.0 }
 0x595   :  { %16701 = vmatmul.mubr.msk.f32.vlgmr.msra.gmra.mxu0 %vm3173_vm2, %v10386_v7  ;;  %v10398_v9 = vsel %vm10326_vm1, %v10290_v28, %v10362_v35  ;;  %v10366_v23 = vmul.f32 0.01, %v10294_v2  ;;  %vm10330_vm4 = vcmp.gt.f32.partialorder %v10294_v2, 0.0 }
 0x596   :  { %16709 = vmatpush3.xpose.msk.msra.mxu0 %vm3173_vm2, %v10424_v1  ;;  %16710 = vmatprep.mubr.msk.f32.mxu0 %vm16790_vm11, %v22327_v48  ;;  %v10400_v63 = vsel %vm10328_vm3, %v10292_v24, %v10364_v57 }
 0x597   :  { %16718 = vmatprep.subr.mxu0 %v22327_v48  ;;  %v10402_v5 = vsel %vm10330_vm4, %v10294_v2, %v10366_v23 }
 0x599   :  { %16711 = vmatmul.mubr.msk.f32.vlgmr.msra.gmra.mxu0 %vm3173_vm2, %v10388_v47 }
 0x59a   :  { %16719 = vmatpush3.xpose.msk.msra.mxu0 %vm3173_vm2, %v10426_v31  ;;  %16720 = vmatprep.mubr.msk.f32.mxu0 %vm16790_vm11, %v22327_v48 }
 0x59b   :  { %16728 = vmatprep.subr.mxu0 %v22327_v48 }
 0x59d   :  { %16721 = vmatmul.mubr.msk.f32.vlgmr.msra.gmra.mxu0 %vm3173_vm2, %v10390_v16 }
 0x59e   :  { %16729 = vmatpush3.xpose.msk.msra.mxu0 %vm3173_vm2, %v10428_v61  ;;  %16730 = vmatprep.mubr.msk.f32.mxu0 %vm16790_vm11, %v22327_v48 }
 0x59f   :  { %16738 = vmatprep.subr.mxu0 %v22327_v48 }
 0x5a1   :  { %16731 = vmatmul.mubr.msk.f32.vlgmr.msra.gmra.mxu0 %vm3173_vm2, %v10392_v11 }
 0x5a2   :  { %16739 = vmatpush3.xpose.msk.msra.mxu0 %vm3173_vm2, %v10430_v51  ;;  %16740 = vmatprep.mubr.msk.f32.mxu0 %vm16790_vm11, %v22327_v48 }
 0x5a3   :  { %16748 = vmatprep.subr.mxu0 %v22327_v48 }
 0x5a5   :  { %16741 = vmatmul.mubr.msk.f32.vlgmr.msra.gmra.mxu0 %vm3173_vm2, %v10394_v18 }
 0x5a6   :  { %16749 = vmatpush3.xpose.msk.msra.mxu0 %vm3173_vm2, %v10432_v10  ;;  %16750 = vmatprep.mubr.msk.f32.mxu0 %vm16790_vm11, %v22327_v48 }
 0x5a7   :  { %16758 = vmatprep.subr.mxu0 %v22327_v48 }
 0x5a9   :  { %16751 = vmatmul.mubr.msk.f32.vlgmr.msra.gmra.mxu0 %vm3173_vm2, %v10396_v46 }
 0x5aa   :  { %16759 = vmatpush3.xpose.msk.msra.mxu0 %vm3173_vm2, %v10434_v27  ;;  %16760 = vmatprep.mubr.msk.f32.mxu0 %vm16790_vm11, %v22327_v48 }
 0x5ab   :  { %16768 = vmatprep.subr.mxu0 %v22327_v48 }
 0x5ad   :  { %16761 = vmatmul.mubr.msk.f32.vlgmr.msra.gmra.mxu0 %vm3173_vm2, %v10398_v9 }
 0x5ae   :  { %16769 = vmatpush3.xpose.msk.msra.mxu0 %vm3173_vm2, %v10436_v37  ;;  %16770 = vmatprep.mubr.msk.f32.mxu0 %vm16790_vm11, %v22327_v48 }
 0x5af   :  { %16778 = vmatprep.subr.mxu0 %v22327_v48 }
 0x5b1   :  { %16771 = vmatmul.mubr.msk.f32.vlgmr.msra.gmra.mxu0 %vm3173_vm2, %v10400_v63 }
 0x5b2   :  { %16779 = vmatpush3.xpose.msk.msra.mxu0 %vm3173_vm2, %v10438_v33  ;;  %16780 = vmatprep.mubr.msk.f32.mxu0 %vm16790_vm11, %v22327_v48  ;;  %vm13175_vm11 = vcmask 31744  }
 0x5b5   :  { %16781 = vmatmul.mubr.msk.f32.vlgmr.msra.gmra.mxu0 %vm3173_vm2, %v10402_v5 }
 0x60d   :  { %v10511_v15 = vpop.f32.mrf.mxu0 }
 0x60e   :  { %v13176_v13 = vsel %vm13175_vm11, %v10511_v15, 0.0 }
 0x60f   :  { %v16607_v4 = vpop.f32.mrf.mxu0 }
 0x611   :  { %v10587_v0 = vpop.f32.mrf.mxu0 }
 0x612   :  { %v13177_v1 = vsel %vm13175_vm11, %v10587_v0, 0.0 }
 0x613   :  { %v16612_v14 = vpop.f32.mrf.mxu0  ;;  %v13178_v17 = vadd.f32 %v13177_v1, %v13176_v13 }
 0x615   :  { %v10663_v60 = vpop.f32.mrf.mxu0 }
 0x616   :  { %v13179_v52 = vsel %vm13175_vm11, %v10663_v60, 0.0 }
 0x617   :  { %v16617_v6 = vpop.f32.mrf.mxu0  ;;  %v13180_v55 = vadd.f32 %v13179_v52, %v13178_v17 }
 0x619   :  { %v10739_v20 = vpop.f32.mrf.mxu0 }
 0x61a   :  { %v13181_v47 = vsel %vm13175_vm11, %v10739_v20, 0.0 }
 0x61b   :  { %v16622_v30 = vpop.f32.mrf.mxu0  ;;  %v13182_v61 = vadd.f32 %v13181_v47, %v13180_v55 }
 0x61d   :  { %v10815_v36 = vpop.f32.mrf.mxu0 }
 0x61e   :  { %v13183_v40 = vsel %vm13175_vm11, %v10815_v36, 0.0 }
 0x61f   :  { %v16627_v8 = vpop.f32.mrf.mxu0  ;;  %v13184_v54 = vadd.f32 %v13183_v40, %v13182_v61 }
 0x621   :  { %v10891_v26 = vpop.f32.mrf.mxu0 }
 0x622   :  { %v13185_v39 = vsel %vm13175_vm11, %v10891_v26, 0.0 }
 0x623   :  { %v16632_v59 = vpop.f32.mrf.mxu0  ;;  %v13186_v11 = vadd.f32 %v13185_v39, %v13184_v54 }
 0x625   :  { %v10967_v45 = vpop.f32.mrf.mxu0 }
 0x626   :  { %v13187_v34 = vsel %vm13175_vm11, %v10967_v45, 0.0 }
 0x627   :  { %v16637_v53 = vpop.f32.mrf.mxu0  ;;  %v13188_v42 = vadd.f32 %v13187_v34, %v13186_v11 }
 0x629   :  { %v11043_v3 = vpop.f32.mrf.mxu0 }
 0x62a   :  { %v13189_v12 = vsel %vm13175_vm11, %v11043_v3, 0.0 }
 0x62b   :  { %v16642_v22 = vpop.f32.mrf.mxu0  ;;  %v13190_v28 = vadd.f32 %v13189_v12, %v13188_v42 }
 0x62d   :  { %v11119_v48 = vpop.f32.mrf.mxu0 }
 0x62e   :  { %v13191_v18 = vsel %vm13175_vm11, %v11119_v48, 0.0 }
 0x62f   :  { %v16647_v56 = vpop.f32.mrf.mxu0  ;;  %v13192_v27 = vadd.f32 %v13191_v18, %v13190_v28 }
 0x631   :  { %v11195_v7 = vpop.f32.mrf.mxu0  ;;  %v21840_v50 = vpop.f32.mrf.mxu1 }
 0x632   :  { %v13193_v49 = vsel %vm13175_vm11, %v11195_v7, 0.0  ;;  %v13211_v47 = vsel %vm13175_vm11, %v21840_v50, 0.0 }
 0x633   :  { %v16652_v31 = vpop.f32.mrf.mxu0  ;;  %v16697_v25 = vpop.f32.mrf.mxu1  ;;  %v13194_v58 = vadd.f32 %v13193_v49, %v13192_v27 }
 0x635   :  { %v11271_v38 = vpop.f32.mrf.mxu0  ;;  %v21844_v19 = vpop.f32.mrf.mxu1 }
 0x636   :  { %v13195_v35 = vsel %vm13175_vm11, %v11271_v38, 0.0  ;;  %v13215_v39 = vsel %vm13175_vm11, %v21844_v19, 0.0 }
 0x637   :  { %v16657_v16 = vpop.f32.mrf.mxu0  ;;  %v16707_v44 = vpop.f32.mrf.mxu1  ;;  %v13196_v2 = vadd.f32 %v13195_v35, %v13194_v58 }
 0x639   :  { %v11347_v32 = vpop.f32.mrf.mxu0  ;;  %v21848_v51 = vpop.f32.mrf.mxu1 }
 0x63a   :  { %v13197_v9 = vsel %vm13175_vm11, %v11347_v32, 0.0 }
 0x63b   :  { %v16662_v29 = vpop.f32.mrf.mxu0  ;;  %v16717_v21 = vpop.f32.mrf.mxu1  ;;  %v13198_v5 = vadd.f32 %v13197_v9, %v13196_v2 }
 0x63c   :  { %v13219_v29 = vsel %vm13175_vm11, %v21848_v51, 0.0 }
 0x63d   :  { %v11423_v10 = vpop.f32.mrf.mxu0  ;;  %v12335_v43 = vpop.f32.mrf.mxu1 }
 0x63e   :  { %v13199_v63 = vsel %vm13175_vm11, %v11423_v10, 0.0  ;;  %v13223_v18 = vsel %vm13175_vm11, %v12335_v43, 0.0 }
 0x63f   :  { %v16667_v62 = vpop.f32.mrf.mxu0  ;;  %v16727_v41 = vpop.f32.mrf.mxu1  ;;  %v13200_v14 = vadd.f32 %v13199_v63, %v13198_v5 }
 0x641   :  { %v11499_v46 = vpop.f32.mrf.mxu0  ;;  %v12487_v24 = vpop.f32.mrf.mxu1 }
 0x642   :  { %v13201_v4 = vsel %vm13175_vm11, %v11499_v46, 0.0  ;;  %v13227_v27 = vsel %vm13175_vm11, %v12487_v24, 0.0 }
 0x643   :  { %v16672_v37 = vpop.f32.mrf.mxu0  ;;  %v16737_v57 = vpop.f32.mrf.mxu1  ;;  %v13202_v30 = vadd.f32 %v13201_v4, %v13200_v14 }
 0x645   :  { %v11575_v33 = vpop.f32.mrf.mxu0  ;;  %v12639_v23 = vpop.f32.mrf.mxu1 }
 0x646   :  { %v13203_v6 = vsel %vm13175_vm11, %v11575_v33, 0.0  ;;  %v13231_v9 = vsel %vm13175_vm11, %v12639_v23, 0.0 }
 0x647   :  { %v16677_v15 = vpop.f32.mrf.mxu0  ;;  %v16747_v0 = vpop.f32.mrf.mxu1  ;;  %v13204_v59 = vadd.f32 %v13203_v6, %v13202_v30 }
 0x649   :  { %v11651_v60 = vpop.f32.mrf.mxu0  ;;  %v12791_v20 = vpop.f32.mrf.mxu1 }
 0x64a   :  { %v13205_v8 = vsel %vm13175_vm11, %v11651_v60, 0.0  ;;  %v13235_v5 = vsel %vm13175_vm11, %v12791_v20, 0.0 }
 0x64b   :  { %v16682_v36 = vpop.f32.mrf.mxu0  ;;  %v16757_v26 = vpop.f32.mrf.mxu1  ;;  %v13206_v22 = vadd.f32 %v13205_v8, %v13204_v59 }
 0x64d   :  { %v11727_v45 = vpop.f32.mrf.mxu0  ;;  %v12943_v3 = vpop.f32.mrf.mxu1 }
 0x64e   :  { %v13207_v53 = vsel %vm13175_vm11, %v11727_v45, 0.0  ;;  %v13239_v60 = vsel %vm13175_vm11, %v12943_v3, 0.0 }
 0x64f   :  { %v16687_v48 = vpop.f32.mrf.mxu0  ;;  %v16767_v56 = vpop.f32.mrf.mxu1  ;;  %v13208_v1 = vadd.f32 %v13207_v53, %v13206_v22  ;;  %v14252_v53 = vld [vmem:[%s21896_s6] ss:$0 sm:$0xff] }
 0x651   :  { %v11803_v7 = vpop.f32.mrf.mxu0  ;;  %v13095_v52 = vpop.f32.mrf.mxu1 }
 0x652   :  { %v13209_v13 = vsel %vm13175_vm11, %v11803_v7, 0.0  ;;  %v13243_v26 = vsel %vm13175_vm11, %v13095_v52, 0.0 }
 0x653   :  { %v13210_v17 = vadd.f32 %v13209_v13, %v13208_v1  ;;  %v16692_v31 = vpop.f32.mrf.mxu0  ;;  %v16777_v25 = vpop.f32.mrf.mxu1  ;;  %v13258_v13 = vlaneseq }
 0x655   :  { %v11955_v55 = vpop.f32.mrf.mxu0  ;;  %v13212_v38 = vadd.f32 %v13211_v47, %v13210_v17  ;;  %v13259_v17 = vand.u32 127, %v13258_v13 }
 0x656   :  { %v13213_v40 = vsel %vm13175_vm11, %v11955_v55, 0.0 }
 0x657   :  { %v13214_v61 = vadd.f32 %v13213_v40, %v13212_v38  ;;  %v16702_v16 = vpop.f32.mrf.mxu0 }
 0x659   :  { %v12107_v44 = vpop.f32.mrf.mxu0  ;;  %v13216_v54 = vadd.f32 %v13215_v39, %v13214_v61 }
 0x65a   :  { %v13217_v32 = vsel %vm13175_vm11, %v12107_v44, 0.0 }
 0x65b   :  { %v13218_v34 = vadd.f32 %v13217_v32, %v13216_v54  ;;  %v16712_v11 = vpop.f32.mrf.mxu0 }
 0x65d   :  { %v12259_v50 = vpop.f32.mrf.mxu0  ;;  %v13220_v12 = vadd.f32 %v13219_v29, %v13218_v34 }
 0x65e   :  { %v13221_v21 = vsel %vm13175_vm11, %v12259_v50, 0.0 }
 0x65f   :  { %v13222_v42 = vadd.f32 %v13221_v21, %v13220_v12  ;;  %v16722_v10 = vpop.f32.mrf.mxu0 }
 0x661   :  { %v12411_v28 = vpop.f32.mrf.mxu0  ;;  %v13224_v62 = vadd.f32 %v13223_v18, %v13222_v42 }
 0x662   :  { %v13225_v19 = vsel %vm13175_vm11, %v12411_v28, 0.0 }
 0x663   :  { %v13226_v49 = vadd.f32 %v13225_v19, %v13224_v62  ;;  %v16732_v41 = vpop.f32.mrf.mxu0 }
 0x665   :  { %v12563_v46 = vpop.f32.mrf.mxu0  ;;  %v13228_v35 = vadd.f32 %v13227_v27, %v13226_v49 }
 0x666   :  { %v13229_v51 = vsel %vm13175_vm11, %v12563_v46, 0.0 }
 0x667   :  { %v13230_v58 = vadd.f32 %v13229_v51, %v13228_v35  ;;  %v16742_v37 = vpop.f32.mrf.mxu0 }
 0x669   :  { %v12715_v57 = vpop.f32.mrf.mxu0  ;;  %v13232_v2 = vadd.f32 %v13231_v9, %v13230_v58 }
 0x66a   :  { %v13233_v43 = vsel %vm13175_vm11, %v12715_v57, 0.0 }
 0x66b   :  { %v13234_v33 = vadd.f32 %v13233_v43, %v13232_v2  ;;  %v16752_v63 = vpop.f32.mrf.mxu0 }
 0x66d   :  { %v12867_v15 = vpop.f32.mrf.mxu0  ;;  %v13236_v4 = vadd.f32 %v13235_v5, %v13234_v33 }
 0x66e   :  { %v13237_v24 = vsel %vm13175_vm11, %v12867_v15, 0.0 }
 0x66f   :  { %v13238_v0 = vadd.f32 %v13237_v24, %v13236_v4  ;;  %v16762_v14 = vpop.f32.mrf.mxu0 }
 0x671   :  { %v13019_v6 = vpop.f32.mrf.mxu0  ;;  %v13240_v30 = vadd.f32 %v13239_v60, %v13238_v0 }
 0x672   :  { %v13241_v23 = vsel %vm13175_vm11, %v13019_v6, 0.0 }
 0x673   :  { %v13242_v36 = vadd.f32 %v13241_v23, %v13240_v30  ;;  %v16772_v8 = vpop.f32.mrf.mxu0 }
 0x675   :  { %v13171_v59 = vpop.f32.mrf.mxu0  ;;  %v13244_v45 = vadd.f32 %v13243_v26, %v13242_v36 }
 0x676   :  { %v13245_v20 = vsel %vm13175_vm11, %v13171_v59, 0.0 }
 0x677   :  { %v13246_v22 = vadd.f32 %v13245_v20, %v13244_v45  ;;  %v16782_v48 = vpop.f32.mrf.mxu0 }
 0x679   :  { %v13254_v56 = vadd.f32 %v14252_v53, %v13246_v22 }
 0x67b   :  { %vm13255_vm2 = vcmp.gt.f32.partialorder %v13254_v56, 0.0  ;;  %v13256_v3 = vmul.f32 0.01, %v13254_v56 }
 0x67d   :  { %v13257_v1 = vsel %vm13255_vm2, %v13254_v56, %v13256_v3 }
 0x67e   :  { %v13260_v7 = vsel %vm13175_vm11, %v13257_v1, -inf }
 0x67f   :  { %13261 = vmax.xlane.f32.xlu0 %v13260_v7 }
 0x708   :  { %v13262_v52 = vpop.xlane.xlu0 %13261 }
 0x709   :  { %vm13263_vm5 = vcmp.eq.f32.partialorder %v13257_v1, %v13262_v52 }
 0x70a   :  { %v13264_v31 = vsel %vm13263_vm5, %v13259_v17, 1073741824 }
 0x70b   :  { %v13265_v47 = vsel %vm13175_vm11, %v13264_v31, 2147483647 }
 0x70c   :  { %v13267_v25 = vshra.s32 %v13265_v47, 16  ;;  %v13266_v38 = vand.u32 65535, %v13265_v47 }
 0x70e   :  { %v13269_v55 = vcvt.s32.f32 %v13267_v25  ;;  %v13268_v61 = vcvt.s32.f32 %v13266_v38 }
 0x710   :  { %13270 = vmin.xlane.f32.xlu0 %v13269_v55 }
 0x799   :  { %v13271_v40 = vpop.xlane.xlu0 %13270 }
 0x79a   :  { %vm13272_vm6 = vcmp.eq.f32.partialorder %v13269_v55, %v13271_v40  ;;  %v13277_v39 = vcvt.f32.s32 %v13271_v40 }
 0x79b   :  { %v13273_v16 = vsel %vm13272_vm6, %v13268_v61, inf }
 0x79c   :  { %13274 = vmin.xlane.f32.xlu1 %v13273_v16  ;;  %v13278_v54 = vshll.u32 %v13277_v39, 16 }
 0x825   :  { %v13275_v44 = vpop.xlane.xlu1 %13274 }
 0x826   :  { %v13276_v32 = vcvt.f32.s32 %v13275_v44 }
 0x828   :  { %v13279_v34 = vadd.s32 %v13278_v54, %v13276_v32 }
 0x82a   :  { %13281 = vst.msk [vmem:[%s21897_s7] sm:$0xff] %vm13280_vm7, %v13279_v34 }

</bundles_post_ra>
